<compile_context>
chip_gen: v7x
topology: tpu7x:2x2x1
jax: 0.10.0
libtpu: 0.0.40
codegen_flags: <defaults>
</compile_context>

<pallas_src>
import numpy as np
import jax
import jax.numpy as jnp
from jax.experimental import pallas as pl
from jax.experimental.pallas import tpu as pltpu

LEAKY = 0.01      # F.leaky_relu / nn.LeakyReLU default negative_slope
BN_EPS = 1e-5     # nn.BatchNorm1d default eps


# ----------------------------------------------------------------------------
# The fused TapNet kernel
# ----------------------------------------------------------------------------
def tapnet_kernel(cols1_ref, x2d_ref, lab_ref,
                  w1_ref, b1_ref, g1_ref, be1_ref,
                  w2_ref, b2_ref, g2_ref, be2_ref,
                  w3_ref, b3_ref, g3_ref, be3_ref,
                  wih_ref, whh_ref, blstm_ref,
                  w0m_ref, b0m_ref, g0m_ref, be0m_ref, w1m_ref, b1m_ref,
                  aw1_ref, ab1_ref, aw2_ref, ab2_ref,
                  dists_ref, pdist_ref,
                  xproj_scr, h_all_scr):
    N, nclass = dists_ref.shape
    NC, L = x2d_ref.shape
    C = NC // N                       # nfeat
    H = whh_ref.shape[0]              # lstm_dim
    GF1 = w1_ref.shape[0]             # rp_group * filters[0]
    GF2 = w2_ref.shape[0]
    GF3 = w3_ref.shape[0]
    K2 = w2_ref.shape[1] // GF1
    K3 = w3_ref.shape[1] // GF2
    Lout1 = cols1_ref.shape[1] // N
    Lout2 = Lout1 - K2 + 1
    Lout3 = Lout2 - K3 + 1

    # ---- BatchNorm1d (training-mode batch stats per (group, filter) row) + LeakyReLU
    def bn_lrelu_rows(z, gamma, beta):
        m = jnp.mean(z, axis=1, keepdims=True)
        v = jnp.mean((z - m) ** 2, axis=1, keepdims=True)
        z = (z - m) * jax.lax.rsqrt(v + BN_EPS) * gamma + beta
        return jnp.where(z > 0, z, LEAKY * z)

    # ---- CNN branch: ONE matmul per conv layer, all RP groups fused -----------
    # conv-1: block-diagonal weights; im2col was done in the wrapper.
    z = jnp.dot(w1_ref[...], cols1_ref[...],
                preferred_element_type=jnp.float32) + b1_ref[...]       # (G*F1, N*Lout1)
    z = bn_lrelu_rows(z, g1_ref[...], be1_ref[...])

    # conv-2 / conv-3: group-tiled weights; one im2col relayout per layer.
    def conv_fused(z, gfin, k_sz, lin, lout, w_tile, bias, gamma, beta):
        z3d = z.reshape(gfin, N, lin)
        cols = jnp.concatenate([z3d[:, :, k:k + lout] for k in range(k_sz)], axis=0)
        cols = cols.reshape(k_sz * gfin, N * lout)                      # rows = (k, g, c)
        zz = jnp.dot(w_tile, cols, preferred_element_type=jnp.float32) + bias
        return bn_lrelu_rows(zz, gamma, beta)

    z = conv_fused(z, GF1, K2, Lout1, Lout2,
                   w2_ref[...], b2_ref[...], g2_ref[...], be2_ref[...])
    z = conv_fused(z, GF2, K3, Lout2, Lout3,
                   w3_ref[...], b3_ref[...], g3_ref[...], be3_ref[...])

    # torch.mean(x_conv, 2) per group, concatenated over groups -> (N, G*F3)
    conv_feat = jnp.mean(z.reshape(GF3, N, Lout3), axis=2).T

    # ---- LSTM branch: seq = N samples, batch = nfeat channels, input = len_ts -
    whh_t = whh_ref[...]                                                # (H, 4H)
    # hoisted input projection (one matmul) stored to VMEM scratch once
    xproj_scr[...] = (jnp.dot(x2d_ref[...], wih_ref[...],
                              preferred_element_type=jnp.float32) + blstm_ref[...])
    h = jnp.zeros((C, H), jnp.float32)
    c = jnp.zeros((C, H), jnp.float32)
    for t in range(N):                       # static unroll over the (short) sequence
        gates = xproj_scr[t * C:(t + 1) * C, :] + jnp.dot(
            h, whh_t, preferred_element_type=jnp.float32)               # (C, 4H)
        sig = jax.nn.sigmoid(gates[:, :3 * H])    # gates pre-permuted to [i, f, o, g]
        i_g = sig[:, 0:H]
        f_g = sig[:, H:2 * H]
        o_g = sig[:, 2 * H:3 * H]
        g_g = jnp.tanh(gates[:, 3 * H:])
        c = f_g * c + i_g * g_g
        h = o_g * jnp.tanh(c)
        h_all_scr[t] = h                      # kept off the serial chain; mean taken once below
    x_lstm = jnp.mean(h_all_scr[...], axis=1)                           # (N, H)

    # ---- mapping MLP: fc_0 -> bn_0 (batch stats) -> LeakyReLU -> fc_1 ---------
    feat = jnp.concatenate([conv_feat, x_lstm], axis=1)                 # (N, G*F3 + H)
    h0 = jnp.dot(feat, w0m_ref[...], preferred_element_type=jnp.float32) + b0m_ref[...]
    m0 = jnp.mean(h0, axis=0, keepdims=True)
    v0 = jnp.mean((h0 - m0) ** 2, axis=0, keepdims=True)
    h0 = (h0 - m0) * jax.lax.rsqrt(v0 + BN_EPS) * g0m_ref[...] + be0m_ref[...]
    h0 = jnp.where(h0 > 0, h0, LEAKY * h0)
    emb = jnp.dot(h0, w1m_ref[...], preferred_element_type=jnp.float32) + b1m_ref[...]

    # ---- per-class attention prototypes (batched heads) -----------------------
    hcat = jnp.tanh(jnp.dot(emb, aw1_ref[...], preferred_element_type=jnp.float32)
                    + ab1_ref[...])                                     # (N, nclass*att_dim)
    scores = (jnp.dot(hcat, aw2_ref[...], preferred_element_type=jnp.float32)
              + ab2_ref[...])                                           # (N, nclass)
    lab = lab_ref[...]                                                  # (N, 1) int32
    cls_id = jax.lax.broadcasted_iota(jnp.int32, (N, nclass), 1)
    mask = lab == cls_id
    # masked softmax over the samples of each class (== torch gather + softmax)
    # TODO(synk): a class with zero samples in the batch yields a NaN prototype
    #             (same failure mode as the PyTorch reference).
    s = jnp.where(mask, scores, -jnp.inf)
    s = s - jnp.max(s, axis=0, keepdims=True)
    e = jnp.exp(s)
    wsm = e / jnp.sum(e, axis=0, keepdims=True)                         # (N, nclass)
    P = jnp.einsum('nc,nd->cd', wsm, emb,
                   preferred_element_type=jnp.float32)                  # (nclass, D) prototypes

    # ---- euclidean distances via ||x||^2 + ||p||^2 - 2 x.p --------------------
    xsq = jnp.sum(emb * emb, axis=1, keepdims=True)                     # (N, 1)
    psq = jnp.sum(P * P, axis=1, keepdims=True)                         # (nclass, 1)
    psq_r = psq.reshape(1, nclass)                                      # reused, not recomputed

    cross = jnp.einsum('nd,cd->nc', emb, P, preferred_element_type=jnp.float32)
    d = jnp.maximum(xsq + psq_r - 2.0 * cross, 0.0)                     # (N, nclass)
    dists_ref[...] = jnp.exp(-0.5 * d)

    pcross = jnp.einsum('id,jd->ij', P, P, preferred_element_type=jnp.float32)
    pd = jnp.maximum(psq + psq_r - 2.0 * pcross, 0.0)                   # (nclass, nclass)
    # matches the reference: sum of the FULL exp(-0.5*dist) matrix / (nclass*(nclass-1)/2)
    num_pairs = nclass * (nclass - 1) / 2.0
    pdist_ref[...] = (jnp.sum(jnp.exp(-0.5 * pd)) / num_pairs).reshape(1, 1)


# ----------------------------------------------------------------------------
# Wrapper: one fused pallas_call (everything resident in VMEM, no grid)
# ----------------------------------------------------------------------------
def tapnet_forward(x, labels, params, idxs):
    N, C, L = x.shape
    G = len(idxs)
    rp_dim = int(idxs[0].shape[0])
    K1 = params['w1_blk'].shape[1] // (G * rp_dim)
    Lout1 = L - K1 + 1
    nclass = params['ab2_row'].shape[1]

    # conv-1 channel gather + im2col hoisted out of the kernel (idxs are static):
    # columns of cols1 are (n, l); rows are (g, k, c), matching the block-diag weight.
    cols_groups = []
    for idx in idxs:
        xg = jnp.transpose(x[:, idx, :], (1, 0, 2))                     # (rp_dim, N, L)
        cg = jnp.concatenate([xg[:, :, k:k + Lout1] for k in range(K1)], axis=0)
        cols_groups.append(cg.reshape(K1 * rp_dim, N * Lout1))
    cols1 = jnp.concatenate(cols_groups, axis=0)                        # (G*K1*rp_dim, N*Lout1)
    x2d = x.reshape(N * C, L)                                           # LSTM input, pre-flattened

    args = (cols1, x2d, labels,
            params['w1_blk'], params['b1'], params['g1'], params['be1'],
            params['w2_tile'], params['b2'], params['g2'], params['be2'],
            params['w3_tile'], params['b3'], params['g3'], params['be3'],
            params['wih_t'], params['whh_t'], params['b_lstm'],
            params['w0m'], params['b0m'], params['g0m'], params['be0m'],
            params['w1m'], params['b1m'],
            params['aw1_cat'], params['ab1_cat'], params['aw2_blk'], params['ab2_row'])

    # advisory cost estimate for XLA's scheduler (kernel is tiny / latency-bound)
    GF1, GKC1 = params['w1_blk'].shape
    GF2, KGF1 = params['w2_tile'].shape
    GF3, KGF2 = params['w3_tile'].shape
    K2 = KGF1 // GF1
    K3 = KGF2 // GF2
    Lout2 = Lout1 - K2 + 1
    Lout3 = Lout2 - K3 + 1
    H4 = params['wih_t'].shape[1]
    H = H4 // 4
    D0 = params['w0m'].shape[1]
    D1 = params['w1m'].shape[1]
    A = params['aw1_cat'].shape[1]
    flops = 2 * (GF1 * GKC1 * N * Lout1 + GF2 * KGF1 * N * Lout2 + GF3 * KGF2 * N * Lout3
                 + N * C * L * H4 + N * C * H * H4
                 + N * params['w0m'].shape[0] * D0 + N * D0 * D1
                 + N * D1 * A + N * A * nclass
                 + 2 * N * D1 * nclass + nclass * nclass * D1)
    transcendentals = N * C * 4 * H + N * C * H + N * A + 3 * N * nclass
    bytes_accessed = (sum(int(np.prod(a.shape)) * a.dtype.itemsize for a in args)
                      + (N * nclass + 1) * 4)

    dists_exp, proto_dist = pl.pallas_call(
        tapnet_kernel,
        out_shape=(jax.ShapeDtypeStruct((N, nclass), jnp.float32),
                   jax.ShapeDtypeStruct((1, 1), jnp.float32)),
        scratch_shapes=[pltpu.VMEM((N * C, H4), jnp.float32),    # hoisted LSTM input projection
                        pltpu.VMEM((N, C, H), jnp.float32)],     # per-step hidden states
        cost_estimate=pl.CostEstimate(flops=int(flops),
                                      transcendentals=int(transcendentals),
                                      bytes_accessed=int(bytes_accessed)),
    )(*args)

    return dists_exp, proto_dist[0, 0]


# ----------------------------------------------------------------------------
# Deterministic parameter construction + demo
# ----------------------------------------------------------------------------
def main():
    # small config consistent with the module
    N, nfeat, len_ts = 8, 12, 16
    nclass = 3
    rp_group, rp_dim = 3, 4
    filters = [8, 8, 8]
    kernels = [5, 4, 3]
    lstm_dim = 32
    layers_cfg = [64, 32]                   # mapping: [fc_input, 64, 32]
    att_dim = 128
    fc_input = rp_group * filters[2] + lstm_dim

    key = jax.random.PRNGKey(0)

    def nxt(shape, scale=0.1):
        nonlocal key
        key, sub = jax.random.split(key)
        return scale * jax.random.normal(sub, shape, dtype=jnp.float32)

    # input & labels (every class has at least one sample)
    x = nxt((N, nfeat, len_ts), scale=1.0)
    labels = jnp.array([0, 1, 2, 0, 1, 2, 0, 1], dtype=jnp.int32).reshape(N, 1)

    # random-projection channel indices (static at trace time)
    key, sub = jax.random.split(key)
    idxs = [jax.random.permutation(jax.random.fold_in(sub, g), nfeat)[:rp_dim]
            for g in range(rp_group)]

    F1, F2, F3 = filters
    K1, K2, K3 = kernels
    G = rp_group

    # --- parameters in PyTorch layouts ---
    w1_t = nxt((G, F1, rp_dim, K1)); b1_t = nxt((G, F1))     # Conv1d (F, Cin, K) per group
    w2_t = nxt((F2, F1, K2));        b2_t = nxt((F2,))
    w3_t = nxt((F3, F2, K3));        b3_t = nxt((F3,))
    wih = nxt((4 * lstm_dim, len_ts)); whh = nxt((4 * lstm_dim, lstm_dim))
    bih = nxt((4 * lstm_dim,));        bhh = nxt((4 * lstm_dim,))
    w0 = nxt((layers_cfg[0], fc_input)); b0 = nxt((layers_cfg[0],))     # Linear (out, in)
    w1l = nxt((layers_cfg[1], layers_cfg[0])); b1l = nxt((layers_cfg[1],))
    aw1 = nxt((nclass, att_dim, layers_cfg[1])); ab1 = nxt((nclass, att_dim))
    aw2 = nxt((nclass, 1, att_dim));             ab2 = nxt((nclass, 1))

    # --- convert to kernel layouts ---
    def conv_w2d(w):        # (F, Cin, K) -> (F, K*Cin), column index k*Cin + c
        Fo, Cin, K = w.shape
        return jnp.transpose(w, (0, 2, 1)).reshape(Fo, K * Cin)

    # block-diagonal conv-1 weight: rows (g, f), columns (g, k, c)
    w1_blk = jnp.zeros((G * F1, G * K1 * rp_dim), jnp.float32)
    for g in range(G):
        w1_blk = w1_blk.at[g * F1:(g + 1) * F1,
                           g * K1 * rp_dim:(g + 1) * K1 * rp_dim].set(conv_w2d(w1_t[g]))

    # group-tiled conv-2/3 weights: rows (g, f), columns (k, g, c)  [shared across groups]
    def tile_conv_w(w, groups):
        Fo, Cin, K = w.shape
        out = jnp.zeros((groups * Fo, K * groups * Cin), jnp.float32)
        for g in range(groups):
            for k in range(K):
                col = k * groups * Cin + g * Cin
                out = out.at[g * Fo:(g + 1) * Fo, col:col + Cin].set(w[:, :, k])
        return out

    def tile_rows(v, groups):
        return jnp.tile(v.reshape(-1, 1), (groups, 1))

    # LSTM gate reorder [i, f, g, o] (PyTorch) -> [i, f, o, g] (one wide sigmoid + one tanh)
    Hd = lstm_dim
    perm = np.concatenate([np.arange(0, 2 * Hd), np.arange(3 * Hd, 4 * Hd),
                           np.arange(2 * Hd, 3 * Hd)])
    wih_r = wih[perm, :]
    whh_r = whh[perm, :]
    blstm_r = (bih + bhh)[perm]

    # block-diagonal attention score weights
    aw2_blk = jnp.zeros((nclass * att_dim, nclass), jnp.float32)
    for i in range(nclass):
        aw2_blk = aw2_blk.at[i * att_dim:(i + 1) * att_dim, i].set(aw2[i, 0, :])

    params = dict(
        # fused conv stack (im2col weight layouts)
        w1_blk=w1_blk, b1=b1_t.reshape(G * F1, 1),
        g1=jnp.ones((G * F1, 1), jnp.float32), be1=jnp.zeros((G * F1, 1), jnp.float32),
        w2_tile=tile_conv_w(w2_t, G), b2=tile_rows(b2_t, G),
        g2=jnp.ones((G * F2, 1), jnp.float32), be2=jnp.zeros((G * F2, 1), jnp.float32),
        w3_tile=tile_conv_w(w3_t, G), b3=tile_rows(b3_t, G),
        g3=jnp.ones((G * F3, 1), jnp.float32), be3=jnp.zeros((G * F3, 1), jnp.float32),
        # LSTM (pre-transposed, gate-reordered, biases summed)
        wih_t=wih_r.T, whh_t=whh_r.T, b_lstm=blstm_r[None, :],
        # mapping MLP
        w0m=w0.T, b0m=b0[None, :],
        g0m=jnp.ones((1, layers_cfg[0]), jnp.float32),
        be0m=jnp.zeros((1, layers_cfg[0]), jnp.float32),
        w1m=w1l.T, b1m=b1l[None, :],
        # batched per-class attention heads
        aw1_cat=jnp.concatenate([aw1[i].T for i in range(nclass)], axis=1),  # (D, nclass*att)
        ab1_cat=ab1.reshape(1, nclass * att_dim),
        aw2_blk=aw2_blk,                          # (nclass*att, nclass) block-diagonal
        ab2_row=ab2.reshape(1, nclass),
    )

    dists_exp, proto_dist = tapnet_forward(x, labels, params, idxs)
    jax.block_until_ready((dists_exp, proto_dist))
    assert dists_exp.shape == (N, nclass)
    assert proto_dist.shape == ()
    assert bool(jnp.all(jnp.isfinite(dists_exp))) and bool(jnp.isfinite(proto_dist))
    print("KERNEL_OK")


if __name__ == "__main__":
    main()
</pallas_src>

<mosaic_0001>
module attributes {stable_mosaic.version = 11 : i64} {
  func.func @tapnet_kernel(%arg0: memref<60x96xf32, #tpu.memory_space<vmem>>, %arg1: memref<96x16xf32, #tpu.memory_space<vmem>>, %arg2: memref<8x1xi32, #tpu.memory_space<vmem>>, %arg3: memref<24x60xf32, #tpu.memory_space<vmem>>, %arg4: memref<24x1xf32, #tpu.memory_space<vmem>>, %arg5: memref<24x1xf32, #tpu.memory_space<vmem>>, %arg6: memref<24x1xf32, #tpu.memory_space<vmem>>, %arg7: memref<24x96xf32, #tpu.memory_space<vmem>>, %arg8: memref<24x1xf32, #tpu.memory_space<vmem>>, %arg9: memref<24x1xf32, #tpu.memory_space<vmem>>, %arg10: memref<24x1xf32, #tpu.memory_space<vmem>>, %arg11: memref<24x72xf32, #tpu.memory_space<vmem>>, %arg12: memref<24x1xf32, #tpu.memory_space<vmem>>, %arg13: memref<24x1xf32, #tpu.memory_space<vmem>>, %arg14: memref<24x1xf32, #tpu.memory_space<vmem>>, %arg15: memref<16x128xf32, #tpu.memory_space<vmem>>, %arg16: memref<32x128xf32, #tpu.memory_space<vmem>>, %arg17: memref<1x128xf32, #tpu.memory_space<vmem>>, %arg18: memref<56x64xf32, #tpu.memory_space<vmem>>, %arg19: memref<1x64xf32, #tpu.memory_space<vmem>>, %arg20: memref<1x64xf32, #tpu.memory_space<vmem>>, %arg21: memref<1x64xf32, #tpu.memory_space<vmem>>, %arg22: memref<64x32xf32, #tpu.memory_space<vmem>>, %arg23: memref<1x32xf32, #tpu.memory_space<vmem>>, %arg24: memref<32x384xf32, #tpu.memory_space<vmem>>, %arg25: memref<1x384xf32, #tpu.memory_space<vmem>>, %arg26: memref<384x3xf32, #tpu.memory_space<vmem>>, %arg27: memref<1x3xf32, #tpu.memory_space<vmem>>, %arg28: memref<8x3xf32, #tpu.memory_space<vmem>>, %arg29: memref<1x1xf32, #tpu.memory_space<vmem>>, %arg30: memref<96x128xf32, #tpu.memory_space<vmem>>, %arg31: memref<8x12x32xf32, #tpu.memory_space<vmem>>) attributes {dimension_semantics = [], scalar_prefetch = 0 : i64, scratch_operands = 2 : i64, tpu.core_type = #tpu.core_type<tc>} {
    %c0 = arith.constant 0 : index
    %c0_0 = arith.constant 0 : index
    %0 = vector.load %arg3[%c0, %c0_0] : memref<24x60xf32, #tpu.memory_space<vmem>>, vector<24x60xf32>
    %c0_1 = arith.constant 0 : index
    %c0_2 = arith.constant 0 : index
    %1 = vector.load %arg0[%c0_1, %c0_2] : memref<60x96xf32, #tpu.memory_space<vmem>>, vector<60x96xf32>
    %cst = arith.constant dense<0.000000e+00> : vector<24x96xf32>
    %2 = tpu.matmul %0, %1, %cst {dimension_numbers = #tpu.dot_dimension_numbers<[1], [0], [0], [1], [0, 0, 1, 1], [], []>} : vector<24x60xf32>, vector<60x96xf32>, vector<24x96xf32> -> vector<24x96xf32>
    %c0_3 = arith.constant 0 : index
    %c0_4 = arith.constant 0 : index
    %3 = vector.load %arg4[%c0_3, %c0_4] : memref<24x1xf32, #tpu.memory_space<vmem>>, vector<24x1xf32>
    %4 = vector.broadcast %3 : vector<24x1xf32> to vector<24x96xf32>
    %5 = arith.addf %2, %4 : vector<24x96xf32>
    %c0_5 = arith.constant 0 : index
    %c0_6 = arith.constant 0 : index
    %6 = vector.load %arg5[%c0_5, %c0_6] : memref<24x1xf32, #tpu.memory_space<vmem>>, vector<24x1xf32>
    %c0_7 = arith.constant 0 : index
    %c0_8 = arith.constant 0 : index
    %7 = vector.load %arg6[%c0_7, %c0_8] : memref<24x1xf32, #tpu.memory_space<vmem>>, vector<24x1xf32>
    %cst_9 = arith.constant dense<0.000000e+00> : vector<24xf32>
    %8 = vector.multi_reduction <add>, %5, %cst_9 [1] : vector<24x96xf32> to vector<24xf32>
    %9 = vector.shape_cast %8 : vector<24xf32> to vector<24x1xf32>
    %cst_10 = arith.constant 9.600000e+01 : f32
    %10 = vector.broadcast %cst_10 : f32 to vector<24x1xf32>
    %11 = arith.divf %9, %10 : vector<24x1xf32>
    %12 = vector.broadcast %11 : vector<24x1xf32> to vector<24x96xf32>
    %13 = arith.subf %5, %12 : vector<24x96xf32>
    %14 = arith.mulf %13, %13 : vector<24x96xf32>
    %cst_11 = arith.constant dense<0.000000e+00> : vector<24xf32>
    %15 = vector.multi_reduction <add>, %14, %cst_11 [1] : vector<24x96xf32> to vector<24xf32>
    %16 = vector.shape_cast %15 : vector<24xf32> to vector<24x1xf32>
    %cst_12 = arith.constant 9.600000e+01 : f32
    %17 = vector.broadcast %cst_12 : f32 to vector<24x1xf32>
    %18 = arith.divf %16, %17 : vector<24x1xf32>
    %19 = vector.broadcast %11 : vector<24x1xf32> to vector<24x96xf32>
    %20 = arith.subf %5, %19 : vector<24x96xf32>
    %cst_13 = arith.constant 9.99999974E-6 : f32
    %21 = vector.broadcast %cst_13 : f32 to vector<24x1xf32>
    %22 = arith.addf %18, %21 : vector<24x1xf32>
    %23 = math.rsqrt %22 : vector<24x1xf32>
    %24 = vector.broadcast %23 : vector<24x1xf32> to vector<24x96xf32>
    %25 = arith.mulf %20, %24 : vector<24x96xf32>
    %26 = vector.broadcast %6 : vector<24x1xf32> to vector<24x96xf32>
    %27 = arith.mulf %25, %26 : vector<24x96xf32>
    %28 = vector.broadcast %7 : vector<24x1xf32> to vector<24x96xf32>
    %29 = arith.addf %27, %28 : vector<24x96xf32>
    %cst_14 = arith.constant 0.000000e+00 : f32
    %30 = vector.broadcast %cst_14 : f32 to vector<24x96xf32>
    %31 = arith.cmpf ogt, %29, %30 : vector<24x96xf32>
    %cst_15 = arith.constant 0.00999999977 : f32
    %32 = vector.broadcast %cst_15 : f32 to vector<24x96xf32>
    %33 = arith.mulf %32, %29 : vector<24x96xf32>
    %34 = arith.select %31, %29, %33 : vector<24x96xi1>, vector<24x96xf32>
    %c0_16 = arith.constant 0 : index
    %c0_17 = arith.constant 0 : index
    %35 = vector.load %arg7[%c0_16, %c0_17] : memref<24x96xf32, #tpu.memory_space<vmem>>, vector<24x96xf32>
    %c0_18 = arith.constant 0 : index
    %c0_19 = arith.constant 0 : index
    %36 = vector.load %arg8[%c0_18, %c0_19] : memref<24x1xf32, #tpu.memory_space<vmem>>, vector<24x1xf32>
    %c0_20 = arith.constant 0 : index
    %c0_21 = arith.constant 0 : index
    %37 = vector.load %arg9[%c0_20, %c0_21] : memref<24x1xf32, #tpu.memory_space<vmem>>, vector<24x1xf32>
    %c0_22 = arith.constant 0 : index
    %c0_23 = arith.constant 0 : index
    %38 = vector.load %arg10[%c0_22, %c0_23] : memref<24x1xf32, #tpu.memory_space<vmem>>, vector<24x1xf32>
    %39 = vector.shape_cast %34 : vector<24x96xf32> to vector<24x8x12xf32>
    %40 = vector.extract_strided_slice %39 {offsets = [0, 0, 0], sizes = [24, 8, 9], strides = [1, 1, 1]} : vector<24x8x12xf32> to vector<24x8x9xf32>
    %41 = vector.extract_strided_slice %39 {offsets = [0, 0, 1], sizes = [24, 8, 9], strides = [1, 1, 1]} : vector<24x8x12xf32> to vector<24x8x9xf32>
    %42 = vector.extract_strided_slice %39 {offsets = [0, 0, 2], sizes = [24, 8, 9], strides = [1, 1, 1]} : vector<24x8x12xf32> to vector<24x8x9xf32>
    %43 = vector.extract_strided_slice %39 {offsets = [0, 0, 3], sizes = [24, 8, 9], strides = [1, 1, 1]} : vector<24x8x12xf32> to vector<24x8x9xf32>
    %44 = tpu.concatenate %40, %41, %42, %43 in 0 : vector<24x8x9xf32>, vector<24x8x9xf32>, vector<24x8x9xf32>, vector<24x8x9xf32> -> vector<96x8x9xf32>
    %45 = vector.shape_cast %44 : vector<96x8x9xf32> to vector<96x72xf32>
    %cst_24 = arith.constant dense<0.000000e+00> : vector<24x72xf32>
    %46 = tpu.matmul %35, %45, %cst_24 {dimension_numbers = #tpu.dot_dimension_numbers<[1], [0], [0], [1], [0, 0, 1, 1], [], []>} : vector<24x96xf32>, vector<96x72xf32>, vector<24x72xf32> -> vector<24x72xf32>
    %47 = vector.broadcast %36 : vector<24x1xf32> to vector<24x72xf32>
    %48 = arith.addf %46, %47 : vector<24x72xf32>
    %cst_25 = arith.constant dense<0.000000e+00> : vector<24xf32>
    %49 = vector.multi_reduction <add>, %48, %cst_25 [1] : vector<24x72xf32> to vector<24xf32>
    %50 = vector.shape_cast %49 : vector<24xf32> to vector<24x1xf32>
    %cst_26 = arith.constant 7.200000e+01 : f32
    %51 = vector.broadcast %cst_26 : f32 to vector<24x1xf32>
    %52 = arith.divf %50, %51 : vector<24x1xf32>
    %53 = vector.broadcast %52 : vector<24x1xf32> to vector<24x72xf32>
    %54 = arith.subf %48, %53 : vector<24x72xf32>
    %55 = arith.mulf %54, %54 : vector<24x72xf32>
    %cst_27 = arith.constant dense<0.000000e+00> : vector<24xf32>
    %56 = vector.multi_reduction <add>, %55, %cst_27 [1] : vector<24x72xf32> to vector<24xf32>
    %57 = vector.shape_cast %56 : vector<24xf32> to vector<24x1xf32>
    %cst_28 = arith.constant 7.200000e+01 : f32
    %58 = vector.broadcast %cst_28 : f32 to vector<24x1xf32>
    %59 = arith.divf %57, %58 : vector<24x1xf32>
    %60 = vector.broadcast %52 : vector<24x1xf32> to vector<24x72xf32>
    %61 = arith.subf %48, %60 : vector<24x72xf32>
    %cst_29 = arith.constant 9.99999974E-6 : f32
    %62 = vector.broadcast %cst_29 : f32 to vector<24x1xf32>
    %63 = arith.addf %59, %62 : vector<24x1xf32>
    %64 = math.rsqrt %63 : vector<24x1xf32>
    %65 = vector.broadcast %64 : vector<24x1xf32> to vector<24x72xf32>
    %66 = arith.mulf %61, %65 : vector<24x72xf32>
    %67 = vector.broadcast %37 : vector<24x1xf32> to vector<24x72xf32>
    %68 = arith.mulf %66, %67 : vector<24x72xf32>
    %69 = vector.broadcast %38 : vector<24x1xf32> to vector<24x72xf32>
    %70 = arith.addf %68, %69 : vector<24x72xf32>
    %cst_30 = arith.constant 0.000000e+00 : f32
    %71 = vector.broadcast %cst_30 : f32 to vector<24x72xf32>
    %72 = arith.cmpf ogt, %70, %71 : vector<24x72xf32>
    %cst_31 = arith.constant 0.00999999977 : f32
    %73 = vector.broadcast %cst_31 : f32 to vector<24x72xf32>
    %74 = arith.mulf %73, %70 : vector<24x72xf32>
    %75 = arith.select %72, %70, %74 : vector<24x72xi1>, vector<24x72xf32>
    %c0_32 = arith.constant 0 : index
    %c0_33 = arith.constant 0 : index
    %76 = vector.load %arg11[%c0_32, %c0_33] : memref<24x72xf32, #tpu.memory_space<vmem>>, vector<24x72xf32>
    %c0_34 = arith.constant 0 : index
    %c0_35 = arith.constant 0 : index
    %77 = vector.load %arg12[%c0_34, %c0_35] : memref<24x1xf32, #tpu.memory_space<vmem>>, vector<24x1xf32>
    %c0_36 = arith.constant 0 : index
    %c0_37 = arith.constant 0 : index
    %78 = vector.load %arg13[%c0_36, %c0_37] : memref<24x1xf32, #tpu.memory_space<vmem>>, vector<24x1xf32>
    %c0_38 = arith.constant 0 : index
    %c0_39 = arith.constant 0 : index
    %79 = vector.load %arg14[%c0_38, %c0_39] : memref<24x1xf32, #tpu.memory_space<vmem>>, vector<24x1xf32>
    %80 = vector.shape_cast %75 : vector<24x72xf32> to vector<24x8x9xf32>
    %81 = vector.extract_strided_slice %80 {offsets = [0, 0, 0], sizes = [24, 8, 7], strides = [1, 1, 1]} : vector<24x8x9xf32> to vector<24x8x7xf32>
    %82 = vector.extract_strided_slice %80 {offsets = [0, 0, 1], sizes = [24, 8, 7], strides = [1, 1, 1]} : vector<24x8x9xf32> to vector<24x8x7xf32>
    %83 = vector.extract_strided_slice %80 {offsets = [0, 0, 2], sizes = [24, 8, 7], strides = [1, 1, 1]} : vector<24x8x9xf32> to vector<24x8x7xf32>
    %84 = tpu.concatenate %81, %82, %83 in 0 : vector<24x8x7xf32>, vector<24x8x7xf32>, vector<24x8x7xf32> -> vector<72x8x7xf32>
    %85 = vector.shape_cast %84 : vector<72x8x7xf32> to vector<72x56xf32>
    %cst_40 = arith.constant dense<0.000000e+00> : vector<24x56xf32>
    %86 = tpu.matmul %76, %85, %cst_40 {dimension_numbers = #tpu.dot_dimension_numbers<[1], [0], [0], [1], [0, 0, 1, 1], [], []>} : vector<24x72xf32>, vector<72x56xf32>, vector<24x56xf32> -> vector<24x56xf32>
    %87 = vector.broadcast %77 : vector<24x1xf32> to vector<24x56xf32>
    %88 = arith.addf %86, %87 : vector<24x56xf32>
    %cst_41 = arith.constant dense<0.000000e+00> : vector<24xf32>
    %89 = vector.multi_reduction <add>, %88, %cst_41 [1] : vector<24x56xf32> to vector<24xf32>
    %90 = vector.shape_cast %89 : vector<24xf32> to vector<24x1xf32>
    %cst_42 = arith.constant 5.600000e+01 : f32
    %91 = vector.broadcast %cst_42 : f32 to vector<24x1xf32>
    %92 = arith.divf %90, %91 : vector<24x1xf32>
    %93 = vector.broadcast %92 : vector<24x1xf32> to vector<24x56xf32>
    %94 = arith.subf %88, %93 : vector<24x56xf32>
    %95 = arith.mulf %94, %94 : vector<24x56xf32>
    %cst_43 = arith.constant dense<0.000000e+00> : vector<24xf32>
    %96 = vector.multi_reduction <add>, %95, %cst_43 [1] : vector<24x56xf32> to vector<24xf32>
    %97 = vector.shape_cast %96 : vector<24xf32> to vector<24x1xf32>
    %cst_44 = arith.constant 5.600000e+01 : f32
    %98 = vector.broadcast %cst_44 : f32 to vector<24x1xf32>
    %99 = arith.divf %97, %98 : vector<24x1xf32>
    %100 = vector.broadcast %92 : vector<24x1xf32> to vector<24x56xf32>
    %101 = arith.subf %88, %100 : vector<24x56xf32>
    %cst_45 = arith.constant 9.99999974E-6 : f32
    %102 = vector.broadcast %cst_45 : f32 to vector<24x1xf32>
    %103 = arith.addf %99, %102 : vector<24x1xf32>
    %104 = math.rsqrt %103 : vector<24x1xf32>
    %105 = vector.broadcast %104 : vector<24x1xf32> to vector<24x56xf32>
    %106 = arith.mulf %101, %105 : vector<24x56xf32>
    %107 = vector.broadcast %78 : vector<24x1xf32> to vector<24x56xf32>
    %108 = arith.mulf %106, %107 : vector<24x56xf32>
    %109 = vector.broadcast %79 : vector<24x1xf32> to vector<24x56xf32>
    %110 = arith.addf %108, %109 : vector<24x56xf32>
    %cst_46 = arith.constant 0.000000e+00 : f32
    %111 = vector.broadcast %cst_46 : f32 to vector<24x56xf32>
    %112 = arith.cmpf ogt, %110, %111 : vector<24x56xf32>
    %cst_47 = arith.constant 0.00999999977 : f32
    %113 = vector.broadcast %cst_47 : f32 to vector<24x56xf32>
    %114 = arith.mulf %113, %110 : vector<24x56xf32>
    %115 = arith.select %112, %110, %114 : vector<24x56xi1>, vector<24x56xf32>
    %116 = vector.shape_cast %115 : vector<24x56xf32> to vector<24x8x7xf32>
    %cst_48 = arith.constant dense<0.000000e+00> : vector<24x8xf32>
    %117 = vector.multi_reduction <add>, %116, %cst_48 [2] : vector<24x8x7xf32> to vector<24x8xf32>
    %cst_49 = arith.constant 7.000000e+00 : f32
    %118 = vector.broadcast %cst_49 : f32 to vector<24x8xf32>
    %119 = arith.divf %117, %118 : vector<24x8xf32>
    %120 = tpu.transpose %119, [1, 0] : vector<24x8xf32> -> vector<8x24xf32>
    %c0_50 = arith.constant 0 : index
    %c0_51 = arith.constant 0 : index
    %121 = vector.load %arg16[%c0_50, %c0_51] : memref<32x128xf32, #tpu.memory_space<vmem>>, vector<32x128xf32>
    %c0_52 = arith.constant 0 : index
    %c0_53 = arith.constant 0 : index
    %122 = vector.load %arg1[%c0_52, %c0_53] : memref<96x16xf32, #tpu.memory_space<vmem>>, vector<96x16xf32>
    %c0_54 = arith.constant 0 : index
    %c0_55 = arith.constant 0 : index
    %123 = vector.load %arg15[%c0_54, %c0_55] : memref<16x128xf32, #tpu.memory_space<vmem>>, vector<16x128xf32>
    %cst_56 = arith.constant dense<0.000000e+00> : vector<96x128xf32>
    %124 = tpu.matmul %122, %123, %cst_56 {dimension_numbers = #tpu.dot_dimension_numbers<[1], [0], [0], [1], [0, 0, 1, 1], [], []>} : vector<96x16xf32>, vector<16x128xf32>, vector<96x128xf32> -> vector<96x128xf32>
    %c0_57 = arith.constant 0 : index
    %c0_58 = arith.constant 0 : index
    %125 = vector.load %arg17[%c0_57, %c0_58] : memref<1x128xf32, #tpu.memory_space<vmem>>, vector<1x128xf32>
    %126 = vector.broadcast %125 : vector<1x128xf32> to vector<96x128xf32>
    %127 = arith.addf %124, %126 : vector<96x128xf32>
    %c0_59 = arith.constant 0 : index
    %c0_60 = arith.constant 0 : index
    %128 = vector.load %arg30[%c0_59, %c0_60] : memref<96x128xf32, #tpu.memory_space<vmem>>, vector<96x128xf32>
    tpu.vector_store %arg30[%c0_59, %c0_60], %127 {strides = array<i32>} : memref<96x128xf32, #tpu.memory_space<vmem>>, vector<96x128xf32>,
    %cst_61 = arith.constant 0.000000e+00 : f32
    %129 = vector.broadcast %cst_61 : f32 to vector<12x32xf32>
    %cst_62 = arith.constant 0.000000e+00 : f32
    %130 = vector.broadcast %cst_62 : f32 to vector<12x32xf32>
    %c0_63 = arith.constant 0 : index
    %c0_64 = arith.constant 0 : index
    %131 = vector.load %arg30[%c0_63, %c0_64] : memref<96x128xf32, #tpu.memory_space<vmem>>, vector<12x128xf32>
    %cst_65 = arith.constant dense<0.000000e+00> : vector<12x128xf32>
    %132 = tpu.matmul %129, %121, %cst_65 {dimension_numbers = #tpu.dot_dimension_numbers<[1], [0], [0], [1], [0, 0, 1, 1], [], []>} : vector<12x32xf32>, vector<32x128xf32>, vector<12x128xf32> -> vector<12x128xf32>
    %133 = arith.addf %131, %132 : vector<12x128xf32>
    %134 = vector.extract_strided_slice %133 {offsets = [0, 0], sizes = [12, 96], strides = [1, 1]} : vector<12x128xf32> to vector<12x96xf32>
    %135 = arith.negf %134 : vector<12x96xf32>
    %136 = math.exp %135 : vector<12x96xf32>
    %cst_66 = arith.constant 1.000000e+00 : f32
    %137 = vector.broadcast %cst_66 : f32 to vector<12x96xf32>
    %138 = arith.addf %137, %136 : vector<12x96xf32>
    %139 = arith.divf %137, %138 : vector<12x96xf32>
    %140 = vector.extract_strided_slice %139 {offsets = [0, 0], sizes = [12, 32], strides = [1, 1]} : vector<12x96xf32> to vector<12x32xf32>
    %141 = vector.extract_strided_slice %139 {offsets = [0, 32], sizes = [12, 32], strides = [1, 1]} : vector<12x96xf32> to vector<12x32xf32>
    %142 = vector.extract_strided_slice %139 {offsets = [0, 64], sizes = [12, 32], strides = [1, 1]} : vector<12x96xf32> to vector<12x32xf32>
    %143 = vector.extract_strided_slice %133 {offsets = [0, 96], sizes = [12, 32], strides = [1, 1]} : vector<12x128xf32> to vector<12x32xf32>
    %144 = math.tanh %143 : vector<12x32xf32>
    %145 = arith.mulf %141, %130 : vector<12x32xf32>
    %146 = arith.mulf %140, %144 : vector<12x32xf32>
    %147 = arith.addf %145, %146 : vector<12x32xf32>
    %148 = math.tanh %147 : vector<12x32xf32>
    %149 = arith.mulf %142, %148 : vector<12x32xf32>
    %c0_67 = arith.constant 0 : index
    %c0_68 = arith.constant 0 : index
    %c0_69 = arith.constant 0 : index
    %150 = vector.load %arg31[%c0_67, %c0_68, %c0_69] : memref<8x12x32xf32, #tpu.memory_space<vmem>>, vector<1x12x32xf32>
    %151 = vector.shape_cast %150 : vector<1x12x32xf32> to vector<12x32xf32>
    %152 = vector.shape_cast %149 : vector<12x32xf32> to vector<1x12x32xf32>
    tpu.vector_store %arg31[%c0_67, %c0_68, %c0_69], %152 {strides = array<i32>} : memref<8x12x32xf32, #tpu.memory_space<vmem>>, vector<1x12x32xf32>,
    %c12 = arith.constant 12 : index
    %c0_70 = arith.constant 0 : index
    %153 = vector.load %arg30[%c12, %c0_70] : memref<96x128xf32, #tpu.memory_space<vmem>>, vector<12x128xf32>
    %cst_71 = arith.constant dense<0.000000e+00> : vector<12x128xf32>
    %154 = tpu.matmul %149, %121, %cst_71 {dimension_numbers = #tpu.dot_dimension_numbers<[1], [0], [0], [1], [0, 0, 1, 1], [], []>} : vector<12x32xf32>, vector<32x128xf32>, vector<12x128xf32> -> vector<12x128xf32>
    %155 = arith.addf %153, %154 : vector<12x128xf32>
    %156 = vector.extract_strided_slice %155 {offsets = [0, 0], sizes = [12, 96], strides = [1, 1]} : vector<12x128xf32> to vector<12x96xf32>
    %157 = arith.negf %156 : vector<12x96xf32>
    %158 = math.exp %157 : vector<12x96xf32>
    %cst_72 = arith.constant 1.000000e+00 : f32
    %159 = vector.broadcast %cst_72 : f32 to vector<12x96xf32>
    %160 = arith.addf %159, %158 : vector<12x96xf32>
    %161 = arith.divf %159, %160 : vector<12x96xf32>
    %162 = vector.extract_strided_slice %161 {offsets = [0, 0], sizes = [12, 32], strides = [1, 1]} : vector<12x96xf32> to vector<12x32xf32>
    %163 = vector.extract_strided_slice %161 {offsets = [0, 32], sizes = [12, 32], strides = [1, 1]} : vector<12x96xf32> to vector<12x32xf32>
    %164 = vector.extract_strided_slice %161 {offsets = [0, 64], sizes = [12, 32], strides = [1, 1]} : vector<12x96xf32> to vector<12x32xf32>
    %165 = vector.extract_strided_slice %155 {offsets = [0, 96], sizes = [12, 32], strides = [1, 1]} : vector<12x128xf32> to vector<12x32xf32>
    %166 = math.tanh %165 : vector<12x32xf32>
    %167 = arith.mulf %163, %147 : vector<12x32xf32>
    %168 = arith.mulf %162, %166 : vector<12x32xf32>
    %169 = arith.addf %167, %168 : vector<12x32xf32>
    %170 = math.tanh %169 : vector<12x32xf32>
    %171 = arith.mulf %164, %170 : vector<12x32xf32>
    %c1 = arith.constant 1 : index
    %c0_73 = arith.constant 0 : index
    %c0_74 = arith.constant 0 : index
    %172 = vector.load %arg31[%c1, %c0_73, %c0_74] : memref<8x12x32xf32, #tpu.memory_space<vmem>>, vector<1x12x32xf32>
    %173 = vector.shape_cast %172 : vector<1x12x32xf32> to vector<12x32xf32>
    %174 = vector.shape_cast %171 : vector<12x32xf32> to vector<1x12x32xf32>
    tpu.vector_store %arg31[%c1, %c0_73, %c0_74], %174 {strides = array<i32>} : memref<8x12x32xf32, #tpu.memory_space<vmem>>, vector<1x12x32xf32>,
    %c24 = arith.constant 24 : index
    %c0_75 = arith.constant 0 : index
    %175 = vector.load %arg30[%c24, %c0_75] : memref<96x128xf32, #tpu.memory_space<vmem>>, vector<12x128xf32>
    %cst_76 = arith.constant dense<0.000000e+00> : vector<12x128xf32>
    %176 = tpu.matmul %171, %121, %cst_76 {dimension_numbers = #tpu.dot_dimension_numbers<[1], [0], [0], [1], [0, 0, 1, 1], [], []>} : vector<12x32xf32>, vector<32x128xf32>, vector<12x128xf32> -> vector<12x128xf32>
    %177 = arith.addf %175, %176 : vector<12x128xf32>
    %178 = vector.extract_strided_slice %177 {offsets = [0, 0], sizes = [12, 96], strides = [1, 1]} : vector<12x128xf32> to vector<12x96xf32>
    %179 = arith.negf %178 : vector<12x96xf32>
    %180 = math.exp %179 : vector<12x96xf32>
    %cst_77 = arith.constant 1.000000e+00 : f32
    %181 = vector.broadcast %cst_77 : f32 to vector<12x96xf32>
    %182 = arith.addf %181, %180 : vector<12x96xf32>
    %183 = arith.divf %181, %182 : vector<12x96xf32>
    %184 = vector.extract_strided_slice %183 {offsets = [0, 0], sizes = [12, 32], strides = [1, 1]} : vector<12x96xf32> to vector<12x32xf32>
    %185 = vector.extract_strided_slice %183 {offsets = [0, 32], sizes = [12, 32], strides = [1, 1]} : vector<12x96xf32> to vector<12x32xf32>
    %186 = vector.extract_strided_slice %183 {offsets = [0, 64], sizes = [12, 32], strides = [1, 1]} : vector<12x96xf32> to vector<12x32xf32>
    %187 = vector.extract_strided_slice %177 {offsets = [0, 96], sizes = [12, 32], strides = [1, 1]} : vector<12x128xf32> to vector<12x32xf32>
    %188 = math.tanh %187 : vector<12x32xf32>
    %189 = arith.mulf %185, %169 : vector<12x32xf32>
    %190 = arith.mulf %184, %188 : vector<12x32xf32>
    %191 = arith.addf %189, %190 : vector<12x32xf32>
    %192 = math.tanh %191 : vector<12x32xf32>
    %193 = arith.mulf %186, %192 : vector<12x32xf32>
    %c2 = arith.constant 2 : index
    %c0_78 = arith.constant 0 : index
    %c0_79 = arith.constant 0 : index
    %194 = vector.load %arg31[%c2, %c0_78, %c0_79] : memref<8x12x32xf32, #tpu.memory_space<vmem>>, vector<1x12x32xf32>
    %195 = vector.shape_cast %194 : vector<1x12x32xf32> to vector<12x32xf32>
    %196 = vector.shape_cast %193 : vector<12x32xf32> to vector<1x12x32xf32>
    tpu.vector_store %arg31[%c2, %c0_78, %c0_79], %196 {strides = array<i32>} : memref<8x12x32xf32, #tpu.memory_space<vmem>>, vector<1x12x32xf32>,
    %c36 = arith.constant 36 : index
    %c0_80 = arith.constant 0 : index
    %197 = vector.load %arg30[%c36, %c0_80] : memref<96x128xf32, #tpu.memory_space<vmem>>, vector<12x128xf32>
    %cst_81 = arith.constant dense<0.000000e+00> : vector<12x128xf32>
    %198 = tpu.matmul %193, %121, %cst_81 {dimension_numbers = #tpu.dot_dimension_numbers<[1], [0], [0], [1], [0, 0, 1, 1], [], []>} : vector<12x32xf32>, vector<32x128xf32>, vector<12x128xf32> -> vector<12x128xf32>
    %199 = arith.addf %197, %198 : vector<12x128xf32>
    %200 = vector.extract_strided_slice %199 {offsets = [0, 0], sizes = [12, 96], strides = [1, 1]} : vector<12x128xf32> to vector<12x96xf32>
    %201 = arith.negf %200 : vector<12x96xf32>
    %202 = math.exp %201 : vector<12x96xf32>
    %cst_82 = arith.constant 1.000000e+00 : f32
    %203 = vector.broadcast %cst_82 : f32 to vector<12x96xf32>
    %204 = arith.addf %203, %202 : vector<12x96xf32>
    %205 = arith.divf %203, %204 : vector<12x96xf32>
    %206 = vector.extract_strided_slice %205 {offsets = [0, 0], sizes = [12, 32], strides = [1, 1]} : vector<12x96xf32> to vector<12x32xf32>
    %207 = vector.extract_strided_slice %205 {offsets = [0, 32], sizes = [12, 32], strides = [1, 1]} : vector<12x96xf32> to vector<12x32xf32>
    %208 = vector.extract_strided_slice %205 {offsets = [0, 64], sizes = [12, 32], strides = [1, 1]} : vector<12x96xf32> to vector<12x32xf32>
    %209 = vector.extract_strided_slice %199 {offsets = [0, 96], sizes = [12, 32], strides = [1, 1]} : vector<12x128xf32> to vector<12x32xf32>
    %210 = math.tanh %209 : vector<12x32xf32>
    %211 = arith.mulf %207, %191 : vector<12x32xf32>
    %212 = arith.mulf %206, %210 : vector<12x32xf32>
    %213 = arith.addf %211, %212 : vector<12x32xf32>
    %214 = math.tanh %213 : vector<12x32xf32>
    %215 = arith.mulf %208, %214 : vector<12x32xf32>
    %c3 = arith.constant 3 : index
    %c0_83 = arith.constant 0 : index
    %c0_84 = arith.constant 0 : index
    %216 = vector.load %arg31[%c3, %c0_83, %c0_84] : memref<8x12x32xf32, #tpu.memory_space<vmem>>, vector<1x12x32xf32>
    %217 = vector.shape_cast %216 : vector<1x12x32xf32> to vector<12x32xf32>
    %218 = vector.shape_cast %215 : vector<12x32xf32> to vector<1x12x32xf32>
    tpu.vector_store %arg31[%c3, %c0_83, %c0_84], %218 {strides = array<i32>} : memref<8x12x32xf32, #tpu.memory_space<vmem>>, vector<1x12x32xf32>,
    %c48 = arith.constant 48 : index
    %c0_85 = arith.constant 0 : index
    %219 = vector.load %arg30[%c48, %c0_85] : memref<96x128xf32, #tpu.memory_space<vmem>>, vector<12x128xf32>
    %cst_86 = arith.constant dense<0.000000e+00> : vector<12x128xf32>
    %220 = tpu.matmul %215, %121, %cst_86 {dimension_numbers = #tpu.dot_dimension_numbers<[1], [0], [0], [1], [0, 0, 1, 1], [], []>} : vector<12x32xf32>, vector<32x128xf32>, vector<12x128xf32> -> vector<12x128xf32>
    %221 = arith.addf %219, %220 : vector<12x128xf32>
    %222 = vector.extract_strided_slice %221 {offsets = [0, 0], sizes = [12, 96], strides = [1, 1]} : vector<12x128xf32> to vector<12x96xf32>
    %223 = arith.negf %222 : vector<12x96xf32>
    %224 = math.exp %223 : vector<12x96xf32>
    %cst_87 = arith.constant 1.000000e+00 : f32
    %225 = vector.broadcast %cst_87 : f32 to vector<12x96xf32>
    %226 = arith.addf %225, %224 : vector<12x96xf32>
    %227 = arith.divf %225, %226 : vector<12x96xf32>
    %228 = vector.extract_strided_slice %227 {offsets = [0, 0], sizes = [12, 32], strides = [1, 1]} : vector<12x96xf32> to vector<12x32xf32>
    %229 = vector.extract_strided_slice %227 {offsets = [0, 32], sizes = [12, 32], strides = [1, 1]} : vector<12x96xf32> to vector<12x32xf32>
    %230 = vector.extract_strided_slice %227 {offsets = [0, 64], sizes = [12, 32], strides = [1, 1]} : vector<12x96xf32> to vector<12x32xf32>
    %231 = vector.extract_strided_slice %221 {offsets = [0, 96], sizes = [12, 32], strides = [1, 1]} : vector<12x128xf32> to vector<12x32xf32>
    %232 = math.tanh %231 : vector<12x32xf32>
    %233 = arith.mulf %229, %213 : vector<12x32xf32>
    %234 = arith.mulf %228, %232 : vector<12x32xf32>
    %235 = arith.addf %233, %234 : vector<12x32xf32>
    %236 = math.tanh %235 : vector<12x32xf32>
    %237 = arith.mulf %230, %236 : vector<12x32xf32>
    %c4 = arith.constant 4 : index
    %c0_88 = arith.constant 0 : index
    %c0_89 = arith.constant 0 : index
    %238 = vector.load %arg31[%c4, %c0_88, %c0_89] : memref<8x12x32xf32, #tpu.memory_space<vmem>>, vector<1x12x32xf32>
    %239 = vector.shape_cast %238 : vector<1x12x32xf32> to vector<12x32xf32>
    %240 = vector.shape_cast %237 : vector<12x32xf32> to vector<1x12x32xf32>
    tpu.vector_store %arg31[%c4, %c0_88, %c0_89], %240 {strides = array<i32>} : memref<8x12x32xf32, #tpu.memory_space<vmem>>, vector<1x12x32xf32>,
    %c60 = arith.constant 60 : index
    %c0_90 = arith.constant 0 : index
    %241 = vector.load %arg30[%c60, %c0_90] : memref<96x128xf32, #tpu.memory_space<vmem>>, vector<12x128xf32>
    %cst_91 = arith.constant dense<0.000000e+00> : vector<12x128xf32>
    %242 = tpu.matmul %237, %121, %cst_91 {dimension_numbers = #tpu.dot_dimension_numbers<[1], [0], [0], [1], [0, 0, 1, 1], [], []>} : vector<12x32xf32>, vector<32x128xf32>, vector<12x128xf32> -> vector<12x128xf32>
    %243 = arith.addf %241, %242 : vector<12x128xf32>
    %244 = vector.extract_strided_slice %243 {offsets = [0, 0], sizes = [12, 96], strides = [1, 1]} : vector<12x128xf32> to vector<12x96xf32>
    %245 = arith.negf %244 : vector<12x96xf32>
    %246 = math.exp %245 : vector<12x96xf32>
    %cst_92 = arith.constant 1.000000e+00 : f32
    %247 = vector.broadcast %cst_92 : f32 to vector<12x96xf32>
    %248 = arith.addf %247, %246 : vector<12x96xf32>
    %249 = arith.divf %247, %248 : vector<12x96xf32>
    %250 = vector.extract_strided_slice %249 {offsets = [0, 0], sizes = [12, 32], strides = [1, 1]} : vector<12x96xf32> to vector<12x32xf32>
    %251 = vector.extract_strided_slice %249 {offsets = [0, 32], sizes = [12, 32], strides = [1, 1]} : vector<12x96xf32> to vector<12x32xf32>
    %252 = vector.extract_strided_slice %249 {offsets = [0, 64], sizes = [12, 32], strides = [1, 1]} : vector<12x96xf32> to vector<12x32xf32>
    %253 = vector.extract_strided_slice %243 {offsets = [0, 96], sizes = [12, 32], strides = [1, 1]} : vector<12x128xf32> to vector<12x32xf32>
    %254 = math.tanh %253 : vector<12x32xf32>
    %255 = arith.mulf %251, %235 : vector<12x32xf32>
    %256 = arith.mulf %250, %254 : vector<12x32xf32>
    %257 = arith.addf %255, %256 : vector<12x32xf32>
    %258 = math.tanh %257 : vector<12x32xf32>
    %259 = arith.mulf %252, %258 : vector<12x32xf32>
    %c5 = arith.constant 5 : index
    %c0_93 = arith.constant 0 : index
    %c0_94 = arith.constant 0 : index
    %260 = vector.load %arg31[%c5, %c0_93, %c0_94] : memref<8x12x32xf32, #tpu.memory_space<vmem>>, vector<1x12x32xf32>
    %261 = vector.shape_cast %260 : vector<1x12x32xf32> to vector<12x32xf32>
    %262 = vector.shape_cast %259 : vector<12x32xf32> to vector<1x12x32xf32>
    tpu.vector_store %arg31[%c5, %c0_93, %c0_94], %262 {strides = array<i32>} : memref<8x12x32xf32, #tpu.memory_space<vmem>>, vector<1x12x32xf32>,
    %c72 = arith.constant 72 : index
    %c0_95 = arith.constant 0 : index
    %263 = vector.load %arg30[%c72, %c0_95] : memref<96x128xf32, #tpu.memory_space<vmem>>, vector<12x128xf32>
    %cst_96 = arith.constant dense<0.000000e+00> : vector<12x128xf32>
    %264 = tpu.matmul %259, %121, %cst_96 {dimension_numbers = #tpu.dot_dimension_numbers<[1], [0], [0], [1], [0, 0, 1, 1], [], []>} : vector<12x32xf32>, vector<32x128xf32>, vector<12x128xf32> -> vector<12x128xf32>
    %265 = arith.addf %263, %264 : vector<12x128xf32>
    %266 = vector.extract_strided_slice %265 {offsets = [0, 0], sizes = [12, 96], strides = [1, 1]} : vector<12x128xf32> to vector<12x96xf32>
    %267 = arith.negf %266 : vector<12x96xf32>
    %268 = math.exp %267 : vector<12x96xf32>
    %cst_97 = arith.constant 1.000000e+00 : f32
    %269 = vector.broadcast %cst_97 : f32 to vector<12x96xf32>
    %270 = arith.addf %269, %268 : vector<12x96xf32>
    %271 = arith.divf %269, %270 : vector<12x96xf32>
    %272 = vector.extract_strided_slice %271 {offsets = [0, 0], sizes = [12, 32], strides = [1, 1]} : vector<12x96xf32> to vector<12x32xf32>
    %273 = vector.extract_strided_slice %271 {offsets = [0, 32], sizes = [12, 32], strides = [1, 1]} : vector<12x96xf32> to vector<12x32xf32>
    %274 = vector.extract_strided_slice %271 {offsets = [0, 64], sizes = [12, 32], strides = [1, 1]} : vector<12x96xf32> to vector<12x32xf32>
    %275 = vector.extract_strided_slice %265 {offsets = [0, 96], sizes = [12, 32], strides = [1, 1]} : vector<12x128xf32> to vector<12x32xf32>
    %276 = math.tanh %275 : vector<12x32xf32>
    %277 = arith.mulf %273, %257 : vector<12x32xf32>
    %278 = arith.mulf %272, %276 : vector<12x32xf32>
    %279 = arith.addf %277, %278 : vector<12x32xf32>
    %280 = math.tanh %279 : vector<12x32xf32>
    %281 = arith.mulf %274, %280 : vector<12x32xf32>
    %c6 = arith.constant 6 : index
    %c0_98 = arith.constant 0 : index
    %c0_99 = arith.constant 0 : index
    %282 = vector.load %arg31[%c6, %c0_98, %c0_99] : memref<8x12x32xf32, #tpu.memory_space<vmem>>, vector<1x12x32xf32>
    %283 = vector.shape_cast %282 : vector<1x12x32xf32> to vector<12x32xf32>
    %284 = vector.shape_cast %281 : vector<12x32xf32> to vector<1x12x32xf32>
    tpu.vector_store %arg31[%c6, %c0_98, %c0_99], %284 {strides = array<i32>} : memref<8x12x32xf32, #tpu.memory_space<vmem>>, vector<1x12x32xf32>,
    %c84 = arith.constant 84 : index
    %c0_100 = arith.constant 0 : index
    %285 = vector.load %arg30[%c84, %c0_100] : memref<96x128xf32, #tpu.memory_space<vmem>>, vector<12x128xf32>
    %cst_101 = arith.constant dense<0.000000e+00> : vector<12x128xf32>
    %286 = tpu.matmul %281, %121, %cst_101 {dimension_numbers = #tpu.dot_dimension_numbers<[1], [0], [0], [1], [0, 0, 1, 1], [], []>} : vector<12x32xf32>, vector<32x128xf32>, vector<12x128xf32> -> vector<12x128xf32>
    %287 = arith.addf %285, %286 : vector<12x128xf32>
    %288 = vector.extract_strided_slice %287 {offsets = [0, 0], sizes = [12, 96], strides = [1, 1]} : vector<12x128xf32> to vector<12x96xf32>
    %289 = arith.negf %288 : vector<12x96xf32>
    %290 = math.exp %289 : vector<12x96xf32>
    %cst_102 = arith.constant 1.000000e+00 : f32
    %291 = vector.broadcast %cst_102 : f32 to vector<12x96xf32>
    %292 = arith.addf %291, %290 : vector<12x96xf32>
    %293 = arith.divf %291, %292 : vector<12x96xf32>
    %294 = vector.extract_strided_slice %293 {offsets = [0, 0], sizes = [12, 32], strides = [1, 1]} : vector<12x96xf32> to vector<12x32xf32>
    %295 = vector.extract_strided_slice %293 {offsets = [0, 32], sizes = [12, 32], strides = [1, 1]} : vector<12x96xf32> to vector<12x32xf32>
    %296 = vector.extract_strided_slice %293 {offsets = [0, 64], sizes = [12, 32], strides = [1, 1]} : vector<12x96xf32> to vector<12x32xf32>
    %297 = vector.extract_strided_slice %287 {offsets = [0, 96], sizes = [12, 32], strides = [1, 1]} : vector<12x128xf32> to vector<12x32xf32>
    %298 = math.tanh %297 : vector<12x32xf32>
    %299 = arith.mulf %295, %279 : vector<12x32xf32>
    %300 = arith.mulf %294, %298 : vector<12x32xf32>
    %301 = arith.addf %299, %300 : vector<12x32xf32>
    %302 = math.tanh %301 : vector<12x32xf32>
    %303 = arith.mulf %296, %302 : vector<12x32xf32>
    %c7 = arith.constant 7 : index
    %c0_103 = arith.constant 0 : index
    %c0_104 = arith.constant 0 : index
    %304 = vector.load %arg31[%c7, %c0_103, %c0_104] : memref<8x12x32xf32, #tpu.memory_space<vmem>>, vector<1x12x32xf32>
    %305 = vector.shape_cast %304 : vector<1x12x32xf32> to vector<12x32xf32>
    %306 = vector.shape_cast %303 : vector<12x32xf32> to vector<1x12x32xf32>
    tpu.vector_store %arg31[%c7, %c0_103, %c0_104], %306 {strides = array<i32>} : memref<8x12x32xf32, #tpu.memory_space<vmem>>, vector<1x12x32xf32>,
    %c0_105 = arith.constant 0 : index
    %c0_106 = arith.constant 0 : index
    %c0_107 = arith.constant 0 : index
    %307 = vector.load %arg31[%c0_105, %c0_106, %c0_107] : memref<8x12x32xf32, #tpu.memory_space<vmem>>, vector<8x12x32xf32>
    %cst_108 = arith.constant dense<0.000000e+00> : vector<8x32xf32>
    %308 = vector.multi_reduction <add>, %307, %cst_108 [1] : vector<8x12x32xf32> to vector<8x32xf32>
    %cst_109 = arith.constant 1.200000e+01 : f32
    %309 = vector.broadcast %cst_109 : f32 to vector<8x32xf32>
    %310 = arith.divf %308, %309 : vector<8x32xf32>
    %311 = tpu.concatenate %120, %310 in 1 : vector<8x24xf32>, vector<8x32xf32> -> vector<8x56xf32>
    %c0_110 = arith.constant 0 : index
    %c0_111 = arith.constant 0 : index
    %312 = vector.load %arg18[%c0_110, %c0_111] : memref<56x64xf32, #tpu.memory_space<vmem>>, vector<56x64xf32>
    %cst_112 = arith.constant dense<0.000000e+00> : vector<8x64xf32>
    %313 = tpu.matmul %311, %312, %cst_112 {dimension_numbers = #tpu.dot_dimension_numbers<[1], [0], [0], [1], [0, 0, 1, 1], [], []>} : vector<8x56xf32>, vector<56x64xf32>, vector<8x64xf32> -> vector<8x64xf32>
    %c0_113 = arith.constant 0 : index
    %c0_114 = arith.constant 0 : index
    %314 = vector.load %arg19[%c0_113, %c0_114] : memref<1x64xf32, #tpu.memory_space<vmem>>, vector<1x64xf32>
    %315 = vector.broadcast %314 : vector<1x64xf32> to vector<8x64xf32>
    %316 = arith.addf %313, %315 : vector<8x64xf32>
    %cst_115 = arith.constant dense<0.000000e+00> : vector<64xf32>
    %317 = vector.multi_reduction <add>, %316, %cst_115 [0] : vector<8x64xf32> to vector<64xf32>
    %318 = vector.shape_cast %317 : vector<64xf32> to vector<1x64xf32>
    %cst_116 = arith.constant 8.000000e+00 : f32
    %319 = vector.broadcast %cst_116 : f32 to vector<1x64xf32>
    %320 = arith.divf %318, %319 : vector<1x64xf32>
    %321 = vector.broadcast %320 : vector<1x64xf32> to vector<8x64xf32>
    %322 = arith.subf %316, %321 : vector<8x64xf32>
    %323 = arith.mulf %322, %322 : vector<8x64xf32>
    %cst_117 = arith.constant dense<0.000000e+00> : vector<64xf32>
    %324 = vector.multi_reduction <add>, %323, %cst_117 [0] : vector<8x64xf32> to vector<64xf32>
    %325 = vector.shape_cast %324 : vector<64xf32> to vector<1x64xf32>
    %cst_118 = arith.constant 8.000000e+00 : f32
    %326 = vector.broadcast %cst_118 : f32 to vector<1x64xf32>
    %327 = arith.divf %325, %326 : vector<1x64xf32>
    %328 = vector.broadcast %320 : vector<1x64xf32> to vector<8x64xf32>
    %329 = arith.subf %316, %328 : vector<8x64xf32>
    %cst_119 = arith.constant 9.99999974E-6 : f32
    %330 = vector.broadcast %cst_119 : f32 to vector<1x64xf32>
    %331 = arith.addf %327, %330 : vector<1x64xf32>
    %332 = math.rsqrt %331 : vector<1x64xf32>
    %333 = vector.broadcast %332 : vector<1x64xf32> to vector<8x64xf32>
    %334 = arith.mulf %329, %333 : vector<8x64xf32>
    %c0_120 = arith.constant 0 : index
    %c0_121 = arith.constant 0 : index
    %335 = vector.load %arg20[%c0_120, %c0_121] : memref<1x64xf32, #tpu.memory_space<vmem>>, vector<1x64xf32>
    %336 = vector.broadcast %335 : vector<1x64xf32> to vector<8x64xf32>
    %337 = arith.mulf %334, %336 : vector<8x64xf32>
    %c0_122 = arith.constant 0 : index
    %c0_123 = arith.constant 0 : index
    %338 = vector.load %arg21[%c0_122, %c0_123] : memref<1x64xf32, #tpu.memory_space<vmem>>, vector<1x64xf32>
    %339 = vector.broadcast %338 : vector<1x64xf32> to vector<8x64xf32>
    %340 = arith.addf %337, %339 : vector<8x64xf32>
    %cst_124 = arith.constant 0.000000e+00 : f32
    %341 = vector.broadcast %cst_124 : f32 to vector<8x64xf32>
    %342 = arith.cmpf ogt, %340, %341 : vector<8x64xf32>
    %cst_125 = arith.constant 0.00999999977 : f32
    %343 = vector.broadcast %cst_125 : f32 to vector<8x64xf32>
    %344 = arith.mulf %343, %340 : vector<8x64xf32>
    %345 = arith.select %342, %340, %344 : vector<8x64xi1>, vector<8x64xf32>
    %c0_126 = arith.constant 0 : index
    %c0_127 = arith.constant 0 : index
    %346 = vector.load %arg22[%c0_126, %c0_127] : memref<64x32xf32, #tpu.memory_space<vmem>>, vector<64x32xf32>
    %cst_128 = arith.constant dense<0.000000e+00> : vector<8x32xf32>
    %347 = tpu.matmul %345, %346, %cst_128 {dimension_numbers = #tpu.dot_dimension_numbers<[1], [0], [0], [1], [0, 0, 1, 1], [], []>} : vector<8x64xf32>, vector<64x32xf32>, vector<8x32xf32> -> vector<8x32xf32>
    %c0_129 = arith.constant 0 : index
    %c0_130 = arith.constant 0 : index
    %348 = vector.load %arg23[%c0_129, %c0_130] : memref<1x32xf32, #tpu.memory_space<vmem>>, vector<1x32xf32>
    %349 = vector.broadcast %348 : vector<1x32xf32> to vector<8x32xf32>
    %350 = arith.addf %347, %349 : vector<8x32xf32>
    %c0_131 = arith.constant 0 : index
    %c0_132 = arith.constant 0 : index
    %351 = vector.load %arg24[%c0_131, %c0_132] : memref<32x384xf32, #tpu.memory_space<vmem>>, vector<32x384xf32>
    %cst_133 = arith.constant dense<0.000000e+00> : vector<8x384xf32>
    %352 = tpu.matmul %350, %351, %cst_133 {dimension_numbers = #tpu.dot_dimension_numbers<[1], [0], [0], [1], [0, 0, 1, 1], [], []>} : vector<8x32xf32>, vector<32x384xf32>, vector<8x384xf32> -> vector<8x384xf32>
    %c0_134 = arith.constant 0 : index
    %c0_135 = arith.constant 0 : index
    %353 = vector.load %arg25[%c0_134, %c0_135] : memref<1x384xf32, #tpu.memory_space<vmem>>, vector<1x384xf32>
    %354 = vector.broadcast %353 : vector<1x384xf32> to vector<8x384xf32>
    %355 = arith.addf %352, %354 : vector<8x384xf32>
    %356 = math.tanh %355 : vector<8x384xf32>
    %c0_136 = arith.constant 0 : index
    %c0_137 = arith.constant 0 : index
    %357 = vector.load %arg26[%c0_136, %c0_137] : memref<384x3xf32, #tpu.memory_space<vmem>>, vector<384x3xf32>
    %cst_138 = arith.constant dense<0.000000e+00> : vector<8x3xf32>
    %358 = tpu.matmul %356, %357, %cst_138 {dimension_numbers = #tpu.dot_dimension_numbers<[1], [0], [0], [1], [0, 0, 1, 1], [], []>} : vector<8x384xf32>, vector<384x3xf32>, vector<8x3xf32> -> vector<8x3xf32>
    %c0_139 = arith.constant 0 : index
    %c0_140 = arith.constant 0 : index
    %359 = vector.load %arg27[%c0_139, %c0_140] : memref<1x3xf32, #tpu.memory_space<vmem>>, vector<1x3xf32>
    %360 = vector.broadcast %359 : vector<1x3xf32> to vector<8x3xf32>
    %361 = arith.addf %358, %360 : vector<8x3xf32>
    %c0_141 = arith.constant 0 : index
    %c0_142 = arith.constant 0 : index
    %362 = vector.load %arg2[%c0_141, %c0_142] : memref<8x1xi32, #tpu.memory_space<vmem>>, vector<8x1xi32>
    %363 = tpu.iota {dimensions = array<i32: 1>} : vector<8x3xi32>
    %364 = vector.broadcast %362 : vector<8x1xi32> to vector<8x3xi32>
    %365 = arith.cmpi eq, %364, %363 : vector<8x3xi32>
    %cst_143 = arith.constant 0xFF800000 : f32
    %366 = vector.broadcast %cst_143 : f32 to vector<8x3xf32>
    %367 = arith.select %365, %361, %366 : vector<8x3xi1>, vector<8x3xf32>
    %cst_144 = arith.constant dense<0xFF800000> : vector<3xf32>
    %368 = vector.multi_reduction <maximumf>, %367, %cst_144 [0] : vector<8x3xf32> to vector<3xf32>
    %369 = vector.shape_cast %368 : vector<3xf32> to vector<1x3xf32>
    %370 = vector.broadcast %369 : vector<1x3xf32> to vector<8x3xf32>
    %371 = arith.subf %367, %370 : vector<8x3xf32>
    %372 = math.exp %371 : vector<8x3xf32>
    %cst_145 = arith.constant dense<0.000000e+00> : vector<3xf32>
    %373 = vector.multi_reduction <add>, %372, %cst_145 [0] : vector<8x3xf32> to vector<3xf32>
    %374 = vector.shape_cast %373 : vector<3xf32> to vector<1x3xf32>
    %375 = vector.broadcast %374 : vector<1x3xf32> to vector<8x3xf32>
    %376 = arith.divf %372, %375 : vector<8x3xf32>
    "tpu.trace_start"() <{level = 10 : i32, message = "nc,nd->cd"}> : () -> ()
    %cst_146 = arith.constant dense<0.000000e+00> : vector<3x32xf32>
    %377 = tpu.matmul %376, %350, %cst_146 {dimension_numbers = #tpu.dot_dimension_numbers<[0], [0], [1], [1], [0, 1, 1, 1], [], []>} : vector<8x3xf32>, vector<8x32xf32>, vector<3x32xf32> -> vector<3x32xf32>
    "tpu.trace_stop"() : () -> ()
    %378 = arith.mulf %350, %350 : vector<8x32xf32>
    %cst_147 = arith.constant dense<0.000000e+00> : vector<8xf32>
    %379 = vector.multi_reduction <add>, %378, %cst_147 [1] : vector<8x32xf32> to vector<8xf32>
    %380 = vector.shape_cast %379 : vector<8xf32> to vector<8x1xf32>
    %381 = arith.mulf %377, %377 : vector<3x32xf32>
    %cst_148 = arith.constant dense<0.000000e+00> : vector<3xf32>
    %382 = vector.multi_reduction <add>, %381, %cst_148 [1] : vector<3x32xf32> to vector<3xf32>
    %383 = vector.shape_cast %382 : vector<3xf32> to vector<3x1xf32>
    %384 = vector.shape_cast %383 : vector<3x1xf32> to vector<1x3xf32>
    "tpu.trace_start"() <{level = 10 : i32, message = "nd,cd->nc"}> : () -> ()
    %cst_149 = arith.constant dense<0.000000e+00> : vector<8x3xf32>
    %385 = tpu.matmul %350, %377, %cst_149 {dimension_numbers = #tpu.dot_dimension_numbers<[1], [1], [0], [0], [0, 0, 1, 0], [], []>} : vector<8x32xf32>, vector<3x32xf32>, vector<8x3xf32> -> vector<8x3xf32>
    "tpu.trace_stop"() : () -> ()
    %386 = vector.broadcast %380 : vector<8x1xf32> to vector<8x3xf32>
    %387 = vector.broadcast %384 : vector<1x3xf32> to vector<8x3xf32>
    %388 = arith.addf %386, %387 : vector<8x3xf32>
    %cst_150 = arith.constant 2.000000e+00 : f32
    %389 = vector.broadcast %cst_150 : f32 to vector<8x3xf32>
    %390 = arith.mulf %389, %385 : vector<8x3xf32>
    %391 = arith.subf %388, %390 : vector<8x3xf32>
    %cst_151 = arith.constant 0.000000e+00 : f32
    %392 = vector.broadcast %cst_151 : f32 to vector<8x3xf32>
    %393 = arith.maximumf %391, %392 : vector<8x3xf32>
    %cst_152 = arith.constant -5.000000e-01 : f32
    %394 = vector.broadcast %cst_152 : f32 to vector<8x3xf32>
    %395 = arith.mulf %394, %393 : vector<8x3xf32>
    %396 = math.exp %395 : vector<8x3xf32>
    %c0_153 = arith.constant 0 : index
    %c0_154 = arith.constant 0 : index
    %397 = vector.load %arg28[%c0_153, %c0_154] : memref<8x3xf32, #tpu.memory_space<vmem>>, vector<8x3xf32>
    tpu.vector_store %arg28[%c0_153, %c0_154], %396 {strides = array<i32>} : memref<8x3xf32, #tpu.memory_space<vmem>>, vector<8x3xf32>,
    "tpu.trace_start"() <{level = 10 : i32, message = "id,jd->ij"}> : () -> ()
    %cst_155 = arith.constant dense<0.000000e+00> : vector<3x3xf32>
    %398 = tpu.matmul %377, %377, %cst_155 {dimension_numbers = #tpu.dot_dimension_numbers<[1], [1], [0], [0], [0, 0, 1, 0], [], []>} : vector<3x32xf32>, vector<3x32xf32>, vector<3x3xf32> -> vector<3x3xf32>
    "tpu.trace_stop"() : () -> ()
    %399 = vector.broadcast %383 : vector<3x1xf32> to vector<3x3xf32>
    %400 = vector.broadcast %384 : vector<1x3xf32> to vector<3x3xf32>
    %401 = arith.addf %399, %400 : vector<3x3xf32>
    %cst_156 = arith.constant 2.000000e+00 : f32
    %402 = vector.broadcast %cst_156 : f32 to vector<3x3xf32>
    %403 = arith.mulf %402, %398 : vector<3x3xf32>
    %404 = arith.subf %401, %403 : vector<3x3xf32>
    %cst_157 = arith.constant 0.000000e+00 : f32
    %405 = vector.broadcast %cst_157 : f32 to vector<3x3xf32>
    %406 = arith.maximumf %404, %405 : vector<3x3xf32>
    %cst_158 = arith.constant -5.000000e-01 : f32
    %407 = vector.broadcast %cst_158 : f32 to vector<3x3xf32>
    %408 = arith.mulf %407, %406 : vector<3x3xf32>
    %409 = math.exp %408 : vector<3x3xf32>
    %410 = vector.shape_cast %409 : vector<3x3xf32> to vector<1x3x3xf32>
    %cst_159 = arith.constant dense<0.000000e+00> : vector<1xf32>
    %411 = vector.multi_reduction <add>, %410, %cst_159 [1, 2] : vector<1x3x3xf32> to vector<1xf32>
    %412 = vector.shape_cast %411 : vector<1xf32> to vector<1x1x1xf32>
    %413 = vector.extract %412[0, 0, 0] : f32 from vector<1x1x1xf32>
    %cst_160 = arith.constant 3.000000e+00 : f32
    %414 = arith.divf %413, %cst_160 : f32
    %415 = vector.broadcast %414 : f32 to vector<1x1xf32>
    %c0_161 = arith.constant 0 : index
    %c0_162 = arith.constant 0 : index
    %416 = vector.load %arg29[%c0_161, %c0_162] : memref<1x1xf32, #tpu.memory_space<vmem>>, vector<1x1xf32>
    tpu.vector_store %arg29[%c0_161, %c0_162], %415 {strides = array<i32>} : memref<1x1xf32, #tpu.memory_space<vmem>>, vector<1x1xf32>,
    return
  }
}

</mosaic_0001>

<bundles_post_ra>
// kernel: tpu_custom_call.1
= control target key start
LH: loop header
LB: loop body
LE: loop exit
PB: predicated region body
PF: predicated region fallthrough
CT: control target
= control target key end

     0   :  { %s10280_s6 = smov 1   ;;  %s10281_s10 = smov 2   ;;  %s13728_s0 = inlined_call_operand.smem [shape: u32[30], index: -1, kind: input, shape index: {}] }
   0x1   :  { %s10365_s5 = sld [smem:[%s13728_s0]]   ;;  %s10282_s14 = smov 3  }
   0x2   :  { %s10370_s9 = sld [smem:[%s13728_s0 + %s10280_s6]]   ;;  %s10283_s18 = smov 4  }
   0x3   :  { %s10375_s13 = sld [smem:[%s13728_s0 + %s10281_s10]]   ;;  %s10284_s22 = smov 5  }
   0x4   :  { %s10380_s17 = sld [smem:[%s13728_s0 + %s10282_s14]]   ;;  %s10285_s26 = smov 6  }
   0x5   :  { %s10385_s21 = sld [smem:[%s13728_s0 + %s10283_s18]]   ;;  %s10286_s30 = smov 7  }
   0x6   :  { %s10390_s25 = sld [smem:[%s13728_s0 + %s10284_s22]]   ;;  %s10287_s4 = smov 8  }
   0x7   :  { %s10395_s29 = sld [smem:[%s13728_s0 + %s10285_s26]]   ;;  %s10288_s10 = smov 9  }
   0x8   :  { %s10400_s3 = sld [smem:[%s13728_s0 + %s10286_s30]]   ;;  %s10289_s15 = smov 10  }
   0x9   :  { %13765 = sst [smem:[#allocation7_spill]] %s10375_s13  ;;  %s10290_s20 = smov 11  }
   0xa   :  { %s10405_s8 = sld [smem:[%s13728_s0 + %s10287_s4]]   ;;  %s10291_s26 = smov 12  }
   0xb   :  { %s10410_s14 = sld [smem:[%s13728_s0 + %s10288_s10]]   ;;  %s10292_s1 = smov 13  }
   0xc   :  { %s10415_s19 = sld [smem:[%s13728_s0 + %s10289_s15]]   ;;  %s10293_s7 = smov 14  }
   0xd   :  { %s10420_s24 = sld [smem:[%s13728_s0 + %s10290_s20]]   ;;  %s10294_s15 = smov 15  }
   0xe   :  { %s10425_s30 = sld [smem:[%s13728_s0 + %s10291_s26]]   ;;  %s10295_s22 = smov 16  }
   0xf   :  { %s10430_s6 = sld [smem:[%s13728_s0 + %s10292_s1]]   ;;  %s10296_s28 = smov 17  }
  0x10   :  { %s10435_s12 = sld [smem:[%s13728_s0 + %s10293_s7]]   ;;  %s10297_s7 = smov 18  }
  0x11   :  { %s10440_s20 = sld [smem:[%s13728_s0 + %s10294_s15]]   ;;  %s10298_s15 = smov 19  }
  0x12   :  { %s10445_s27 = sld [smem:[%s13728_s0 + %s10295_s22]]   ;;  %s10299_s22 = smov 20  }
  0x13   :  { %s10450_s4 = sld [smem:[%s13728_s0 + %s10296_s28]]   ;;  %s10300_s28 = smov 21  }
  0x14   :  { %13766 = sst [smem:[#allocation8_spill]] %s10425_s30 }
  0x15   :  { %13767 = sst [smem:[#allocation9_spill]] %s10430_s6 }
  0x16   :  { %13768 = sst [smem:[#allocation10_spill]] %s10435_s12 }
  0x17   :  { %s10455_s13 = sld [smem:[%s13728_s0 + %s10297_s7]]   ;;  %s10301_s7 = smov 22  }
  0x18   :  { %s10460_s6 = sld [smem:[%s13728_s0 + %s10298_s15]]   ;;  %s10302_s15 = smov 23  }
  0x19   :  { %s10465_s12 = sld [smem:[%s13728_s0 + %s10299_s22]]   ;;  %s10303_s22 = smov 24  }
  0x1a   :  { %s10470_s30 = sld [smem:[%s13728_s0 + %s10300_s28]]   ;;  %s10304_s28 = smov 25  }
  0x1d   :  { %13769 = sst [smem:[#allocation11_spill]] %s10455_s13 }
  0x1e   :  { %13770 = sst [smem:[#allocation12_spill]] %s10460_s6 }
  0x1f   :  { %13771 = sst [smem:[#allocation13_spill]] %s10465_s12 }
  0x20   :  { %13772 = sst [smem:[#allocation14_spill]] %s10470_s30 }
  0x21   :  { %s10475_s13 = sld [smem:[%s13728_s0 + %s10301_s7]]   ;;  %s10305_s7 = smov 26  }
  0x22   :  { %s10480_s6 = sld [smem:[%s13728_s0 + %s10302_s15]]   ;;  %s10306_s15 = smov 27  }
  0x23   :  { %s10485_s12 = sld [smem:[%s13728_s0 + %s10303_s22]]   ;;  %s10307_s22 = smov 28  }
  0x24   :  { %s10490_s30 = sld [smem:[%s13728_s0 + %s10304_s28]]   ;;  %s10308_s28 = smov 29  }
  0x27   :  { %13773 = sst [smem:[#allocation15_spill]] %s10475_s13 }
  0x28   :  { %13774 = sst [smem:[#allocation16_spill]] %s10480_s6 }
  0x29   :  { %13775 = sst [smem:[#allocation17_spill]] %s10485_s12 }
  0x2a   :  { %13776 = sst [smem:[#allocation18_spill]] %s10490_s30 }
  0x2b   :  { %s10495_s13 = sld [smem:[%s13728_s0 + %s10305_s7]]  }
  0x2c   :  { %s10500_s6 = sld [smem:[%s13728_s0 + %s10306_s15]]  }
  0x2d   :  { %s10505_s12 = sld [smem:[%s13728_s0 + %s10307_s22]]  }
  0x2e   :  { %s10510_s30 = sld [smem:[%s13728_s0 + %s10308_s28]]  }
  0x2f   :  { %v125_v0 = vld [vmem:[%s10365_s5] sm:$0xff]  ;;  %v126_v1 = vld [vmem:[%s10365_s5 + $0x8] sm:$0xff]  ;;  %v127_v2 = vld [vmem:[%s10365_s5 + $0x10] sm:$0xff]  ;;  %v13738_v3 = vmov 0.0|0.0   ;;  %vm10310_vm0 = vmmov 0   ;;  %v13736_v6 = vmov 0.0  }
  0x30   :  { %9461 = vmatprep.subr.bf16.mxu0 %v13738_v3  ;;  %v9462_v4 = vpack.c.bf16 %v126_v1, %v125_v0  ;;  %v128_v5 = vld [vmem:[%s10365_s5 + $0x18] sm:$0xff]  ;;  %9474 = vmatprep.subr.bf16.mxu1 %v13738_v3  ;;  %v10312_v8 = vmov 0   ;;  %v129_v9 = vld [vmem:[%s10365_s5 + $0x20] sm:$0xff]  ;;  %v130_v10 = vld [vmem:[%s10365_s5 + $0x28] sm:$0xff] }
  0x31   :  { %9185 = vmatprep.mubr.msk.f32.mxu0 %vm10310_vm0, %v13736_v6  ;;  %9218 = vmatprep.mubr.msk.f32.mxu1 %vm10310_vm0, %v13736_v6  ;;  %v9465_v7 = vpack.c.bf16 %v128_v5, %v127_v2  ;;  %v133_v11 = vld [vmem:[%s10385_s21] sm:$0xff]  ;;  %v135_v12 = vld [vmem:[%s10385_s21 + $0x10] sm:$0xff]  ;;  %v134_v13 = vld [vmem:[%s10385_s21 + $0x8] sm:$0xff] }
  0x32   :  { %9463 = vmatpush3.bf16.msra.mxu0 %v9462_v4  ;;  %9742 = vset.pattern.permute.xlu0 %v10312_v8 }
  0x33   :  { %9464 = vmatprep.subr.bf16.mxu0 %v13738_v3  ;;  %9743 = vset.pattern.permute.xlu1 %v10312_v8 }
  0x34   :  { %138 = vperm.xlu0 %9742, %v133_v11   ;;  %148 = vperm.xlu1 %9743, %v135_v12  }
  0x35   :  { %65 = vsyncpa [#allocation5], 0  ;;  %v9468_v14 = vpack.c.bf16 %v130_v10, %v129_v9  ;;  %v248_v15 = vld [vmem:[%s10395_s29] sm:$0xff]  ;;  %v131_v16 = vld [vmem:[%s10365_s5 + $0x30] sm:$0xff]  ;;  %vm161_vm1 = vcmask 1043456   ;;  %vm10313_vm2 = vmmov 1  }
  0x36   :  { %9466 = vmatpush3.bf16.msra.mxu0 %v9465_v7  ;;  %v132_v17 = vld [vmem:[%s10365_s5 + $0x38] sm:$0xf]  ;;  %v245_v18 = vld [vmem:[%s10390_s25] sm:$0xff]  ;;  %v246_v20 = vld [vmem:[%s10390_s25 + $0x8] sm:$0xff]  ;;  %vm151_vm4 = vcmask 490496   ;;  %vm251_vm5 = vcmask 785408  }
  0x37   :  { %9467 = vmatprep.subr.bf16.mxu0 %v13738_v3  ;;  %v9471_v19 = vpack.c.bf16 %v132_v17, %v131_v16  ;;  %vm9472_vm3 = vmpackc.low %vm161_vm1, %vm10313_vm2  ;;  %v247_v21 = vld [vmem:[%s10390_s25 + $0x10] sm:$0xff]  ;;  %v122_v22 = vld [vmem:[%s10380_s17] sm:$0xff]  ;;  %s10314_s0 = smov 104   ;;  %s10315_s5 = smov 116   ;;  %vm3031_vm9 = vcmask 72704   ;;  %vm3044_vm10 = vcmask 146432  }
  0x38   :  { %143 = vperm.xlu0 %9742, %v134_v13   ;;  %312 = vperm.xlu1 %9743, %v248_v15   ;;  %v123_v23 = vld [vmem:[%s10380_s17 + $0x8] sm:$0xff]  ;;  %v124_v24 = vld [vmem:[%s10380_s17 + $0x10] sm:$0xff]  ;;  %s10316_s17 = smov 80   ;;  %s10317_s21 = smov 92   ;;  %vm3057_vm11 = vcmask 220160   ;;  %vm3070_vm12 = vcmask 293888  }
  0x39   :  { %v249_v40 = vld [vmem:[%s10395_s29 + $0x8] sm:$0xff]  ;;  %v250_v41 = vld [vmem:[%s10395_s29 + $0x10] sm:$0xff]  ;;  %s10318_s25 = smov 56   ;;  %s10319_s29 = smov 68   ;;  %vm3083_vm13 = vcmask 367616   ;;  %vm3096_vm14 = vcmask 441344  }
  0x3a   :  { %9469 = vmatpush3.bf16.msra.mxu0 %v9468_v14  ;;  %s10320_s7 = smov 44   ;;  %s10323_s10 = smov 127   ;;  %vm3109_vm15 = vcmask 515072   ;;  %vm3226_vm1 = vcmask 588800  }
  0x3b   :  { %9470 = vmatprep.subr.bf16.mxu0 %v13738_v3  ;;  %s10324_s11 = smov 126   ;;  %s10325_s15 = smov 125  }
  0x3c   :  { %294 = vperm.xlu0 %9742, %v245_v18   ;;  %299 = vperm.xlu1 %9743, %v246_v20   ;;  %s10326_s16 = smov 18   ;;  %s10327_s18 = smov 9  }
  0x3d   :  { %s10328_s22 = smov 36   ;;  %s10329_s23 = smov 27  }
  0x3e   :  { %9473 = vmatpush3.bf16.msk.msra.mxu0 %vm9472_vm3, %v9471_v19  ;;  %s10330_s26 = smov 45   ;;  %s10331_s28 = smov 54  }
  0x3f   :  { %9492 = vmatprep.subr.bf16.mxu0 %v13738_v3  ;;  %s10332_s1 = smov 63   ;;  %s10337_s2 = smov 83  }
  0x40   :  { %304 = vperm.xlu0 %9742, %v247_v21  }
  0x41   :  { %9186 = vmatmul.mubr.msk.f32.vlgmr.msra.gmra.mrb[0].mxu0 %vm151_vm4, %v122_v22 }
  0x42   :  { %9188 = vmatprep.mubr.msk.f32.mxu0 %vm10310_vm0, %v13736_v6 }
  0x45   :  { %9189 = vmatmul.mubr.msk.f32.gmra.mrb[2].mxu0 %vm151_vm4, %v123_v23 }
  0x46   :  { %9191 = vmatprep.mubr.msk.f32.mxu0 %vm10310_vm0, %v13736_v6 }
  0x49   :  { %9192 = vmatmul.mubr.msk.f32.gmra.mrb[4].mxu0 %vm151_vm4, %v124_v24 }
  0x4a   :  { %9245 = vmatprep.mubr.msk.f32.mxu0 %vm10310_vm0, %v13736_v6 }
  0xb3   :  { %v139_v25 = vpop.permute.xlu0 %138  ;;  %v149_v34 = vpop.permute.xlu1 %148 }
  0xb7   :  { %v144_v30 = vpop.permute.xlu0 %143  ;;  %v313_v42 = vpop.permute.xlu1 %312 }
  0xbb   :  { %v295_v43 = vpop.permute.xlu0 %294  ;;  %v300_v44 = vpop.permute.xlu1 %299 }
  0xbf   :  { %v305_v45 = vpop.permute.xlu0 %304 }
 0x114   :  { %v231_v26 = vpop.f32.mrb[0].mxu0 }
 0x115   :  { %v232_v27 = vadd.f32 %v231_v26, %v139_v25  ;;  %v9187_v28 = vpop.f32.mrb[1].mxu0 }
 0x116   :  { %v10321_v28 = vmov 1983009808  }
 0x117   :  { %v252_v29 = vsel %vm251_vm5, %v232_v27, 0.0 }
 0x118   :  { %253 = vadd.xlane.f32.xlu1 %v252_v29  ;;  %v236_v31 = vpop.f32.mrb[2].mxu0  ;;  %v418_v29 = vunpack.c.l.s4 %v10321_v28 }
 0x119   :  { %v237_v32 = vadd.f32 %v236_v31, %v144_v30  ;;  %v9190_v33 = vpop.f32.mrb[3].mxu0  ;;  %v13735_v30 = vlaneseq  ;;  %v10322_v31 = vmov 1934713408  }
 0x11a   :  { %v419_v33 = vunpack.c.0.s8 %v418_v29 }
 0x11b   :  { %v255_v35 = vsel %vm251_vm5, %v237_v32, 0.0 }
 0x11c   :  { %256 = vadd.xlane.f32.xlu0 %v255_v35  ;;  %v241_v36 = vpop.f32.mrb[4].mxu0 }
 0x11d   :  { %v242_v37 = vadd.f32 %v241_v36, %v149_v34  ;;  %v9193_v38 = vpop.f32.mrb[5].mxu0  ;;  %v10576_v34 = vshrl.u32 %v13735_v30, 7 }
 0x11f   :  { %v258_v39 = vsel %vm251_vm5, %v242_v37, 0.0  ;;  %13777 = vst [vmem:[#allocation19_spill] sm:$0xff] %v10576_v34  ;;  %v10579_v38 = vsub.s32 %v419_v33, %v10576_v34 }
 0x120   :  { %259 = vadd.xlane.f32.xlu0 %v258_v39 }
 0x121   :  { %13778 = vst [vmem:[#allocation20_spill] sm:$0xff] %v10579_v38 }
 0x129   :  { %317 = vperm.xlu1 %9743, %v249_v40  }
 0x136   :  { %322 = vperm.xlu0 %9742, %v250_v41  }
 0x1a5   :  { %v254_v46 = vpop.xlane.xlu1 %253 }
 0x1a6   :  { %v262_v47 = vmul.f32 0.010416667, %v254_v46 }
 0x1a8   :  { %v265_v48 = vsub.f32 %v232_v27, %v262_v47 }
 0x1a9   :  { %v257_v49 = vpop.xlane.xlu0 %256  ;;  %v318_v61 = vpop.permute.xlu1 %317 }
 0x1aa   :  { %v263_v50 = vmul.f32 0.010416667, %v257_v49  ;;  %v268_v51 = vmul.f32 %v265_v48, %v265_v48 }
 0x1ac   :  { %v266_v52 = vsub.f32 %v237_v32, %v263_v50  ;;  %v271_v53 = vsel %vm251_vm5, %v268_v51, 0.0  ;;  %v482_v32 = vunpack.c.l.s4 %v10322_v31 }
 0x1ad   :  { %272 = vadd.xlane.f32.xlu1 %v271_v53  ;;  %v260_v54 = vpop.xlane.xlu0 %259 }
 0x1ae   :  { %v264_v55 = vmul.f32 0.010416667, %v260_v54  ;;  %v269_v56 = vmul.f32 %v266_v52, %v266_v52 }
 0x1b0   :  { %v267_v57 = vsub.f32 %v242_v37, %v264_v55  ;;  %v274_v58 = vsel %vm251_vm5, %v269_v56, 0.0  ;;  %v483_v37 = vunpack.c.0.s8 %v482_v32 }
 0x1b1   :  { %275 = vadd.xlane.f32.xlu0 %v274_v58 }
 0x1b2   :  { %v270_v59 = vmul.f32 %v267_v57, %v267_v57 }
 0x1b4   :  { %v277_v60 = vsel %vm251_vm5, %v270_v59, 0.0 }
 0x1b5   :  { %278 = vadd.xlane.f32.xlu1 %v277_v60  ;;  %v323_v62 = vpop.permute.xlu0 %322 }
 0x23a   :  { %v273_v63 = vpop.xlane.xlu1 %272 }
 0x23b   :  { %v280_v0 = vmul.f32 0.010416667, %v273_v63 }
 0x23d   :  { %v283_v1 = vadd.f32 1e-05, %v280_v0 }
 0x23e   :  { %v276_v2 = vpop.xlane.xlu0 %275 }
 0x23f   :  { %10094 = vrsqrt.f32 %v283_v1  ;;  %v281_v4 = vmul.f32 0.010416667, %v276_v2 }
 0x241   :  { %v284_v5 = vadd.f32 1e-05, %v281_v4 }
 0x242   :  { %v279_v7 = vpop.xlane.xlu1 %278 }
 0x243   :  { %10096 = vrsqrt.f32 %v284_v5  ;;  %v282_v8 = vmul.f32 0.010416667, %v279_v7 }
 0x245   :  { %v285_v9 = vadd.f32 1e-05, %v282_v8 }
 0x247   :  { %10098 = vrsqrt.f32 %v285_v9 }
 0x249   :  { %v10095_v10 = vpop.eup %10094 }
 0x24a   :  { %v289_v11 = vmul.f32 %v10095_v10, %v265_v48 }
 0x24c   :  { %v307_v12 = vmul.f32 %v295_v43, %v289_v11 }
 0x24d   :  { %v10097_v13 = vpop.eup %10096 }
 0x24e   :  { %v325_v14 = vadd.f32 %v313_v42, %v307_v12  ;;  %v290_v15 = vmul.f32 %v10097_v13, %v266_v52 }
 0x250   :  { %v331_v16 = vmul.f32 0.01, %v325_v14  ;;  %vm328_vm6 = vcmp.gt.f32.partialorder %v325_v14, 0.0  ;;  %v308_v18 = vmul.f32 %v300_v44, %v290_v15 }
 0x251   :  { %v10099_v17 = vpop.eup %10098 }
 0x252   :  { %v291_v19 = vmul.f32 %v10099_v17, %v267_v57  ;;  %v334_v20 = vsel %vm328_vm6, %v325_v14, %v331_v16  ;;  %v326_v21 = vadd.f32 %v318_v61, %v308_v18  ;;  %vm5452_vm6 = vcmask 113664  }
 0x253   :  { %361 = vrot.lane.b32.xlu0 %v334_v20, %s10314_s0  ;;  %352 = vrot.lane.b32.xlu1 %v334_v20, %s10315_s5 }
 0x254   :  { %v309_v22 = vmul.f32 %v305_v45, %v291_v19  ;;  %v332_v23 = vmul.f32 0.01, %v326_v21  ;;  %vm329_vm7 = vcmp.gt.f32.partialorder %v326_v21, 0.0  ;;  %v10582_v45 = vsub.s32 %v483_v37, %v10576_v34 }
 0x256   :  { %v327_v24 = vadd.f32 %v323_v62, %v309_v22  ;;  %v10555_v26 = vsel %vm329_vm7, %v326_v21, %v332_v23  ;;  %vm5462_vm7 = vcmask 171008  }
 0x257   :  { %379 = vrot.lane.b32.xlu0 %v334_v20, %s10316_s17  ;;  %370 = vrot.lane.b32.xlu1 %v334_v20, %s10317_s21 }
 0x258   :  { %v333_v25 = vmul.f32 0.01, %v327_v24  ;;  %vm330_vm8 = vcmp.gt.f32.partialorder %v327_v24, 0.0 }
 0x25a   :  { %v10558_v27 = vsel %vm330_vm8, %v327_v24, %v333_v25  ;;  %vm5472_vm8 = vcmask 228352  }
 0x25b   :  { %397 = vrot.lane.b32.xlu0 %v334_v20, %s10318_s25  ;;  %388 = vrot.lane.b32.xlu1 %v334_v20, %s10319_s29 }
 0x25f   :  { %406 = vrot.lane.b32.xlu1 %v334_v20, %s10320_s7  ;;  %354 = vrot.lane.b32.xlu0 %v10555_v26, %s10315_s5 }
 0x263   :  { %356 = vrot.lane.b32.xlu1 %v10558_v27, %s10315_s5  ;;  %363 = vrot.lane.b32.xlu0 %v10555_v26, %s10314_s0  ;;  %s10339_s5 = smov 14  }
 0x267   :  { %365 = vrot.lane.b32.xlu1 %v10558_v27, %s10314_s0  ;;  %372 = vrot.lane.b32.xlu0 %v10555_v26, %s10317_s21  ;;  %s10338_s0 = smov 65  }
 0x26b   :  { %374 = vrot.lane.b32.xlu1 %v10558_v27, %s10317_s21  ;;  %381 = vrot.lane.b32.xlu0 %v10555_v26, %s10316_s17 }
 0x26f   :  { %383 = vrot.lane.b32.xlu1 %v10558_v27, %s10316_s17  ;;  %390 = vrot.lane.b32.xlu0 %v10555_v26, %s10319_s29  ;;  %s10340_s17 = smov 7  }
 0x273   :  { %392 = vrot.lane.b32.xlu1 %v10558_v27, %s10319_s29  ;;  %399 = vrot.lane.b32.xlu0 %v10555_v26, %s10318_s25  ;;  %s10343_s29 = smov 35  }
 0x277   :  { %401 = vrot.lane.b32.xlu1 %v10558_v27, %s10318_s25  ;;  %408 = vrot.lane.b32.xlu0 %v10555_v26, %s10320_s7  ;;  %s10342_s25 = smov 21  }
 0x27b   :  { %410 = vrot.lane.b32.xlu1 %v10558_v27, %s10320_s7  ;;  %s10344_s7 = smov 42  }
 0x2c5   :  { %v353_v35 = vpop.permute.xlu1 %352  ;;  %v362_v36 = vpop.permute.xlu0 %361 }
 0x2c6   :  { %v415_v39 = vcombine.low %v334_v20, %v362_v36  ;;  %v416_v40 = vcombine.high %v334_v20, %v362_v36 }
 0x2c8   :  { %v423_v46 = vrot.slane %v415_v39, %v10579_v38  ;;  %v430_v47 = vrot.slane %v416_v40, %v10579_v38 }
 0x2c9   :  { %v371_v41 = vpop.permute.xlu1 %370  ;;  %v380_v42 = vpop.permute.xlu0 %379 }
 0x2ca   :  { %v431_v43 = vcombine.low %v353_v35, %v371_v41  ;;  %v432_v44 = vcombine.high %v353_v35, %v371_v41 }
 0x2cc   :  { %v439_v48 = vrot.slane %v431_v43, %v10579_v38  ;;  %v446_v49 = vrot.slane %v432_v44, %v10579_v38 }
 0x2cd   :  { %v389_v50 = vpop.permute.xlu1 %388  ;;  %v398_v51 = vpop.permute.xlu0 %397 }
 0x2ce   :  { %v479_v52 = vcombine.low %v423_v46, %v439_v48  ;;  %v480_v53 = vcombine.high %v423_v46, %v439_v48  ;;  %v495_v54 = vcombine.low %v430_v47, %v446_v49  ;;  %v496_v55 = vcombine.high %v430_v47, %v446_v49 }
 0x2cf   :  { %v447_v56 = vcombine.low %v380_v42, %v398_v51  ;;  %v448_v4 = vcombine.high %v380_v42, %v398_v51 }
 0x2d0   :  { %v487_v57 = vrot.slane %v479_v52, %v10582_v45  ;;  %v494_v58 = vrot.slane %v480_v53, %v10582_v45  ;;  %v10591_v59 = vrot.slane %v495_v54, %v10582_v45  ;;  %v10594_v60 = vrot.slane %v496_v55, %v10582_v45 }
 0x2d1   :  { %v407_v61 = vpop.permute.xlu1 %406  ;;  %v355_v62 = vpop.permute.xlu0 %354  ;;  %v455_v8 = vrot.slane %v447_v56, %v10579_v38  ;;  %v462_v21 = vrot.slane %v448_v4, %v10579_v38 }
 0x2d2   :  { %v463_v63 = vcombine.low %v389_v50, %v407_v61  ;;  %v464_v0 = vcombine.high %v389_v50, %v407_v61  ;;  %v8878_v1 = vcombine.low %v487_v57, %v494_v58  ;;  %v8880_v2 = vcombine.high %v487_v57, %v494_v58 }
 0x2d3   :  { %v8882_v5 = vcombine.low %v10591_v59, %v10594_v60  ;;  %v8884_v7 = vcombine.high %v10591_v59, %v10594_v60 }
 0x2d4   :  { %v471_v9 = vrot.slane %v463_v63, %v10579_v38  ;;  %v10603_v10 = vrot.slane %v8878_v1, %v10579_v38  ;;  %v10606_v11 = vrot.slane %v8880_v2, %v10579_v38  ;;  %v478_v15 = vrot.slane %v464_v0, %v10579_v38 }
 0x2d5   :  { %v364_v12 = vpop.permute.xlu0 %363  ;;  %v10609_v13 = vrot.slane %v8882_v5, %v10579_v38  ;;  %v10612_v14 = vrot.slane %v8884_v7, %v10579_v38  ;;  %v10615_v18 = vpop.permute.xlu1 %356 }
 0x2d6   :  { %v511_v16 = vcombine.low %v455_v8, %v471_v9  ;;  %v512_v17 = vcombine.high %v455_v8, %v471_v9  ;;  %v1128_v19 = vcombine.high %v10603_v10, %v10606_v11  ;;  %v551_v23 = vcombine.low %v10555_v26, %v364_v12 }
 0x2d7   :  { %v1160_v20 = vcombine.high %v10609_v13, %v10612_v14  ;;  %v552_v24 = vcombine.high %v10555_v26, %v364_v12  ;;  %v527_v29 = vcombine.low %v462_v21, %v478_v15  ;;  %v528_v42 = vcombine.high %v462_v21, %v478_v15 }
 0x2d8   :  { %v10623_v22 = vrot.slane %v511_v16, %v10582_v45  ;;  %v10628_v28 = vrot.slane %v512_v17, %v10582_v45  ;;  %v10637_v36 = vrot.slane %v1128_v19, %v10582_v45  ;;  %v559_v26 = vrot.slane %v551_v23, %v10579_v38 }
 0x2d9   :  { %v373_v25 = vpop.permute.xlu0 %372  ;;  %v10640_v37 = vrot.slane %v1160_v20, %v10582_v45  ;;  %v566_v39 = vrot.slane %v552_v24, %v10579_v38  ;;  %v10646_v43 = vpop.permute.xlu1 %365  ;;  %v10655_v50 = vrot.slane %v527_v29, %v10582_v45  ;;  %v10678_v61 = vrot.slane %v528_v42, %v10582_v45 }
 0x2da   :  { %v567_v31 = vcombine.low %v355_v62, %v373_v25  ;;  %v568_v32 = vcombine.high %v355_v62, %v373_v25  ;;  %v10631_v33 = vcombine.high %v487_v57, %v10623_v22  ;;  %v10634_v35 = vcombine.low %v487_v57, %v10623_v22 }
 0x2db   :  { %v10658_v51 = vcombine.high %v494_v58, %v10628_v28  ;;  %v10661_v52 = vcombine.low %v494_v58, %v10628_v28  ;;  %v1193_v53 = vcombine.low %v10637_v36, %v10640_v37  ;;  %v1127_v62 = vcombine.low %v10603_v10, %v10606_v11 }
 0x2dc   :  { %v575_v40 = vrot.slane %v567_v31, %v10579_v38  ;;  %v582_v41 = vrot.slane %v568_v32, %v10579_v38  ;;  %849 = vrot.lane.b32.xlu1 %v10631_v33, %s10323_s10  ;;  %847 = vrot.lane.b32.xlu0 %v10634_v35, %s10323_s10  ;;  %v10696_v5 = vcombine.high %v10591_v59, %v10655_v50 }
 0x2dd   :  { %v10652_v44 = vpop.permute.xlu0 %381  ;;  %v375_v4 = vpop.permute.xlu1 %374  ;;  %v10700_v7 = vcombine.low %v10591_v59, %v10655_v50  ;;  %v687_v12 = vcombine.low %v10558_v27, %v10646_v43  ;;  %v10715_v59 = vcombine.high %v10594_v60, %v10678_v61  ;;  %v10718_v20 = vrot.slane %v1127_v62, %v10582_v45 }
 0x2de   :  { %v615_v46 = vcombine.low %v559_v26, %v575_v40  ;;  %v616_v47 = vcombine.high %v559_v26, %v575_v40  ;;  %v631_v48 = vcombine.low %v566_v39, %v582_v41  ;;  %v632_v49 = vcombine.high %v566_v39, %v582_v41 }
 0x2df   :  { %v703_v16 = vcombine.low %v10615_v18, %v375_v4  ;;  %13779 = vst [vmem:[#allocation21_spill] sm:$0xff] %v10718_v20  ;;  %v1159_v21 = vcombine.low %v10609_v13, %v10612_v14  ;;  %v10725_v29 = vcombine.low %v10594_v60, %v10678_v61  ;;  %v8879_v60 = vcombine.low %v10623_v22, %v10628_v28 }
 0x2e0   :  { %v10666_v54 = vrot.slane %v615_v46, %v10582_v45  ;;  %v10669_v55 = vrot.slane %v616_v47, %v10582_v45  ;;  %v10672_v56 = vrot.slane %v631_v48, %v10582_v45  ;;  %v10675_v57 = vrot.slane %v632_v49, %v10582_v45  ;;  %853 = vrot.lane.b32.xlu1 %v10658_v51, %s10323_s10 }
 0x2e1   :  { %851 = vrot.lane.b32.xlu0 %v10661_v52, %s10323_s10  ;;  %v391_v58 = vpop.permute.xlu0 %390  ;;  %v10736_v13 = vrot.slane %v1159_v21, %v10582_v45  ;;  %v704_v40 = vcombine.high %v10615_v18, %v375_v4  ;;  %v711_v41 = vrot.slane %v703_v16, %v10579_v38  ;;  %v8883_v4 = vcombine.low %v10655_v50, %v10678_v61 }
 0x2e2   :  { %v8886_v63 = vcombine.low %v10666_v54, %v10669_v55  ;;  %v8888_v0 = vcombine.high %v10666_v54, %v10669_v55  ;;  %v8890_v1 = vcombine.low %v10672_v56, %v10675_v57  ;;  %v8892_v2 = vcombine.high %v10672_v56, %v10675_v57 }
 0x2e3   :  { %13780 = vst [vmem:[#allocation22_spill] sm:$0xff] %v10736_v13  ;;  %v1192_v49 = vcombine.high %v10718_v20, %v10736_v13 }
 0x2e4   :  { %v1207_v8 = vrot.slane %v8886_v63, %v10579_v38  ;;  %v1223_v9 = vrot.slane %v8888_v0, %v10579_v38  ;;  %v1239_v10 = vrot.slane %v8890_v1, %v10579_v38  ;;  %v1255_v11 = vrot.slane %v8892_v2, %v10579_v38  ;;  %857 = vrot.lane.b32.xlu1 %v10696_v5, %s10323_s10 }
 0x2e5   :  { %v400_v15 = vpop.permute.xlu0 %399  ;;  %855 = vrot.lane.b32.xlu0 %v10700_v7, %s10323_s10  ;;  %v10761_v1 = vrot.slane %v8879_v60, %v10579_v38  ;;  %v8881_v2 = vcombine.high %v10623_v22, %v10628_v28  ;;  %v718_v22 = vrot.slane %v704_v40, %v10579_v38  ;;  %v1110_v60 = vrot.slane %v8883_v4, %v10579_v38 }
 0x2e6   :  { %v1264_v17 = vcombine.high %v1207_v8, %v1223_v9  ;;  %v1296_v19 = vcombine.high %v1239_v10, %v1255_v11  ;;  %v1263_v23 = vcombine.low %v1207_v8, %v1223_v9  ;;  %v1295_v24 = vcombine.low %v1239_v10, %v1255_v11 }
 0x2e7   :  { %v583_v25 = vcombine.low %v10652_v44, %v400_v15  ;;  %v584_v47 = vcombine.high %v10652_v44, %v400_v15  ;;  %v688_v8 = vcombine.high %v10558_v27, %v10646_v43  ;;  %v695_v9 = vrot.slane %v687_v12, %v10579_v38 }
 0x2e8   :  { %v10728_v31 = vrot.slane %v1264_v17, %v10582_v45  ;;  %v10731_v32 = vrot.slane %v1296_v19, %v10582_v45  ;;  %861 = vrot.lane.b32.xlu1 %v10715_v59, %s10323_s10  ;;  %v10739_v14 = vrot.slane %v1263_v23, %v10582_v45  ;;  %v10742_v39 = vrot.slane %v1295_v24, %v10582_v45 }
 0x2e9   :  { %v409_v26 = vpop.permute.xlu0 %408  ;;  %859 = vrot.lane.b32.xlu0 %v10725_v29, %s10323_s10  ;;  %v591_v18 = vrot.slane %v583_v25, %v10579_v38  ;;  %v10780_v15 = vrot.slane %v8881_v2, %v10579_v38  ;;  %v751_v28 = vcombine.low %v695_v9, %v711_v41  ;;  %v8885_v27 = vcombine.high %v10655_v50, %v10678_v61 }
 0x2ea   :  { %13781 = vst [vmem:[#allocation23_spill] sm:$0xff] %v10739_v14  ;;  %13782 = vst [vmem:[#allocation24_spill] sm:$0xff] %v10742_v39  ;;  %v599_v42 = vcombine.low %v391_v58, %v409_v26  ;;  %v600_v46 = vcombine.high %v391_v58, %v409_v26  ;;  %v1329_v48 = vcombine.low %v10728_v31, %v10731_v32 }
 0x2eb   :  { %v1328_v62 = vcombine.high %v10739_v14, %v10742_v39  ;;  %v1143_v43 = vcombine.low %v10761_v1, %v10780_v15  ;;  %v702_v12 = vrot.slane %v688_v8, %v10579_v38  ;;  %v752_v19 = vcombine.high %v695_v9, %v711_v41 }
 0x2ec   :  { %v607_v63 = vrot.slane %v599_v42, %v10579_v38  ;;  %v614_v0 = vrot.slane %v600_v46, %v10579_v38  ;;  %921 = vrot.lane.b32.xlu1 %v10631_v33, %s10324_s11  ;;  %v10765_v44 = vpack.i.bf16 %v1329_v48, %v1193_v53  ;;  %v598_v53 = vrot.slane %v584_v47, %v10579_v38 }
 0x2ed   :  { %v10767_v58 = vpack.i.bf16 %v1328_v62, %v1192_v49  ;;  %919 = vrot.lane.b32.xlu0 %v10634_v35, %s10324_s11  ;;  %v767_v24 = vcombine.low %v702_v12, %v718_v22  ;;  %v768_v25 = vcombine.high %v702_v12, %v718_v22  ;;  %v10799_v26 = vrot.slane %v751_v28, %v10582_v45 }
 0x2ee   :  { %v647_v10 = vcombine.low %v591_v18, %v607_v63  ;;  %v648_v11 = vcombine.high %v591_v18, %v607_v63  ;;  %v663_v16 = vcombine.low %v598_v53, %v614_v0  ;;  %v664_v17 = vcombine.high %v598_v53, %v614_v0 }
 0x2ef   :  { %v10811_v40 = vrot.slane %v752_v19, %v10582_v45  ;;  %v1126_v41 = vrot.slane %v8885_v27, %v10579_v38  ;;  %v10821_v47 = vrot.slane %v767_v24, %v10582_v45  ;;  %v10824_v48 = vrot.slane %v768_v25, %v10582_v45 }
 0x2f0   :  { %925 = vrot.lane.b32.xlu1 %v10658_v51, %s10324_s11  ;;  %v10791_v21 = vrot.slane %v647_v10, %v10582_v45  ;;  %v10794_v23 = vrot.slane %v648_v11, %v10582_v45  ;;  %v10802_v50 = vrot.slane %v663_v16, %v10582_v45  ;;  %v10805_v61 = vrot.slane %v664_v17, %v10582_v45 }
 0x2f1   :  { %923 = vrot.lane.b32.xlu0 %v10661_v52, %s10324_s11  ;;  %v1151_v49 = vrot.slane %v1143_v43, %v10582_v45  ;;  %v1175_v62 = vcombine.low %v1110_v60, %v1126_v41  ;;  %v1194_v4 = vcombine.high %v10637_v36, %v10640_v37  ;;  %v1330_v8 = vcombine.high %v10728_v31, %v10731_v32 }
 0x2f2   :  { %v8887_v42 = vcombine.low %v10791_v21, %v10794_v23  ;;  %v8889_v46 = vcombine.high %v10791_v21, %v10794_v23  ;;  %v8891_v0 = vcombine.low %v10802_v50, %v10805_v61  ;;  %v8893_v2 = vcombine.high %v10802_v50, %v10805_v61 }
 0x2f3   :  { %v8894_v9 = vcombine.low %v10799_v26, %v10811_v40  ;;  %v1183_v10 = vrot.slane %v1175_v62, %v10582_v45  ;;  %v8896_v22 = vcombine.high %v10799_v26, %v10811_v40  ;;  %v10848_v16 = vpack.i.bf16 %v1330_v8, %v1194_v4 }
 0x2f4   :  { %929 = vrot.lane.b32.xlu1 %v10696_v5, %s10324_s11  ;;  %v1214_v18 = vrot.slane %v8887_v42, %v10579_v38  ;;  %v1230_v63 = vrot.slane %v8889_v46, %v10579_v38  ;;  %v1246_v11 = vrot.slane %v8891_v0, %v10579_v38  ;;  %v1262_v28 = vrot.slane %v8893_v2, %v10579_v38 }
 0x2f5   :  { %927 = vrot.lane.b32.xlu0 %v10700_v7, %s10324_s11  ;;  %v10851_v36 = vrot.slane %v8894_v9, %v10579_v38  ;;  %v8898_v37 = vcombine.low %v10821_v47, %v10824_v48  ;;  %v1195_v31 = vcombine.low %v1151_v49, %v1183_v10  ;;  %v1196_v17 = vcombine.high %v1151_v49, %v1183_v10 }
 0x2f6   :  { %v1279_v53 = vcombine.low %v1214_v18, %v1230_v63  ;;  %v10859_v27 = vrot.slane %v8896_v22, %v10579_v38  ;;  %v1311_v43 = vcombine.low %v1246_v11, %v1262_v28  ;;  %v8900_v19 = vcombine.high %v10821_v47, %v10824_v48 }
 0x2f7   :  { %v10864_v12 = vrot.slane %v8898_v37, %v10579_v38  ;;  %v1176_v24 = vcombine.high %v1110_v60, %v1126_v41  ;;  %v1280_v25 = vcombine.high %v1214_v18, %v1230_v63  ;;  %v1312_v42 = vcombine.high %v1246_v11, %v1262_v28 }
 0x2f8   :  { %933 = vrot.lane.b32.xlu1 %v10715_v59, %s10324_s11  ;;  %v1287_v32 = vrot.slane %v1279_v53, %v10582_v45  ;;  %v1319_v46 = vrot.slane %v1311_v43, %v10582_v45  ;;  %v10872_v49 = vrot.slane %v8900_v19, %v10579_v38  ;;  %v1399_v62 = vcombine.low %v10851_v36, %v10859_v27 }
 0x2f9   :  { %931 = vrot.lane.b32.xlu0 %v10725_v29, %s10324_s11  ;;  %v1190_v0 = vrot.slane %v1176_v24, %v10582_v45  ;;  %v679_v37 = vcombine.low %v10666_v54, %v10791_v21 }
 0x2fa   :  { %v1331_v60 = vcombine.low %v1287_v32, %v1319_v46  ;;  %v1332_v41 = vcombine.high %v1287_v32, %v1319_v46  ;;  %v1431_v18 = vcombine.low %v10864_v12, %v10872_v49  ;;  %v10893_v10 = vrot.slane %v1399_v62, %v10582_v45 }
 0x2fb   :  { %v686_v32 = vcombine.high %v10675_v57, %v10805_v61 }
 0x2fc   :  { %993 = vrot.lane.b32.xlu1 %v10631_v33, %s10325_s15  ;;  %v1144_v33 = vcombine.high %v10761_v1, %v10780_v15  ;;  %v1294_v1 = vrot.slane %v1280_v25, %v10582_v45  ;;  %v1326_v15 = vrot.slane %v1312_v42, %v10582_v45  ;;  %v10886_v4 = vpack.i.bf16 %v1331_v60, %v1195_v31 }
 0x2fd   :  { %991 = vrot.lane.b32.xlu0 %v10634_v35, %s10325_s15  ;;  %v10888_v8 = vpack.i.bf16 %v1332_v41, %v1196_v17  ;;  %13783 = vst [vmem:[#allocation25_spill] sm:$0xff] %v10893_v10  ;;  %v682_v31 = vcombine.high %v10669_v55, %v10794_v23 }
 0x2fe   :  { %v1158_v35 = vrot.slane %v1144_v33, %v10582_v45  ;;  %v1333_v2 = vcombine.low %v1294_v1, %v1326_v15  ;;  %v1334_v9 = vcombine.high %v1294_v1, %v1326_v15 }
 0x300   :  { %997 = vrot.lane.b32.xlu1 %v10658_v51, %s10325_s15  ;;  %v1197_v63 = vcombine.low %v1158_v35, %v1190_v0  ;;  %v1198_v51 = vcombine.high %v1158_v35, %v1190_v0 }
 0x301   :  { %995 = vrot.lane.b32.xlu0 %v10661_v52, %s10325_s15  ;;  %v10896_v52 = vrot.slane %v1431_v18, %v10582_v45 }
 0x302   :  { %v10898_v11 = vpack.i.bf16 %v1333_v2, %v1197_v63  ;;  %v10902_v53 = vpack.i.bf16 %v1334_v9, %v1198_v51 }
 0x303   :  { %13784 = vst [vmem:[#allocation26_spill] sm:$0xff] %v10896_v52 }
 0x304   :  { %1001 = vrot.lane.b32.xlu1 %v10696_v5, %s10325_s15 }
 0x305   :  { %999 = vrot.lane.b32.xlu0 %v10700_v7, %s10325_s15  ;;  %v680_v7 = vcombine.high %v10666_v54, %v10791_v21  ;;  %v683_v54 = vcombine.low %v10672_v56, %v10802_v50  ;;  %v384_v21 = vpop.permute.xlu1 %383 }
 0x308   :  { %1005 = vrot.lane.b32.xlu1 %v10715_v59, %s10325_s15  ;;  %v681_v59 = vcombine.low %v10669_v55, %v10794_v23  ;;  %v685_v55 = vcombine.low %v10675_v57, %v10805_v61 }
 0x309   :  { %1003 = vrot.lane.b32.xlu0 %v10725_v29, %s10325_s15  ;;  %v684_v29 = vcombine.high %v10672_v56, %v10802_v50  ;;  %v393_v23 = vpop.permute.xlu1 %392 }
 0x30c   :  { %865 = vrot.lane.b32.xlu1 %v680_v7, %s10323_s10 }
 0x30d   :  { %863 = vrot.lane.b32.xlu0 %v679_v37, %s10323_s10  ;;  %v402_v56 = vpop.permute.xlu1 %401 }
 0x30e   :  { %v719_v61 = vcombine.low %v384_v21, %v402_v56  ;;  %v720_v24 = vcombine.high %v384_v21, %v402_v56 }
 0x310   :  { %869 = vrot.lane.b32.xlu1 %v682_v31, %s10323_s10  ;;  %v727_v43 = vrot.slane %v719_v61, %v10579_v38  ;;  %v734_v35 = vrot.slane %v720_v24, %v10579_v38 }
 0x311   :  { %867 = vrot.lane.b32.xlu0 %v681_v59, %s10323_s10  ;;  %v411_v50 = vpop.permute.xlu1 %410 }
 0x312   :  { %v735_v57 = vcombine.low %v393_v23, %v411_v50  ;;  %v736_v19 = vcombine.high %v393_v23, %v411_v50 }
 0x314   :  { %873 = vrot.lane.b32.xlu1 %v684_v29, %s10323_s10  ;;  %v743_v17 = vrot.slane %v735_v57, %v10579_v38  ;;  %v750_v25 = vrot.slane %v736_v19, %v10579_v38 }
 0x315   :  { %871 = vrot.lane.b32.xlu0 %v683_v54, %s10323_s10 }
 0x316   :  { %v783_v33 = vcombine.low %v727_v43, %v743_v17  ;;  %v784_v42 = vcombine.high %v727_v43, %v743_v17  ;;  %v799_v0 = vcombine.low %v734_v35, %v750_v25  ;;  %v800_v60 = vcombine.high %v734_v35, %v750_v25 }
 0x318   :  { %877 = vrot.lane.b32.xlu1 %v686_v32, %s10323_s10  ;;  %v10956_v46 = vrot.slane %v783_v33, %v10582_v45  ;;  %v10962_v62 = vrot.slane %v784_v42, %v10582_v45  ;;  %v10971_v41 = vrot.slane %v799_v0, %v10582_v45 }
 0x319   :  { %875 = vrot.lane.b32.xlu0 %v685_v55, %s10323_s10 }
 0x31a   :  { %v816_v1 = vcombine.high %v10799_v26, %v10956_v46  ;;  %v815_v15 = vcombine.low %v10799_v26, %v10956_v46  ;;  %v818_v18 = vcombine.high %v10811_v40, %v10962_v62  ;;  %v817_v63 = vcombine.low %v10811_v40, %v10962_v62 }
 0x31b   :  { %v10980_v26 = vrot.slane %v800_v60, %v10582_v45  ;;  %v820_v2 = vcombine.high %v10821_v47, %v10971_v41  ;;  %v819_v51 = vcombine.low %v10821_v47, %v10971_v41 }
 0x31c   :  { %937 = vrot.lane.b32.xlu1 %v680_v7, %s10324_s11 }
 0x31d   :  { %935 = vrot.lane.b32.xlu0 %v679_v37, %s10324_s11  ;;  %v822_v40 = vcombine.high %v10824_v48, %v10980_v26  ;;  %v821_v9 = vcombine.low %v10824_v48, %v10980_v26 }
 0x320   :  { %941 = vrot.lane.b32.xlu1 %v682_v31, %s10324_s11 }
 0x321   :  { %939 = vrot.lane.b32.xlu0 %v681_v59, %s10324_s11 }
 0x324   :  { %945 = vrot.lane.b32.xlu1 %v684_v29, %s10324_s11 }
 0x325   :  { %943 = vrot.lane.b32.xlu0 %v683_v54, %s10324_s11 }
 0x328   :  { %949 = vrot.lane.b32.xlu1 %v686_v32, %s10324_s11 }
 0x329   :  { %947 = vrot.lane.b32.xlu0 %v685_v55, %s10324_s11 }
 0x32c   :  { %1009 = vrot.lane.b32.xlu1 %v680_v7, %s10325_s15 }
 0x32d   :  { %1007 = vrot.lane.b32.xlu0 %v679_v37, %s10325_s15 }
 0x330   :  { %1013 = vrot.lane.b32.xlu1 %v682_v31, %s10325_s15 }
 0x331   :  { %1011 = vrot.lane.b32.xlu0 %v681_v59, %s10325_s15 }
 0x334   :  { %1017 = vrot.lane.b32.xlu1 %v684_v29, %s10325_s15 }
 0x335   :  { %1015 = vrot.lane.b32.xlu0 %v683_v54, %s10325_s15 }
 0x338   :  { %1021 = vrot.lane.b32.xlu1 %v686_v32, %s10325_s15 }
 0x339   :  { %1019 = vrot.lane.b32.xlu0 %v685_v55, %s10325_s15 }
 0x33c   :  { %881 = vrot.lane.b32.xlu1 %v816_v1, %s10323_s10 }
 0x33d   :  { %879 = vrot.lane.b32.xlu0 %v815_v15, %s10323_s10 }
 0x340   :  { %885 = vrot.lane.b32.xlu1 %v818_v18, %s10323_s10 }
 0x341   :  { %883 = vrot.lane.b32.xlu0 %v817_v63, %s10323_s10 }
 0x344   :  { %889 = vrot.lane.b32.xlu1 %v820_v2, %s10323_s10 }
 0x345   :  { %887 = vrot.lane.b32.xlu0 %v819_v51, %s10323_s10 }
 0x348   :  { %893 = vrot.lane.b32.xlu1 %v822_v40, %s10323_s10 }
 0x349   :  { %891 = vrot.lane.b32.xlu0 %v821_v9, %s10323_s10 }
 0x34c   :  { %953 = vrot.lane.b32.xlu1 %v816_v1, %s10324_s11 }
 0x34d   :  { %951 = vrot.lane.b32.xlu0 %v815_v15, %s10324_s11 }
 0x34e   :  { %v10996_v7 = vpop.permute.xlu1 %849  ;;  %v10998_v47 = vpop.permute.xlu0 %847 }
 0x350   :  { %957 = vrot.lane.b32.xlu1 %v818_v18, %s10324_s11 }
 0x351   :  { %955 = vrot.lane.b32.xlu0 %v817_v63, %s10324_s11 }
 0x352   :  { %v11002_v37 = vpop.permute.xlu1 %853 }
 0x353   :  { %v11004_v31 = vpop.permute.xlu0 %851  ;;  %v1487_v48 = vcombine.low %v10996_v7, %v11002_v37 }
 0x354   :  { %961 = vrot.lane.b32.xlu1 %v820_v2, %s10324_s11  ;;  %v1471_v59 = vcombine.low %v10998_v47, %v11004_v31 }
 0x355   :  { %959 = vrot.lane.b32.xlu0 %v819_v51, %s10324_s11  ;;  %v11019_v21 = vrot.slane %v1487_v48, %v10579_v38  ;;  %v1432_v48 = vcombine.high %v10864_v12, %v10872_v49  ;;  %v8897_v12 = vcombine.high %v10956_v46, %v10962_v62  ;;  %v8899_v49 = vcombine.low %v10971_v41, %v10980_v26 }
 0x356   :  { %v11012_v29 = vpop.permute.xlu1 %857  ;;  %v11022_v32 = vrot.slane %v1471_v59, %v10579_v38  ;;  %v8895_v59 = vcombine.low %v10956_v46, %v10962_v62 }
 0x357   :  { %v11014_v54 = vpop.permute.xlu0 %855 }
 0x358   :  { %965 = vrot.lane.b32.xlu1 %v822_v40, %s10324_s11  ;;  %v1535_v61 = vcombine.low %v11022_v32, %v11019_v21 }
 0x359   :  { %963 = vrot.lane.b32.xlu0 %v821_v9, %s10324_s11 }
 0x35a   :  { %v862_v55 = vpop.permute.xlu1 %861  ;;  %v11039_v24 = vrot.slane %v1535_v61, %v10582_v45 }
 0x35b   :  { %v1519_v23 = vcombine.low %v11012_v29, %v862_v55  ;;  %v860_v56 = vpop.permute.xlu0 %859 }
 0x35c   :  { %v1503_v50 = vcombine.low %v11014_v54, %v860_v56  ;;  %1025 = vrot.lane.b32.xlu1 %v816_v1, %s10325_s15  ;;  %13785 = vst [vmem:[#allocation27_spill] sm:$0xff] %v11039_v24  ;;  %v1400_v1 = vcombine.high %v10851_v36, %v10859_v27 }
 0x35d   :  { %v1527_v57 = vrot.slane %v1519_v23, %v10579_v38  ;;  %1023 = vrot.lane.b32.xlu0 %v815_v15, %s10325_s15 }
 0x35e   :  { %v1511_v17 = vrot.slane %v1503_v50, %v10579_v38  ;;  %v11032_v43 = vpop.permute.xlu1 %921 }
 0x35f   :  { %v11034_v19 = vpop.permute.xlu0 %919 }
 0x360   :  { %v1567_v33 = vcombine.low %v1511_v17, %v1527_v57  ;;  %1029 = vrot.lane.b32.xlu1 %v818_v18, %s10325_s15  ;;  %v1568_v23 = vcombine.high %v1511_v17, %v1527_v57  ;;  %v11132_v57 = vrot.slane %v8895_v59, %v10579_v38  ;;  %v11135_v17 = vrot.slane %v8897_v12, %v10579_v38 }
 0x361   :  { %1027 = vrot.lane.b32.xlu0 %v817_v63, %s10325_s15 }
 0x362   :  { %v11042_v25 = vrot.slane %v1567_v33, %v10582_v45  ;;  %v11044_v42 = vpop.permute.xlu1 %925 }
 0x363   :  { %v11046_v35 = vpop.permute.xlu0 %923  ;;  %v1895_v15 = vcombine.low %v11032_v43, %v11044_v42 }
 0x364   :  { %13786 = vst [vmem:[#allocation28_spill] sm:$0xff] %v11042_v25  ;;  %1033 = vrot.lane.b32.xlu1 %v820_v2, %s10325_s15  ;;  %v1879_v60 = vcombine.low %v11034_v19, %v11046_v35  ;;  %v11065_v2 = vrot.slane %v1400_v1, %v10582_v45  ;;  %v11138_v1 = vrot.slane %v8899_v49, %v10579_v38 }
 0x365   :  { %1031 = vrot.lane.b32.xlu0 %v819_v51, %s10325_s15  ;;  %v11068_v51 = vrot.slane %v1895_v15, %v10579_v38 }
 0x366   :  { %v11058_v18 = vpop.permute.xlu1 %929  ;;  %v11071_v36 = vrot.slane %v1879_v60, %v10579_v38 }
 0x367   :  { %v11060_v63 = vpop.permute.xlu0 %927 }
 0x368   :  { %1037 = vrot.lane.b32.xlu1 %v822_v40, %s10325_s15  ;;  %v1520_v40 = vcombine.high %v11012_v29, %v862_v55  ;;  %v8901_v29 = vcombine.high %v10971_v41, %v10980_v26  ;;  %v1472_v55 = vcombine.high %v10998_v47, %v11004_v31  ;;  %v1943_v46 = vcombine.low %v11071_v36, %v11068_v51 }
 0x369   :  { %1035 = vrot.lane.b32.xlu0 %v821_v9, %s10325_s15  ;;  %v1504_v9 = vcombine.high %v11014_v54, %v860_v56  ;;  %v1488_v54 = vcombine.high %v10996_v7, %v11002_v37  ;;  %v1536_v56 = vcombine.high %v11022_v32, %v11019_v21  ;;  %v1464_v26 = vcombine.high %v10893_v10, %v10896_v52  ;;  %s10349_s15 = smov 121  }
 0x36a   :  { %v11073_v27 = vpop.permute.xlu1 %933  ;;  %v1446_v7 = vrot.slane %v1432_v48, %v10582_v45  ;;  %v11117_v47 = vrot.slane %v1520_v40, %v10579_v38  ;;  %v1600_v21 = vcombine.high %v11039_v24, %v11042_v25  ;;  %v1486_v60 = vrot.slane %v1472_v55, %v10579_v38 }
 0x36b   :  { %v1927_v50 = vcombine.low %v11058_v18, %v11073_v27  ;;  %v11083_v61 = vpop.permute.xlu0 %931  ;;  %v11120_v37 = vrot.slane %v1504_v9, %v10579_v38  ;;  %v1502_v15 = vrot.slane %v1488_v54, %v10579_v38  ;;  %v1550_v48 = vrot.slane %v1536_v56, %v10582_v45 }
 0x36c   :  { %v1911_v33 = vcombine.low %v11060_v63, %v11083_v61  ;;  %9750 = vrot.lane.b32.xlu1 %v10765_v44, %s10326_s16  ;;  %v11147_v59 = vrot.slane %v1943_v46, %v10582_v45  ;;  %v1415_v54 = vcombine.low %v11132_v57, %v11135_v17  ;;  %v1466_v6 = vcombine.high %v11065_v2, %v1446_v7 }
 0x36d   :  { %v11102_v44 = vrot.slane %v1927_v50, %v10579_v38  ;;  %9745 = vrot.lane.b32.xlu0 %v10767_v58, %s10327_s18  ;;  %v1582_v58 = vrot.slane %v1568_v23, %v10582_v45  ;;  %v1583_v23 = vcombine.low %v11120_v37, %v11117_v47  ;;  %v1551_v49 = vcombine.low %v1486_v60, %v1502_v15 }
 0x36e   :  { %v11109_v62 = vrot.slane %v1911_v33, %v10579_v38  ;;  %v11111_v41 = vpop.permute.xlu1 %993  ;;  %13787 = vst [vmem:[#allocation29_spill] sm:$0xff] %v11147_v59  ;;  %v9779_v33 = vpack.i.bf16 %v1600_v21, %v1464_v26  ;;  %v1928_v13 = vcombine.high %v11058_v18, %v11073_v27 }
 0x36f   :  { %v11123_v31 = vpop.permute.xlu0 %991  ;;  %v1601_v12 = vcombine.low %v1550_v48, %v1582_v58  ;;  %v1559_v30 = vrot.slane %v1551_v49, %v10582_v45 }
 0x370   :  { %v1975_v32 = vcombine.low %v11109_v62, %v11102_v44  ;;  %9760 = vrot.lane.b32.xlu1 %v10886_v4, %s10328_s22  ;;  %v1398_v4 = vrot.slane %v8901_v29, %v10579_v38  ;;  %v1465_v29 = vcombine.low %v11065_v2, %v1446_v7 }
 0x371   :  { %9755 = vrot.lane.b32.xlu0 %v10848_v16, %s10329_s23  ;;  %v1423_v16 = vrot.slane %v1415_v54, %v10582_v45  ;;  %v1416_v54 = vcombine.high %v11132_v57, %v11135_v17 }
 0x372   :  { %v11150_v40 = vrot.slane %v1975_v32, %v10582_v45  ;;  %v11152_v9 = vpop.permute.xlu1 %997  ;;  %v1447_v55 = vcombine.low %v11138_v1, %v1398_v4  ;;  %v9784_v32 = vpack.i.bf16 %v1601_v12, %v1465_v29 }
 0x373   :  { %v11156_v50 = vpop.permute.xlu0 %995  ;;  %v2303_v56 = vcombine.low %v11111_v41, %v11152_v9 }
 0x374   :  { %13788 = vst [vmem:[#allocation30_spill] sm:$0xff] %v11150_v40  ;;  %9765 = vrot.lane.b32.xlu1 %v10888_v8, %s10330_s26  ;;  %v2287_v46 = vcombine.low %v11123_v31, %v11156_v50  ;;  %v1591_v8 = vrot.slane %v1583_v23, %v10582_v45  ;;  %v1455_v5 = vrot.slane %v1447_v55, %v10582_v45 }
 0x375   :  { %9780 = vrot.lane.b32.xlu0 %v9779_v33, %s10327_s18  ;;  %v1602_v33 = vcombine.high %v1550_v48, %v1582_v58  ;;  %v11184_v23 = vrot.slane %v2303_v56, %v10579_v38  ;;  %v1552_v55 = vcombine.high %v1486_v60, %v1502_v15 }
 0x376   :  { %v11171_v26 = vpop.permute.xlu1 %1001  ;;  %v11187_v12 = vrot.slane %v2287_v46, %v10579_v38  ;;  %v1603_v7 = vcombine.low %v1559_v30, %v1591_v8  ;;  %v1604_v15 = vcombine.high %v1559_v30, %v1591_v8 }
 0x377   :  { %v11174_v21 = vpop.permute.xlu0 %999  ;;  %v9789_v2 = vpack.i.bf16 %v1602_v33, %v1466_v6  ;;  %v1448_v6 = vcombine.high %v11138_v1, %v1398_v4  ;;  %v1566_v33 = vrot.slane %v1552_v55, %v10582_v45  ;;  %v1468_v1 = vcombine.high %v1423_v16, %v1455_v5 }
 0x378   :  { %9770 = vrot.lane.b32.xlu1 %v10898_v11, %s10331_s28  ;;  %v1584_v11 = vcombine.high %v11120_v37, %v11117_v47  ;;  %v1467_v37 = vcombine.low %v1423_v16, %v1455_v5  ;;  %v2351_v56 = vcombine.low %v11187_v12, %v11184_v23  ;;  %v1430_v4 = vrot.slane %v1416_v54, %v10582_v45 }
 0x379   :  { %9785 = vrot.lane.b32.xlu0 %v9784_v32, %s10326_s16  ;;  %v9799_v8 = vpack.i.bf16 %v1604_v15, %v1468_v1 }
 0x37a   :  { %v11189_v58 = vpop.permute.xlu1 %1005  ;;  %v9794_v17 = vpack.i.bf16 %v1603_v7, %v1467_v37 }
 0x37b   :  { %v2335_v48 = vcombine.low %v11171_v26, %v11189_v58  ;;  %v11195_v49 = vpop.permute.xlu0 %1003 }
 0x37c   :  { %v2319_v29 = vcombine.low %v11174_v21, %v11195_v49  ;;  %9775 = vrot.lane.b32.xlu1 %v10902_v53, %s10332_s1  ;;  %v1598_v53 = vrot.slane %v1584_v11, %v10582_v45 }
 0x37d   :  { %v11204_v47 = vrot.slane %v2335_v48, %v10579_v38  ;;  %9790 = vrot.lane.b32.xlu0 %v9789_v2, %s10329_s23  ;;  %v1462_v48 = vrot.slane %v1448_v6, %v10582_v45  ;;  %v11225_v2 = vrot.slane %v2351_v56, %v10582_v45 }
 0x37e   :  { %v11211_v46 = vrot.slane %v2319_v29, %v10579_v38  ;;  %v11213_v32 = vpop.permute.xlu1 %865  ;;  %v1605_v29 = vcombine.low %v1566_v33, %v1598_v53 }
 0x37f   :  { %v11216_v57 = vpop.permute.xlu0 %863  ;;  %13789 = vst [vmem:[#allocation31_spill] sm:$0xff] %v11225_v2  ;;  %v1469_v5 = vcombine.low %v1430_v4, %v1462_v48  ;;  %v1470_v15 = vcombine.high %v1430_v4, %v1462_v48 }
 0x380   :  { %v2383_v60 = vcombine.low %v11211_v46, %v11204_v47 }
 0x381   :  { %9795 = vrot.lane.b32.xlu0 %v9794_v17, %s10328_s22  ;;  %v9804_v56 = vpack.i.bf16 %v1605_v29, %v1469_v5  ;;  %v1606_v17 = vcombine.high %v1566_v33, %v1598_v53 }
 0x382   :  { %v11228_v11 = vrot.slane %v2383_v60, %v10582_v45  ;;  %v11230_v7 = vpop.permute.xlu1 %869 }
 0x383   :  { %v11232_v30 = vpop.permute.xlu0 %867  ;;  %v1623_v16 = vcombine.low %v11213_v32, %v11230_v7  ;;  %v9809_v3 = vpack.i.bf16 %v1606_v17, %v1470_v15 }
 0x384   :  { %13790 = vst [vmem:[#allocation32_spill] sm:$0xff] %v11228_v11  ;;  %v1607_v54 = vcombine.low %v11216_v57, %v11232_v30  ;;  %v1944_v11 = vcombine.high %v11071_v36, %v11068_v51 }
 0x385   :  { %9800 = vrot.lane.b32.xlu0 %v9799_v8, %s10330_s26  ;;  %v11247_v60 = vrot.slane %v1623_v16, %v10579_v38 }
 0x386   :  { %v11241_v37 = vpop.permute.xlu1 %873  ;;  %v11250_v1 = vrot.slane %v1607_v54, %v10579_v38 }
 0x387   :  { %v11243_v6 = vpop.permute.xlu0 %871 }
 0x388   :  { %v1671_v4 = vcombine.low %v11250_v1, %v11247_v60 }
 0x389   :  { %9805 = vrot.lane.b32.xlu0 %v9804_v56, %s10331_s28 }
 0x38a   :  { %v11252_v8 = vpop.permute.xlu1 %877  ;;  %v11272_v54 = vrot.slane %v1671_v4, %v10582_v45 }
 0x38b   :  { %v1655_v55 = vcombine.low %v11241_v37, %v11252_v8  ;;  %v11256_v0 = vpop.permute.xlu0 %875 }
 0x38c   :  { %v1639_v53 = vcombine.low %v11243_v6, %v11256_v0 }
 0x38d   :  { %v11261_v33 = vrot.slane %v1655_v55, %v10579_v38  ;;  %9810 = vrot.lane.b32.xlu0 %v9809_v3, %s10332_s1 }
 0x38e   :  { %v11267_v48 = vrot.slane %v1639_v53, %v10579_v38  ;;  %v938_v29 = vpop.permute.xlu1 %937 }
 0x38f   :  { %v936_v5 = vpop.permute.xlu0 %935 }
 0x390   :  { %v1703_v16 = vcombine.low %v11267_v48, %v11261_v33 }
 0x392   :  { %v11275_v56 = vrot.slane %v1703_v16, %v10582_v45  ;;  %v942_v55 = vpop.permute.xlu1 %941 }
 0x393   :  { %v940_v17 = vpop.permute.xlu0 %939  ;;  %v2031_v15 = vcombine.low %v938_v29, %v942_v55 }
 0x394   :  { %v2015_v28 = vcombine.low %v936_v5, %v940_v17 }
 0x395   :  { %v2039_v34 = vrot.slane %v2031_v15, %v10579_v38  ;;  %v1896_v15 = vcombine.high %v11032_v43, %v11044_v42 }
 0x396   :  { %v946_v53 = vpop.permute.xlu1 %945  ;;  %v2023_v52 = vrot.slane %v2015_v28, %v10579_v38  ;;  %v1912_v28 = vcombine.high %v11060_v63, %v11083_v61  ;;  %v11302_v63 = vrot.slane %v1928_v13, %v10579_v38  ;;  %v2008_v13 = vcombine.high %v11147_v59, %v11150_v40 }
 0x397   :  { %v944_v22 = vpop.permute.xlu0 %943 }
 0x398   :  { %v2079_v3 = vcombine.low %v2023_v52, %v2039_v34 }
 0x39a   :  { %v950_v10 = vpop.permute.xlu1 %949  ;;  %v11305_v61 = vrot.slane %v2079_v3, %v10582_v45 }
 0x39b   :  { %v2063_v25 = vcombine.low %v946_v53, %v950_v10  ;;  %v948_v4 = vpop.permute.xlu0 %947  ;;  %v2064_v39 = vcombine.high %v946_v53, %v950_v10  ;;  %v1976_v10 = vcombine.high %v11109_v62, %v11102_v44  ;;  %v2032_v53 = vcombine.high %v938_v29, %v942_v55 }
 0x39c   :  { %v2047_v24 = vcombine.low %v944_v22, %v948_v4  ;;  %v2048_v14 = vcombine.high %v944_v22, %v948_v4  ;;  %v2016_v22 = vcombine.high %v936_v5, %v940_v17  ;;  %v2080_v4 = vcombine.high %v2023_v52, %v2039_v34  ;;  %13792 = vst [vmem:[#allocation34_spill] sm:$0xff] %v11305_v61 }
 0x39d   :  { %v2071_v16 = vrot.slane %v2063_v25, %v10579_v38  ;;  %v2078_v43 = vrot.slane %v2064_v39, %v10579_v38  ;;  %v11316_v39 = vrot.slane %v2032_v53, %v10579_v38  ;;  %v1910_v29 = vrot.slane %v1896_v15, %v10579_v38 }
 0x39e   :  { %v2055_v20 = vrot.slane %v2047_v24, %v10579_v38  ;;  %v11285_v2 = vpop.permute.xlu1 %1009  ;;  %v1880_v24 = vcombine.high %v11034_v19, %v11046_v35  ;;  %v2062_v42 = vrot.slane %v2048_v14, %v10579_v38  ;;  %v1926_v19 = vrot.slane %v1912_v28, %v10579_v38 }
 0x39f   :  { %v11293_v25 = vpop.permute.xlu0 %1007  ;;  %v1990_v35 = vrot.slane %v1976_v10, %v10582_v45  ;;  %v2030_v51 = vrot.slane %v2016_v22, %v10579_v38  ;;  %v2094_v36 = vrot.slane %v2080_v4, %v10582_v45  ;;  %v1958_v55 = vrot.slane %v1944_v11, %v10582_v45 }
 0x3a0   :  { %13791 = vst [vmem:[#allocation33_spill] sm:$0xff] %v11293_v25  ;;  %v2111_v18 = vcombine.low %v2055_v20, %v2071_v16  ;;  %v2112_v27 = vcombine.high %v2055_v20, %v2071_v16  ;;  %v1894_v5 = vrot.slane %v1880_v24, %v10579_v38  ;;  %v2127_v17 = vcombine.low %v2062_v42, %v2078_v43 }
 0x3a1   :  { %v1991_v4 = vcombine.low %v1926_v19, %v11302_v63  ;;  %v2095_v15 = vcombine.low %v2030_v51, %v11316_v39  ;;  %v2009_v11 = vcombine.low %v1958_v55, %v1990_v35 }
 0x3a2   :  { %v11308_v34 = vrot.slane %v2111_v18, %v10582_v45  ;;  %v2126_v20 = vrot.slane %v2112_v27, %v10582_v45  ;;  %v11311_v52 = vpop.permute.xlu1 %1013  ;;  %v1959_v18 = vcombine.low %v1894_v5, %v1910_v29  ;;  %v2135_v27 = vrot.slane %v2127_v17, %v10582_v45 }
 0x3a3   :  { %v11318_v14 = vpop.permute.xlu0 %1011  ;;  %v2439_v3 = vcombine.low %v11285_v2, %v11311_v52 }
 0x3a4   :  { %13793 = vst [vmem:[#allocation35_spill] sm:$0xff] %v11308_v34  ;;  %v2144_v62 = vcombine.high %v11305_v61, %v11308_v34  ;;  %v2423_v16 = vcombine.low %v11293_v25, %v11318_v14  ;;  %v2145_v53 = vcombine.low %v2094_v36, %v2126_v20  ;;  %v2146_v40 = vcombine.high %v2094_v36, %v2126_v20 }
 0x3a5   :  { %v11344_v24 = vrot.slane %v2439_v3, %v10579_v38  ;;  %v2103_v61 = vrot.slane %v2095_v15, %v10582_v45  ;;  %v2010_v3 = vcombine.high %v1958_v55, %v1990_v35  ;;  %v2128_v25 = vcombine.high %v2062_v42, %v2078_v43 }
 0x3a6   :  { %v11335_v28 = vpop.permute.xlu1 %1017  ;;  %v9814_v10 = vpack.i.bf16 %v2144_v62, %v2008_v13  ;;  %v11347_v44 = vrot.slane %v2423_v16, %v10579_v38  ;;  %v9819_v62 = vpack.i.bf16 %v2145_v53, %v2009_v11  ;;  %v1967_v16 = vrot.slane %v1959_v18, %v10582_v45 }
 0x3a7   :  { %v11337_v22 = vpop.permute.xlu0 %1015  ;;  %v9824_v15 = vpack.i.bf16 %v2146_v40, %v2010_v3  ;;  %v2147_v11 = vcombine.low %v2103_v61, %v2135_v27  ;;  %v2096_v35 = vcombine.high %v2030_v51, %v11316_v39  ;;  %v1960_v42 = vcombine.high %v1894_v5, %v1910_v29 }
 0x3a8   :  { %13794 = vst [vmem:[#allocation36_spill] sm:$0xff] %v11337_v22  ;;  %9815 = vrot.lane.b32.xlu0 %v9814_v10, %s10327_s18  ;;  %v1999_v10 = vrot.slane %v1991_v4, %v10582_v45  ;;  %v2487_v36 = vcombine.low %v11347_v44, %v11344_v24  ;;  %v2142_v55 = vrot.slane %v2128_v25, %v10582_v45 }
 0x3a9   :  { %v2304_v51 = vcombine.high %v11111_v41, %v11152_v9  ;;  %v2288_v29 = vcombine.high %v11123_v31, %v11156_v50  ;;  %v2336_v3 = vcombine.high %v11171_v26, %v11189_v58  ;;  %v1974_v41 = vrot.slane %v1960_v42, %v10582_v45 }
 0x3aa   :  { %v11349_v13 = vpop.permute.xlu1 %1021  ;;  %v2011_v43 = vcombine.low %v1967_v16, %v1999_v10  ;;  %v11380_v18 = vrot.slane %v2487_v36, %v10582_v45  ;;  %v2012_v25 = vcombine.high %v1967_v16, %v1999_v10  ;;  %v2320_v36 = vcombine.high %v11174_v21, %v11195_v49 }
 0x3ab   :  { %v2471_v59 = vcombine.low %v11335_v28, %v11349_v13  ;;  %v11353_v34 = vpop.permute.xlu0 %1019  ;;  %v11408_v21 = vrot.slane %v2304_v51, %v10579_v38  ;;  %v11411_v49 = vrot.slane %v2288_v29, %v10579_v38  ;;  %v1624_v29 = vcombine.high %v11213_v32, %v11230_v7 }
 0x3ac   :  { %v2455_v17 = vcombine.low %v11337_v22, %v11353_v34  ;;  %9820 = vrot.lane.b32.xlu0 %v9819_v62, %s10326_s16  ;;  %v1992_v22 = vcombine.high %v1926_v19, %v11302_v63  ;;  %13795 = vst [vmem:[#allocation37_spill] sm:$0xff] %v11380_v18  ;;  %v9829_v19 = vpack.i.bf16 %v2147_v11, %v2011_v43 }
 0x3ad   :  { %v11362_v20 = vrot.slane %v2471_v59, %v10579_v38  ;;  %v11417_v10 = vrot.slane %v2320_v36, %v10579_v38  ;;  %v2367_v51 = vcombine.low %v11411_v49, %v11408_v21 }
 0x3ae   :  { %v11367_v53 = vrot.slane %v2455_v17, %v10579_v38  ;;  %v11369_v4 = vpop.permute.xlu1 %881  ;;  %v2148_v17 = vcombine.high %v2103_v61, %v2135_v27  ;;  %v2006_v39 = vrot.slane %v1992_v22, %v10582_v45  ;;  %v11414_v27 = vrot.slane %v2336_v3, %v10579_v38 }
 0x3af   :  { %v11372_v62 = vpop.permute.xlu0 %879 }
 0x3b0   :  { %v2519_v59 = vcombine.low %v11367_v53, %v11362_v20  ;;  %9825 = vrot.lane.b32.xlu0 %v9824_v15, %s10329_s23  ;;  %v2110_v15 = vrot.slane %v2096_v35, %v10582_v45  ;;  %v9834_v26 = vpack.i.bf16 %v2148_v17, %v2012_v25  ;;  %v2013_v16 = vcombine.low %v1974_v41, %v2006_v39 }
 0x3b1   :  { %v2014_v11 = vcombine.high %v1974_v41, %v2006_v39  ;;  %v2352_v17 = vcombine.high %v11187_v12, %v11184_v23  ;;  %v2384_v39 = vcombine.high %v11211_v46, %v11204_v47  ;;  %v2399_v36 = vcombine.low %v11417_v10, %v11414_v27 }
 0x3b2   :  { %v11383_v40 = vrot.slane %v2519_v59, %v10582_v45  ;;  %v11385_v63 = vpop.permute.xlu1 %885  ;;  %v2149_v58 = vcombine.low %v2110_v15, %v2142_v55  ;;  %v1608_v23 = vcombine.high %v11216_v57, %v11232_v30  ;;  %v1656_v41 = vcombine.high %v11241_v37, %v11252_v8 }
 0x3b3   :  { %v11392_v5 = vpop.permute.xlu0 %883  ;;  %v1759_v31 = vcombine.low %v11369_v4, %v11385_v63  ;;  %v1704_v57 = vcombine.high %v11267_v48, %v11261_v33  ;;  %v1760_v30 = vcombine.high %v11369_v4, %v11385_v63 }
 0x3b4   :  { %13796 = vst [vmem:[#allocation38_spill] sm:$0xff] %v11383_v40  ;;  %9830 = vrot.lane.b32.xlu0 %v9829_v19, %s10328_s22  ;;  %v1743_v9 = vcombine.low %v11372_v62, %v11392_v5  ;;  %v9839_v42 = vpack.i.bf16 %v2149_v58, %v2013_v16  ;;  %v2150_v19 = vcombine.high %v2110_v15, %v2142_v55 }
 0x3b5   :  { %v1767_v35 = vrot.slane %v1759_v31, %v10579_v38  ;;  %v2400_v55 = vcombine.high %v11417_v10, %v11414_v27  ;;  %v1640_v58 = vcombine.high %v11243_v6, %v11256_v0  ;;  %v1744_v37 = vcombine.high %v11372_v62, %v11392_v5 }
 0x3b6   :  { %v890_v50 = vpop.permute.xlu1 %889  ;;  %v1751_v59 = vrot.slane %v1743_v9, %v10579_v38  ;;  %v9844_v9 = vpack.i.bf16 %v2150_v19, %v2014_v11  ;;  %v11458_v10 = vrot.slane %v1608_v23, %v10579_v38  ;;  %v1672_v0 = vcombine.high %v11250_v1, %v11247_v60 }
 0x3b7   :  { %v888_v22 = vpop.permute.xlu0 %887  ;;  %v11469_v48 = vrot.slane %v1656_v41, %v10579_v38  ;;  %v11481_v60 = vrot.slane %v1640_v58, %v10579_v38  ;;  %v1718_v1 = vrot.slane %v1704_v57, %v10582_v45  ;;  %v11485_v16 = vrot.slane %v1760_v30, %v10579_v38 }
 0x3b8   :  { %9835 = vrot.lane.b32.xlu0 %v9834_v26, %s10330_s26  ;;  %v1807_v47 = vcombine.low %v1751_v59, %v1767_v35  ;;  %v11444_v26 = vrot.slane %v1624_v29, %v10579_v38  ;;  %v1808_v8 = vcombine.high %v1751_v59, %v1767_v35  ;;  %v1736_v35 = vcombine.high %v11272_v54, %v11275_v56 }
 0x3b9   :  { %v11492_v59 = vrot.slane %v1744_v37, %v10579_v38  ;;  %v11500_v29 = vrot.slane %v2384_v39, %v10582_v45  ;;  %v11514_v39 = vrot.slane %v2352_v17, %v10582_v45  ;;  %v11526_v57 = vrot.slane %v2399_v36, %v10582_v45 }
 0x3ba   :  { %v894_v43 = vpop.permute.xlu1 %893  ;;  %v11472_v4 = vrot.slane %v1807_v47, %v10582_v45  ;;  %v11529_v30 = vrot.slane %v2400_v55, %v10582_v45 }
 0x3bb   :  { %v1791_v25 = vcombine.low %v890_v50, %v894_v43  ;;  %v892_v3 = vpop.permute.xlu0 %891  ;;  %v1792_v12 = vcombine.high %v890_v50, %v894_v43  ;;  %v1822_v43 = vrot.slane %v1808_v8, %v10582_v45  ;;  %v1823_v17 = vcombine.low %v11492_v59, %v11485_v16 }
 0x3bc   :  { %v1775_v15 = vcombine.low %v888_v22, %v892_v3  ;;  %9840 = vrot.lane.b32.xlu0 %v9839_v42, %s10331_s28  ;;  %v1776_v7 = vcombine.high %v888_v22, %v892_v3  ;;  %v1687_v3 = vcombine.low %v11458_v10, %v11444_v26 }
 0x3bd   :  { %v1799_v32 = vrot.slane %v1791_v25, %v10579_v38  ;;  %v11463_v6 = vrot.slane %v1792_v12, %v10579_v38  ;;  %v1686_v25 = vrot.slane %v1672_v0, %v10582_v45 }
 0x3be   :  { %v1783_v46 = vrot.slane %v1775_v15, %v10579_v38  ;;  %v11441_v31 = vpop.permute.xlu1 %953  ;;  %v11466_v33 = vrot.slane %v1776_v7, %v10579_v38 }
 0x3bf   :  { %v11452_v50 = vpop.permute.xlu0 %951  ;;  %v1737_v37 = vcombine.low %v1686_v25, %v1718_v1  ;;  %v1738_v36 = vcombine.high %v1686_v25, %v1718_v1 }
 0x3c0   :  { %v1839_v22 = vcombine.low %v1783_v46, %v1799_v32  ;;  %v1840_v27 = vcombine.high %v1783_v46, %v1799_v32  ;;  %9845 = vrot.lane.b32.xlu0 %v9844_v9, %s10332_s1  ;;  %v1855_v15 = vcombine.low %v11466_v33, %v11463_v6  ;;  %v11519_v46 = vrot.slane %v2367_v51, %v10582_v45 }
 0x3c1   :  { %v1719_v9 = vcombine.low %v11481_v60, %v11469_v48  ;;  %v11535_v51 = vrot.slane %v1687_v3, %v10582_v45  ;;  %v1856_v1 = vcombine.high %v11466_v33, %v11463_v6 }
 0x3c2   :  { %v11475_v62 = vrot.slane %v1839_v22, %v10582_v45  ;;  %v1854_v63 = vrot.slane %v1840_v27, %v10582_v45  ;;  %v11478_v5 = vpop.permute.xlu1 %957  ;;  %v11538_v8 = vrot.slane %v1855_v15, %v10582_v45  ;;  %v13797_v22 = vld [vmem:[#allocation32_spill] sm:$0xff]  ;;  %v13798_v27 = vld [vmem:[#allocation31_spill] sm:$0xff]  ;;  %v1720_v15 = vcombine.high %v11481_v60, %v11469_v48 }
 0x3c3   :  { %v11487_v11 = vpop.permute.xlu0 %955  ;;  %v2167_v23 = vcombine.low %v11441_v31, %v11478_v5  ;;  %v1727_v61 = vrot.slane %v1719_v9, %v10582_v45  ;;  %v2472_v48 = vcombine.high %v11335_v28, %v11349_v13  ;;  %v13800_v60 = vld [vmem:[#allocation36_spill] sm:$0xff] }
 0x3c4   :  { %v1872_v19 = vcombine.high %v11472_v4, %v11475_v62  ;;  %v2151_v12 = vcombine.low %v11452_v50, %v11487_v11  ;;  %v1873_v41 = vcombine.low %v1822_v43, %v1854_v63  ;;  %v1874_v3 = vcombine.high %v1822_v43, %v1854_v63 }
 0x3c5   :  { %v11545_v55 = vrot.slane %v2167_v23, %v10579_v38  ;;  %v2440_v23 = vcombine.high %v11285_v2, %v11311_v52  ;;  %v2456_v43 = vcombine.high %v13800_v60, %v11353_v34  ;;  %v1688_v34 = vcombine.high %v11458_v10, %v11444_v26 }
 0x3c6   :  { %v11511_v32 = vpop.permute.xlu1 %961  ;;  %v9849_v7 = vpack.i.bf16 %v1872_v19, %v1736_v35  ;;  %v11548_v35 = vrot.slane %v2151_v12, %v10579_v38  ;;  %v13799_v12 = vld [vmem:[#allocation33_spill] sm:$0xff]  ;;  %v9859_v9 = vpack.i.bf16 %v1874_v3, %v1738_v36  ;;  %v1739_v6 = vcombine.low %v11535_v51, %v1727_v61 }
 0x3c7   :  { %v11523_v58 = vpop.permute.xlu0 %959  ;;  %v2424_v0 = vcombine.high %v13799_v12, %v11318_v14  ;;  %v1824_v36 = vcombine.high %v11492_v59, %v11485_v16  ;;  %v11605_v10 = vrot.slane %v1720_v15, %v10582_v45  ;;  %v11611_v3 = vrot.slane %v2456_v43, %v10579_v38 }
 0x3c8   :  { %9850 = vrot.lane.b32.xlu1 %v9849_v7, %s10327_s18  ;;  %v9854_v7 = vpack.i.bf16 %v1873_v41, %v1737_v37  ;;  %v1831_v41 = vrot.slane %v1823_v17, %v10582_v45  ;;  %v2215_v52 = vcombine.low %v11548_v35, %v11545_v55  ;;  %v11594_v17 = vrot.slane %v2440_v23, %v10579_v38 }
 0x3c9   :  { %v11597_v37 = vrot.slane %v2424_v0, %v10579_v38  ;;  %v11614_v0 = vrot.slane %v1856_v1, %v10582_v45  ;;  %v1740_v43 = vcombine.high %v11535_v51, %v1727_v61  ;;  %v2152_v61 = vcombine.high %v11452_v50, %v11487_v11 }
 0x3ca   :  { %v11550_v19 = vpop.permute.xlu1 %965  ;;  %v1875_v28 = vcombine.low %v1831_v41, %v11538_v8  ;;  %v11617_v23 = vrot.slane %v2215_v52, %v10582_v45  ;;  %v1876_v15 = vcombine.high %v1831_v41, %v11538_v8  ;;  %v1838_v8 = vrot.slane %v1824_v36, %v10582_v45 }
 0x3cb   :  { %v2199_v42 = vcombine.low %v11511_v32, %v11550_v19  ;;  %v11557_v47 = vpop.permute.xlu0 %963  ;;  %v2503_v52 = vcombine.low %v11597_v37, %v11594_v17 }
 0x3cc   :  { %v2183_v63 = vcombine.low %v11523_v58, %v11557_v47  ;;  %9855 = vrot.lane.b32.xlu1 %v9854_v7, %s10326_s16  ;;  %v11608_v7 = vrot.slane %v2472_v48, %v10579_v38  ;;  %v9864_v12 = vpack.i.bf16 %v1875_v28, %v1739_v6  ;;  %v2488_v48 = vcombine.high %v11347_v44, %v11344_v24 }
 0x3cd   :  { %v11574_v2 = vrot.slane %v2199_v42, %v10579_v38  ;;  %v2168_v24 = vcombine.high %v11441_v31, %v11478_v5  ;;  %v1877_v6 = vcombine.low %v1838_v8, %v11614_v0  ;;  %v2200_v31 = vcombine.high %v11511_v32, %v11550_v19  ;;  %v13807_v42 = vld [vmem:[#allocation23_spill] sm:$0xff] }
 0x3ce   :  { %v11579_v14 = vrot.slane %v2183_v63, %v10579_v38  ;;  %v11581_v25 = vpop.permute.xlu1 %1025  ;;  %v1702_v63 = vrot.slane %v1688_v34, %v10582_v45  ;;  %v2535_v44 = vcombine.low %v11611_v3, %v11608_v7  ;;  %v9869_v34 = vpack.i.bf16 %v1876_v15, %v1740_v43 }
 0x3cf   :  { %v11586_v13 = vpop.permute.xlu0 %1023  ;;  %v2184_v50 = vcombine.high %v11523_v58, %v11557_v47  ;;  %v11676_v47 = vrot.slane %v2168_v24, %v10579_v38  ;;  %v11679_v58 = vrot.slane %v2152_v61, %v10579_v38  ;;  %v11689_v24 = vrot.slane %v2200_v31, %v10579_v38 }
 0x3d0   :  { %v2247_v26 = vcombine.low %v11579_v14, %v11574_v2  ;;  %9860 = vrot.lane.b32.xlu1 %v9859_v9, %s10329_s23  ;;  %v2520_v9 = vcombine.high %v11367_v53, %v11362_v20  ;;  %v1741_v51 = vcombine.low %v1702_v63, %v11605_v10  ;;  %v1742_v11 = vcombine.high %v1702_v63, %v11605_v10 }
 0x3d1   :  { %v11673_v32 = vrot.slane %v2535_v44, %v10582_v45  ;;  %v2248_v19 = vcombine.high %v11579_v14, %v11574_v2  ;;  %v2216_v44 = vcombine.high %v11548_v35, %v11545_v55  ;;  %v11692_v61 = vrot.slane %v2184_v50, %v10579_v38 }
 0x3d2   :  { %v11620_v16 = vrot.slane %v2247_v26, %v10582_v45  ;;  %v11622_v59 = vpop.permute.xlu1 %1029  ;;  %v11661_v26 = vrot.slane %v2488_v48, %v10582_v45  ;;  %v11667_v15 = vrot.slane %v2520_v9, %v10582_v45  ;;  %v1878_v9 = vcombine.high %v1838_v8, %v11614_v0  ;;  %v13808_v0 = vld [vmem:[#allocation24_spill] sm:$0xff] }
 0x3d3   :  { %v11628_v60 = vpop.permute.xlu0 %1027  ;;  %v2575_v20 = vcombine.low %v11581_v25, %v11622_v59  ;;  %v2552_v14 = vcombine.high %v11380_v18, %v11383_v40  ;;  %v2262_v35 = vrot.slane %v2248_v19, %v10582_v45  ;;  %v2230_v36 = vrot.slane %v2216_v44, %v10582_v45 }
 0x3d4   :  { %9865 = vrot.lane.b32.xlu1 %v9864_v12, %s10328_s22  ;;  %v2559_v53 = vcombine.low %v11586_v13, %v11628_v60  ;;  %v11664_v12 = vrot.slane %v2503_v52, %v10582_v45  ;;  %v9874_v52 = vpack.i.bf16 %v1877_v6, %v1741_v51  ;;  %v9879_v50 = vpack.i.bf16 %v1878_v9, %v1742_v11 }
 0x3d5   :  { %v2583_v10 = vrot.slane %v2575_v20, %v10579_v38  ;;  %v2231_v1 = vcombine.low %v11679_v58, %v11676_v47  ;;  %v2576_v11 = vcombine.high %v11581_v25, %v11622_v59  ;;  %v2560_v19 = vcombine.high %v11586_v13, %v11628_v60 }
 0x3d6   :  { %v1034_v28 = vpop.permute.xlu1 %1033  ;;  %v2567_v63 = vrot.slane %v2559_v53, %v10579_v38  ;;  %v13802_v13 = vcombine.high %v13798_v27, %v13797_v22  ;;  %v13809_v33 = vcombine.low %v13807_v42, %v13808_v0 }
 0x3d7   :  { %v1032_v5 = vpop.permute.xlu0 %1031 }
 0x3d8   :  { %9870 = vrot.lane.b32.xlu1 %v9869_v34, %s10330_s26  ;;  %v2623_v53 = vcombine.low %v2567_v63, %v2583_v10  ;;  %v2624_v44 = vcombine.high %v2567_v63, %v2583_v10  ;;  %v11736_v10 = vrot.slane %v2231_v1, %v10582_v45  ;;  %v2282_v1 = vcombine.high %v2230_v36, %v2262_v35 }
 0x3da   :  { %v1038_v48 = vpop.permute.xlu1 %1037  ;;  %v11725_v43 = vrot.slane %v2623_v53, %v10582_v45  ;;  %v11743_v53 = vrot.slane %v2576_v11, %v10579_v38 }
 0x3db   :  { %v2607_v34 = vcombine.low %v1034_v28, %v1038_v48  ;;  %v1036_v41 = vpop.permute.xlu0 %1035  ;;  %v2608_v8 = vcombine.high %v1034_v28, %v1038_v48  ;;  %v2281_v28 = vcombine.low %v2230_v36, %v2262_v35  ;;  %v13806_v35 = vcombine.low %v11514_v39, %v11500_v29 }
 0x3dc   :  { %v2591_v2 = vcombine.low %v1032_v5, %v1036_v41  ;;  %9875 = vrot.lane.b32.xlu1 %v9874_v52, %s10331_s28  ;;  %v2592_v20 = vcombine.high %v1032_v5, %v1036_v41  ;;  %v2280_v52 = vcombine.high %v11617_v23, %v11620_v16  ;;  %v2263_v41 = vcombine.low %v11692_v61, %v11689_v24 }
 0x3dd   :  { %v2615_v51 = vrot.slane %v2607_v34, %v10579_v38  ;;  %v11721_v34 = vrot.slane %v2608_v8, %v10579_v38 }
 0x3de   :  { %v2599_v6 = vrot.slane %v2591_v2, %v10579_v38  ;;  %v11704_v31 = vpop.permute.xlu1 %9750  ;;  %v2606_v2 = vrot.slane %v2592_v20, %v10579_v38  ;;  %v9884_v60 = vpack.i.bf16 %v13802_v13, %v2280_v52  ;;  %v11739_v63 = vrot.slane %v2263_v41, %v10582_v45 }
 0x3df   :  { %v9746_v5 = vpop.permute.xlu0 %9745  ;;  %v2638_v52 = vrot.slane %v2624_v44, %v10582_v45  ;;  %v9889_v44 = vpack.i.bf16 %v13806_v35, %v2281_v28  ;;  %v13810_v28 = vcombine.high %v11514_v39, %v11500_v29 }
 0x3e0   :  { %v2655_v48 = vcombine.low %v2599_v6, %v2615_v51  ;;  %v2656_v9 = vcombine.high %v2599_v6, %v2615_v51  ;;  %9880 = vrot.lane.b32.xlu1 %v9879_v50, %s10332_s1  ;;  %v9747_v25 = vunpack.i.l.bf16 %v9746_v5  ;;  %v9748_v51 = vunpack.i.h.bf16 %v9746_v5 }
 0x3e1   :  { %v11746_v6 = vrot.slane %v2560_v19, %v10579_v38  ;;  %v2671_v41 = vcombine.low %v2606_v2, %v11721_v34  ;;  %v9752_v5 = vunpack.i.l.bf16 %v11704_v31  ;;  %v9753_v19 = vunpack.i.h.bf16 %v11704_v31 }
 0x3e2   :  { %v11728_v55 = vrot.slane %v2655_v48, %v10582_v45  ;;  %v11730_v59 = vpop.permute.xlu1 %9760  ;;  %v2670_v8 = vrot.slane %v2656_v9, %v10582_v45  ;;  %v13803_v48 = vld [vmem:[#allocation21_spill] sm:$0xff]  ;;  %v13804_v9 = vld [vmem:[#allocation22_spill] sm:$0xff]  ;;  %v3033_v38 = vsel %vm3031_vm9, %v13809_v33, %v9748_v51  ;;  %v2283_v33 = vcombine.low %v11736_v10, %v11739_v63 }
 0x3e3   :  { %v9756_v20 = vpop.permute.xlu0 %9755  ;;  %v13805_v13 = vcombine.low %v13803_v48, %v13804_v9  ;;  %v2639_v48 = vcombine.low %v11746_v6, %v11743_v53  ;;  %v9894_v9 = vpack.i.bf16 %v13810_v28, %v2282_v1  ;;  %v2672_v42 = vcombine.high %v2606_v2, %v11721_v34 }
 0x3e4   :  { %13801 = vst [vmem:[#allocation32_spill] sm:$0xff] %v11728_v55  ;;  %9885 = vrot.lane.b32.xlu1 %v9884_v60, %s10327_s18  ;;  %v2688_v11 = vcombine.high %v11725_v43, %v11728_v55  ;;  %v9757_v60 = vunpack.i.l.bf16 %v9756_v20  ;;  %v9758_v40 = vunpack.i.h.bf16 %v9756_v20  ;;  %v2689_v55 = vcombine.low %v2638_v52, %v2670_v8 }
 0x3e5   :  { %v3032_v50 = vsel %vm3031_vm9, %v13805_v13, %v9747_v25  ;;  %v2264_v25 = vcombine.high %v11692_v61, %v11689_v24  ;;  %v9763_v0 = vunpack.i.h.bf16 %v11730_v59  ;;  %v9762_v61 = vunpack.i.l.bf16 %v11730_v59 }
 0x3e6   :  { %v9766_v36 = vpop.permute.xlu1 %9765  ;;  %v9904_v31 = vpack.i.bf16 %v2688_v11, %v2552_v14  ;;  %v11782_v14 = vrot.slane %v2671_v41, %v10582_v45  ;;  %v3045_v24 = vsel %vm3044_vm10, %v3032_v50, %v9752_v5  ;;  %v3046_v51 = vsel %vm3044_vm10, %v3033_v38, %v9753_v19 }
 0x3e7   :  { %v11768_v18 = vpop.permute.xlu0 %9780  ;;  %v3058_v29 = vsel %vm3057_vm11, %v3045_v24, %v9757_v60  ;;  %v2690_v20 = vcombine.high %v2638_v52, %v2670_v8  ;;  %v3059_v1 = vsel %vm3057_vm11, %v3046_v51, %v9758_v40  ;;  %v9768_v34 = vunpack.i.h.bf16 %v9766_v36 }
 0x3e8   :  { %9890 = vrot.lane.b32.xlu1 %v9889_v44, %s10326_s16  ;;  %9905 = vrot.lane.b32.xlu0 %v9904_v31, %s10327_s18  ;;  %v9767_v2 = vunpack.i.l.bf16 %v9766_v36  ;;  %v13811_v11 = vcombine.low %v11661_v26, %v11667_v15  ;;  %v2278_v5 = vrot.slane %v2264_v25, %v10582_v45  ;;  %v11798_v59 = vrot.slane %v2639_v48, %v10582_v45  ;;  %s10351_s18 = smov 107  }
 0x3e9   :  { %v2640_v40 = vcombine.high %v11746_v6, %v11743_v53  ;;  %v11804_v8 = vrot.slane %v2672_v42, %v10582_v45  ;;  %v2284_v13 = vcombine.high %v11736_v10, %v11739_v63  ;;  %v13813_v36 = vcombine.high %v11661_v26, %v11667_v15 }
 0x3ea   :  { %v9771_v39 = vpop.permute.xlu1 %9770  ;;  %v9914_v50 = vpack.i.bf16 %v2689_v55, %v13811_v11  ;;  %v13812_v55 = vcombine.low %v11519_v46, %v11526_v57  ;;  %v2691_v53 = vcombine.low %v11798_v59, %v11782_v14  ;;  %v3071_v6 = vsel %vm3070_vm12, %v3058_v29, %v9762_v61 }
 0x3eb   :  { %v11791_v41 = vpop.permute.xlu0 %9785  ;;  %v9773_v38 = vunpack.i.h.bf16 %v9771_v39  ;;  %v9772_v19 = vunpack.i.l.bf16 %v9771_v39  ;;  %v9924_v35 = vpack.i.bf16 %v2690_v20, %v13813_v36  ;;  %v3072_v44 = vsel %vm3070_vm12, %v3059_v1, %v9763_v0 }
 0x3ec   :  { %9895 = vrot.lane.b32.xlu1 %v9894_v9, %s10329_s23  ;;  %9915 = vrot.lane.b32.xlu0 %v9914_v50, %s10326_s16  ;;  %v9899_v52 = vpack.i.bf16 %v13812_v55, %v2283_v33  ;;  %v3084_v28 = vsel %vm3083_vm13, %v3071_v6, %v9767_v2  ;;  %v3085_v9 = vsel %vm3083_vm13, %v3072_v44, %v9768_v34  ;;  %v9788_v55 = vunpack.i.h.bf16 %v11791_v41  ;;  %v13820_v44 = vld [vmem:[#allocation27_spill] sm:$0xff]  ;;  %s10350_s16 = smov 100  }
 0x3ed   :  { %v13814_v10 = vcombine.high %v11611_v3, %v11608_v7  ;;  %v13815_v15 = vcombine.high %v11679_v58, %v11676_v47  ;;  %v3097_v33 = vsel %vm3096_vm14, %v3084_v28, %v9772_v19  ;;  %v3098_v42 = vsel %vm3096_vm14, %v3085_v9, %v9773_v38  ;;  %v13823_v28 = vld [vmem:[#allocation25_spill] sm:$0xff]  ;;  %v13824_v9 = vld [vmem:[#allocation26_spill] sm:$0xff] }
 0x3ee   :  { %v9776_v60 = vpop.permute.xlu1 %9775  ;;  %v11835_v0 = vrot.slane %v2640_v40, %v10582_v45  ;;  %v2555_v7 = vcombine.low %v11664_v12, %v11673_v32  ;;  %v13816_v47 = vcombine.high %v11411_v49, %v11408_v21  ;;  %v13817_v61 = vcombine.high %v11519_v46, %v11526_v57 }
 0x3ef   :  { %v9778_v31 = vunpack.i.h.bf16 %v9776_v60  ;;  %v9777_v25 = vunpack.i.l.bf16 %v9776_v60  ;;  %v9791_v48 = vpop.permute.xlu0 %9790  ;;  %v11825_v26 = vrot.slane %v13814_v10, %v10582_v45  ;;  %v2246_v63 = vrot.slane %v13815_v15, %v10582_v45 }
 0x3f0   :  { %9900 = vrot.lane.b32.xlu1 %v9899_v52, %s10328_s22  ;;  %9925 = vrot.lane.b32.xlu0 %v9924_v35, %s10329_s23  ;;  %v2382_v58 = vrot.slane %v13816_v47, %v10582_v45  ;;  %v9909_v51 = vpack.i.bf16 %v13817_v61, %v2284_v13  ;;  %v13818_v20 = vcombine.high %v11597_v37, %v11594_v17  ;;  %v13819_v46 = vmov 0.0|0.0   ;;  %s10353_s23 = smov 93  }
 0x3f1   :  { %v3110_v3 = vsel %vm3109_vm15, %v3097_v33, %v9777_v25  ;;  %v3111_v24 = vsel %vm3109_vm15, %v3098_v42, %v9778_v31  ;;  %v2285_v39 = vcombine.low %v2246_v63, %v2278_v5  ;;  %v9934_v2 = vpack.i.bf16 %v2691_v53, %v2555_v7  ;;  %v13821_v31 = vld [vmem:[#allocation28_spill] sm:$0xff] }
 0x3f2   :  { %v9475_v29 = vpack.c.bf16 %v3111_v24, %v3110_v3  ;;  %v2518_v1 = vrot.slane %v13818_v20, %v10582_v45  ;;  %v2693_v11 = vcombine.low %v11835_v0, %v11804_v8  ;;  %v2421_v21 = vcombine.low %v2382_v58, %v11529_v30  ;;  %v342_v3 = vld [vmem:[%s10405_s8 + $0x10] sm:$0xff] }
 0x3f3   :  { %v9796_v34 = vpop.permute.xlu0 %9795  ;;  %v2286_v17 = vcombine.high %v2246_v63, %v2278_v5  ;;  %v9783_v38 = vunpack.i.h.bf16 %v11768_v18  ;;  %v9782_v19 = vunpack.i.l.bf16 %v11768_v18  ;;  %v2422_v40 = vcombine.high %v2382_v58, %v11529_v30  ;;  %v340_v5 = vld [vmem:[%s10405_s8] sm:$0xff] }
 0x3f4   :  { %9910 = vrot.lane.b32.xlu1 %v9909_v51, %s10330_s26  ;;  %9476 = vmatpush3.bf16.msra.mxu1 %v9475_v29  ;;  %v2557_v49 = vcombine.low %v2518_v1, %v11825_v26  ;;  %v9919_v57 = vpack.i.bf16 %v2421_v21, %v2285_v39  ;;  %v9787_v52 = vunpack.i.l.bf16 %v11791_v41  ;;  %v9793_v13 = vunpack.i.h.bf16 %v9791_v48 }
 0x3f5   :  { %9935 = vrot.lane.b32.xlu0 %v9934_v2, %s10328_s22  ;;  %9477 = vmatprep.subr.bf16.mxu1 %v13819_v46  ;;  %v9792_v60 = vunpack.i.l.bf16 %v9791_v48  ;;  %v9929_v36 = vpack.i.bf16 %v2422_v40, %v2286_v17  ;;  %v2692_v35 = vcombine.high %v11798_v59, %v11782_v14  ;;  %v9798_v53 = vunpack.i.h.bf16 %v9796_v34  ;;  %s10352_s22 = smov 86  }
 0x3f6   :  { %v9944_v50 = vpack.i.bf16 %v2693_v11, %v2557_v49  ;;  %v9797_v6 = vunpack.i.l.bf16 %v9796_v34  ;;  %v2556_v30 = vcombine.high %v11664_v12, %v11673_v32  ;;  %v13822_v25 = vcombine.low %v13820_v44, %v13821_v31  ;;  %v13830_v44 = vld [vmem:[#allocation30_spill] sm:$0xff] }
 0x3f7   :  { %v9801_v37 = vpop.permute.xlu0 %9800  ;;  %v13825_v48 = vcombine.low %v13823_v28, %v13824_v9  ;;  %v2694_v24 = vcombine.high %v11835_v0, %v11804_v8  ;;  %v2558_v51 = vcombine.high %v2518_v1, %v11825_v26  ;;  %v341_v26 = vld [vmem:[%s10405_s8 + $0x8] sm:$0xff]  ;;  %s10334_s8 = smov 119  }
 0x3f8   :  { %9920 = vrot.lane.b32.xlu1 %v9919_v57, %s10331_s28  ;;  %v3035_v41 = vsel %vm3031_vm9, %v13822_v25, %v9783_v38  ;;  %v9803_v15 = vunpack.i.h.bf16 %v9801_v37  ;;  %v9802_v63 = vunpack.i.l.bf16 %v9801_v37  ;;  %v9939_v7 = vpack.i.bf16 %v2692_v35, %v2556_v30  ;;  %v13826_v35 = vld [vmem:[#allocation34_spill] sm:$0xff]  ;;  %v13829_v30 = vld [vmem:[#allocation29_spill] sm:$0xff] }
 0x3f9   :  { %9945 = vrot.lane.b32.xlu0 %v9944_v50, %s10331_s28  ;;  %v3034_v10 = vsel %vm3031_vm9, %v13825_v48, %v9782_v19  ;;  %v3048_v59 = vsel %vm3044_vm10, %v3035_v41, %v9788_v55  ;;  %v9949_v0 = vpack.i.bf16 %v2694_v24, %v2558_v51  ;;  %v13831_v31 = vcombine.low %v13829_v30, %v13830_v44  ;;  %s13854_s28 = sld [smem:[#allocation7_spill]] }
 0x3fa   :  { %v3047_v14 = vsel %vm3044_vm10, %v3034_v10, %v9787_v52  ;;  %v3061_v42 = vsel %vm3057_vm11, %v3048_v59, %v9793_v13 }
 0x3fb   :  { %v9806_v18 = vpop.permute.xlu0 %9805  ;;  %v3060_v32 = vsel %vm3057_vm11, %v3047_v14, %v9792_v60  ;;  %v3074_v58 = vsel %vm3070_vm12, %v3061_v42, %v9798_v53  ;;  %v13827_v53 = vld [vmem:[#allocation35_spill] sm:$0xff] }
 0x3fc   :  { %9930 = vrot.lane.b32.xlu1 %v9929_v36, %s10332_s1  ;;  %v9808_v33 = vunpack.i.h.bf16 %v9806_v18  ;;  %v9807_v12 = vunpack.i.l.bf16 %v9806_v18  ;;  %v3073_v47 = vsel %vm3070_vm12, %v3060_v32, %v9797_v6  ;;  %v3087_v39 = vsel %vm3083_vm13, %v3074_v58, %v9803_v15 }
 0x3fd   :  { %3124 = vperm.xlu0 %9742, %v340_v5   ;;  %v3086_v29 = vsel %vm3083_vm13, %v3073_v47, %v9802_v63  ;;  %v13828_v6 = vcombine.low %v13826_v35, %v13827_v53 }
 0x3fe   :  { %v3099_v2 = vsel %vm3096_vm14, %v3086_v29, %v9807_v12  ;;  %v3100_v8 = vsel %vm3096_vm14, %v3087_v39, %v9808_v33 }
 0x3ff   :  { %v9811_v61 = vpop.permute.xlu0 %9810 }
 0x400   :  { %v9813_v20 = vunpack.i.h.bf16 %v9811_v61  ;;  %v9812_v34 = vunpack.i.l.bf16 %v9811_v61  ;;  %9940 = vrot.lane.b32.xlu1 %v9939_v7, %s10330_s26  ;;  %s10354_s26 = smov 79  }
 0x401   :  { %3134 = vperm.xlu0 %9742, %v342_v3  }
 0x402   :  { %v3112_v11 = vsel %vm3109_vm15, %v3099_v2, %v9812_v34  ;;  %v3113_v21 = vsel %vm3109_vm15, %v3100_v8, %v9813_v20 }
 0x403   :  { %v9478_v49 = vpack.c.bf16 %v3113_v21, %v3112_v11 }
 0x404   :  { %9950 = vrot.lane.b32.xlu1 %v9949_v0, %s10332_s1  ;;  %s13855_s1 = sld [smem:[#allocation11_spill]] }
 0x405   :  { %9479 = vmatpush3.bf16.msra.mxu1 %v9478_v49 }
 0x406   :  { %9480 = vmatprep.subr.bf16.mxu1 %v13819_v46 }
 0x408   :  { %3129 = vperm.xlu1 %9743, %v341_v26  }
 0x41a   :  { %v9816_v1 = vpop.permute.xlu0 %9815 }
 0x41b   :  { %v9818_v38 = vunpack.i.h.bf16 %v9816_v1  ;;  %v9817_v19 = vunpack.i.l.bf16 %v9816_v1 }
 0x41d   :  { %v3039_v18 = vsel %vm3031_vm9, %v13828_v6, %v9818_v38  ;;  %v3038_v25 = vsel %vm3031_vm9, %v13831_v31, %v9817_v19  ;;  %v13833_v38 = vcombine.low %v11472_v4, %v11475_v62 }
 0x41e   :  { %v9821_v57 = vpop.permute.xlu0 %9820 }
 0x41f   :  { %v9823_v40 = vunpack.i.h.bf16 %v9821_v57  ;;  %v9822_v55 = vunpack.i.l.bf16 %v9821_v57 }
 0x421   :  { %v3051_v9 = vsel %vm3044_vm10, %v3038_v25, %v9822_v55  ;;  %v3052_v48 = vsel %vm3044_vm10, %v3039_v18, %v9823_v40 }
 0x422   :  { %v9826_v17 = vpop.permute.xlu0 %9825 }
 0x423   :  { %v9828_v52 = vunpack.i.h.bf16 %v9826_v17  ;;  %v9827_v13 = vunpack.i.l.bf16 %v9826_v17 }
 0x425   :  { %v3064_v63 = vsel %vm3057_vm11, %v3051_v9, %v9827_v13  ;;  %v3065_v14 = vsel %vm3057_vm11, %v3052_v48, %v9828_v52 }
 0x426   :  { %v9831_v37 = vpop.permute.xlu0 %9830 }
 0x427   :  { %v9833_v60 = vunpack.i.h.bf16 %v9831_v37  ;;  %v9832_v36 = vunpack.i.l.bf16 %v9831_v37  ;;  %v13832_v37 = vcombine.low %v11272_v54, %v11275_v56 }
 0x429   :  { %v3077_v59 = vsel %vm3070_vm12, %v3064_v63, %v9832_v36  ;;  %v3078_v33 = vsel %vm3070_vm12, %v3065_v14, %v9833_v60 }
 0x42a   :  { %v9836_v50 = vpop.permute.xlu0 %9835 }
 0x42b   :  { %v9838_v41 = vunpack.i.h.bf16 %v9836_v50  ;;  %v9837_v28 = vunpack.i.l.bf16 %v9836_v50 }
 0x42d   :  { %v3090_v32 = vsel %vm3083_vm13, %v3077_v59, %v9837_v28  ;;  %v3091_v42 = vsel %vm3083_vm13, %v3078_v33, %v9838_v41 }
 0x42e   :  { %v9841_v5 = vpop.permute.xlu0 %9840 }
 0x42f   :  { %v9843_v10 = vunpack.i.h.bf16 %v9841_v5  ;;  %v9842_v15 = vunpack.i.l.bf16 %v9841_v5 }
 0x431   :  { %v3103_v24 = vsel %vm3096_vm14, %v3090_v32, %v9842_v15  ;;  %v3104_v47 = vsel %vm3096_vm14, %v3091_v42, %v9843_v10 }
 0x432   :  { %v9846_v12 = vpop.permute.xlu0 %9845 }
 0x433   :  { %v9848_v7 = vunpack.i.h.bf16 %v9846_v12  ;;  %v9847_v3 = vunpack.i.l.bf16 %v9846_v12 }
 0x435   :  { %v3116_v58 = vsel %vm3109_vm15, %v3103_v24, %v9847_v3  ;;  %v3117_v61 = vsel %vm3109_vm15, %v3104_v47, %v9848_v7  ;;  %v13834_v24 = vcombine.low %v13798_v27, %v13797_v22 }
 0x436   :  { %v9484_v51 = vpack.c.bf16 %v3117_v61, %v3116_v58  ;;  %v13835_v58 = vcombine.low %v11617_v23, %v11620_v16 }
 0x43a   :  { %v9851_v29 = vpop.permute.xlu1 %9850 }
 0x43b   :  { %v9853_v8 = vunpack.i.h.bf16 %v9851_v29  ;;  %v9852_v0 = vunpack.i.l.bf16 %v9851_v29 }
 0x43d   :  { %v3036_v50 = vsel %vm3031_vm9, %v13832_v37, %v9852_v0  ;;  %v3037_v19 = vsel %vm3031_vm9, %v13833_v38, %v9853_v8 }
 0x43e   :  { %v9856_v39 = vpop.permute.xlu1 %9855 }
 0x43f   :  { %v9858_v11 = vunpack.i.h.bf16 %v9856_v39  ;;  %v9857_v21 = vunpack.i.l.bf16 %v9856_v39 }
 0x441   :  { %v3049_v52 = vsel %vm3044_vm10, %v3036_v50, %v9857_v21  ;;  %v3050_v13 = vsel %vm3044_vm10, %v3037_v19, %v9858_v11 }
 0x442   :  { %v9861_v20 = vpop.permute.xlu1 %9860 }
 0x443   :  { %v9863_v49 = vunpack.i.h.bf16 %v9861_v20  ;;  %v9862_v26 = vunpack.i.l.bf16 %v9861_v20 }
 0x445   :  { %v3062_v5 = vsel %vm3057_vm11, %v3049_v52, %v9862_v26  ;;  %v3063_v35 = vsel %vm3057_vm11, %v3050_v13, %v9863_v49 }
 0x446   :  { %v9866_v34 = vpop.permute.xlu1 %9865 }
 0x447   :  { %v9868_v1 = vunpack.i.h.bf16 %v9866_v34  ;;  %v9867_v57 = vunpack.i.l.bf16 %v9866_v34 }
 0x449   :  { %v3075_v54 = vsel %vm3070_vm12, %v3062_v5, %v9867_v57  ;;  %v3076_v56 = vsel %vm3070_vm12, %v3063_v35, %v9868_v1  ;;  %v13836_v5 = vld [vmem:[#allocation32_spill] sm:$0xff] }
 0x44a   :  { %v9871_v2 = vpop.permute.xlu1 %9870  ;;  %v13837_v35 = vcombine.low %v11725_v43, %v13836_v5 }
 0x44b   :  { %v9873_v40 = vunpack.i.h.bf16 %v9871_v2  ;;  %v9872_v55 = vunpack.i.l.bf16 %v9871_v2 }
 0x44d   :  { %v3088_v4 = vsel %vm3083_vm13, %v3075_v54, %v9872_v55  ;;  %v3089_v62 = vsel %vm3083_vm13, %v3076_v56, %v9873_v40  ;;  %v13838_v56 = vld [vmem:[#allocation37_spill] sm:$0xff] }
 0x44e   :  { %v9876_v17 = vpop.permute.xlu1 %9875 }
 0x44f   :  { %v9878_v60 = vunpack.i.h.bf16 %v9876_v17  ;;  %v9877_v36 = vunpack.i.l.bf16 %v9876_v17 }
 0x451   :  { %v3101_v30 = vsel %vm3096_vm14, %v3088_v4, %v9877_v36  ;;  %v3102_v44 = vsel %vm3096_vm14, %v3089_v62, %v9878_v60 }
 0x452   :  { %v9881_v53 = vpop.permute.xlu1 %9880 }
 0x453   :  { %v9883_v6 = vunpack.i.h.bf16 %v9881_v53  ;;  %v9882_v18 = vunpack.i.l.bf16 %v9881_v53  ;;  %v13839_v53 = vld [vmem:[#allocation38_spill] sm:$0xff] }
 0x454   :  { %v13840_v4 = vcombine.low %v13838_v56, %v13839_v53 }
 0x455   :  { %v3114_v31 = vsel %vm3109_vm15, %v3101_v30, %v9882_v18  ;;  %v3115_v25 = vsel %vm3109_vm15, %v3102_v44, %v9883_v6 }
 0x456   :  { %v9886_v41 = vpop.permute.xlu1 %9885  ;;  %v9481_v28 = vpack.c.bf16 %v3115_v25, %v3114_v31 }
 0x457   :  { %v9888_v14 = vunpack.i.h.bf16 %v9886_v41  ;;  %v9887_v59 = vunpack.i.l.bf16 %v9886_v41 }
 0x458   :  { %9482 = vmatpush3.bf16.msra.mxu1 %v9481_v28 }
 0x459   :  { %9483 = vmatprep.subr.bf16.mxu1 %v13819_v46  ;;  %v3041_v47 = vsel %vm3031_vm9, %v13834_v24, %v9888_v14  ;;  %v3040_v61 = vsel %vm3031_vm9, %v13835_v58, %v9887_v59 }
 0x45a   :  { %v9891_v9 = vpop.permute.xlu1 %9890  ;;  %v9906_v48 = vpop.permute.xlu0 %9905 }
 0x45b   :  { %v9893_v32 = vunpack.i.h.bf16 %v9891_v9  ;;  %v9892_v42 = vunpack.i.l.bf16 %v9891_v9  ;;  %v9908_v20 = vunpack.i.h.bf16 %v9906_v48  ;;  %v9907_v34 = vunpack.i.l.bf16 %v9906_v48 }
 0x45c   :  { %9485 = vmatpush3.bf16.msra.mxu1 %v9484_v51 }
 0x45d   :  { %9486 = vmatprep.subr.bf16.mxu1 %v13819_v46  ;;  %v3053_v0 = vsel %vm3044_vm10, %v3040_v61, %v9892_v42  ;;  %v3054_v11 = vsel %vm3044_vm10, %v3041_v47, %v9893_v32  ;;  %v3043_v54 = vsel %vm3031_vm9, %v13837_v35, %v9908_v20  ;;  %v3042_v62 = vsel %vm3031_vm9, %v13840_v4, %v9907_v34  ;;  %v337_v61 = vld [vmem:[%s10400_s3] sm:$0xff] }
 0x45e   :  { %v9896_v10 = vpop.permute.xlu1 %9895  ;;  %v9916_v15 = vpop.permute.xlu0 %9915  ;;  %vm5482_vm9 = vcmask 285696  }
 0x45f   :  { %v9898_v7 = vunpack.i.h.bf16 %v9896_v10  ;;  %v9897_v3 = vunpack.i.l.bf16 %v9896_v10  ;;  %v9918_v23 = vunpack.i.h.bf16 %v9916_v15  ;;  %v9917_v16 = vunpack.i.l.bf16 %v9916_v15 }
 0x461   :  { %v3066_v27 = vsel %vm3057_vm11, %v3053_v0, %v9897_v3  ;;  %v3067_v49 = vsel %vm3057_vm11, %v3054_v11, %v9898_v7  ;;  %v3055_v30 = vsel %vm3044_vm10, %v3042_v62, %v9917_v16  ;;  %v3056_v44 = vsel %vm3044_vm10, %v3043_v54, %v9918_v23 }
 0x462   :  { %v9901_v63 = vpop.permute.xlu1 %9900  ;;  %v9926_v12 = vpop.permute.xlu0 %9925  ;;  %vm5492_vm10 = vcmask 343040  }
 0x463   :  { %v9903_v51 = vunpack.i.h.bf16 %v9901_v63  ;;  %v9902_v29 = vunpack.i.l.bf16 %v9901_v63  ;;  %v9928_v17 = vunpack.i.h.bf16 %v9926_v12  ;;  %v9927_v37 = vunpack.i.l.bf16 %v9926_v12 }
 0x465   :  { %v3079_v1 = vsel %vm3070_vm12, %v3066_v27, %v9902_v29  ;;  %v3080_v57 = vsel %vm3070_vm12, %v3067_v49, %v9903_v51  ;;  %v3068_v41 = vsel %vm3057_vm11, %v3055_v30, %v9927_v37  ;;  %v3069_v43 = vsel %vm3057_vm11, %v3056_v44, %v9928_v17  ;;  %v338_v29 = vld [vmem:[%s10400_s3 + $0x8] sm:$0xff]  ;;  %v346_v17 = vld [vmem:[%s10415_s19] sm:$0xff]  ;;  %v348_v30 = vld [vmem:[%s10415_s19 + $0x10] sm:$0xff] }
 0x466   :  { %v9911_v33 = vpop.permute.xlu1 %9910  ;;  %v13841_v51 = vmov 0.0   ;;  %v344_v37 = vld [vmem:[%s10410_s14 + $0x8] sm:$0xff]  ;;  %vm5502_vm11 = vcmask 400384  }
 0x467   :  { %v9913_v2 = vunpack.i.h.bf16 %v9911_v33  ;;  %v9912_v8 = vunpack.i.l.bf16 %v9911_v33  ;;  %v9936_v26 = vpop.permute.xlu0 %9935 }
 0x468   :  { %v9938_v52 = vunpack.i.h.bf16 %v9936_v26  ;;  %v9937_v13 = vunpack.i.l.bf16 %v9936_v26 }
 0x469   :  { %v3092_v38 = vsel %vm3083_vm13, %v3079_v1, %v9912_v8  ;;  %v3093_v19 = vsel %vm3083_vm13, %v3080_v57, %v9913_v2 }
 0x46a   :  { %v9921_v39 = vpop.permute.xlu1 %9920  ;;  %v3081_v10 = vsel %vm3070_vm12, %v3068_v41, %v9937_v13  ;;  %v3082_v15 = vsel %vm3070_vm12, %v3069_v43, %v9938_v52  ;;  %vm6483_vm12 = vcmask 130048  }
 0x46b   :  { %v9923_v21 = vunpack.i.h.bf16 %v9921_v39  ;;  %v9922_v22 = vunpack.i.l.bf16 %v9921_v39  ;;  %v9946_v28 = vpop.permute.xlu0 %9945  ;;  %v339_v39 = vld [vmem:[%s10400_s3 + $0x10] sm:$0xff]  ;;  %s10333_s3 = smov 110  }
 0x46c   :  { %v9948_v59 = vunpack.i.h.bf16 %v9946_v28  ;;  %v9947_v33 = vunpack.i.l.bf16 %v9946_v28 }
 0x46d   :  { %v3105_v60 = vsel %vm3096_vm14, %v3092_v38, %v9922_v22  ;;  %v3106_v36 = vsel %vm3096_vm14, %v3093_v19, %v9923_v21  ;;  %v345_v38 = vld [vmem:[%s10410_s14 + $0x10] sm:$0xff] }
 0x46e   :  { %v9931_v50 = vpop.permute.xlu1 %9930 }
 0x46f   :  { %v9933_v40 = vunpack.i.h.bf16 %v9931_v50  ;;  %v9932_v55 = vunpack.i.l.bf16 %v9931_v50  ;;  %v343_v50 = vld [vmem:[%s10410_s14] sm:$0xff]  ;;  %s10335_s14 = smov 101  }
 0x471   :  { %v3118_v6 = vsel %vm3109_vm15, %v3105_v60, %v9932_v55  ;;  %v3119_v18 = vsel %vm3109_vm15, %v3106_v36, %v9933_v40 }
 0x472   :  { %v9941_v31 = vpop.permute.xlu1 %9940  ;;  %v9487_v25 = vpack.c.bf16 %v3119_v18, %v3118_v6  ;;  %v347_v18 = vld [vmem:[%s10415_s19 + $0x8] sm:$0xff]  ;;  %s10336_s19 = smov 74  }
 0x473   :  { %v9943_v9 = vunpack.i.h.bf16 %v9941_v31  ;;  %v9942_v48 = vunpack.i.l.bf16 %v9941_v31 }
 0x474   :  { %9488 = vmatpush3.bf16.msra.mxu1 %v9487_v25 }
 0x475   :  { %v3094_v63 = vsel %vm3083_vm13, %v3081_v10, %v9942_v48  ;;  %v3095_v14 = vsel %vm3083_vm13, %v3082_v15, %v9943_v9  ;;  %9489 = vmatprep.subr.bf16.mxu1 %v13819_v46  ;;  %vm6797_vm13 = vcmask 257024  }
 0x476   :  { %v9951_v12 = vpop.permute.xlu1 %9950  ;;  %v3107_v7 = vsel %vm3096_vm14, %v3094_v63, %v9947_v33  ;;  %v3108_v3 = vsel %vm3096_vm14, %v3095_v14, %v9948_v59  ;;  %vm6659_vm14 = vcmask 261120  }
 0x477   :  { %v9953_v32 = vunpack.i.h.bf16 %v9951_v12  ;;  %v9952_v42 = vunpack.i.l.bf16 %v9951_v12 }
 0x479   :  { %v3120_v24 = vsel %vm3109_vm15, %v3107_v7, %v9952_v42  ;;  %v3121_v47 = vsel %vm3109_vm15, %v3108_v3, %v9953_v32  ;;  %vm5616_vm15 = vcmask 457728  }
 0x47a   :  { %v9490_v58 = vpack.c.bf16 %v3121_v47, %v3120_v24 }
 0x47c   :  { %9491 = vmatpush3.bf16.msra.mxu1 %v9490_v58  ;;  %v3125_v20 = vpop.permute.xlu0 %3124 }
 0x47f   :  { %9219 = vmatmul.mubr.msk.f32.vlgmr.msra.gmra.mrb[0].mxu1 %vm251_vm5, %v337_v61 }
 0x480   :  { %9221 = vmatprep.mubr.msk.f32.mxu1 %vm10310_vm0, %v13841_v51  ;;  %v3135_v23 = vpop.permute.xlu0 %3134 }
 0x483   :  { %9222 = vmatmul.mubr.msk.f32.gmra.mrb[2].mxu1 %vm251_vm5, %v338_v29 }
 0x484   :  { %9224 = vmatprep.mubr.msk.f32.mxu1 %vm10310_vm0, %v13841_v51 }
 0x487   :  { %9225 = vmatmul.mubr.msk.f32.gmra.mrb[4].mxu1 %vm251_vm5, %v339_v39  ;;  %v3130_v11 = vpop.permute.xlu1 %3129  ;;  %vm5442_vm5 = vcmask 56320  }
 0x552   :  { %v3212_v34 = vpop.f32.mrb[0].mxu1 }
 0x553   :  { %v3213_v2 = vadd.f32 %v3212_v34, %v3125_v20  ;;  %v9220_v8 = vpop.f32.mrb[1].mxu1 }
 0x555   :  { %v3227_v0 = vsel %vm3226_vm1, %v3213_v2, 0.0 }
 0x556   :  { %3228 = vadd.xlane.f32.xlu1 %v3227_v0  ;;  %v3217_v21 = vpop.f32.mrb[2].mxu1 }
 0x557   :  { %v3218_v22 = vadd.f32 %v3217_v21, %v3130_v11  ;;  %v9223_v27 = vpop.f32.mrb[3].mxu1 }
 0x559   :  { %v3230_v49 = vsel %vm3226_vm1, %v3218_v22, 0.0 }
 0x55a   :  { %3231 = vadd.xlane.f32.xlu0 %v3230_v49  ;;  %v3222_v16 = vpop.f32.mrb[4].mxu1 }
 0x55b   :  { %v3223_v26 = vadd.f32 %v3222_v16, %v3135_v23  ;;  %v9226_v1 = vpop.f32.mrb[5].mxu1 }
 0x55d   :  { %v3233_v57 = vsel %vm3226_vm1, %v3223_v26, 0.0 }
 0x55e   :  { %3234 = vadd.xlane.f32.xlu0 %v3233_v57 }
 0x567   :  { %3287 = vperm.xlu1 %9743, %v346_v17  }
 0x56b   :  { %3274 = vperm.xlu1 %9743, %v344_v37   ;;  %v13842_v37 = vld [vmem:[#allocation20_spill] sm:$0xff] }
 0x574   :  { %3269 = vperm.xlu0 %9742, %v343_v50  }
 0x578   :  { %3279 = vperm.xlu0 %9742, %v345_v38  }
 0x5e3   :  { %v3229_v19 = vpop.xlane.xlu1 %3228 }
 0x5e4   :  { %v3237_v40 = vmul.f32 0.013888889, %v3229_v19 }
 0x5e6   :  { %v3240_v55 = vsub.f32 %v3213_v2, %v3237_v40 }
 0x5e7   :  { %v3232_v52 = vpop.xlane.xlu0 %3231  ;;  %v3288_v44 = vpop.permute.xlu1 %3287 }
 0x5e8   :  { %v3238_v13 = vmul.f32 0.013888889, %v3232_v52  ;;  %v3243_v60 = vmul.f32 %v3240_v55, %v3240_v55 }
 0x5ea   :  { %v3241_v36 = vsub.f32 %v3218_v22, %v3238_v13  ;;  %v3246_v5 = vsel %vm3226_vm1, %v3243_v60, 0.0 }
 0x5eb   :  { %3247 = vadd.xlane.f32.xlu1 %v3246_v5  ;;  %v3235_v35 = vpop.xlane.xlu0 %3234  ;;  %v3275_v25 = vpop.permute.xlu1 %3274 }
 0x5ec   :  { %v3239_v54 = vmul.f32 0.013888889, %v3235_v35  ;;  %v3244_v56 = vmul.f32 %v3241_v36, %v3241_v36 }
 0x5ee   :  { %v3242_v53 = vsub.f32 %v3223_v26, %v3239_v54  ;;  %v3249_v4 = vsel %vm3226_vm1, %v3244_v56, 0.0 }
 0x5ef   :  { %3250 = vadd.xlane.f32.xlu0 %v3249_v4 }
 0x5f0   :  { %v3245_v62 = vmul.f32 %v3242_v53, %v3242_v53 }
 0x5f2   :  { %v3252_v6 = vsel %vm3226_vm1, %v3245_v62, 0.0 }
 0x5f3   :  { %3253 = vadd.xlane.f32.xlu1 %v3252_v6  ;;  %v3270_v31 = vpop.permute.xlu0 %3269 }
 0x5f7   :  { %v3280_v41 = vpop.permute.xlu0 %3279 }
 0x604   :  { %3292 = vperm.xlu1 %9743, %v347_v18  }
 0x605   :  { %3297 = vperm.xlu0 %9742, %v348_v30  }
 0x678   :  { %v3248_v43 = vpop.xlane.xlu1 %3247 }
 0x679   :  { %v3255_v28 = vmul.f32 0.013888889, %v3248_v43 }
 0x67b   :  { %v3258_v9 = vadd.f32 1e-05, %v3255_v28 }
 0x67c   :  { %v3251_v48 = vpop.xlane.xlu0 %3250 }
 0x67d   :  { %10100 = vrsqrt.f32 %v3258_v9  ;;  %v3256_v10 = vmul.f32 0.013888889, %v3251_v48 }
 0x67f   :  { %v3259_v15 = vadd.f32 1e-05, %v3256_v10 }
 0x680   :  { %v3254_v63 = vpop.xlane.xlu1 %3253 }
 0x681   :  { %10102 = vrsqrt.f32 %v3259_v15  ;;  %v3257_v14 = vmul.f32 0.013888889, %v3254_v63 }
 0x683   :  { %v3260_v59 = vadd.f32 1e-05, %v3257_v14 }
 0x684   :  { %v3293_v39 = vpop.permute.xlu1 %3292  ;;  %v3298_v2 = vpop.permute.xlu0 %3297 }
 0x685   :  { %10104 = vrsqrt.f32 %v3260_v59 }
 0x687   :  { %v10101_v33 = vpop.eup %10100 }
 0x688   :  { %v3264_v12 = vmul.f32 %v10101_v33, %v3240_v55 }
 0x68a   :  { %v3282_v32 = vmul.f32 %v3270_v31, %v3264_v12 }
 0x68b   :  { %v10103_v42 = vpop.eup %10102 }
 0x68c   :  { %v3300_v7 = vadd.f32 %v3288_v44, %v3282_v32  ;;  %v3265_v3 = vmul.f32 %v10103_v42, %v3241_v36 }
 0x68e   :  { %v3306_v24 = vmul.f32 0.01, %v3300_v7  ;;  %vm3303_vm2 = vcmp.gt.f32.partialorder %v3300_v7, 0.0  ;;  %v3283_v58 = vmul.f32 %v3275_v25, %v3265_v3 }
 0x68f   :  { %v10105_v47 = vpop.eup %10104 }
 0x690   :  { %v3266_v61 = vmul.f32 %v10105_v47, %v3242_v53  ;;  %v3309_v29 = vsel %vm3303_vm2, %v3300_v7, %v3306_v24  ;;  %v3301_v20 = vadd.f32 %v3293_v39, %v3283_v58 }
 0x691   :  { %3336 = vrot.lane.b32.xlu0 %v3309_v29, %s10333_s3  ;;  %3327 = vrot.lane.b32.xlu1 %v3309_v29, %s10334_s8 }
 0x692   :  { %v3284_v34 = vmul.f32 %v3280_v41, %v3266_v61  ;;  %v3307_v8 = vmul.f32 0.01, %v3301_v20  ;;  %vm3304_vm3 = vcmp.gt.f32.partialorder %v3301_v20, 0.0 }
 0x694   :  { %v3302_v0 = vadd.f32 %v3298_v2, %v3284_v34  ;;  %v12007_v11 = vsel %vm3304_vm3, %v3301_v20, %v3307_v8 }
 0x695   :  { %3354 = vrot.lane.b32.xlu0 %v3309_v29, %s10317_s21  ;;  %3345 = vrot.lane.b32.xlu1 %v3309_v29, %s10335_s14 }
 0x696   :  { %v3308_v21 = vmul.f32 0.01, %v3302_v0  ;;  %vm3305_vm4 = vcmp.gt.f32.partialorder %v3302_v0, 0.0 }
 0x698   :  { %v12010_v22 = vsel %vm3305_vm4, %v3302_v0, %v3308_v21  ;;  %vm6395_vm4 = vcmask 1041409  }
 0x699   :  { %3372 = vrot.lane.b32.xlu0 %v3309_v29, %s10336_s19  ;;  %3363 = vrot.lane.b32.xlu1 %v3309_v29, %s10337_s2 }
 0x69d   :  { %3381 = vrot.lane.b32.xlu1 %v3309_v29, %s10338_s0  ;;  %3329 = vrot.lane.b32.xlu0 %v12007_v11, %s10334_s8 }
 0x6a1   :  { %3338 = vrot.lane.b32.xlu0 %v12007_v11, %s10333_s3  ;;  %3331 = vrot.lane.b32.xlu1 %v12010_v22, %s10334_s8  ;;  %s13856_s8 = sld [smem:[#allocation15_spill]] }
 0x6a5   :  { %3347 = vrot.lane.b32.xlu0 %v12007_v11, %s10335_s14  ;;  %3340 = vrot.lane.b32.xlu1 %v12010_v22, %s10333_s3  ;;  %s10355_s3 = smov 24  }
 0x6a9   :  { %3356 = vrot.lane.b32.xlu0 %v12007_v11, %s10317_s21  ;;  %3349 = vrot.lane.b32.xlu1 %v12010_v22, %s10335_s14  ;;  %s13857_s14 = sld [smem:[#allocation17_spill]] }
 0x6ad   :  { %3365 = vrot.lane.b32.xlu0 %v12007_v11, %s10337_s2  ;;  %3358 = vrot.lane.b32.xlu1 %v12010_v22, %s10317_s21  ;;  %s10341_s21 = smov 28  }
 0x6b1   :  { %3374 = vrot.lane.b32.xlu0 %v12007_v11, %s10336_s19  ;;  %3367 = vrot.lane.b32.xlu1 %v12010_v22, %s10337_s2  ;;  %s13859_s2 = sld [smem:[#allocation13_spill]] }
 0x6b5   :  { %3383 = vrot.lane.b32.xlu0 %v12007_v11, %s10338_s0  ;;  %3376 = vrot.lane.b32.xlu1 %v12010_v22, %s10336_s19  ;;  %s13858_s19 = sld [smem:[#allocation12_spill]] }
 0x6b9   :  { %3385 = vrot.lane.b32.xlu1 %v12010_v22, %s10338_s0  ;;  %s13860_s0 = sld [smem:[#allocation14_spill]] }
 0x703   :  { %v3328_v27 = vpop.permute.xlu1 %3327  ;;  %v3337_v49 = vpop.permute.xlu0 %3336 }
 0x704   :  { %v3390_v23 = vcombine.low %v3309_v29, %v3337_v49  ;;  %v3391_v16 = vcombine.high %v3309_v29, %v3337_v49 }
 0x706   :  { %v3398_v50 = vrot.slane %v3390_v23, %v13842_v37  ;;  %v3405_v38 = vrot.slane %v3391_v16, %v13842_v37 }
 0x707   :  { %v3346_v26 = vpop.permute.xlu1 %3345  ;;  %v3355_v1 = vpop.permute.xlu0 %3354 }
 0x708   :  { %v3406_v57 = vcombine.low %v3328_v27, %v3346_v26  ;;  %v3407_v17 = vcombine.high %v3328_v27, %v3346_v26 }
 0x70a   :  { %v3414_v19 = vrot.slane %v3406_v57, %v13842_v37  ;;  %v3421_v40 = vrot.slane %v3407_v17, %v13842_v37 }
 0x70b   :  { %v3364_v55 = vpop.permute.xlu1 %3363  ;;  %v3373_v52 = vpop.permute.xlu0 %3372 }
 0x70c   :  { %v3454_v13 = vcombine.low %v3398_v50, %v3414_v19  ;;  %v3455_v60 = vcombine.high %v3398_v50, %v3414_v19  ;;  %v3470_v36 = vcombine.low %v3405_v38, %v3421_v40  ;;  %v3471_v5 = vcombine.high %v3405_v38, %v3421_v40 }
 0x70d   :  { %v3422_v35 = vcombine.low %v3355_v1, %v3373_v52  ;;  %v3423_v25 = vcombine.high %v3355_v1, %v3373_v52 }
 0x70e   :  { %v3462_v54 = vrot.slane %v3454_v13, %v10582_v45  ;;  %v3469_v56 = vrot.slane %v3455_v60, %v10582_v45  ;;  %v3478_v53 = vrot.slane %v3470_v36, %v10582_v45  ;;  %v12035_v4 = vrot.slane %v3471_v5, %v10582_v45 }
 0x70f   :  { %v3382_v62 = vpop.permute.xlu1 %3381  ;;  %v3330_v6 = vpop.permute.xlu0 %3329  ;;  %v3430_v28 = vrot.slane %v3422_v35, %v13842_v37  ;;  %v3437_v3 = vrot.slane %v3423_v25, %v13842_v37 }
 0x710   :  { %v3438_v18 = vcombine.low %v3364_v55, %v3382_v62  ;;  %v3439_v30 = vcombine.high %v3364_v55, %v3382_v62  ;;  %v8905_v44 = vcombine.low %v3462_v54, %v3469_v56  ;;  %v8907_v31 = vcombine.high %v3462_v54, %v3469_v56 }
 0x711   :  { %v8909_v41 = vcombine.low %v3478_v53, %v12035_v4  ;;  %v8911_v43 = vcombine.high %v3478_v53, %v12035_v4 }
 0x712   :  { %v3446_v9 = vrot.slane %v3438_v18, %v13842_v37  ;;  %v3974_v48 = vrot.slane %v8905_v44, %v13842_v37  ;;  %v3990_v10 = vrot.slane %v8907_v31, %v13842_v37  ;;  %v3453_v33 = vrot.slane %v3439_v30, %v13842_v37 }
 0x713   :  { %v12043_v15 = vpop.permute.xlu1 %3331  ;;  %v3339_v63 = vpop.permute.xlu0 %3338  ;;  %v4006_v14 = vrot.slane %v8909_v41, %v13842_v37  ;;  %v4022_v59 = vrot.slane %v8911_v43, %v13842_v37 }
 0x714   :  { %v3486_v12 = vcombine.low %v3430_v28, %v3446_v9  ;;  %v3487_v32 = vcombine.high %v3430_v28, %v3446_v9  ;;  %v4031_v42 = vcombine.high %v3974_v48, %v3990_v10  ;;  %v3502_v29 = vcombine.low %v3437_v3, %v3453_v33 }
 0x715   :  { %v4063_v7 = vcombine.high %v4006_v14, %v4022_v59  ;;  %v3503_v21 = vcombine.high %v3437_v3, %v3453_v33  ;;  %v3526_v57 = vcombine.low %v12007_v11, %v3339_v63  ;;  %v3527_v17 = vcombine.high %v12007_v11, %v3339_v63 }
 0x716   :  { %v12050_v24 = vrot.slane %v3486_v12, %v10582_v45  ;;  %v12055_v61 = vrot.slane %v3487_v32, %v10582_v45  ;;  %v12062_v34 = vrot.slane %v4031_v42, %v10582_v45  ;;  %v12073_v27 = vrot.slane %v3502_v29, %v10582_v45 }
 0x717   :  { %v12052_v47 = vpop.permute.xlu1 %3340  ;;  %v3348_v58 = vpop.permute.xlu0 %3347  ;;  %v12065_v2 = vrot.slane %v4063_v7, %v10582_v45  ;;  %v4030_v19 = vcombine.low %v3974_v48, %v3990_v10  ;;  %v12094_v40 = vrot.slane %v3503_v21, %v10582_v45  ;;  %v3534_v13 = vrot.slane %v3526_v57, %v13842_v37 }
 0x718   :  { %v3519_v39 = vcombine.high %v3462_v54, %v12050_v24  ;;  %v12059_v20 = vcombine.low %v3462_v54, %v12050_v24  ;;  %v3542_v49 = vcombine.low %v3330_v6, %v3348_v58  ;;  %v3543_v23 = vcombine.high %v3330_v6, %v3348_v58 }
 0x719   :  { %v12076_v16 = vcombine.high %v3469_v56, %v12055_v61  ;;  %v12079_v26 = vcombine.low %v3469_v56, %v12055_v61  ;;  %v4096_v1 = vcombine.low %v12062_v34, %v12065_v2  ;;  %v12099_v11 = vcombine.high %v3478_v53, %v12073_v27 }
 0x71a   :  { %3824 = vrot.lane.b32.xlu1 %v3519_v39, %s10323_s10  ;;  %3822 = vrot.lane.b32.xlu0 %v12059_v20, %s10323_s10  ;;  %v3550_v55 = vrot.slane %v3542_v49, %v13842_v37  ;;  %v3557_v52 = vrot.slane %v3543_v23, %v13842_v37  ;;  %v12103_v60 = vcombine.low %v3478_v53, %v12073_v27 }
 0x71b   :  { %v3350_v8 = vpop.permute.xlu1 %3349  ;;  %v12070_v0 = vpop.permute.xlu0 %3356  ;;  %v3541_v36 = vrot.slane %v3527_v17, %v13842_v37  ;;  %v12116_v62 = vcombine.high %v12035_v4, %v12094_v40  ;;  %v12119_v18 = vrot.slane %v4030_v19, %v10582_v45  ;;  %v4062_v30 = vcombine.low %v4006_v14, %v4022_v59 }
 0x71c   :  { %v3590_v54 = vcombine.low %v3534_v13, %v3550_v55  ;;  %v3591_v56 = vcombine.high %v3534_v13, %v3550_v55  ;;  %v3678_v44 = vcombine.low %v12043_v15, %v3350_v8  ;;  %v12124_v31 = vcombine.low %v12035_v4, %v12094_v40 }
 0x71d   :  { %v3606_v53 = vcombine.low %v3541_v36, %v3557_v52  ;;  %v3607_v6 = vcombine.high %v3541_v36, %v3557_v52  ;;  %v3662_v25 = vcombine.low %v12010_v22, %v12052_v47  ;;  %v12133_v28 = vrot.slane %v4062_v30, %v10582_v45 }
 0x71e   :  { %3828 = vrot.lane.b32.xlu1 %v12076_v16, %s10323_s10  ;;  %3826 = vrot.lane.b32.xlu0 %v12079_v26, %s10323_s10  ;;  %v8906_v9 = vcombine.low %v12050_v24, %v12055_v61  ;;  %v3663_v48 = vcombine.high %v12010_v22, %v12052_v47  ;;  %v12140_v4 = vrot.slane %v3590_v54, %v10582_v45 }
 0x71f   :  { %v12089_v50 = vpop.permute.xlu1 %3358  ;;  %v12091_v38 = vpop.permute.xlu0 %3365  ;;  %v12143_v10 = vrot.slane %v3591_v56, %v10582_v45  ;;  %v3679_v63 = vcombine.high %v12043_v15, %v3350_v8  ;;  %v12149_v14 = vrot.slane %v3606_v53, %v10582_v45  ;;  %v12152_v59 = vrot.slane %v3607_v6, %v10582_v45 }
 0x720   :  { %v4095_v22 = vcombine.high %v12119_v18, %v12133_v28  ;;  %v3686_v12 = vrot.slane %v3678_v44, %v13842_v37  ;;  %v12162_v42 = vrot.slane %v8906_v9, %v13842_v37  ;;  %v8908_v7 = vcombine.high %v12050_v24, %v12055_v61 }
 0x721   :  { %v8910_v3 = vcombine.low %v12073_v27, %v12094_v40  ;;  %v3670_v47 = vrot.slane %v3662_v25, %v13842_v37  ;;  %v3677_v58 = vrot.slane %v3663_v48, %v13842_v37  ;;  %v3693_v29 = vrot.slane %v3679_v63, %v13842_v37 }
 0x722   :  { %3832 = vrot.lane.b32.xlu1 %v12099_v11, %s10323_s10  ;;  %3830 = vrot.lane.b32.xlu0 %v12103_v60, %s10323_s10  ;;  %v8915_v24 = vcombine.high %v12140_v4, %v12143_v10  ;;  %v8917_v61 = vcombine.low %v12149_v14, %v12152_v59  ;;  %v3997_v21 = vrot.slane %v8908_v7, %v13842_v37 }
 0x723   :  { %v12108_v5 = vpop.permute.xlu1 %3367  ;;  %v12110_v35 = vpop.permute.xlu0 %3374  ;;  %v3726_v49 = vcombine.low %v3670_v47, %v3686_v12  ;;  %v8912_v55 = vcombine.high %v12073_v27, %v12094_v40  ;;  %v3727_v13 = vcombine.high %v3670_v47, %v3686_v12  ;;  %v3743_v54 = vcombine.high %v3677_v58, %v3693_v29 }
 0x724   :  { %v3558_v32 = vcombine.low %v12070_v0, %v12110_v35  ;;  %v3559_v17 = vcombine.high %v12070_v0, %v12110_v35  ;;  %v4046_v52 = vcombine.low %v12162_v42, %v3997_v21  ;;  %v12208_v56 = vrot.slane %v8917_v61, %v13842_v37 }
 0x725   :  { %v4013_v44 = vrot.slane %v8910_v3, %v13842_v37  ;;  %v4029_v48 = vrot.slane %v8912_v55, %v13842_v37  ;;  %v12230_v63 = vrot.slane %v3727_v13, %v10582_v45 }
 0x726   :  { %3836 = vrot.lane.b32.xlu1 %v12116_v62, %s10323_s10  ;;  %3834 = vrot.lane.b32.xlu0 %v12124_v31, %s10323_s10  ;;  %v3566_v19 = vrot.slane %v3558_v32, %v13842_v37  ;;  %v12217_v6 = vrot.slane %v3559_v17, %v13842_v37  ;;  %v12251_v7 = vrot.slane %v4046_v52, %v10582_v45 }
 0x727   :  { %v12130_v41 = vpop.permute.xlu1 %3376  ;;  %v3384_v43 = vpop.permute.xlu0 %3383  ;;  %v4078_v3 = vcombine.low %v4013_v44, %v4029_v48  ;;  %v4079_v61 = vcombine.high %v4013_v44, %v4029_v48 }
 0x728   :  { %v3574_v33 = vcombine.low %v12091_v38, %v3384_v43  ;;  %v3575_v23 = vcombine.high %v12091_v38, %v3384_v43  ;;  %v3742_v38 = vcombine.low %v3677_v58, %v3693_v29  ;;  %v3694_v36 = vcombine.low %v12089_v50, %v12130_v41 }
 0x729   :  { %v3695_v30 = vcombine.high %v12089_v50, %v12130_v41  ;;  %v4097_v29 = vcombine.high %v12062_v34, %v12065_v2  ;;  %v12292_v17 = vrot.slane %v4079_v61, %v10582_v45 }
 0x72a   :  { %3896 = vrot.lane.b32.xlu1 %v3519_v39, %s10324_s11  ;;  %3894 = vrot.lane.b32.xlu0 %v12059_v20, %s10324_s11  ;;  %v8913_v39 = vcombine.low %v12140_v4, %v12143_v10  ;;  %v3582_v8 = vrot.slane %v3574_v33, %v13842_v37  ;;  %v8919_v20 = vcombine.high %v12149_v14, %v12152_v59 }
 0x72b   :  { %v3386_v15 = vpop.permute.xlu1 %3385  ;;  %v12204_v27 = vrot.slane %v3575_v23, %v13842_v37  ;;  %v3702_v25 = vrot.slane %v3694_v36, %v13842_v37  ;;  %v12233_v50 = vrot.slane %v3742_v38, %v10582_v45  ;;  %v3709_v32 = vrot.slane %v3695_v30, %v13842_v37 }
 0x72c   :  { %v3710_v57 = vcombine.low %v12108_v5, %v3386_v15  ;;  %v3622_v0 = vcombine.low %v3566_v19, %v3582_v8  ;;  %v12198_v35 = vrot.slane %v8913_v39, %v13842_v37  ;;  %v12211_v53 = vrot.slane %v8919_v20, %v13842_v37 }
 0x72d   :  { %v3623_v43 = vcombine.high %v3566_v19, %v3582_v8  ;;  %v3711_v9 = vcombine.high %v12108_v5, %v3386_v15  ;;  %v3638_v5 = vcombine.low %v12217_v6, %v12204_v27  ;;  %v4047_v39 = vcombine.high %v12162_v42, %v3997_v21 }
 0x72e   :  { %3900 = vrot.lane.b32.xlu1 %v12076_v16, %s10324_s11  ;;  %3898 = vrot.lane.b32.xlu0 %v12079_v26, %s10324_s11  ;;  %v12201_v16 = vrot.slane %v8915_v24, %v13842_v37  ;;  %v3718_v40 = vrot.slane %v3710_v57, %v13842_v37  ;;  %v12214_v26 = vrot.slane %v3726_v49, %v10582_v45 }
 0x72f   :  { %v12239_v41 = vrot.slane %v3622_v0, %v10582_v45  ;;  %v4198_v12 = vcombine.low %v12208_v56, %v12211_v53  ;;  %v12254_v47 = vrot.slane %v3623_v43, %v10582_v45  ;;  %v3725_v58 = vrot.slane %v3711_v9, %v13842_v37 }
 0x730   :  { %v3758_v33 = vcombine.low %v3702_v25, %v3718_v40  ;;  %v3759_v15 = vcombine.high %v3702_v25, %v3718_v40  ;;  %v12269_v24 = vrot.slane %v4078_v3, %v10582_v45  ;;  %v12272_v49 = vrot.slane %v3638_v5, %v10582_v45 }
 0x731   :  { %v12266_v8 = vcombine.high %v12140_v4, %v12239_v41  ;;  %v3654_v42 = vcombine.low %v12140_v4, %v12239_v41  ;;  %v12280_v21 = vrot.slane %v4047_v39, %v10582_v45  ;;  %v3774_v19 = vcombine.low %v3709_v32, %v3725_v58 }
 0x732   :  { %3904 = vrot.lane.b32.xlu1 %v12099_v11, %s10324_s11  ;;  %3902 = vrot.lane.b32.xlu0 %v12103_v60, %s10324_s11  ;;  %v12236_v11 = vrot.slane %v3743_v54, %v10582_v45  ;;  %v4166_v60 = vcombine.low %v12198_v35, %v12201_v16  ;;  %v12283_v23 = vrot.slane %v3759_v15, %v10582_v45 }
 0x733   :  { %v4098_v57 = vcombine.low %v12251_v7, %v12269_v24  ;;  %v4099_v20 = vcombine.high %v12251_v7, %v12269_v24  ;;  %v3775_v4 = vcombine.high %v3709_v32, %v3725_v58  ;;  %v3657_v55 = vcombine.high %v12143_v10, %v12254_v47 }
 0x734   :  { %v8921_v52 = vcombine.low %v12214_v26, %v12230_v63  ;;  %v4100_v13 = vcombine.low %v12280_v21, %v12292_v17  ;;  %v4101_v38 = vcombine.high %v12280_v21, %v12292_v17  ;;  %v8923_v36 = vcombine.high %v12214_v26, %v12230_v63 }
 0x735   :  { %v8925_v54 = vcombine.low %v12233_v50, %v12236_v11  ;;  %v3656_v0 = vcombine.low %v12143_v10, %v12254_v47  ;;  %v8927_v40 = vcombine.high %v12233_v50, %v12236_v11  ;;  %v3782_v25 = vrot.slane %v3774_v19, %v10582_v45 }
 0x736   :  { %3908 = vrot.lane.b32.xlu1 %v12116_v62, %s10324_s11  ;;  %3906 = vrot.lane.b32.xlu0 %v12124_v31, %s10324_s11  ;;  %v3639_v62 = vcombine.high %v12217_v6, %v12204_v27  ;;  %v12275_v31 = vrot.slane %v3758_v33, %v10582_v45  ;;  %v12310_v27 = vrot.slane %v8921_v52, %v13842_v37 }
 0x737   :  { %v12316_v6 = vrot.slane %v8923_v36, %v13842_v37  ;;  %v12319_v30 = vrot.slane %v8925_v54, %v13842_v37  ;;  %v3789_v43 = vrot.slane %v3775_v4, %v10582_v45  ;;  %v12329_v9 = vrot.slane %v4166_v60, %v10582_v45 }
 0x738   :  { %v8922_v44 = vcombine.low %v12275_v31, %v12283_v23  ;;  %v8924_v10 = vcombine.high %v12275_v31, %v12283_v23  ;;  %v12332_v48 = vrot.slane %v4198_v12, %v10582_v45  ;;  %v12335_v5 = vrot.slane %v3639_v62, %v10582_v45 }
 0x739   :  { %v3659_v33 = vcombine.high %v12149_v14, %v12272_v49  ;;  %v12340_v32 = vrot.slane %v8927_v40, %v13842_v37  ;;  %v4302_v15 = vcombine.low %v12310_v27, %v12316_v6  ;;  %v3658_v3 = vcombine.low %v12149_v14, %v12272_v49 }
 0x73a   :  { %3840 = vrot.lane.b32.xlu1 %v12266_v8, %s10323_s10  ;;  %3838 = vrot.lane.b32.xlu0 %v3654_v42, %s10323_s10  ;;  %v4253_v60 = vrot.slane %v8922_v44, %v13842_v37  ;;  %v4269_v39 = vrot.slane %v8924_v10, %v13842_v37  ;;  %v8926_v62 = vcombine.low %v3782_v25, %v3789_v43 }
 0x73b   :  { %v12349_v12 = vrot.slane %v4302_v15, %v10582_v45  ;;  %v4334_v58 = vcombine.low %v12319_v30, %v12340_v32  ;;  %v8928_v61 = vcombine.high %v3782_v25, %v3789_v43  ;;  %v3661_v14 = vcombine.high %v12152_v59, %v12335_v5 }
 0x73c   :  { %v3660_v4 = vcombine.low %v12152_v59, %v12335_v5  ;;  %v4285_v54 = vrot.slane %v8926_v62, %v13842_v37  ;;  %v4318_v44 = vcombine.low %v4253_v60, %v4269_v39  ;;  %v4319_v10 = vcombine.high %v4253_v60, %v4269_v39 }
 0x73d   :  { %v12362_v52 = vrot.slane %v4334_v58, %v10582_v45  ;;  %v4301_v40 = vrot.slane %v8928_v61, %v13842_v37 }
 0x73e   :  { %3844 = vrot.lane.b32.xlu1 %v3657_v55, %s10323_s10  ;;  %3842 = vrot.lane.b32.xlu0 %v3656_v0, %s10323_s10  ;;  %v12373_v59 = vrot.slane %v4318_v44, %v10582_v45  ;;  %v12376_v19 = vrot.slane %v4319_v10, %v10582_v45  ;;  %v4231_v44 = vcombine.high %v12329_v9, %v12332_v48 }
 0x73f   :  { %v4350_v58 = vcombine.low %v4285_v54, %v4301_v40  ;;  %v4351_v36 = vcombine.high %v4285_v54, %v4301_v40 }
 0x741   :  { %v12379_v62 = vrot.slane %v4350_v58, %v10582_v45  ;;  %v12382_v60 = vrot.slane %v4351_v36, %v10582_v45 }
 0x742   :  { %3848 = vrot.lane.b32.xlu1 %v3659_v33, %s10323_s10  ;;  %3846 = vrot.lane.b32.xlu0 %v3658_v3, %s10323_s10 }
 0x743   :  { %v4370_v39 = vcombine.low %v12373_v59, %v12379_v62  ;;  %v4371_v61 = vcombine.high %v12373_v59, %v12379_v62  ;;  %v4372_v54 = vcombine.low %v12376_v19, %v12382_v60  ;;  %v4373_v40 = vcombine.high %v12376_v19, %v12382_v60 }
 0x746   :  { %3852 = vrot.lane.b32.xlu1 %v3661_v14, %s10323_s10  ;;  %3850 = vrot.lane.b32.xlu0 %v3660_v4, %s10323_s10 }
 0x74a   :  { %3912 = vrot.lane.b32.xlu1 %v12266_v8, %s10324_s11  ;;  %3910 = vrot.lane.b32.xlu0 %v3654_v42, %s10324_s11  ;;  %v3791_v8 = vcombine.high %v12214_v26, %v12275_v31  ;;  %v3790_v42 = vcombine.low %v12214_v26, %v12275_v31  ;;  %v3797_v26 = vcombine.high %v12236_v11, %v3789_v43 }
 0x74b   :  { %v3796_v31 = vcombine.low %v12236_v11, %v3789_v43  ;;  %v4167_v11 = vcombine.high %v12198_v35, %v12201_v16  ;;  %v4199_v43 = vcombine.high %v12208_v56, %v12211_v53 }
 0x74e   :  { %3916 = vrot.lane.b32.xlu1 %v3657_v55, %s10324_s11  ;;  %3914 = vrot.lane.b32.xlu0 %v3656_v0, %s10324_s11  ;;  %v3793_v55 = vcombine.high %v12230_v63, %v12283_v23  ;;  %v3792_v0 = vcombine.low %v12230_v63, %v12283_v23  ;;  %v8914_v63 = vcombine.low %v12239_v41, %v12254_v47 }
 0x74f   :  { %v8916_v23 = vcombine.high %v12239_v41, %v12254_v47 }
 0x751   :  { %v4133_v41 = vrot.slane %v8916_v23, %v13842_v37 }
 0x752   :  { %3920 = vrot.lane.b32.xlu1 %v3659_v33, %s10324_s11  ;;  %3918 = vrot.lane.b32.xlu0 %v3658_v3, %s10324_s11  ;;  %v3795_v33 = vcombine.high %v12233_v50, %v3782_v25  ;;  %v3794_v3 = vcombine.low %v12233_v50, %v3782_v25  ;;  %v8918_v50 = vcombine.low %v12272_v49, %v12335_v5 }
 0x753   :  { %v8920_v25 = vcombine.high %v12272_v49, %v12335_v5  ;;  %v4181_v49 = vrot.slane %v4167_v11, %v10582_v45  ;;  %v4213_v5 = vrot.slane %v4199_v43, %v10582_v45 }
 0x754   :  { %v4149_v47 = vrot.slane %v8918_v50, %v13842_v37 }
 0x755   :  { %v4232_v56 = vcombine.low %v4181_v49, %v4213_v5 }
 0x756   :  { %3924 = vrot.lane.b32.xlu1 %v3661_v14, %s10324_s11  ;;  %3922 = vrot.lane.b32.xlu0 %v3660_v4, %s10324_s11  ;;  %v4117_v14 = vrot.slane %v8914_v63, %v13842_v37  ;;  %v4165_v4 = vrot.slane %v8920_v25, %v13842_v37 }
 0x757   :  { %v9959_v10 = vpack.i.bf16 %v4232_v56, %v4096_v1 }
 0x758   :  { %v4182_v35 = vcombine.low %v4117_v14, %v4133_v41  ;;  %v4214_v16 = vcombine.low %v4149_v47, %v4165_v4 }
 0x75a   :  { %3856 = vrot.lane.b32.xlu1 %v3791_v8, %s10323_s10  ;;  %3854 = vrot.lane.b32.xlu0 %v3790_v42, %s10323_s10  ;;  %v4190_v53 = vrot.slane %v4182_v35, %v10582_v45  ;;  %v4222_v36 = vrot.slane %v4214_v16, %v10582_v45 }
 0x75c   :  { %v4234_v58 = vcombine.low %v4190_v53, %v4222_v36 }
 0x75e   :  { %3860 = vrot.lane.b32.xlu1 %v3793_v55, %s10323_s10  ;;  %3858 = vrot.lane.b32.xlu0 %v3792_v0, %s10323_s10 }
 0x762   :  { %3864 = vrot.lane.b32.xlu1 %v3795_v33, %s10323_s10  ;;  %3862 = vrot.lane.b32.xlu0 %v3794_v3, %s10323_s10 }
 0x766   :  { %3868 = vrot.lane.b32.xlu1 %v3797_v26, %s10323_s10  ;;  %3866 = vrot.lane.b32.xlu0 %v3796_v31, %s10323_s10  ;;  %s10345_s10 = smov 49  }
 0x76a   :  { %3928 = vrot.lane.b32.xlu1 %v3791_v8, %s10324_s11  ;;  %3926 = vrot.lane.b32.xlu0 %v3790_v42, %s10324_s11  ;;  %v4183_v8 = vcombine.high %v4117_v14, %v4133_v41  ;;  %v4215_v42 = vcombine.high %v4149_v47, %v4165_v4 }
 0x76c   :  { %v4197_v1 = vrot.slane %v4183_v8, %v10582_v45 }
 0x76e   :  { %3932 = vrot.lane.b32.xlu1 %v3793_v55, %s10324_s11  ;;  %3930 = vrot.lane.b32.xlu0 %v3792_v0, %s10324_s11  ;;  %v9954_v55 = vpack.i.bf16 %v4231_v44, %v4095_v22  ;;  %v4233_v0 = vcombine.high %v4181_v49, %v4213_v5 }
 0x770   :  { %v9964_v22 = vpack.i.bf16 %v4233_v0, %v4097_v29 }
 0x772   :  { %3936 = vrot.lane.b32.xlu1 %v3795_v33, %s10324_s11  ;;  %3934 = vrot.lane.b32.xlu0 %v3794_v3, %s10324_s11  ;;  %v9969_v33 = vpack.i.bf16 %v4234_v58, %v4098_v57  ;;  %v4235_v3 = vcombine.high %v4190_v53, %v4222_v36  ;;  %v4303_v53 = vcombine.high %v12310_v27, %v12316_v6 }
 0x773   :  { %v4335_v36 = vcombine.high %v12319_v30, %v12340_v32  ;;  %v4367_v32 = vcombine.high %v12349_v12, %v12362_v52 }
 0x776   :  { %3940 = vrot.lane.b32.xlu1 %v3797_v26, %s10324_s11  ;;  %3938 = vrot.lane.b32.xlu0 %v3796_v31, %s10324_s11  ;;  %v4229_v26 = vrot.slane %v4215_v42, %v10582_v45  ;;  %v9974_v31 = vpack.i.bf16 %v4235_v3, %v4099_v20  ;;  %s10348_s11 = smov 114  }
 0x778   :  { %v4236_v57 = vcombine.low %v4197_v1, %v4229_v26  ;;  %v4237_v34 = vcombine.high %v4197_v1, %v4229_v26  ;;  %v4317_v1 = vrot.slane %v4303_v53, %v10582_v45  ;;  %v4349_v26 = vrot.slane %v4335_v36, %v10582_v45 }
 0x77a   :  { %9960 = vrot.lane.b32.xlu1 %v9959_v10, %s10339_s5  ;;  %9955 = vrot.lane.b32.xlu0 %v9954_v55, %s10340_s17  ;;  %v9979_v63 = vpack.i.bf16 %v4236_v57, %v4100_v13  ;;  %v9984_v2 = vpack.i.bf16 %v4237_v34, %v4101_v38 }
 0x77e   :  { %9970 = vrot.lane.b32.xlu1 %v9969_v33, %s10341_s21  ;;  %9965 = vrot.lane.b32.xlu0 %v9964_v22, %s10342_s25 }
 0x782   :  { %9975 = vrot.lane.b32.xlu1 %v9974_v31, %s10343_s29 }
 0x786   :  { %9980 = vrot.lane.b32.xlu1 %v9979_v63, %s10344_s7 }
 0x78a   :  { %9985 = vrot.lane.b32.xlu1 %v9984_v2, %s10345_s10 }
 0x78c   :  { %v3825_v7 = vpop.permute.xlu1 %3824  ;;  %v3823_v29 = vpop.permute.xlu0 %3822 }
 0x790   :  { %v3829_v24 = vpop.permute.xlu1 %3828  ;;  %v3827_v20 = vpop.permute.xlu0 %3826 }
 0x791   :  { %v4390_v23 = vcombine.low %v3825_v7, %v3829_v24  ;;  %v4374_v50 = vcombine.low %v3823_v29, %v3827_v20  ;;  %v4391_v16 = vcombine.high %v3825_v7, %v3829_v24  ;;  %v4375_v44 = vcombine.high %v3823_v29, %v3827_v20 }
 0x793   :  { %v4398_v13 = vrot.slane %v4390_v23, %v13842_v37  ;;  %v4382_v43 = vrot.slane %v4374_v50, %v13842_v37  ;;  %v4405_v6 = vrot.slane %v4391_v16, %v13842_v37  ;;  %v4389_v22 = vrot.slane %v4375_v44, %v13842_v37 }
 0x794   :  { %v3833_v25 = vpop.permute.xlu1 %3832  ;;  %v3831_v11 = vpop.permute.xlu0 %3830 }
 0x795   :  { %v4438_v49 = vcombine.low %v4382_v43, %v4398_v13  ;;  %v4439_v10 = vcombine.high %v4382_v43, %v4398_v13  ;;  %v4454_v50 = vcombine.low %v4389_v22, %v4405_v6 }
 0x797   :  { %v12496_v0 = vrot.slane %v4438_v49, %v10582_v45  ;;  %v4453_v31 = vrot.slane %v4439_v10, %v10582_v45  ;;  %v4369_v49 = vcombine.high %v4317_v1, %v4349_v26 }
 0x798   :  { %v3837_v14 = vpop.permute.xlu1 %3836  ;;  %v3835_v47 = vpop.permute.xlu0 %3834 }
 0x799   :  { %v4422_v41 = vcombine.low %v3833_v25, %v3837_v14  ;;  %v4406_v21 = vcombine.low %v3831_v11, %v3835_v47  ;;  %v4423_v17 = vcombine.high %v3833_v25, %v3837_v14  ;;  %v4407_v4 = vcombine.high %v3831_v11, %v3835_v47 }
 0x79a   :  { %v4368_v25 = vcombine.low %v4317_v1, %v4349_v26 }
 0x79b   :  { %v4430_v38 = vrot.slane %v4422_v41, %v13842_v37  ;;  %v4414_v5 = vrot.slane %v4406_v21, %v13842_v37  ;;  %v4437_v42 = vrot.slane %v4423_v17, %v13842_v37  ;;  %v4421_v55 = vrot.slane %v4407_v4, %v13842_v37 }
 0x79c   :  { %v12485_v35 = vpop.permute.xlu1 %3896  ;;  %v12487_v56 = vpop.permute.xlu0 %3894 }
 0x79d   :  { %v4470_v58 = vcombine.low %v4414_v5, %v4430_v38  ;;  %v4471_v8 = vcombine.high %v4414_v5, %v4430_v38  ;;  %v4486_v34 = vcombine.low %v4421_v55, %v4437_v42  ;;  %v4462_v38 = vrot.slane %v4454_v50, %v10582_v45 }
 0x79e   :  { %v4487_v5 = vcombine.high %v4421_v55, %v4437_v42 }
 0x79f   :  { %v12499_v33 = vrot.slane %v4470_v58, %v10582_v45  ;;  %v4485_v3 = vrot.slane %v4471_v8, %v10582_v45  ;;  %v4494_v11 = vrot.slane %v4486_v34, %v10582_v45 }
 0x7a0   :  { %v12502_v27 = vpop.permute.xlu1 %3900  ;;  %v12505_v30 = vpop.permute.xlu0 %3898  ;;  %v4501_v42 = vrot.slane %v4487_v5, %v10582_v45 }
 0x7a1   :  { %v4502_v57 = vcombine.low %v12496_v0, %v12499_v33  ;;  %v4503_v63 = vcombine.high %v12496_v0, %v12499_v33  ;;  %v4798_v2 = vcombine.low %v12485_v35, %v12502_v27  ;;  %v4782_v7 = vcombine.low %v12487_v56, %v12505_v30 }
 0x7a2   :  { %v4504_v20 = vcombine.low %v4453_v31, %v4485_v3  ;;  %v4505_v47 = vcombine.high %v4453_v31, %v4485_v3  ;;  %v4506_v58 = vcombine.low %v4462_v38, %v4494_v11  ;;  %v4455_v3 = vcombine.high %v4389_v22, %v4405_v6 }
 0x7a3   :  { %v9989_v24 = vpack.i.bf16 %v4503_v63, %v4367_v32  ;;  %v12528_v13 = vrot.slane %v4798_v2, %v13842_v37  ;;  %v12531_v43 = vrot.slane %v4782_v7, %v13842_v37  ;;  %v4507_v6 = vcombine.high %v4462_v38, %v4494_v11 }
 0x7a4   :  { %v12521_v29 = vpop.permute.xlu1 %3904  ;;  %v12523_v23 = vpop.permute.xlu0 %3902  ;;  %v9994_v41 = vpack.i.bf16 %v4504_v20, %v4368_v25  ;;  %v9999_v10 = vpack.i.bf16 %v4505_v47, %v4369_v49  ;;  %v10004_v31 = vpack.i.bf16 %v4506_v58, %v4370_v39  ;;  %v4469_v63 = vrot.slane %v4455_v3, %v10582_v45 }
 0x7a5   :  { %9990 = vrot.lane.b32.xlu0 %v9989_v24, %s10340_s17  ;;  %v4846_v53 = vcombine.low %v12531_v43, %v12528_v13  ;;  %v10009_v39 = vpack.i.bf16 %v4507_v6, %v4371_v61  ;;  %v4783_v6 = vcombine.high %v12487_v56, %v12505_v30 }
 0x7a6   :  { %v4508_v20 = vcombine.low %v4469_v63, %v4501_v42 }
 0x7a7   :  { %v12560_v55 = vrot.slane %v4846_v53, %v10582_v45 }
 0x7a8   :  { %v12533_v14 = vpop.permute.xlu1 %3908  ;;  %v12537_v17 = vpop.permute.xlu0 %3906  ;;  %v10014_v47 = vpack.i.bf16 %v4508_v20, %v4372_v54 }
 0x7a9   :  { %v4830_v21 = vcombine.low %v12521_v29, %v12533_v14  ;;  %v4814_v4 = vcombine.low %v12523_v23, %v12537_v17  ;;  %9995 = vrot.lane.b32.xlu0 %v9994_v41, %s10339_s5  ;;  %v4815_v19 = vcombine.high %v12523_v23, %v12537_v17  ;;  %v4797_v17 = vrot.slane %v4783_v6, %v13842_v37 }
 0x7ab   :  { %v12544_v16 = vrot.slane %v4830_v21, %v13842_v37  ;;  %v12549_v36 = vrot.slane %v4814_v4, %v13842_v37  ;;  %v4509_v21 = vcombine.high %v4469_v63, %v4501_v42  ;;  %v4829_v23 = vrot.slane %v4815_v19, %v13842_v37 }
 0x7ac   :  { %v12551_v44 = vpop.permute.xlu1 %3840  ;;  %v12553_v8 = vpop.permute.xlu0 %3838 }
 0x7ad   :  { %v4878_v32 = vcombine.low %v12549_v36, %v12544_v16  ;;  %10000 = vrot.lane.b32.xlu0 %v9999_v10, %s10342_s25  ;;  %v10019_v5 = vpack.i.bf16 %v4509_v21, %v4373_v40  ;;  %v4799_v40 = vcombine.high %v12485_v35, %v12502_v27 }
 0x7af   :  { %v12563_v1 = vrot.slane %v4878_v32, %v10582_v45 }
 0x7b0   :  { %v12565_v26 = vpop.permute.xlu1 %3844  ;;  %v12570_v22 = vpop.permute.xlu0 %3842 }
 0x7b1   :  { %10005 = vrot.lane.b32.xlu0 %v10004_v31, %s10341_s21  ;;  %v4526_v2 = vcombine.low %v12551_v44, %v12565_v26  ;;  %v4510_v7 = vcombine.low %v12553_v8, %v12570_v22  ;;  %v4831_v31 = vcombine.high %v12521_v29, %v12533_v14  ;;  %v4813_v14 = vrot.slane %v4799_v40, %v13842_v37 }
 0x7b3   :  { %v12589_v25 = vrot.slane %v4526_v2, %v13842_v37  ;;  %v12592_v11 = vrot.slane %v4510_v7, %v13842_v37  ;;  %v12637_v29 = vrot.slane %v4831_v31, %v13842_v37 }
 0x7b4   :  { %v12580_v24 = vpop.permute.xlu1 %3848  ;;  %v12585_v50 = vpop.permute.xlu0 %3846 }
 0x7b5   :  { %10010 = vrot.lane.b32.xlu0 %v10009_v39, %s10343_s29  ;;  %v4574_v4 = vcombine.low %v12592_v11, %v12589_v25 }
 0x7b7   :  { %v12621_v58 = vrot.slane %v4574_v4, %v10582_v45 }
 0x7b8   :  { %v12594_v41 = vpop.permute.xlu1 %3852  ;;  %v12601_v62 = vpop.permute.xlu0 %3850 }
 0x7b9   :  { %v4558_v59 = vcombine.low %v12580_v24, %v12594_v41  ;;  %v4542_v61 = vcombine.low %v12585_v50, %v12601_v62  ;;  %10015 = vrot.lane.b32.xlu0 %v10014_v47, %s10344_s7 }
 0x7bb   :  { %v12607_v38 = vrot.slane %v4558_v59, %v13842_v37  ;;  %v12612_v49 = vrot.slane %v4542_v61, %v13842_v37 }
 0x7bc   :  { %v3913_v54 = vpop.permute.xlu1 %3912  ;;  %v3911_v53 = vpop.permute.xlu0 %3910 }
 0x7bd   :  { %v4606_v10 = vcombine.low %v12612_v49, %v12607_v38  ;;  %10020 = vrot.lane.b32.xlu0 %v10019_v5, %s10345_s10 }
 0x7bf   :  { %v12624_v3 = vrot.slane %v4606_v10, %v10582_v45  ;;  %v4862_v10 = vcombine.low %v4797_v17, %v4813_v14 }
 0x7c0   :  { %v3917_v32 = vpop.permute.xlu1 %3916  ;;  %v3915_v42 = vpop.permute.xlu0 %3914 }
 0x7c1   :  { %v4934_v63 = vcombine.low %v3913_v54, %v3917_v32  ;;  %v4935_v2 = vcombine.high %v3913_v54, %v3917_v32  ;;  %v4918_v7 = vcombine.low %v3911_v53, %v3915_v42  ;;  %v4919_v39 = vcombine.high %v3911_v53, %v3915_v42 }
 0x7c2   :  { %v4894_v54 = vcombine.low %v4829_v23, %v12637_v29 }
 0x7c3   :  { %v4942_v35 = vrot.slane %v4934_v63, %v13842_v37  ;;  %v12644_v27 = vrot.slane %v4935_v2, %v13842_v37  ;;  %v4926_v56 = vrot.slane %v4918_v7, %v13842_v37  ;;  %v12648_v30 = vrot.slane %v4919_v39, %v13842_v37 }
 0x7c4   :  { %v3921_v20 = vpop.permute.xlu1 %3920  ;;  %v3919_v47 = vpop.permute.xlu0 %3918  ;;  %v12666_v7 = vrot.slane %v4894_v54, %v10582_v45 }
 0x7c5   :  { %v4982_v31 = vcombine.low %v4926_v56, %v4942_v35  ;;  %v4998_v19 = vcombine.low %v12648_v30, %v12644_v27 }
 0x7c7   :  { %v12681_v54 = vrot.slane %v4998_v19, %v10582_v45 }
 0x7c8   :  { %v3925_v21 = vpop.permute.xlu1 %3924  ;;  %v3923_v4 = vpop.permute.xlu0 %3922 }
 0x7c9   :  { %v4966_v59 = vcombine.low %v3921_v20, %v3925_v21  ;;  %v4967_v61 = vcombine.high %v3921_v20, %v3925_v21  ;;  %v4950_v5 = vcombine.low %v3919_v47, %v3923_v4  ;;  %v4951_v53 = vcombine.high %v3919_v47, %v3923_v4 }
 0x7ca   :  { %v4847_v21 = vcombine.high %v12531_v43, %v12528_v13  ;;  %v4983_v4 = vcombine.high %v4926_v56, %v4942_v35  ;;  %v4863_v43 = vcombine.high %v4797_v17, %v4813_v14  ;;  %v4511_v56 = vcombine.high %v12553_v8, %v12570_v22 }
 0x7cb   :  { %v4974_v32 = vrot.slane %v4966_v59, %v13842_v37  ;;  %v12653_v42 = vrot.slane %v4967_v61, %v13842_v37  ;;  %v4958_v40 = vrot.slane %v4950_v5, %v13842_v37  ;;  %v12659_v6 = vrot.slane %v4951_v53, %v13842_v37 }
 0x7cc   :  { %v12661_v63 = vpop.permute.xlu1 %3856  ;;  %v12663_v2 = vpop.permute.xlu0 %3854  ;;  %v12673_v59 = vrot.slane %v4862_v10, %v10582_v45  ;;  %v4879_v61 = vcombine.high %v12549_v36, %v12544_v16  ;;  %v12678_v5 = vrot.slane %v4982_v31, %v10582_v45  ;;  %v4895_v10 = vcombine.high %v4829_v23, %v12637_v29 }
 0x7cd   :  { %v5014_v39 = vcombine.low %v4958_v40, %v4974_v32  ;;  %v5015_v20 = vcombine.high %v4958_v40, %v4974_v32  ;;  %v5030_v47 = vcombine.low %v12659_v6, %v12653_v42  ;;  %v4527_v16 = vcombine.high %v12551_v44, %v12565_v26 }
 0x7ce   :  { %v4915_v19 = vcombine.high %v12673_v59, %v12666_v7  ;;  %v4893_v29 = vrot.slane %v4879_v61, %v10582_v45  ;;  %v4997_v44 = vrot.slane %v4983_v4, %v10582_v45  ;;  %v4911_v26 = vcombine.high %v12560_v55, %v12563_v1 }
 0x7cf   :  { %v12684_v53 = vrot.slane %v5014_v39, %v10582_v45  ;;  %v12687_v32 = vrot.slane %v5030_v47, %v10582_v45  ;;  %v5029_v36 = vrot.slane %v5015_v20, %v10582_v45  ;;  %v4861_v39 = vrot.slane %v4847_v21, %v10582_v45 }
 0x7d0   :  { %v12689_v13 = vpop.permute.xlu1 %3860  ;;  %v12695_v35 = vpop.permute.xlu0 %3858  ;;  %v12717_v4 = vrot.slane %v4527_v16, %v13842_v37  ;;  %v12720_v60 = vrot.slane %v4511_v56, %v13842_v37  ;;  %v12724_v34 = vrot.slane %v4863_v43, %v10582_v45  ;;  %v12727_v31 = vrot.slane %v4895_v10, %v10582_v45 }
 0x7d1   :  { %v5051_v14 = vcombine.high %v12681_v54, %v12687_v32  ;;  %v5047_v23 = vcombine.high %v12678_v5, %v12684_v53  ;;  %v4662_v8 = vcombine.low %v12661_v63, %v12689_v13  ;;  %v4646_v22 = vcombine.low %v12663_v2, %v12695_v35 }
 0x7d2   :  { %v5048_v61 = vcombine.low %v4997_v44, %v5029_v36  ;;  %v4912_v21 = vcombine.low %v4861_v39, %v4893_v29  ;;  %v5031_v43 = vcombine.high %v12659_v6, %v12653_v42 }
 0x7d3   :  { %v10044_v40 = vpack.i.bf16 %v5051_v14, %v4915_v19  ;;  %v10024_v47 = vpack.i.bf16 %v5047_v23, %v4911_v26  ;;  %v4913_v19 = vcombine.high %v4861_v39, %v4893_v29  ;;  %v4559_v14 = vcombine.high %v12580_v24, %v12594_v41 }
 0x7d4   :  { %v3865_v17 = vpop.permute.xlu1 %3864  ;;  %v3863_v20 = vpop.permute.xlu0 %3862  ;;  %v4670_v16 = vrot.slane %v4662_v8, %v13842_v37  ;;  %v4654_v56 = vrot.slane %v4646_v22, %v13842_v37  ;;  %v4914_v23 = vcombine.low %v12673_v59, %v12666_v7  ;;  %v10029_v15 = vpack.i.bf16 %v5048_v61, %v4912_v21 }
 0x7d5   :  { %10045 = vrot.lane.b32.xlu1 %v10044_v40, %s10343_s29  ;;  %10025 = vrot.lane.b32.xlu0 %v10024_v47, %s10340_s17  ;;  %v5049_v47 = vcombine.high %v4997_v44, %v5029_v36  ;;  %v4575_v29 = vcombine.high %v12592_v11, %v12589_v25  ;;  %v4590_v24 = vcombine.low %v12720_v60, %v12717_v4 }
 0x7d6   :  { %v4543_v41 = vcombine.high %v12585_v50, %v12601_v62  ;;  %v4999_v7 = vcombine.high %v12648_v30, %v12644_v27  ;;  %v12749_v36 = vrot.slane %v4559_v14, %v13842_v37  ;;  %v4607_v25 = vcombine.high %v12612_v49, %v12607_v38 }
 0x7d7   :  { %v4710_v11 = vcombine.low %v4654_v56, %v4670_v16  ;;  %v5045_v62 = vrot.slane %v5031_v43, %v10582_v45  ;;  %v4663_v27 = vcombine.high %v12661_v63, %v12689_v13  ;;  %v10034_v22 = vpack.i.bf16 %v5049_v47, %v4913_v19 }
 0x7d8   :  { %v3869_v26 = vpop.permute.xlu1 %3868  ;;  %v3867_v40 = vpop.permute.xlu0 %3866  ;;  %v4711_v38 = vcombine.high %v4654_v56, %v4670_v16  ;;  %v5013_v61 = vrot.slane %v4999_v7, %v10582_v45 }
 0x7d9   :  { %v4694_v10 = vcombine.low %v3865_v17, %v3869_v26  ;;  %v4678_v8 = vcombine.low %v3863_v20, %v3867_v40  ;;  %v4695_v59 = vcombine.high %v3865_v17, %v3869_v26  ;;  %v4679_v6 = vcombine.high %v3863_v20, %v3867_v40  ;;  %10030 = vrot.lane.b32.xlu0 %v10029_v15, %s10339_s5 }
 0x7da   :  { %v5050_v15 = vcombine.low %v12681_v54, %v12687_v32  ;;  %v4647_v17 = vcombine.high %v12663_v2, %v12695_v35  ;;  %v4557_v20 = vrot.slane %v4543_v41, %v13842_v37  ;;  %v12775_v54 = vrot.slane %v4607_v25, %v10582_v45 }
 0x7db   :  { %v4702_v42 = vrot.slane %v4694_v10, %v13842_v37  ;;  %v4686_v44 = vrot.slane %v4678_v8, %v13842_v37  ;;  %v12768_v21 = vrot.slane %v4695_v59, %v13842_v37  ;;  %v12771_v63 = vrot.slane %v4679_v6, %v13842_v37 }
 0x7dc   :  { %v12754_v50 = vpop.permute.xlu1 %3928  ;;  %v12759_v30 = vpop.permute.xlu0 %3926  ;;  %v12778_v2 = vrot.slane %v4710_v11, %v10582_v45  ;;  %v12787_v19 = vrot.slane %v4663_v27, %v13842_v37  ;;  %v10039_v16 = vpack.i.bf16 %v5050_v15, %v4914_v23  ;;  %v5052_v56 = vcombine.low %v5013_v61, %v5045_v62 }
 0x7dd   :  { %v4742_v49 = vcombine.low %v4686_v44, %v4702_v42  ;;  %v4743_v39 = vcombine.high %v4686_v44, %v4702_v42  ;;  %10035 = vrot.lane.b32.xlu0 %v10034_v22, %s10342_s25  ;;  %v4639_v26 = vcombine.high %v12621_v58, %v12624_v3  ;;  %v12792_v43 = vrot.slane %v4647_v17, %v13842_v37 }
 0x7de   :  { %v4725_v10 = vrot.slane %v4711_v38, %v10582_v45  ;;  %v4622_v41 = vcombine.low %v4557_v20, %v12749_v36  ;;  %v4758_v23 = vcombine.low %v12771_v63, %v12768_v21  ;;  %v4916_v8 = vcombine.low %v12724_v34, %v12727_v31 }
 0x7df   :  { %v12781_v32 = vrot.slane %v4742_v49, %v10582_v45  ;;  %v4757_v13 = vrot.slane %v4743_v39, %v10582_v45  ;;  %v5053_v7 = vcombine.high %v5013_v61, %v5045_v62  ;;  %v4589_v59 = vrot.slane %v4575_v29, %v10582_v45 }
 0x7e0   :  { %v12784_v35 = vpop.permute.xlu1 %3932  ;;  %v3931_v14 = vpop.permute.xlu0 %3930  ;;  %v4917_v25 = vcombine.high %v12724_v34, %v12727_v31  ;;  %v4591_v44 = vcombine.high %v12720_v60, %v12717_v4  ;;  %v10049_v17 = vpack.i.bf16 %v5052_v56, %v4916_v8  ;;  %v12814_v62 = vrot.slane %v4590_v24, %v10582_v45 }
 0x7e1   :  { %v4774_v40 = vcombine.low %v12778_v2, %v12781_v32  ;;  %v4775_v47 = vcombine.high %v12778_v2, %v12781_v32  ;;  %10040 = vrot.lane.b32.xlu0 %v10039_v16, %s10341_s21  ;;  %v4776_v11 = vcombine.low %v4725_v10, %v4757_v13  ;;  %v5070_v27 = vcombine.low %v12754_v50, %v12784_v35 }
 0x7e2   :  { %v5054_v22 = vcombine.low %v12759_v30, %v3931_v14  ;;  %v4623_v29 = vcombine.high %v4557_v20, %v12749_v36  ;;  %v4726_v38 = vcombine.low %v12792_v43, %v12787_v19  ;;  %v4640_v34 = vcombine.low %v4589_v59, %v12775_v54 }
 0x7e3   :  { %v10059_v6 = vpack.i.bf16 %v4775_v47, %v4639_v26  ;;  %v4630_v60 = vrot.slane %v4622_v41, %v10582_v45  ;;  %v4766_v31 = vrot.slane %v4758_v23, %v10582_v45  ;;  %v10054_v4 = vpack.i.bf16 %v5053_v7, %v4917_v25 }
 0x7e4   :  { %v3937_v42 = vpop.permute.xlu1 %3936  ;;  %v3935_v15 = vpop.permute.xlu0 %3934  ;;  %v4641_v49 = vcombine.high %v4589_v59, %v12775_v54  ;;  %v5071_v24 = vcombine.high %v12754_v50, %v12784_v35  ;;  %v5055_v36 = vcombine.high %v12759_v30, %v3931_v14  ;;  %v10064_v20 = vpack.i.bf16 %v4776_v11, %v4640_v34 }
 0x7e5   :  { %10060 = vrot.lane.b32.xlu1 %v10059_v6, %s10340_s17  ;;  %10050 = vrot.lane.b32.xlu0 %v10049_v17, %s10344_s7  ;;  %v4777_v61 = vcombine.high %v4725_v10, %v4757_v13  ;;  %v5078_v16 = vrot.slane %v5070_v27, %v13842_v37  ;;  %v5062_v56 = vrot.slane %v5054_v22, %v13842_v37 }
 0x7e6   :  { %v4734_v23 = vrot.slane %v4726_v38, %v10582_v45  ;;  %v4759_v54 = vcombine.high %v12771_v63, %v12768_v21  ;;  %v12835_v30 = vrot.slane %v4623_v29, %v10582_v45  ;;  %v4727_v13 = vcombine.high %v12792_v43, %v12787_v19 }
 0x7e7   :  { %v10069_v7 = vpack.i.bf16 %v4777_v61, %v4641_v49  ;;  %v5069_v6 = vrot.slane %v5055_v36, %v13842_v37  ;;  %v5119_v25 = vcombine.high %v5062_v56, %v5078_v16  ;;  %v4642_v43 = vcombine.low %v12814_v62, %v4630_v60 }
 0x7e8   :  { %v3941_v39 = vpop.permute.xlu1 %3940  ;;  %v3939_v41 = vpop.permute.xlu0 %3938  ;;  %v4778_v59 = vcombine.low %v4734_v23, %v4766_v31  ;;  %v12848_v11 = vrot.slane %v4759_v54, %v10582_v45  ;;  %v12852_v17 = vrot.slane %v4591_v44, %v10582_v45  ;;  %v12855_v29 = vrot.slane %v4727_v13, %v10582_v45 }
 0x7e9   :  { %v5102_v26 = vcombine.low %v3937_v42, %v3941_v39  ;;  %v5103_v47 = vcombine.high %v3937_v42, %v3941_v39  ;;  %v5086_v8 = vcombine.low %v3935_v15, %v3939_v41  ;;  %v5087_v50 = vcombine.high %v3935_v15, %v3939_v41  ;;  %10065 = vrot.lane.b32.xlu1 %v10064_v20, %s10339_s5 }
 0x7ea   :  { %10055 = vrot.lane.b32.xlu0 %v10054_v4, %s10345_s10  ;;  %v5085_v42 = vrot.slane %v5071_v24, %v13842_v37  ;;  %v4779_v15 = vcombine.high %v4734_v23, %v4766_v31  ;;  %v4643_v34 = vcombine.high %v12814_v62, %v4630_v60  ;;  %v5118_v4 = vcombine.low %v5062_v56, %v5078_v16 }
 0x7eb   :  { %v5110_v35 = vrot.slane %v5102_v26, %v13842_v37  ;;  %v5117_v14 = vrot.slane %v5103_v47, %v13842_v37  ;;  %v5094_v10 = vrot.slane %v5086_v8, %v13842_v37  ;;  %v5101_v21 = vrot.slane %v5087_v50, %v13842_v37 }
 0x7ec   :  { %v9961_v63 = vpop.permute.xlu1 %9960  ;;  %v9956_v19 = vpop.permute.xlu0 %9955  ;;  %v10074_v36 = vpack.i.bf16 %v4778_v59, %v4642_v43  ;;  %v5134_v20 = vcombine.low %v5069_v6, %v5085_v42  ;;  %v12862_v44 = vrot.slane %v5119_v25, %v10582_v45  ;;  %v10079_v26 = vpack.i.bf16 %v4779_v15, %v4643_v34 }
 0x7ed   :  { %v5150_v27 = vcombine.low %v5094_v10, %v5110_v35  ;;  %v5151_v22 = vcombine.high %v5094_v10, %v5110_v35  ;;  %10070 = vrot.lane.b32.xlu1 %v10069_v7, %s10342_s25  ;;  %v5166_v38 = vcombine.low %v5101_v21, %v5117_v14  ;;  %v9957_v49 = vunpack.i.l.bf16 %v9956_v19 }
 0x7ee   :  { %v9958_v61 = vunpack.i.h.bf16 %v9956_v19  ;;  %v4644_v62 = vcombine.low %v12852_v17, %v12835_v30  ;;  %v4780_v60 = vcombine.low %v12855_v29, %v12848_v11  ;;  %v5167_v56 = vcombine.high %v5101_v21, %v5117_v14 }
 0x7ef   :  { %v12859_v39 = vrot.slane %v5151_v22, %v10582_v45  ;;  %v12870_v16 = vrot.slane %v5150_v27, %v10582_v45  ;;  %v9962_v47 = vunpack.i.l.bf16 %v9961_v63  ;;  %v12875_v23 = vrot.slane %v5166_v38, %v10582_v45 }
 0x7f0   :  { %v9971_v24 = vpop.permute.xlu1 %9970  ;;  %v9966_v31 = vpop.permute.xlu0 %9965  ;;  %v9963_v54 = vunpack.i.h.bf16 %v9961_v63  ;;  %v13843_v8 = vcombine.low %v12119_v18, %v12133_v28  ;;  %v12882_v10 = vrot.slane %v5118_v4, %v10582_v45  ;;  %v5135_v7 = vcombine.high %v5069_v6, %v5085_v42 }
 0x7f1   :  { %10075 = vrot.lane.b32.xlu1 %v10074_v36, %s10341_s21  ;;  %v5185_v41 = vcombine.high %v12862_v44, %v12859_v39  ;;  %v9967_v13 = vunpack.i.l.bf16 %v9966_v31  ;;  %v13844_v14 = vcombine.low %v12329_v9, %v12332_v48  ;;  %v9968_v59 = vunpack.i.h.bf16 %v9966_v31  ;;  %v6475_v36 = vld [vmem:[%s10440_s20 + $0x8] sm:$0xff] }
 0x7f2   :  { %v5443_v50 = vsel %vm5442_vm5, %v13843_v8, %v9957_v49  ;;  %v12890_v63 = vrot.slane %v5134_v20, %v10582_v45  ;;  %v10084_v18 = vpack.i.bf16 %v4780_v60, %v4644_v62  ;;  %v4781_v28 = vcombine.high %v12855_v29, %v12848_v11 }
 0x7f3   :  { %v5444_v21 = vsel %vm5442_vm5, %v13844_v14, %v9958_v61  ;;  %5287 = vrot.lane.b32.xlu0 %v5185_v41, %s10342_s25  ;;  %v5182_v42 = vcombine.low %v12882_v10, %v12870_v16  ;;  %v9972_v6 = vunpack.i.l.bf16 %v9971_v24  ;;  %v5453_v9 = vsel %vm5452_vm6, %v5443_v50, %v9962_v47  ;;  %v6462_v41 = vld [vmem:[%s10370_s9] sm:$0xff]  ;;  %v6463_v14 = vld [vmem:[%s10370_s9 + $0x8] sm:$0xff] }
 0x7f4   :  { %v9976_v35 = vpop.permute.xlu1 %9975  ;;  %v5187_v48 = vcombine.high %v12890_v63, %v12875_v23  ;;  %v12901_v25 = vrot.slane %v5167_v56, %v10582_v45  ;;  %v9973_v19 = vunpack.i.h.bf16 %v9971_v24  ;;  %v5454_v43 = vsel %vm5452_vm6, %v5444_v21, %v9963_v54  ;;  %v6474_v24 = vld [vmem:[%s10440_s20] sm:$0xff]  ;;  %9258 = vmatprep.mubr.msk.f32.mxu1 %vm6483_vm12, %v6462_v41  ;;  %s10347_s20 = smov 64  }
 0x7f5   :  { %10080 = vrot.lane.b32.xlu1 %v10079_v26, %s10343_s29  ;;  %v5463_v27 = vsel %vm5462_vm7, %v5453_v9, %v9967_v13  ;;  %v9977_v11 = vunpack.i.l.bf16 %v9976_v35  ;;  %v5464_v15 = vsel %vm5462_vm7, %v5454_v43, %v9968_v59  ;;  %v9978_v29 = vunpack.i.h.bf16 %v9976_v35  ;;  %v6464_v59 = vld [vmem:[%s10370_s9 + $0x10] sm:$0xff]  ;;  %v6465_v9 = vld [vmem:[%s10370_s9 + $0x18] sm:$0xff] }
 0x7f6   :  { %v5149_v38 = vrot.slane %v5135_v7, %v10582_v45  ;;  %v4645_v49 = vcombine.high %v12852_v17, %v12835_v30  ;;  %v5473_v20 = vsel %vm5472_vm8, %v5463_v27, %v9972_v6  ;;  %v9504_v31 = vpack.c.bf16 %v6475_v36, %v6474_v24  ;;  %v6461_v43 = vld [vmem:[%s10445_s27 + $0x18] sm:$0xff] }
 0x7f7   :  { %5359 = vrot.lane.b32.xlu0 %v5187_v48, %s10343_s29  ;;  %v5474_v26 = vsel %vm5472_vm8, %v5464_v15, %v9973_v19  ;;  %v5483_v62 = vsel %vm5482_vm9, %v5473_v20, %v9977_v11  ;;  %v5183_v35 = vcombine.high %v12882_v10, %v12870_v16  ;;  %v5184_v21 = vcombine.low %v12862_v44, %v12859_v39  ;;  %v6460_v19 = vld [vmem:[%s10445_s27 + $0x10] sm:$0xff] }
 0x7f8   :  { %v9981_v22 = vpop.permute.xlu1 %9980  ;;  %v5189_v61 = vcombine.high %v5149_v38, %v12901_v25  ;;  %v10089_v56 = vpack.i.bf16 %v4781_v28, %v4645_v49  ;;  %v5484_v47 = vsel %vm5482_vm9, %v5474_v26, %v9978_v29  ;;  %9505 = vmatprep.subr.bf16.mxu1 %v9504_v31  ;;  %v6459_v28 = vld [vmem:[%s10445_s27 + $0x8] sm:$0xff]  ;;  %v5186_v48 = vcombine.low %v12890_v63, %v12875_v23 }
 0x7f9   :  { %v9983_v34 = vunpack.i.h.bf16 %v9981_v22  ;;  %v9982_v4 = vunpack.i.l.bf16 %v9981_v22  ;;  %10085 = vrot.lane.b32.xlu1 %v10084_v18, %s10344_s7  ;;  %9507 = vmatpush3.bf16.msra.mxu1 %v9504_v31  ;;  %v6458_v18 = vld [vmem:[%s10445_s27] sm:$0xff]  ;;  %v12949_v39 = vpack.c.bf16 %v6461_v43, %v6460_v19  ;;  %v5188_v44 = vcombine.low %v5149_v38, %v12901_v25  ;;  %s13850_s27 = sld [smem:[#allocation10_spill]] }
 0x7fa   :  { %v12938_v6 = vpack.c.bf16 %v6459_v28, %v6458_v18 }
 0x7fb   :  { %5431 = vrot.lane.b32.xlu0 %v5189_v61, %s10345_s10  ;;  %v5493_v54 = vsel %vm5492_vm10, %v5483_v62, %v9982_v4  ;;  %v5494_v8 = vsel %vm5492_vm10, %v5484_v47, %v9983_v34  ;;  %v13845_v61 = vcombine.low %v12349_v12, %v12362_v52 }
 0x7fc   :  { %v9986_v60 = vpop.permute.xlu1 %9985  ;;  %9259 = vmatmul.mubr.msk.f32.vlgmr.msra.gmra.mrb[6].mxu1 %vm6483_vm12, %v6463_v14  ;;  %9525 = vmatprep.subr.bf16.mxu1 %v12938_v6 }
 0x7fd   :  { %v9988_v30 = vunpack.i.h.bf16 %v9986_v60  ;;  %v9987_v17 = vunpack.i.l.bf16 %v9986_v60  ;;  %10090 = vrot.lane.b32.xlu1 %v10089_v56, %s10345_s10  ;;  %9261 = vmatprep.mubr.msk.f32.mxu1 %vm6483_vm12, %v6464_v59 }
 0x7fe   :  { %9527 = vmatpush3.bf16.msra.mxu1 %v12938_v6 }
 0x7ff   :  { %v5503_v50 = vsel %vm5502_vm11, %v5493_v54, %v9987_v17  ;;  %v5504_v13 = vsel %vm5502_vm11, %v5494_v8, %v9988_v30  ;;  %9529 = vmatprep.subr.bf16.mxu1 %v12949_v39 }
 0x800   :  { %v9493_v7 = vpack.c.bf16 %v5504_v13, %v5503_v50  ;;  %9262 = vmatmul.mubr.msk.f32.gmra.mrb[8].mxu1 %vm6483_vm12, %v6465_v9 }
 0x801   :  { %5215 = vrot.lane.b32.xlu1 %v5183_v35, %s10340_s17  ;;  %s13862_s17 = sld [smem:[#allocation18_spill]] }
 0x802   :  { %9494 = vmatpush3.bf16.msra.mxu0 %v9493_v7  ;;  %9531 = vmatpush3.bf16.msra.mxu1 %v12949_v39 }
 0x803   :  { %9495 = vmatprep.subr.bf16.mxu0 %v13819_v46  ;;  %9541 = vmatprep.subr.bf16.mxu1 %v12938_v6 }
 0x805   :  { %5251 = vrot.lane.b32.xlu1 %v5184_v21, %s10339_s5  ;;  %s13861_s5 = sld [smem:[#allocation16_spill]] }
 0x809   :  { %5323 = vrot.lane.b32.xlu1 %v5186_v48, %s10341_s21 }
 0x80d   :  { %5395 = vrot.lane.b32.xlu1 %v5188_v44, %s10344_s7 }
 0x817   :  { %v9991_v27 = vpop.permute.xlu0 %9990 }
 0x818   :  { %v9993_v15 = vunpack.i.h.bf16 %v9991_v27  ;;  %v9992_v29 = vunpack.i.l.bf16 %v9991_v27 }
 0x81a   :  { %v5446_v38 = vsel %vm5442_vm5, %v4502_v57, %v9993_v15  ;;  %v5445_v31 = vsel %vm5442_vm5, %v13845_v61, %v9992_v29  ;;  %v13847_v29 = vcombine.low %v12560_v55, %v12563_v1 }
 0x81b   :  { %v9996_v23 = vpop.permute.xlu0 %9995 }
 0x81c   :  { %v9998_v34 = vunpack.i.h.bf16 %v9996_v23  ;;  %v9997_v4 = vunpack.i.l.bf16 %v9996_v23 }
 0x81e   :  { %v5455_v60 = vsel %vm5452_vm6, %v5445_v31, %v9997_v4  ;;  %v5456_v56 = vsel %vm5452_vm6, %v5446_v38, %v9998_v34 }
 0x81f   :  { %v10001_v63 = vpop.permute.xlu0 %10000 }
 0x820   :  { %v10003_v49 = vunpack.i.h.bf16 %v10001_v63  ;;  %v10002_v24 = vunpack.i.l.bf16 %v10001_v63 }
 0x822   :  { %v5465_v17 = vsel %vm5462_vm7, %v5455_v60, %v10002_v24  ;;  %v5466_v41 = vsel %vm5462_vm7, %v5456_v56, %v10003_v49 }
 0x823   :  { %v10006_v11 = vpop.permute.xlu0 %10005 }
 0x824   :  { %v10008_v36 = vunpack.i.h.bf16 %v10006_v11  ;;  %v10007_v20 = vunpack.i.l.bf16 %v10006_v11 }
 0x826   :  { %v5475_v0 = vsel %vm5472_vm8, %v5465_v17, %v10007_v20  ;;  %v5476_v33 = vsel %vm5472_vm8, %v5466_v41, %v10008_v36 }
 0x827   :  { %v10011_v22 = vpop.permute.xlu0 %10010 }
 0x828   :  { %v10013_v26 = vunpack.i.h.bf16 %v10011_v22  ;;  %v10012_v62 = vunpack.i.l.bf16 %v10011_v22  ;;  %v13846_v22 = vcombine.low %v12678_v5, %v12684_v53 }
 0x82a   :  { %v5485_v12 = vsel %vm5482_vm9, %v5475_v0, %v10012_v62  ;;  %v5486_v52 = vsel %vm5482_vm9, %v5476_v33, %v10013_v26 }
 0x82b   :  { %v10016_v25 = vpop.permute.xlu0 %10015 }
 0x82c   :  { %v10018_v47 = vunpack.i.h.bf16 %v10016_v25  ;;  %v10017_v30 = vunpack.i.l.bf16 %v10016_v25 }
 0x82e   :  { %v5495_v50 = vsel %vm5492_vm10, %v5485_v12, %v10017_v30  ;;  %v5496_v13 = vsel %vm5492_vm10, %v5486_v52, %v10018_v47 }
 0x82f   :  { %v10021_v57 = vpop.permute.xlu0 %10020 }
 0x830   :  { %v10023_v54 = vunpack.i.h.bf16 %v10021_v57  ;;  %v10022_v8 = vunpack.i.l.bf16 %v10021_v57 }
 0x832   :  { %v5505_v35 = vsel %vm5502_vm11, %v5495_v50, %v10022_v8  ;;  %v5506_v7 = vsel %vm5502_vm11, %v5496_v13, %v10023_v54 }
 0x833   :  { %v9496_v14 = vpack.c.bf16 %v5506_v7, %v5505_v35 }
 0x835   :  { %9497 = vmatpush3.bf16.msra.mxu0 %v9496_v14 }
 0x836   :  { %9498 = vmatprep.subr.bf16.mxu0 %v13819_v46 }
 0x847   :  { %v10026_v21 = vpop.permute.xlu0 %10025  ;;  %v10046_v28 = vpop.permute.xlu1 %10045 }
 0x848   :  { %v10028_v9 = vunpack.i.h.bf16 %v10026_v21  ;;  %v10027_v48 = vunpack.i.l.bf16 %v10026_v21  ;;  %v10048_v31 = vunpack.i.h.bf16 %v10046_v28  ;;  %v10047_v55 = vunpack.i.l.bf16 %v10046_v28 }
 0x84a   :  { %v5450_v15 = vsel %vm5442_vm5, %v13846_v22, %v10028_v9  ;;  %v5449_v34 = vsel %vm5442_vm5, %v13847_v29, %v10027_v48 }
 0x84b   :  { %v10031_v59 = vpop.permute.xlu0 %10030 }
 0x84c   :  { %v10033_v19 = vunpack.i.h.bf16 %v10031_v59  ;;  %v10032_v43 = vunpack.i.l.bf16 %v10031_v59 }
 0x84e   :  { %v5459_v49 = vsel %vm5452_vm6, %v5449_v34, %v10032_v43  ;;  %v5460_v24 = vsel %vm5452_vm6, %v5450_v15, %v10033_v19 }
 0x84f   :  { %v10036_v18 = vpop.permute.xlu0 %10035 }
 0x850   :  { %v10038_v27 = vunpack.i.h.bf16 %v10036_v18  ;;  %v10037_v23 = vunpack.i.l.bf16 %v10036_v18  ;;  %v13848_v18 = vcombine.low %v12621_v58, %v12624_v3 }
 0x852   :  { %v5469_v20 = vsel %vm5462_vm7, %v5459_v49, %v10037_v23  ;;  %v5470_v25 = vsel %vm5462_vm7, %v5460_v24, %v10038_v27 }
 0x853   :  { %v10041_v44 = vpop.permute.xlu0 %10040 }
 0x854   :  { %v10043_v63 = vunpack.i.h.bf16 %v10041_v44  ;;  %v10042_v11 = vunpack.i.l.bf16 %v10041_v44 }
 0x856   :  { %v5479_v38 = vsel %vm5472_vm8, %v5469_v20, %v10042_v11  ;;  %v5480_v5 = vsel %vm5472_vm8, %v5470_v25, %v10043_v63 }
 0x857   :  { %v10061_v4 = vpop.permute.xlu1 %10060  ;;  %v10051_v36 = vpop.permute.xlu0 %10050  ;;  %v5489_v62 = vsel %vm5482_vm9, %v5479_v38, %v10047_v55  ;;  %v5490_v60 = vsel %vm5482_vm9, %v5480_v5, %v10048_v31 }
 0x858   :  { %v10053_v53 = vunpack.i.h.bf16 %v10051_v36  ;;  %v10052_v61 = vunpack.i.l.bf16 %v10051_v36  ;;  %v10063_v54 = vunpack.i.h.bf16 %v10061_v4  ;;  %v10062_v8 = vunpack.i.l.bf16 %v10061_v4 }
 0x85a   :  { %v5499_v30 = vsel %vm5492_vm10, %v5489_v62, %v10052_v61  ;;  %v5500_v17 = vsel %vm5492_vm10, %v5490_v60, %v10053_v53  ;;  %v5447_v28 = vsel %vm5442_vm5, %v13848_v18, %v10062_v8  ;;  %v5448_v9 = vsel %vm5442_vm5, %v4774_v40, %v10063_v54  ;;  %v3313_v60 = vld [vmem:[%s10420_s24 + $0x8] sm:$0xff] }
 0x85b   :  { %v10066_v1 = vpop.permute.xlu1 %10065 }
 0x85c   :  { %v10056_v26 = vpop.permute.xlu0 %10055  ;;  %v10068_v50 = vunpack.i.h.bf16 %v10066_v1  ;;  %v10067_v13 = vunpack.i.l.bf16 %v10066_v1 }
 0x85d   :  { %v10058_v56 = vunpack.i.h.bf16 %v10056_v26  ;;  %v10057_v47 = vunpack.i.l.bf16 %v10056_v26 }
 0x85e   :  { %v5457_v43 = vsel %vm5452_vm6, %v5447_v28, %v10067_v13  ;;  %v5458_v44 = vsel %vm5452_vm6, %v5448_v9, %v10068_v50 }
 0x85f   :  { %v5509_v41 = vsel %vm5502_vm11, %v5499_v30, %v10057_v47  ;;  %v5510_v0 = vsel %vm5502_vm11, %v5500_v17, %v10058_v56  ;;  %v10071_v33 = vpop.permute.xlu1 %10070  ;;  %v3314_v56 = vld [vmem:[%s10420_s24 + $0x10] sm:$0xff]  ;;  %v13052_v47 = vld [vmem:[%s10450_s4] ss:$0 sm:$0xff]  ;;  %s13851_s4 = sld [smem:[#allocation9_spill]] }
 0x860   :  { %v9502_v57 = vpack.c.bf16 %v5510_v0, %v5509_v41  ;;  %v10073_v35 = vunpack.i.h.bf16 %v10071_v33  ;;  %v10072_v7 = vunpack.i.l.bf16 %v10071_v33 }
 0x862   :  { %v5467_v63 = vsel %vm5462_vm7, %v5457_v43, %v10072_v7  ;;  %v5468_v11 = vsel %vm5462_vm7, %v5458_v44, %v10073_v35 }
 0x863   :  { %v10076_v12 = vpop.permute.xlu1 %10075 }
 0x864   :  { %v10078_v14 = vunpack.i.h.bf16 %v10076_v12  ;;  %v10077_v21 = vunpack.i.l.bf16 %v10076_v12 }
 0x865   :  { %v5288_v20 = vpop.permute.xlu0 %5287 }
 0x866   :  { %v5477_v58 = vsel %vm5472_vm8, %v5467_v63, %v10077_v21  ;;  %v5478_v3 = vsel %vm5472_vm8, %v5468_v11, %v10078_v14 }
 0x867   :  { %v10081_v52 = vpop.permute.xlu1 %10080 }
 0x868   :  { %v10083_v48 = vunpack.i.h.bf16 %v10081_v52  ;;  %v10082_v19 = vunpack.i.l.bf16 %v10081_v52 }
 0x869   :  { %v5360_v53 = vpop.permute.xlu0 %5359 }
 0x86a   :  { %v5487_v2 = vsel %vm5482_vm9, %v5477_v58, %v10082_v19  ;;  %v5488_v32 = vsel %vm5482_vm9, %v5478_v3, %v10083_v48 }
 0x86b   :  { %v10086_v59 = vpop.permute.xlu1 %10085 }
 0x86c   :  { %v10088_v27 = vunpack.i.h.bf16 %v10086_v59  ;;  %v10087_v23 = vunpack.i.l.bf16 %v10086_v59 }
 0x86d   :  { %v5432_v16 = vpop.permute.xlu0 %5431 }
 0x86e   :  { %v5497_v29 = vsel %vm5492_vm10, %v5487_v2, %v10087_v23  ;;  %v5498_v34 = vsel %vm5492_vm10, %v5488_v32, %v10088_v27 }
 0x86f   :  { %v10091_v22 = vpop.permute.xlu1 %10090 }
 0x870   :  { %v10093_v40 = vunpack.i.h.bf16 %v10091_v22  ;;  %v10092_v15 = vunpack.i.l.bf16 %v10091_v22 }
 0x872   :  { %v5507_v4 = vsel %vm5502_vm11, %v5497_v29, %v10092_v15  ;;  %v5508_v49 = vsel %vm5502_vm11, %v5498_v34, %v10093_v40 }
 0x873   :  { %v5216_v24 = vpop.permute.xlu1 %5215  ;;  %v9499_v36 = vpack.c.bf16 %v5508_v49, %v5507_v4 }
 0x874   :  { %v5451_v25 = vsel %vm5442_vm5, %v5182_v42, %v5216_v24  ;;  %v3312_v42 = vld [vmem:[%s10420_s24] sm:$0xff]  ;;  %s10346_s24 = smov 32  }
 0x875   :  { %9500 = vmatpush3.bf16.msra.mxu0 %v9499_v36 }
 0x876   :  { %9501 = vmatprep.subr.bf16.mxu0 %v13819_v46 }
 0x877   :  { %v5252_v38 = vpop.permute.xlu1 %5251 }
 0x878   :  { %v5461_v5 = vsel %vm5452_vm6, %v5451_v25, %v5252_v38  ;;  %vm6397_vm6 = vcmask 1042434  }
 0x879   :  { %9503 = vmatpush3.bf16.msra.mxu0 %v9502_v57  ;;  %v5471_v31 = vsel %vm5462_vm7, %v5461_v5, %v5288_v20  ;;  %vm6399_vm7 = vcmask 1043459  }
 0x87a   :  { %9243 = vmatprep.subr.mxu0 %v13841_v51 }
 0x87b   :  { %v5324_v61 = vpop.permute.xlu1 %5323 }
 0x87c   :  { %v5481_v55 = vsel %vm5472_vm8, %v5471_v31, %v5324_v61  ;;  %vm6401_vm8 = vcmask 1044484  }
 0x87d   :  { %v5491_v26 = vsel %vm5482_vm9, %v5481_v55, %v5360_v53  ;;  %vm6403_vm9 = vcmask 1045509  }
 0x87f   :  { %v5396_v1 = vpop.permute.xlu1 %5395 }
 0x880   :  { %v5501_v10 = vsel %vm5492_vm10, %v5491_v26, %v5396_v1  ;;  %vm6405_vm10 = vcmask 1046534  }
 0x881   :  { %v5511_v62 = vsel %vm5502_vm11, %v5501_v10, %v5432_v16  ;;  %vm7908_vm11 = vcmask 195584  }
 0x882   :  { %9244 = vmatpush3.msra.mxu0 %v5511_v62 }
 0x883   :  { %9246 = vmatmul.mubr.msk.f32.vlgmr.msra.gmra.mrb[6].mxu0 %vm3226_vm1, %v3312_v42  ;;  %9509 = vmatprep.subr.bf16.mxu0 %v12938_v6 }
 0x884   :  { %9511 = vmatpush3.bf16.msra.mxu0 %v12938_v6  ;;  %9248 = vmatprep.mubr.msk.f32.mxu0 %vm10310_vm0, %v13841_v51 }
 0x885   :  { %9513 = vmatprep.subr.bf16.mxu0 %v12949_v39 }
 0x887   :  { %9249 = vmatmul.mubr.msk.f32.gmra.mrb[8].mxu0 %vm3226_vm1, %v3313_v60 }
 0x888   :  { %9251 = vmatprep.mubr.msk.f32.mxu0 %vm10310_vm0, %v13841_v51  ;;  %9515 = vmatpush3.bf16.msra.mxu0 %v12949_v39 }
 0x889   :  { %9517 = vmatprep.subr.bf16.mxu0 %v12938_v6 }
 0x88b   :  { %9252 = vmatmul.mubr.msk.f32.gmra.mrb[10].mxu0 %vm3226_vm1, %v3314_v56 }
 0x88c   :  { %9284 = vmatprep.mubr.f32.mxu0 %v13841_v51 }
 0x88f   :  { %9285 = vmatmul.mubr.f32.vlgmr.msra.gmra.mrb[12].mxu0 %v13841_v51 }
 0x890   :  { %9519 = vmatpush3.bf16.msra.mxu0 %v12938_v6 }
 0x891   :  { %9521 = vmatprep.subr.bf16.mxu0 %v12949_v39 }
 0x894   :  { %9523 = vmatpush3.bf16.msra.mxu0 %v12949_v39 }
 0x895   :  { %9533 = vmatprep.subr.bf16.mxu0 %v12938_v6 }
 0x8cf   :  { %v9260_v30 = vpop.f32.mrb[6].mxu1 }
 0x8d0   :  { %v6592_v17 = vadd.f32 %v9260_v30, %v13052_v47  ;;  %v6586_v41 = vpop.f32.mrb[7].mxu1 }
 0x8d1   :  { %v6587_v0 = vadd.f32 %v13052_v47, %v6586_v41 }
 0x8d2   :  { %6646 = vst [vmem:[#allocation2 + $0x8] sm:$0xff] %v6592_v17 }
 0x8d3   :  { %v9263_v33 = vpop.f32.mrb[8].mxu1 }
 0x8d4   :  { %v13057_v57 = vadd.f32 %v9263_v33, %v13052_v47  ;;  %v6596_v12 = vpop.f32.mrb[9].mxu1 }
 0x8d5   :  { %v6597_v52 = vadd.f32 %v13052_v47, %v6596_v12 }
 0x8d7   :  { %6647 = vst [vmem:[#allocation2 + $0x10] sm:$0xff] %v6597_v52 }
 0x8d9   :  { %v6658_v14 = vld [vmem:[#allocation2 + $0x8] sm:$0xf] }
 0x8de   :  { %v6800_v31 = vld [vmem:[#allocation2 + $0x14] sm:$0xf]  ;;  %v6799_v26 = vld [vmem:[#allocation2 + $0xc] sm:$0xff] }
 0x956   :  { %v13060_v54 = vpop.f32.mrb[6].mxu0 }
 0x957   :  { %v9247_v8 = vpop.f32.mrb[7].mxu0 }
 0x95a   :  { %v13062_v50 = vpop.f32.mrb[8].mxu0 }
 0x95b   :  { %v9250_v13 = vpop.f32.mrb[9].mxu0 }
 0x95e   :  { %v13064_v35 = vpop.f32.mrb[10].mxu0 }
 0x95f   :  { %v9253_v7 = vpop.f32.mrb[11].mxu0 }
 0x962   :  { %v9286_v21 = vpop.f32.mrb[12].mxu0 }
 0x963   :  { %v6739_v59 = vadd.f32 %v9286_v21, %v6658_v14  ;;  %v6729_v18 = vpop.f32.mrb[13].mxu0 }
 0x964   :  { %v6738_v28 = vadd.f32 %v6729_v18, %v6587_v0 }
 0x965   :  { %10106 = vtanh.f32 %v6739_v59  ;;  %v8946_v19 = vmul.f32 -1.442695, %v6739_v59 }
 0x966   :  { %10108 = vtanh.f32 %v6738_v28  ;;  %v8945_v43 = vmul.f32 -1.442695, %v6738_v28 }
 0x967   :  { %10110 = vpow2.f32 %v8946_v19  ;;  %v6467_v19 = vld [vmem:[%s10370_s9 + $0x28] sm:$0xff] }
 0x968   :  { %10112 = vpow2.f32 %v8945_v43  ;;  %v6468_v43 = vld [vmem:[%s10370_s9 + $0x30] sm:$0xff] }
 0x96f   :  { %v10107_v9 = vpop.eup %10106 }
 0x970   :  { %v10109_v48 = vpop.eup %10108  ;;  %6760 = vrot.lane.b32.xlu0 %v10107_v9, %s10346_s24 }
 0x971   :  { %6758 = vrot.lane.b32.xlu1 %v10109_v48, %s10346_s24  ;;  %v10111_v44 = vpop.eup %10110  ;;  %v6466_v48 = vld [vmem:[%s10370_s9 + $0x20] sm:$0xff] }
 0x972   :  { %v10113_v27 = vpop.eup %10112  ;;  %v6747_v23 = vadd.f32 1.0, %v10111_v44  ;;  %9264 = vmatprep.mubr.msk.f32.mxu1 %vm6483_vm12, %v6466_v48  ;;  %v6469_v44 = vld [vmem:[%s10370_s9 + $0x38] sm:$0xff] }
 0x973   :  { %v6746_v63 = vadd.f32 1.0, %v10113_v27  ;;  %9265 = vmatmul.mubr.msk.f32.gmra.mrb[10].mxu1 %vm6483_vm12, %v6467_v19  ;;  %v6470_v27 = vld [vmem:[%s10370_s9 + $0x40] sm:$0xff] }
 0x974   :  { %10114 = vrcp.f32 %v6747_v23  ;;  %9267 = vmatprep.mubr.msk.f32.mxu1 %vm6483_vm12, %v6468_v43  ;;  %v6471_v23 = vld [vmem:[%s10370_s9 + $0x48] sm:$0xff] }
 0x975   :  { %10116 = vrcp.f32 %v6746_v63  ;;  %v6472_v63 = vld [vmem:[%s10370_s9 + $0x50] sm:$0xff] }
 0x977   :  { %9268 = vmatmul.mubr.msk.f32.gmra.mrb[12].mxu1 %vm6483_vm12, %v6469_v44 }
 0x978   :  { %9270 = vmatprep.mubr.msk.f32.mxu1 %vm6483_vm12, %v6470_v27 }
 0x97b   :  { %9271 = vmatmul.mubr.msk.f32.gmra.mrb[14].mxu1 %vm6483_vm12, %v6471_v23 }
 0x97c   :  { %9273 = vmatprep.mubr.msk.f32.mxu1 %vm6483_vm12, %v6472_v63 }
 0x97e   :  { %v10115_v11 = vpop.eup %10114 }
 0x97f   :  { %v10117_v3 = vpop.eup %10116  ;;  %v6755_v40 = vmul.f32 0.0, %v10115_v11 }
 0x980   :  { %v6754_v29 = vmul.f32 0.0, %v10117_v3 }
 0x9e2   :  { %v6761_v58 = vpop.permute.xlu0 %6760 }
 0x9e3   :  { %v6765_v22 = vmul.f32 %v10115_v11, %v6761_v58  ;;  %v6759_v2 = vpop.permute.xlu1 %6758 }
 0x9e4   :  { %v6764_v32 = vmul.f32 %v10117_v3, %v6759_v2 }
 0x9e5   :  { %6770 = vrot.lane.b32.xlu0 %v6765_v22, %s10346_s24 }
 0x9e6   :  { %6768 = vrot.lane.b32.xlu1 %v6764_v32, %s10346_s24 }
 0xa57   :  { %v6771_v15 = vpop.permute.xlu0 %6770 }
 0xa58   :  { %v6775_v34 = vadd.f32 %v6771_v15, %v6755_v40  ;;  %v6769_v4 = vpop.permute.xlu1 %6768  ;;  %v9266_v15 = vpop.f32.mrb[10].mxu1 }
 0xa59   :  { %v6774_v49 = vadd.f32 %v6769_v4, %v6754_v29  ;;  %v6612_v29 = vadd.f32 %v9266_v15, %v13052_v47 }
 0xa5a   :  { %10118 = vtanh.f32 %v6775_v34 }
 0xa5b   :  { %10120 = vtanh.f32 %v6774_v49  ;;  %6650 = vst [vmem:[#allocation2 + $0x28] sm:$0xff] %v6612_v29 }
 0xa64   :  { %v10119_v24 = vpop.eup %10118 }
 0xa65   :  { %v10121_v36 = vpop.eup %10120  ;;  %6782 = vrot.lane.b32.xlu0 %v10119_v24, %s10346_s24 }
 0xa66   :  { %6780 = vrot.lane.b32.xlu1 %v10121_v36, %s10346_s24 }
 0xad7   :  { %v6783_v20 = vpop.permute.xlu0 %6782 }
 0xad8   :  { %v6787_v25 = vmul.f32 %v10115_v11, %v6783_v20  ;;  %v6781_v38 = vpop.permute.xlu1 %6780 }
 0xad9   :  { %v6786_v5 = vmul.f32 %v10117_v3, %v6781_v38  ;;  %v6473_v3 = vld [vmem:[%s10370_s9 + $0x58] sm:$0xff]  ;;  %s13849_s9 = sld [smem:[#allocation8_spill]] }
 0xada   :  { %6792 = vrot.lane.b32.xlu0 %v6787_v25, %s10347_s20  ;;  %9274 = vmatmul.mubr.msk.f32.gmra.mrb[16].mxu1 %vm6483_vm12, %v6473_v3  ;;  %vm7997_vm12 = vcmask 523264  }
 0xadb   :  { %6790 = vrot.lane.b32.xlu1 %v6786_v5, %s10347_s20 }
 0xb4c   :  { %v6793_v53 = vpop.permute.xlu0 %6792 }
 0xb4d   :  { %6798 = vst.msk [vmem:[#allocation3 + $0x8] sm:$0xf] %vm6797_vm13, %v6793_v53  ;;  %v6791_v61 = vpop.permute.xlu1 %6790 }
 0xb4e   :  { %6796 = vst.msk [vmem:[#allocation3] sm:$0xff] %vm6659_vm14, %v6791_v61  ;;  %9295 = vmatprep.mubr.msk.f32.mxu0 %vm6659_vm14, %v6791_v61 }
 0xb4f   :  { %9296 = vmatmul.mubr.msk.f32.vlgmr.msra.gmra.mrb[14].mxu0 %vm6659_vm14, %v6793_v53 }
 0xb50   :  { %9535 = vmatpush3.bf16.msra.mxu0 %v12938_v6 }
 0xb51   :  { %9537 = vmatprep.subr.bf16.mxu0 %v12949_v39 }
 0xb54   :  { %9539 = vmatpush3.bf16.msra.mxu0 %v12949_v39 }
 0xb55   :  { %9549 = vmatprep.subr.bf16.mxu0 %v12938_v6 }
 0xc22   :  { %v9297_v55 = vpop.f32.mrb[14].mxu0 }
 0xc23   :  { %v6881_v1 = vadd.f32 %v9297_v55, %v6800_v31  ;;  %v6871_v16 = vpop.f32.mrb[15].mxu0 }
 0xc24   :  { %v6880_v10 = vadd.f32 %v6871_v16, %v6799_v26 }
 0xc25   :  { %10122 = vtanh.f32 %v6881_v1  ;;  %v8950_v60 = vmul.f32 -1.442695, %v6881_v1 }
 0xc26   :  { %10124 = vtanh.f32 %v6880_v10  ;;  %v8949_v56 = vmul.f32 -1.442695, %v6880_v10 }
 0xc27   :  { %10126 = vpow2.f32 %v8950_v60 }
 0xc28   :  { %10128 = vpow2.f32 %v8949_v56 }
 0xc2f   :  { %v10123_v42 = vpop.eup %10122 }
 0xc30   :  { %v10125_v62 = vpop.eup %10124  ;;  %6902 = vrot.lane.b32.xlu0 %v10123_v42, %s10346_s24 }
 0xc31   :  { %6900 = vrot.lane.b32.xlu1 %v10125_v62, %s10346_s24  ;;  %v10127_v30 = vpop.eup %10126 }
 0xc32   :  { %v10129_v17 = vpop.eup %10128  ;;  %v6889_v41 = vadd.f32 1.0, %v10127_v30 }
 0xc33   :  { %v6888_v0 = vadd.f32 1.0, %v10129_v17 }
 0xc34   :  { %10130 = vrcp.f32 %v6889_v41 }
 0xc35   :  { %10132 = vrcp.f32 %v6888_v0 }
 0xc3e   :  { %v10131_v33 = vpop.eup %10130 }
 0xc3f   :  { %v10133_v52 = vpop.eup %10132  ;;  %v6897_v14 = vmul.f32 %v10131_v33, %v6775_v34  ;;  %v6606_v34 = vpop.f32.mrb[11].mxu1 }
 0xc40   :  { %v6896_v59 = vmul.f32 %v10133_v52, %v6774_v49  ;;  %v6607_v4 = vadd.f32 %v13052_v47, %v6606_v34  ;;  %v9269_v49 = vpop.f32.mrb[12].mxu1 }
 0xc41   :  { %v6622_v24 = vadd.f32 %v9269_v49, %v13052_v47  ;;  %v6616_v36 = vpop.f32.mrb[13].mxu1 }
 0xc42   :  { %6649 = vst [vmem:[#allocation2 + $0x20] sm:$0xff] %v6607_v4  ;;  %v13116_v20 = vadd.f32 %v13052_v47, %v6616_v36  ;;  %v9272_v25 = vpop.f32.mrb[14].mxu1 }
 0xc43   :  { %6652 = vst [vmem:[#allocation2 + $0x38] sm:$0xff] %v6622_v24  ;;  %v13119_v38 = vadd.f32 %v9272_v25, %v13052_v47  ;;  %v6626_v5 = vpop.f32.mrb[15].mxu1 }
 0xc44   :  { %v6627_v53 = vadd.f32 %v13052_v47, %v6626_v5  ;;  %v9275_v61 = vpop.f32.mrb[16].mxu1 }
 0xc45   :  { %v6642_v31 = vadd.f32 %v9275_v61, %v13052_v47  ;;  %v6636_v55 = vpop.f32.mrb[17].mxu1 }
 0xc46   :  { %6653 = vst [vmem:[#allocation2 + $0x40] sm:$0xff] %v6627_v53  ;;  %v6637_v1 = vadd.f32 %v13052_v47, %v6636_v55 }
 0xc47   :  { %6656 = vst [vmem:[#allocation2 + $0x58] sm:$0xff] %v6642_v31 }
 0xc48   :  { %6655 = vst [vmem:[#allocation2 + $0x50] sm:$0xff] %v6637_v1 }
 0xc49   :  { %v6942_v47 = vld [vmem:[#allocation2 + $0x20] sm:$0xf] }
 0xca2   :  { %v6903_v12 = vpop.permute.xlu0 %6902 }
 0xca3   :  { %v6907_v8 = vmul.f32 %v10131_v33, %v6903_v12  ;;  %v6901_v13 = vpop.permute.xlu1 %6900 }
 0xca4   :  { %v6906_v7 = vmul.f32 %v10133_v52, %v6901_v13 }
 0xca5   :  { %6912 = vrot.lane.b32.xlu0 %v6907_v8, %s10346_s24 }
 0xca6   :  { %6910 = vrot.lane.b32.xlu1 %v6906_v7, %s10346_s24 }
 0xd17   :  { %v6913_v21 = vpop.permute.xlu0 %6912 }
 0xd18   :  { %v13086_v18 = vadd.f32 %v6913_v21, %v6897_v14  ;;  %v6911_v28 = vpop.permute.xlu1 %6910 }
 0xd19   :  { %v13088_v9 = vadd.f32 %v6911_v28, %v6896_v59 }
 0xd1a   :  { %10134 = vtanh.f32 %v13086_v18 }
 0xd1b   :  { %10136 = vtanh.f32 %v13088_v9 }
 0xd24   :  { %v10135_v11 = vpop.eup %10134 }
 0xd25   :  { %v10137_v58 = vpop.eup %10136  ;;  %6924 = vrot.lane.b32.xlu0 %v10135_v11, %s10346_s24 }
 0xd26   :  { %6922 = vrot.lane.b32.xlu1 %v10137_v58, %s10346_s24 }
 0xd97   :  { %v6925_v22 = vpop.permute.xlu0 %6924 }
 0xd98   :  { %v6929_v2 = vmul.f32 %v10131_v33, %v6925_v22  ;;  %v6923_v32 = vpop.permute.xlu1 %6922  ;;  %v7084_v22 = vld [vmem:[#allocation2 + $0x2c] sm:$0xf] }
 0xd99   :  { %v6928_v40 = vmul.f32 %v10133_v52, %v6923_v32 }
 0xd9a   :  { %6934 = vrot.lane.b32.xlu0 %v6929_v2, %s10347_s20 }
 0xd9b   :  { %6932 = vrot.lane.b32.xlu1 %v6928_v40, %s10347_s20  ;;  %v7083_v40 = vld [vmem:[#allocation2 + $0x24] sm:$0xff] }
 0xe0c   :  { %v6935_v26 = vpop.permute.xlu0 %6934 }
 0xe0d   :  { %6940 = vst.msk [vmem:[#allocation3 + $0x18] sm:$0xf] %vm6797_vm13, %v6935_v26  ;;  %v6933_v16 = vpop.permute.xlu1 %6932 }
 0xe0e   :  { %6939 = vst.msk [vmem:[#allocation3 + $0x10] sm:$0xff] %vm6659_vm14, %v6933_v16  ;;  %9306 = vmatprep.mubr.msk.f32.mxu1 %vm6659_vm14, %v6933_v16 }
 0xe0f   :  { %9307 = vmatmul.mubr.msk.f32.vlgmr.msra.gmra.mrb[18].mxu1 %vm6659_vm14, %v6935_v26 }
 0xe10   :  { %9543 = vmatpush3.bf16.msra.mxu1 %v12938_v6 }
 0xe11   :  { %9545 = vmatprep.subr.bf16.mxu1 %v12949_v39 }
 0xe14   :  { %9547 = vmatpush3.bf16.msra.mxu1 %v12949_v39 }
 0xe15   :  { %9557 = vmatprep.subr.bf16.mxu1 %v12938_v6 }
 0xee2   :  { %v9308_v10 = vpop.f32.mrb[18].mxu1 }
 0xee3   :  { %v7023_v42 = vadd.f32 %v9308_v10, %v6942_v47  ;;  %v7013_v62 = vpop.f32.mrb[19].mxu1 }
 0xee4   :  { %v7022_v60 = vadd.f32 %v7013_v62, %v13057_v57 }
 0xee5   :  { %10138 = vtanh.f32 %v7023_v42  ;;  %v8954_v17 = vmul.f32 -1.442695, %v7023_v42 }
 0xee6   :  { %10140 = vtanh.f32 %v7022_v60  ;;  %v8953_v41 = vmul.f32 -1.442695, %v7022_v60 }
 0xee7   :  { %10142 = vpow2.f32 %v8954_v17 }
 0xee8   :  { %10144 = vpow2.f32 %v8953_v41 }
 0xeef   :  { %v10139_v56 = vpop.eup %10138 }
 0xef0   :  { %v10141_v30 = vpop.eup %10140  ;;  %7044 = vrot.lane.b32.xlu0 %v10139_v56, %s10346_s24 }
 0xef1   :  { %7042 = vrot.lane.b32.xlu1 %v10141_v30, %s10346_s24  ;;  %v10143_v0 = vpop.eup %10142 }
 0xef2   :  { %v10145_v33 = vpop.eup %10144  ;;  %v7031_v12 = vadd.f32 1.0, %v10143_v0 }
 0xef3   :  { %v7030_v52 = vadd.f32 1.0, %v10145_v33 }
 0xef4   :  { %10146 = vrcp.f32 %v7031_v12 }
 0xef5   :  { %10148 = vrcp.f32 %v7030_v52 }
 0xefe   :  { %v10147_v8 = vpop.eup %10146 }
 0xeff   :  { %v10149_v13 = vpop.eup %10148  ;;  %v7039_v59 = vmul.f32 %v10147_v8, %v13086_v18 }
 0xf00   :  { %v7038_v48 = vmul.f32 %v10149_v13, %v13088_v9 }
 0xf62   :  { %v7045_v57 = vpop.permute.xlu0 %7044 }
 0xf63   :  { %v7049_v7 = vmul.f32 %v10147_v8, %v7045_v57  ;;  %v7043_v14 = vpop.permute.xlu1 %7042  ;;  %v7226_v57 = vld [vmem:[#allocation2 + $0x38] sm:$0xf] }
 0xf64   :  { %v7048_v21 = vmul.f32 %v10149_v13, %v7043_v14 }
 0xf65   :  { %7054 = vrot.lane.b32.xlu0 %v7049_v7, %s10346_s24 }
 0xf66   :  { %7052 = vrot.lane.b32.xlu1 %v7048_v21, %s10346_s24 }
 0xfd7   :  { %v7055_v28 = vpop.permute.xlu0 %7054 }
 0xfd8   :  { %v7059_v19 = vadd.f32 %v7055_v28, %v7039_v59  ;;  %v7053_v43 = vpop.permute.xlu1 %7052 }
 0xfd9   :  { %v7058_v44 = vadd.f32 %v7053_v43, %v7038_v48 }
 0xfda   :  { %10150 = vtanh.f32 %v7059_v19 }
 0xfdb   :  { %10152 = vtanh.f32 %v7058_v44 }
 0xfe4   :  { %v10151_v27 = vpop.eup %10150 }
 0xfe5   :  { %v10153_v23 = vpop.eup %10152  ;;  %7066 = vrot.lane.b32.xlu0 %v10151_v27, %s10346_s24 }
 0xfe6   :  { %7064 = vrot.lane.b32.xlu1 %v10153_v23, %s10346_s24 }
0x1057   :  { %v7067_v63 = vpop.permute.xlu0 %7066 }
0x1058   :  { %v7071_v11 = vmul.f32 %v10147_v8, %v7067_v63  ;;  %v7065_v58 = vpop.permute.xlu1 %7064 }
0x1059   :  { %v7070_v3 = vmul.f32 %v10149_v13, %v7065_v58 }
0x105a   :  { %7076 = vrot.lane.b32.xlu0 %v7071_v11, %s10347_s20 }
0x105b   :  { %7074 = vrot.lane.b32.xlu1 %v7070_v3, %s10347_s20 }
0x10cc   :  { %v7077_v18 = vpop.permute.xlu0 %7076 }
0x10cd   :  { %7082 = vst.msk [vmem:[#allocation3 + $0x28] sm:$0xf] %vm6797_vm13, %v7077_v18  ;;  %v7075_v9 = vpop.permute.xlu1 %7074 }
0x10ce   :  { %7081 = vst.msk [vmem:[#allocation3 + $0x20] sm:$0xff] %vm6659_vm14, %v7075_v9  ;;  %9317 = vmatprep.mubr.msk.f32.mxu0 %vm6659_vm14, %v7075_v9 }
0x10cf   :  { %9318 = vmatmul.mubr.msk.f32.vlgmr.msra.gmra.mrb[16].mxu0 %vm6659_vm14, %v7077_v18 }
0x10d0   :  { %9551 = vmatpush3.bf16.msra.mxu0 %v12938_v6 }
0x10d1   :  { %9553 = vmatprep.subr.bf16.mxu0 %v12949_v39 }
0x10d4   :  { %9555 = vmatpush3.bf16.msra.mxu0 %v12949_v39 }
0x10d5   :  { %9565 = vmatprep.subr.bf16.mxu0 %v12938_v6 }
0x11a2   :  { %v9319_v2 = vpop.f32.mrb[16].mxu0 }
0x11a3   :  { %v7165_v32 = vadd.f32 %v9319_v2, %v7084_v22  ;;  %v7155_v15 = vpop.f32.mrb[17].mxu0 }
0x11a4   :  { %v7164_v29 = vadd.f32 %v7155_v15, %v7083_v40 }
0x11a5   :  { %10154 = vtanh.f32 %v7165_v32  ;;  %v8958_v49 = vmul.f32 -1.442695, %v7165_v32 }
0x11a6   :  { %10156 = vtanh.f32 %v7164_v29  ;;  %v8957_v24 = vmul.f32 -1.442695, %v7164_v29 }
0x11a7   :  { %10158 = vpow2.f32 %v8958_v49 }
0x11a8   :  { %10160 = vpow2.f32 %v8957_v24 }
0x11af   :  { %v10155_v34 = vpop.eup %10154 }
0x11b0   :  { %v10157_v4 = vpop.eup %10156  ;;  %7186 = vrot.lane.b32.xlu0 %v10155_v34, %s10346_s24 }
0x11b1   :  { %7184 = vrot.lane.b32.xlu1 %v10157_v4, %s10346_s24  ;;  %v10159_v36 = vpop.eup %10158 }
0x11b2   :  { %v10161_v25 = vpop.eup %10160  ;;  %v7173_v5 = vadd.f32 1.0, %v10159_v36 }
0x11b3   :  { %v7172_v53 = vadd.f32 1.0, %v10161_v25 }
0x11b4   :  { %10162 = vrcp.f32 %v7173_v5 }
0x11b5   :  { %10164 = vrcp.f32 %v7172_v53  ;;  %v7368_v53 = vld [vmem:[#allocation2 + $0x44] sm:$0xf] }
0x11be   :  { %v10163_v61 = vpop.eup %10162 }
0x11bf   :  { %v10165_v55 = vpop.eup %10164  ;;  %v7181_v47 = vmul.f32 %v10163_v61, %v7059_v19 }
0x11c0   :  { %v7180_v42 = vmul.f32 %v10165_v55, %v7058_v44 }
0x1222   :  { %v7187_v31 = vpop.permute.xlu0 %7186 }
0x1223   :  { %v7191_v1 = vmul.f32 %v10163_v61, %v7187_v31  ;;  %v7185_v26 = vpop.permute.xlu1 %7184 }
0x1224   :  { %v7190_v16 = vmul.f32 %v10165_v55, %v7185_v26 }
0x1225   :  { %7196 = vrot.lane.b32.xlu0 %v7191_v1, %s10346_s24 }
0x1226   :  { %7194 = vrot.lane.b32.xlu1 %v7190_v16, %s10346_s24 }
0x1297   :  { %v7197_v10 = vpop.permute.xlu0 %7196 }
0x1298   :  { %v7201_v62 = vadd.f32 %v7197_v10, %v7181_v47  ;;  %v7195_v60 = vpop.permute.xlu1 %7194 }
0x1299   :  { %v7200_v56 = vadd.f32 %v7195_v60, %v7180_v42 }
0x129a   :  { %10166 = vtanh.f32 %v7201_v62 }
0x129b   :  { %10168 = vtanh.f32 %v7200_v56 }
0x12a4   :  { %v10167_v30 = vpop.eup %10166 }
0x12a5   :  { %v10169_v17 = vpop.eup %10168  ;;  %7208 = vrot.lane.b32.xlu0 %v10167_v30, %s10346_s24 }
0x12a6   :  { %7206 = vrot.lane.b32.xlu1 %v10169_v17, %s10346_s24 }
0x1317   :  { %v7209_v41 = vpop.permute.xlu0 %7208 }
0x1318   :  { %v7213_v0 = vmul.f32 %v10163_v61, %v7209_v41  ;;  %v7207_v33 = vpop.permute.xlu1 %7206 }
0x1319   :  { %v7212_v12 = vmul.f32 %v10165_v55, %v7207_v33  ;;  %v7367_v55 = vld [vmem:[#allocation2 + $0x3c] sm:$0xff] }
0x131a   :  { %7218 = vrot.lane.b32.xlu0 %v7213_v0, %s10347_s20 }
0x131b   :  { %7216 = vrot.lane.b32.xlu1 %v7212_v12, %s10347_s20 }
0x138c   :  { %v7219_v52 = vpop.permute.xlu0 %7218 }
0x138d   :  { %7224 = vst.msk [vmem:[#allocation3 + $0x38] sm:$0xf] %vm6797_vm13, %v7219_v52  ;;  %v7217_v8 = vpop.permute.xlu1 %7216 }
0x138e   :  { %7223 = vst.msk [vmem:[#allocation3 + $0x30] sm:$0xff] %vm6659_vm14, %v7217_v8  ;;  %9328 = vmatprep.mubr.msk.f32.mxu1 %vm6659_vm14, %v7217_v8 }
0x138f   :  { %9329 = vmatmul.mubr.msk.f32.vlgmr.msra.gmra.mrb[20].mxu1 %vm6659_vm14, %v7219_v52 }
0x1390   :  { %9559 = vmatpush3.bf16.msra.mxu1 %v12938_v6 }
0x1391   :  { %9561 = vmatprep.subr.bf16.mxu1 %v12949_v39 }
0x1394   :  { %9563 = vmatpush3.bf16.msra.mxu1 %v12949_v39 }
0x1395   :  { %9572 = vmatprep.subr.bf16.mxu1 %v13819_v46 }
0x1462   :  { %v9330_v13 = vpop.f32.mrb[20].mxu1 }
0x1463   :  { %v7307_v7 = vadd.f32 %v9330_v13, %v7226_v57  ;;  %v7297_v14 = vpop.f32.mrb[21].mxu1 }
0x1464   :  { %v7306_v21 = vadd.f32 %v7297_v14, %v13116_v20 }
0x1465   :  { %10170 = vtanh.f32 %v7307_v7  ;;  %v8962_v48 = vmul.f32 -1.442695, %v7307_v7 }
0x1466   :  { %10172 = vtanh.f32 %v7306_v21  ;;  %v8961_v19 = vmul.f32 -1.442695, %v7306_v21 }
0x1467   :  { %10174 = vpow2.f32 %v8962_v48 }
0x1468   :  { %10176 = vpow2.f32 %v8961_v19 }
0x146f   :  { %v10171_v59 = vpop.eup %10170 }
0x1470   :  { %v10173_v28 = vpop.eup %10172  ;;  %7328 = vrot.lane.b32.xlu0 %v10171_v59, %s10346_s24 }
0x1471   :  { %7326 = vrot.lane.b32.xlu1 %v10173_v28, %s10346_s24  ;;  %v10175_v43 = vpop.eup %10174 }
0x1472   :  { %v10177_v44 = vpop.eup %10176  ;;  %v7315_v27 = vadd.f32 1.0, %v10175_v43 }
0x1473   :  { %v7314_v23 = vadd.f32 1.0, %v10177_v44 }
0x1474   :  { %10178 = vrcp.f32 %v7315_v27  ;;  %v7510_v27 = vld [vmem:[#allocation2 + $0x50] sm:$0xf] }
0x1475   :  { %10180 = vrcp.f32 %v7314_v23 }
0x147e   :  { %v10179_v63 = vpop.eup %10178 }
0x147f   :  { %v10181_v11 = vpop.eup %10180  ;;  %v7323_v9 = vmul.f32 %v10179_v63, %v7201_v62 }
0x1480   :  { %v7322_v2 = vmul.f32 %v10181_v11, %v7200_v56 }
0x14e2   :  { %v7329_v20 = vpop.permute.xlu0 %7328 }
0x14e3   :  { %v7333_v58 = vmul.f32 %v10179_v63, %v7329_v20  ;;  %v7327_v3 = vpop.permute.xlu1 %7326 }
0x14e4   :  { %v7332_v18 = vmul.f32 %v10181_v11, %v7327_v3 }
0x14e5   :  { %7338 = vrot.lane.b32.xlu0 %v7333_v58, %s10346_s24 }
0x14e6   :  { %7336 = vrot.lane.b32.xlu1 %v7332_v18, %s10346_s24 }
0x1557   :  { %v7339_v22 = vpop.permute.xlu0 %7338 }
0x1558   :  { %v7343_v32 = vadd.f32 %v7339_v22, %v7323_v9  ;;  %v7337_v40 = vpop.permute.xlu1 %7336 }
0x1559   :  { %v7342_v15 = vadd.f32 %v7337_v40, %v7322_v2 }
0x155a   :  { %10182 = vtanh.f32 %v7343_v32 }
0x155b   :  { %10184 = vtanh.f32 %v7342_v15 }
0x1564   :  { %v10183_v29 = vpop.eup %10182 }
0x1565   :  { %v10185_v34 = vpop.eup %10184  ;;  %7350 = vrot.lane.b32.xlu0 %v10183_v29, %s10346_s24 }
0x1566   :  { %7348 = vrot.lane.b32.xlu1 %v10185_v34, %s10346_s24 }
0x15d7   :  { %v7351_v4 = vpop.permute.xlu0 %7350 }
0x15d8   :  { %v7355_v49 = vmul.f32 %v10179_v63, %v7351_v4  ;;  %v7349_v24 = vpop.permute.xlu1 %7348 }
0x15d9   :  { %v7354_v36 = vmul.f32 %v10181_v11, %v7349_v24 }
0x15da   :  { %7360 = vrot.lane.b32.xlu0 %v7355_v49, %s10347_s20 }
0x15db   :  { %7358 = vrot.lane.b32.xlu1 %v7354_v36, %s10347_s20 }
0x164c   :  { %v7361_v25 = vpop.permute.xlu0 %7360 }
0x164d   :  { %7366 = vst.msk [vmem:[#allocation3 + $0x48] sm:$0xf] %vm6797_vm13, %v7361_v25  ;;  %v7359_v5 = vpop.permute.xlu1 %7358 }
0x164e   :  { %7365 = vst.msk [vmem:[#allocation3 + $0x40] sm:$0xff] %vm6659_vm14, %v7359_v5  ;;  %9339 = vmatprep.mubr.msk.f32.mxu0 %vm6659_vm14, %v7359_v5 }
0x164f   :  { %9340 = vmatmul.mubr.msk.f32.vlgmr.msra.gmra.mrb[18].mxu0 %vm6659_vm14, %v7361_v25 }
0x1650   :  { %9567 = vmatpush3.bf16.msra.mxu0 %v12938_v6 }
0x1651   :  { %9569 = vmatprep.subr.bf16.mxu0 %v12949_v39 }
0x1654   :  { %9571 = vmatpush3.bf16.msra.mxu0 %v12949_v39 }
0x1655   :  { %9581 = vmatprep.subr.bf16.mxu0 %v13819_v46 }
0x1722   :  { %v9341_v61 = vpop.f32.mrb[18].mxu0 }
0x1723   :  { %v7449_v31 = vadd.f32 %v9341_v61, %v7368_v53  ;;  %v7439_v1 = vpop.f32.mrb[19].mxu0 }
0x1724   :  { %v7448_v26 = vadd.f32 %v7439_v1, %v7367_v55 }
0x1725   :  { %10186 = vtanh.f32 %v7449_v31  ;;  %v8966_v6 = vmul.f32 -1.442695, %v7449_v31 }
0x1726   :  { %10188 = vtanh.f32 %v7448_v26  ;;  %v8965_v10 = vmul.f32 -1.442695, %v7448_v26 }
0x1727   :  { %10190 = vpow2.f32 %v8966_v6  ;;  %v3316_v6 = vld [vmem:[%s13849_s9 + $0x8] sm:$0xff] }
0x1728   :  { %10192 = vpow2.f32 %v8965_v10  ;;  %v3315_v10 = vld [vmem:[%s13849_s9] sm:$0xff] }
0x172f   :  { %v10187_v16 = vpop.eup %10186 }
0x1730   :  { %v10189_v47 = vpop.eup %10188  ;;  %7470 = vrot.lane.b32.xlu0 %v10187_v16, %s10346_s24 }
0x1731   :  { %7468 = vrot.lane.b32.xlu1 %v10189_v47, %s10346_s24  ;;  %v10191_v39 = vpop.eup %10190 }
0x1732   :  { %v10193_v42 = vpop.eup %10192  ;;  %v7457_v62 = vadd.f32 1.0, %v10191_v39  ;;  %v3317_v39 = vld [vmem:[%s13849_s9 + $0x10] sm:$0xff] }
0x1733   :  { %v7456_v60 = vadd.f32 1.0, %v10193_v42 }
0x1734   :  { %10194 = vrcp.f32 %v7457_v62 }
0x1735   :  { %10196 = vrcp.f32 %v7456_v60 }
0x173e   :  { %v10195_v56 = vpop.eup %10194 }
0x173f   :  { %v10197_v17 = vpop.eup %10196  ;;  %v7465_v12 = vmul.f32 %v10195_v56, %v7343_v32 }
0x1740   :  { %v7464_v8 = vmul.f32 %v10197_v17, %v7342_v15 }
0x17a2   :  { %v7471_v30 = vpop.permute.xlu0 %7470 }
0x17a3   :  { %v7475_v41 = vmul.f32 %v10195_v56, %v7471_v30  ;;  %v7469_v0 = vpop.permute.xlu1 %7468 }
0x17a4   :  { %v7474_v33 = vmul.f32 %v10197_v17, %v7469_v0 }
0x17a5   :  { %7480 = vrot.lane.b32.xlu0 %v7475_v41, %s10346_s24 }
0x17a6   :  { %7478 = vrot.lane.b32.xlu1 %v7474_v33, %s10346_s24 }
0x1817   :  { %v7481_v52 = vpop.permute.xlu0 %7480 }
0x1818   :  { %v7485_v57 = vadd.f32 %v7481_v52, %v7465_v12  ;;  %v7479_v13 = vpop.permute.xlu1 %7478 }
0x1819   :  { %v7484_v7 = vadd.f32 %v7479_v13, %v7464_v8 }
0x181a   :  { %10198 = vtanh.f32 %v7485_v57 }
0x181b   :  { %10200 = vtanh.f32 %v7484_v7 }
0x1824   :  { %v10199_v14 = vpop.eup %10198 }
0x1825   :  { %v10201_v21 = vpop.eup %10200  ;;  %7492 = vrot.lane.b32.xlu0 %v10199_v14, %s10346_s24 }
0x1826   :  { %7490 = vrot.lane.b32.xlu1 %v10201_v21, %s10346_s24 }
0x1897   :  { %v7493_v59 = vpop.permute.xlu0 %7492 }
0x1898   :  { %v7497_v28 = vmul.f32 %v10195_v56, %v7493_v59  ;;  %v7491_v48 = vpop.permute.xlu1 %7490 }
0x1899   :  { %v7496_v19 = vmul.f32 %v10197_v17, %v7491_v48  ;;  %v7652_v48 = vld [vmem:[#allocation2 + $0x5c] sm:$0xf] }
0x189a   :  { %7502 = vrot.lane.b32.xlu0 %v7497_v28, %s10347_s20 }
0x189b   :  { %7500 = vrot.lane.b32.xlu1 %v7496_v19, %s10347_s20 }
0x190c   :  { %v7503_v43 = vpop.permute.xlu0 %7502 }
0x190d   :  { %7508 = vst.msk [vmem:[#allocation3 + $0x58] sm:$0xf] %vm6797_vm13, %v7503_v43  ;;  %v7501_v44 = vpop.permute.xlu1 %7500 }
0x190e   :  { %7507 = vst.msk [vmem:[#allocation3 + $0x50] sm:$0xff] %vm6659_vm14, %v7501_v44  ;;  %9350 = vmatprep.mubr.msk.f32.mxu1 %vm6659_vm14, %v7501_v44  ;;  %v7651_v44 = vld [vmem:[#allocation2 + $0x54] sm:$0xff] }
0x190f   :  { %9351 = vmatmul.mubr.msk.f32.vlgmr.msra.gmra.mrb[22].mxu1 %vm6659_vm14, %v7503_v43 }
0x1910   :  { %9378 = vmatprep.mubr.msk.f32.mxu1 %vm10310_vm0, %v13841_v51 }
0x19e2   :  { %v9352_v23 = vpop.f32.mrb[22].mxu1 }
0x19e3   :  { %v7591_v63 = vadd.f32 %v9352_v23, %v7510_v27  ;;  %v7581_v20 = vpop.f32.mrb[23].mxu1 }
0x19e4   :  { %v7590_v11 = vadd.f32 %v7581_v20, %v13119_v38 }
0x19e5   :  { %10202 = vtanh.f32 %v7591_v63  ;;  %v8970_v18 = vmul.f32 -1.442695, %v7591_v63 }
0x19e6   :  { %10204 = vtanh.f32 %v7590_v11  ;;  %v8969_v9 = vmul.f32 -1.442695, %v7590_v11  ;;  %v3321_v11 = vld [vmem:[%s13850_s27] sm:$0xff] }
0x19e7   :  { %10206 = vpow2.f32 %v8970_v18 }
0x19e8   :  { %10208 = vpow2.f32 %v8969_v9 }
0x19ef   :  { %v10203_v58 = vpop.eup %10202 }
0x19f0   :  { %v10205_v3 = vpop.eup %10204  ;;  %7612 = vrot.lane.b32.xlu0 %v10203_v58, %s10346_s24  ;;  %v3322_v58 = vld [vmem:[%s13850_s27 + $0x8] sm:$0xff] }
0x19f1   :  { %7610 = vrot.lane.b32.xlu1 %v10205_v3, %s10346_s24  ;;  %v10207_v22 = vpop.eup %10206 }
0x19f2   :  { %v10209_v2 = vpop.eup %10208  ;;  %v7599_v32 = vadd.f32 1.0, %v10207_v22 }
0x19f3   :  { %v7598_v40 = vadd.f32 1.0, %v10209_v2  ;;  %v3318_v2 = vld [vmem:[%s13851_s4] sm:$0xff] }
0x19f4   :  { %10210 = vrcp.f32 %v7599_v32  ;;  %v3319_v32 = vld [vmem:[%s13851_s4 + $0x8] sm:$0xff] }
0x19f5   :  { %10212 = vrcp.f32 %v7598_v40  ;;  %v3320_v40 = vld [vmem:[%s13851_s4 + $0x10] sm:$0xff] }
0x19fe   :  { %v10211_v15 = vpop.eup %10210 }
0x19ff   :  { %v10213_v29 = vpop.eup %10212  ;;  %v7607_v24 = vmul.f32 %v10211_v15, %v7485_v57 }
0x1a00   :  { %v7606_v25 = vmul.f32 %v10213_v29, %v7484_v7 }
0x1a62   :  { %v7613_v38 = vpop.permute.xlu0 %7612 }
0x1a63   :  { %v7617_v34 = vmul.f32 %v10211_v15, %v7613_v38  ;;  %v7611_v4 = vpop.permute.xlu1 %7610 }
0x1a64   :  { %v7616_v49 = vmul.f32 %v10213_v29, %v7611_v4 }
0x1a65   :  { %7622 = vrot.lane.b32.xlu0 %v7617_v34, %s10346_s24 }
0x1a66   :  { %7620 = vrot.lane.b32.xlu1 %v7616_v49, %s10346_s24 }
0x1ad7   :  { %v7623_v36 = vpop.permute.xlu0 %7622 }
0x1ad8   :  { %v13203_v5 = vadd.f32 %v7623_v36, %v7607_v24  ;;  %v7621_v53 = vpop.permute.xlu1 %7620 }
0x1ad9   :  { %v13205_v61 = vadd.f32 %v7621_v53, %v7606_v25 }
0x1ada   :  { %10214 = vtanh.f32 %v13203_v5 }
0x1adb   :  { %10216 = vtanh.f32 %v13205_v61 }
0x1ae4   :  { %v10215_v31 = vpop.eup %10214 }
0x1ae5   :  { %v10217_v55 = vpop.eup %10216  ;;  %7634 = vrot.lane.b32.xlu0 %v10215_v31, %s10346_s24 }
0x1ae6   :  { %7632 = vrot.lane.b32.xlu1 %v10217_v55, %s10346_s24 }
0x1b57   :  { %v7635_v1 = vpop.permute.xlu0 %7634 }
0x1b58   :  { %v7639_v26 = vmul.f32 %v10211_v15, %v7635_v1  ;;  %v7633_v16 = vpop.permute.xlu1 %7632  ;;  %v3323_v15 = vld [vmem:[%s13850_s27 + $0x10] sm:$0xff] }
0x1b59   :  { %v7638_v47 = vmul.f32 %v10213_v29, %v7633_v16 }
0x1b5a   :  { %7644 = vrot.lane.b32.xlu0 %v7639_v26, %s10347_s20 }
0x1b5b   :  { %7642 = vrot.lane.b32.xlu1 %v7638_v47, %s10347_s20 }
0x1b5e   :  { %5519 = vperm.xlu0 %9742, %v3316_v6  }
0x1b5f   :  { %5514 = vperm.xlu1 %9743, %v3315_v10  }
0x1b63   :  { %5524 = vperm.xlu1 %9743, %v3317_v39  }
0x1bcc   :  { %v7645_v42 = vpop.permute.xlu0 %7644 }
0x1bcd   :  { %7650 = vst.msk [vmem:[#allocation3 + $0x68] sm:$0xf] %vm6797_vm13, %v7645_v42  ;;  %v7643_v62 = vpop.permute.xlu1 %7642 }
0x1bce   :  { %7649 = vst.msk [vmem:[#allocation3 + $0x60] sm:$0xff] %vm6659_vm14, %v7643_v62  ;;  %9361 = vmatprep.mubr.msk.f32.mxu0 %vm6659_vm14, %v7643_v62 }
0x1bcf   :  { %9362 = vmatmul.mubr.msk.f32.vlgmr.msra.gmra.mrb[20].mxu0 %vm6659_vm14, %v7645_v42 }
0x1bd0   :  { %9397 = vmatprep.mubr.msk.f32.mxu0 %vm10310_vm0, %v13841_v51 }
0x1bdd   :  { %v5520_v60 = vpop.permute.xlu0 %5519 }
0x1bde   :  { %v5608_v56 = vadd.f32 %v13062_v50, %v5520_v60  ;;  %v5515_v30 = vpop.permute.xlu1 %5514 }
0x1bdf   :  { %v5603_v17 = vadd.f32 %v13060_v54, %v5515_v30 }
0x1be0   :  { %v5620_v41 = vsel %vm5616_vm15, %v5608_v56, 0.0 }
0x1be1   :  { %5621 = vadd.xlane.f32.xlu1 %v5620_v41  ;;  %v5617_v0 = vsel %vm5616_vm15, %v5603_v17, 0.0 }
0x1be2   :  { %5618 = vadd.xlane.f32.xlu0 %v5617_v0  ;;  %v5525_v33 = vpop.permute.xlu1 %5524 }
0x1be3   :  { %v5613_v12 = vadd.f32 %v13064_v35, %v5525_v33 }
0x1be5   :  { %v5623_v52 = vsel %vm5616_vm15, %v5613_v12, 0.0 }
0x1be6   :  { %5624 = vadd.xlane.f32.xlu0 %v5623_v52 }
0x1c6e   :  { %v5622_v8 = vpop.xlane.xlu1 %5621 }
0x1c6f   :  { %v5628_v57 = vmul.f32 0.017857144, %v5622_v8  ;;  %v5619_v13 = vpop.xlane.xlu0 %5618 }
0x1c70   :  { %v5627_v3 = vmul.f32 0.017857144, %v5619_v13 }
0x1c71   :  { %v5631_v7 = vsub.f32 %v5608_v56, %v5628_v57 }
0x1c72   :  { %v5630_v18 = vsub.f32 %v5603_v17, %v5627_v3 }
0x1c73   :  { %v5625_v50 = vpop.xlane.xlu0 %5624  ;;  %v5634_v14 = vmul.f32 %v5631_v7, %v5631_v7 }
0x1c74   :  { %v5629_v21 = vmul.f32 0.017857144, %v5625_v50  ;;  %v5633_v9 = vmul.f32 %v5630_v18, %v5630_v18 }
0x1c75   :  { %v5639_v54 = vsel %vm5616_vm15, %v5634_v14, 0.0 }
0x1c76   :  { %v13229_v59 = vsub.f32 %v5613_v12, %v5629_v21  ;;  %5640 = vadd.xlane.f32.xlu0 %v5639_v54  ;;  %v5636_v22 = vsel %vm5616_vm15, %v5633_v9, 0.0 }
0x1c78   :  { %v5635_v28 = vmul.f32 %v13229_v59, %v13229_v59 }
0x1c7a   :  { %v5642_v35 = vsel %vm5616_vm15, %v5635_v28, 0.0 }
0x1c7b   :  { %5643 = vadd.xlane.f32.xlu0 %v5642_v35 }
0x1ca2   :  { %v9363_v19 = vpop.f32.mrb[20].mxu0 }
0x1ca3   :  { %v13234_v43 = vadd.f32 %v9363_v19, %v7652_v48  ;;  %v7723_v27 = vpop.f32.mrb[21].mxu0 }
0x1ca4   :  { %v7732_v23 = vadd.f32 %v7723_v27, %v7651_v44 }
0x1ca5   :  { %10218 = vtanh.f32 %v13234_v43  ;;  %v8974_v33 = vmul.f32 -1.442695, %v13234_v43 }
0x1ca6   :  { %10220 = vtanh.f32 %v7732_v23  ;;  %v8973_v17 = vmul.f32 -1.442695, %v7732_v23 }
0x1caf   :  { %v10219_v63 = vpop.eup %10218 }
0x1cb0   :  { %v10221_v20 = vpop.eup %10220  ;;  %7754 = vrot.lane.b32.xlu1 %v10219_v63, %s10346_s24 }
0x1cb1   :  { %7752 = vrot.lane.b32.xlu0 %v10221_v20, %s10346_s24 }
0x1cb5   :  { %5677 = vperm.xlu0 %9742, %v3321_v11  }
0x1cb9   :  { %5682 = vperm.xlu0 %9742, %v3322_v58  }
0x1cd4   :  { %5637 = vadd.xlane.f32.xlu1 %v5636_v22 }
0x1ce5   :  { %5659 = vperm.xlu1 %9743, %v3318_v2  }
0x1ce9   :  { %5664 = vperm.xlu1 %9743, %v3319_v32  }
0x1ced   :  { %5669 = vperm.xlu1 %9743, %v3320_v40  }
0x1cf1   :  { %5687 = vperm.xlu1 %9743, %v3323_v15  }
0x1d03   :  { %v5641_v29 = vpop.xlane.xlu0 %5640 }
0x1d04   :  { %v5646_v4 = vmul.f32 0.017857144, %v5641_v29 }
0x1d06   :  { %v5649_v36 = vadd.f32 1e-05, %v5646_v4 }
0x1d08   :  { %v5644_v25 = vpop.xlane.xlu0 %5643 }
0x1d09   :  { %v5647_v47 = vmul.f32 0.017857144, %v5644_v25 }
0x1d0b   :  { %v5650_v60 = vadd.f32 1e-05, %v5647_v47 }
0x1d22   :  { %v13246_v38 = vpop.permute.xlu1 %7754 }
0x1d23   :  { %v13248_v31 = vpop.permute.xlu0 %7752 }
0x1d34   :  { %v5678_v6 = vpop.permute.xlu0 %5677 }
0x1d38   :  { %v5683_v41 = vpop.permute.xlu0 %5682 }
0x1d61   :  { %v5638_v34 = vpop.xlane.xlu1 %5637 }
0x1d62   :  { %v5645_v49 = vmul.f32 0.017857144, %v5638_v34 }
0x1d64   :  { %v5648_v24 = vadd.f32 1e-05, %v5645_v49 }
0x1d65   :  { %v5660_v55 = vpop.permute.xlu1 %5659 }
0x1d66   :  { %10222 = vrsqrt.f32 %v5648_v24 }
0x1d67   :  { %10224 = vrsqrt.f32 %v5649_v36 }
0x1d68   :  { %10226 = vrsqrt.f32 %v5650_v60 }
0x1d69   :  { %v5665_v39 = vpop.permute.xlu1 %5664  ;;  %10228 = vpow2.f32 %v8973_v17 }
0x1d6a   :  { %10230 = vpow2.f32 %v8974_v33 }
0x1d6d   :  { %v5670_v52 = vpop.permute.xlu1 %5669 }
0x1d70   :  { %v10223_v53 = vpop.eup %10222 }
0x1d71   :  { %v5654_v1 = vmul.f32 %v10223_v53, %v5630_v18  ;;  %v10225_v16 = vpop.eup %10224  ;;  %v5688_v50 = vpop.permute.xlu1 %5687 }
0x1d72   :  { %v5655_v62 = vmul.f32 %v10225_v16, %v5631_v7  ;;  %v10227_v57 = vpop.eup %10226 }
0x1d73   :  { %v5672_v26 = vmul.f32 %v5660_v55, %v5654_v1  ;;  %v5656_v13 = vmul.f32 %v10227_v57, %v13229_v59  ;;  %v10229_v7 = vpop.eup %10228 }
0x1d74   :  { %v5673_v30 = vmul.f32 %v5665_v39, %v5655_v62  ;;  %v7740_v21 = vadd.f32 1.0, %v10229_v7  ;;  %v10231_v28 = vpop.eup %10230 }
0x1d75   :  { %v5690_v10 = vadd.f32 %v5678_v6, %v5672_v26  ;;  %v5674_v14 = vmul.f32 %v5670_v52, %v5656_v13  ;;  %v7741_v35 = vadd.f32 1.0, %v10231_v28 }
0x1d76   :  { %v5691_v0 = vadd.f32 %v5683_v41, %v5673_v30  ;;  %10232 = vrcp.f32 %v7740_v21 }
0x1d77   :  { %vm5693_vm1 = vcmp.gt.f32.partialorder %v5690_v10, 0.0  ;;  %v5696_v42 = vmul.f32 0.01, %v5690_v10  ;;  %v5692_v54 = vadd.f32 %v5688_v50, %v5674_v14  ;;  %10234 = vrcp.f32 %v7741_v35 }
0x1d78   :  { %v5697_v12 = vmul.f32 0.01, %v5691_v0  ;;  %vm5694_vm2 = vcmp.gt.f32.partialorder %v5691_v0, 0.0 }
0x1d79   :  { %v13250_v56 = vsel %vm5693_vm1, %v5690_v10, %v5696_v42  ;;  %v5698_v59 = vmul.f32 0.01, %v5692_v54  ;;  %vm5695_vm3 = vcmp.gt.f32.partialorder %v5692_v54, 0.0 }
0x1d7a   :  { %5714 = vrot.lane.b32.xlu1 %v13250_v56, %s10348_s11  ;;  %5705 = vrot.lane.b32.xlu0 %v13250_v56, %s10349_s15  ;;  %v13265_v8 = vsel %vm5694_vm2, %v5691_v0, %v5697_v12  ;;  %vm8556_vm2 = vcmask 64512  }
0x1d7b   :  { %v13284_v48 = vsel %vm5695_vm3, %v5692_v54, %v5698_v59  ;;  %vm8635_vm3 = vcmask 256000  }
0x1d7e   :  { %5732 = vrot.lane.b32.xlu1 %v13250_v56, %s10350_s16  ;;  %5723 = vrot.lane.b32.xlu0 %v13250_v56, %s10351_s18 }
0x1d80   :  { %v13294_v19 = vpop.eup %10232 }
0x1d81   :  { %v7758_v43 = vmul.f32 %v13294_v19, %v13248_v31  ;;  %v13301_v44 = vpop.eup %10234 }
0x1d82   :  { %5750 = vrot.lane.b32.xlu1 %v13250_v56, %s10352_s22  ;;  %5741 = vrot.lane.b32.xlu0 %v13250_v56, %s10353_s23  ;;  %v7759_v27 = vmul.f32 %v13301_v44, %v13246_v38 }
0x1d86   :  { %5759 = vrot.lane.b32.xlu0 %v13250_v56, %s10354_s26  ;;  %5707 = vrot.lane.b32.xlu1 %v13265_v8, %s10349_s15 }
0x1d8a   :  { %5716 = vrot.lane.b32.xlu0 %v13265_v8, %s10348_s11  ;;  %5725 = vrot.lane.b32.xlu1 %v13265_v8, %s10351_s18 }
0x1d8e   :  { %5734 = vrot.lane.b32.xlu0 %v13265_v8, %s10350_s16  ;;  %5743 = vrot.lane.b32.xlu1 %v13265_v8, %s10353_s23 }
0x1d92   :  { %5752 = vrot.lane.b32.xlu0 %v13265_v8, %s10352_s22  ;;  %5761 = vrot.lane.b32.xlu1 %v13265_v8, %s10354_s26 }
0x1d96   :  { %5718 = vrot.lane.b32.xlu1 %v13284_v48, %s10348_s11  ;;  %5709 = vrot.lane.b32.xlu0 %v13284_v48, %s10349_s15 }
0x1d9a   :  { %5736 = vrot.lane.b32.xlu1 %v13284_v48, %s10350_s16  ;;  %5727 = vrot.lane.b32.xlu0 %v13284_v48, %s10351_s18 }
0x1d9e   :  { %7762 = vrot.lane.b32.xlu1 %v7758_v43, %s10346_s24  ;;  %5745 = vrot.lane.b32.xlu0 %v13284_v48, %s10353_s23 }
0x1da2   :  { %5754 = vrot.lane.b32.xlu1 %v13284_v48, %s10352_s22  ;;  %7764 = vrot.lane.b32.xlu0 %v7759_v27, %s10346_s24 }
0x1da6   :  { %5763 = vrot.lane.b32.xlu0 %v13284_v48, %s10354_s26 }
0x1dec   :  { %v5706_v23 = vpop.permute.xlu0 %5705  ;;  %v5715_v63 = vpop.permute.xlu1 %5714 }
0x1ded   :  { %v5769_v20 = vcombine.high %v13250_v56, %v5715_v63  ;;  %v5768_v2 = vcombine.low %v13250_v56, %v5715_v63 }
0x1def   :  { %v13312_v9 = vrot.slane %v5769_v20, %v13842_v37  ;;  %v5776_v4 = vrot.slane %v5768_v2, %v13842_v37 }
0x1df0   :  { %v5724_v11 = vpop.permute.xlu0 %5723  ;;  %v5733_v58 = vpop.permute.xlu1 %5732 }
0x1df1   :  { %v5785_v3 = vcombine.high %v5706_v23, %v5724_v11  ;;  %v5784_v18 = vcombine.low %v5706_v23, %v5724_v11 }
0x1df3   :  { %v13315_v22 = vrot.slane %v5785_v3, %v13842_v37  ;;  %v5792_v38 = vrot.slane %v5784_v18, %v13842_v37 }
0x1df4   :  { %v5742_v32 = vpop.permute.xlu0 %5741  ;;  %v5751_v40 = vpop.permute.xlu1 %5750 }
0x1df5   :  { %v5849_v15 = vcombine.high %v13312_v9, %v13315_v22  ;;  %v5800_v29 = vcombine.low %v5733_v58, %v5751_v40  ;;  %v5801_v34 = vcombine.high %v5733_v58, %v5751_v40  ;;  %v5832_v53 = vcombine.low %v5776_v4, %v5792_v38 }
0x1df6   :  { %v5833_v16 = vcombine.high %v5776_v4, %v5792_v38  ;;  %v5848_v23 = vcombine.low %v13312_v9, %v13315_v22 }
0x1df7   :  { %v5808_v31 = vrot.slane %v5800_v29, %v13842_v37  ;;  %v5815_v55 = vrot.slane %v5801_v34, %v13842_v37  ;;  %v5840_v17 = vrot.slane %v5832_v53, %v10582_v45  ;;  %v13352_v58 = vrot.slane %v5849_v15, %v10582_v45 }
0x1df8   :  { %v5760_v49 = vpop.permute.xlu0 %5759  ;;  %v5708_v24 = vpop.permute.xlu1 %5707  ;;  %v5847_v13 = vrot.slane %v5833_v16, %v10582_v45 }
0x1df9   :  { %v5816_v36 = vcombine.low %v5742_v32, %v5760_v49  ;;  %v5817_v25 = vcombine.high %v5742_v32, %v5760_v49 }
0x1dfb   :  { %v5824_v1 = vrot.slane %v5816_v36, %v13842_v37  ;;  %v5831_v26 = vrot.slane %v5817_v25, %v13842_v37 }
0x1dfc   :  { %v5717_v47 = vpop.permute.xlu0 %5716  ;;  %v5726_v6 = vpop.permute.xlu1 %5725 }
0x1dfd   :  { %v5864_v10 = vcombine.low %v5808_v31, %v5824_v1  ;;  %v5865_v39 = vcombine.high %v5808_v31, %v5824_v1  ;;  %v5881_v42 = vcombine.high %v5815_v55, %v5831_v26  ;;  %v5904_v62 = vcombine.low %v13265_v8, %v5717_v47 }
0x1dfe   :  { %v5905_v60 = vcombine.high %v13265_v8, %v5717_v47  ;;  %v5920_v56 = vcombine.low %v5708_v24, %v5726_v6  ;;  %v5921_v30 = vcombine.high %v5708_v24, %v5726_v6  ;;  %v5880_v63 = vcombine.low %v5815_v55, %v5831_v26 }
0x1dff   :  { %v5872_v41 = vrot.slane %v5864_v10, %v10582_v45  ;;  %v5879_v0 = vrot.slane %v5865_v39, %v10582_v45  ;;  %v13339_v8 = vrot.slane %v5881_v42, %v10582_v45  ;;  %v5912_v7 = vrot.slane %v5904_v62, %v13842_v37 }
0x1e00   :  { %v13332_v33 = vrot.slane %v5905_v60, %v13842_v37  ;;  %v13335_v12 = vrot.slane %v5921_v30, %v13842_v37  ;;  %v5735_v52 = vpop.permute.xlu0 %5734  ;;  %v5744_v57 = vpop.permute.xlu1 %5743  ;;  %v5928_v50 = vrot.slane %v5920_v56, %v13842_v37  ;;  %v5888_v25 = vrot.slane %v5880_v63, %v10582_v45 }
0x1e01   :  { %v5897_v14 = vcombine.high %v5840_v17, %v5872_v41  ;;  %v5896_v21 = vcombine.low %v5840_v17, %v5872_v41  ;;  %v5898_v35 = vcombine.low %v5847_v13, %v5879_v0  ;;  %v5899_v59 = vcombine.high %v5847_v13, %v5879_v0 }
0x1e02   :  { %v5984_v54 = vcombine.low %v13332_v33, %v13335_v12  ;;  %v5985_v28 = vcombine.high %v13332_v33, %v13335_v12  ;;  %v5968_v40 = vcombine.low %v5912_v7, %v5928_v50  ;;  %v5902_v9 = vcombine.low %v13352_v58, %v13339_v8 }
0x1e03   :  { %v6179_v43 = vsel %vm5442_vm5, %v5897_v14, 0.0  ;;  %v6176_v27 = vsel %vm5442_vm5, %v5896_v21, 0.0  ;;  %v6182_v38 = vsel %vm5442_vm5, %v5898_v35, 0.0  ;;  %v6185_v29 = vsel %vm5442_vm5, %v5899_v59, 0.0 }
0x1e04   :  { %v5753_v20 = vpop.permute.xlu0 %5752  ;;  %6180 = vadd.xlane.f32.xlu0 %v6179_v43  ;;  %6177 = vadd.xlane.f32.xlu1 %v6176_v27  ;;  %v5762_v11 = vpop.permute.xlu1 %5761  ;;  %v5969_v49 = vcombine.high %v5912_v7, %v5928_v50  ;;  %v5903_v53 = vcombine.high %v13352_v58, %v13339_v8  ;;  %v5856_v47 = vrot.slane %v5848_v23, %v10582_v45 }
0x1e05   :  { %v5936_v3 = vcombine.low %v5735_v52, %v5753_v20  ;;  %v5937_v18 = vcombine.high %v5735_v52, %v5753_v20  ;;  %v5952_v2 = vcombine.low %v5744_v57, %v5762_v11  ;;  %v5953_v32 = vcombine.high %v5744_v57, %v5762_v11 }
0x1e06   :  { %v5976_v6 = vrot.slane %v5968_v40, %v10582_v45  ;;  %v5983_v56 = vrot.slane %v5969_v49, %v10582_v45  ;;  %v13375_v30 = vrot.slane %v5984_v54, %v10582_v45  ;;  %v5900_v33 = vcombine.low %v5856_v47, %v5888_v25 }
0x1e07   :  { %v5944_v22 = vrot.slane %v5936_v3, %v13842_v37  ;;  %v5951_v34 = vrot.slane %v5937_v18, %v13842_v37  ;;  %v5960_v4 = vrot.slane %v5952_v2, %v13842_v37  ;;  %v5967_v15 = vrot.slane %v5953_v32, %v13842_v37 }
0x1e08   :  { %v5710_v24 = vpop.permute.xlu0 %5709  ;;  %6183 = vadd.xlane.f32.xlu0 %v6182_v38  ;;  %6186 = vadd.xlane.f32.xlu1 %v6185_v29  ;;  %v5719_v36 = vpop.permute.xlu1 %5718  ;;  %v13389_v59 = vrot.slane %v5985_v28, %v10582_v45  ;;  %v6188_v3 = vsel %vm5442_vm5, %v5900_v33, 0.0  ;;  %v5901_v2 = vcombine.high %v5856_v47, %v5888_v25  ;;  %v7749_v49 = vmul.f32 %v13301_v44, %v13203_v5 }
0x1e09   :  { %v6000_v31 = vcombine.low %v5944_v22, %v5960_v4  ;;  %v6001_v55 = vcombine.high %v5944_v22, %v5960_v4  ;;  %v6016_v1 = vcombine.low %v5951_v34, %v5967_v15  ;;  %v6017_v26 = vcombine.high %v5951_v34, %v5967_v15 }
0x1e0a   :  { %v6041_v16 = vcombine.high %v13284_v48, %v5719_v36  ;;  %v6040_v32 = vcombine.low %v13284_v48, %v5719_v36  ;;  %v6191_v4 = vsel %vm5442_vm5, %v5901_v2, 0.0 }
0x1e0b   :  { %v6008_v10 = vrot.slane %v6000_v31, %v10582_v45  ;;  %v6015_v39 = vrot.slane %v6001_v55, %v10582_v45  ;;  %v13371_v42 = vrot.slane %v6016_v1, %v10582_v45  ;;  %v13383_v13 = vrot.slane %v6017_v26, %v10582_v45 }
0x1e0c   :  { %v5728_v62 = vpop.permute.xlu0 %5727  ;;  %v5737_v60 = vpop.permute.xlu1 %5736  ;;  %v6055_v12 = vrot.slane %v6041_v16, %v13842_v37  ;;  %v6048_v15 = vrot.slane %v6040_v32, %v13842_v37 }
0x1e0d   :  { %v6057_v17 = vcombine.high %v5710_v24, %v5728_v62  ;;  %v6033_v41 = vcombine.high %v5976_v6, %v6008_v10  ;;  %v6032_v0 = vcombine.low %v5976_v6, %v6008_v10  ;;  %v6036_v52 = vcombine.low %v13375_v30, %v13371_v42 }
0x1e0e   :  { %v6037_v57 = vcombine.high %v13375_v30, %v13371_v42  ;;  %v6034_v21 = vcombine.low %v5983_v56, %v6015_v39  ;;  %v6056_v23 = vcombine.low %v5710_v24, %v5728_v62  ;;  %v6038_v63 = vcombine.low %v13389_v59, %v13383_v13 }
0x1e0f   :  { %v6071_v7 = vrot.slane %v6057_v17, %v13842_v37  ;;  %v6203_v50 = vsel %vm5442_vm5, %v6033_v41, 0.0  ;;  %v6200_v14 = vsel %vm5442_vm5, %v6032_v0, 0.0  ;;  %v6039_v20 = vcombine.high %v13389_v59, %v13383_v13 }
0x1e10   :  { %v5746_v54 = vpop.permute.xlu0 %5745  ;;  %6204 = vadd.xlane.f32.xlu1 %v6203_v50  ;;  %6201 = vadd.xlane.f32.xlu0 %v6200_v14  ;;  %v7763_v35 = vpop.permute.xlu1 %7762  ;;  %v6206_v11 = vsel %vm5442_vm5, %v6034_v21, 0.0  ;;  %v6035_v18 = vcombine.high %v5983_v56, %v6015_v39  ;;  %v6064_v38 = vrot.slane %v6056_v23, %v13842_v37  ;;  %v6212_v2 = vsel %vm5442_vm5, %v6036_v52, 0.0 }
0x1e11   :  { %v6120_v43 = vcombine.low %v6055_v12, %v6071_v7  ;;  %v6121_v27 = vcombine.high %v6055_v12, %v6071_v7 }
0x1e12   :  { %v6209_v34 = vsel %vm5442_vm5, %v6035_v18, 0.0  ;;  %v6104_v25 = vcombine.low %v6048_v15, %v6064_v38  ;;  %v6105_v47 = vcombine.high %v6048_v15, %v6064_v38  ;;  %v13853_v38 = vld [vmem:[#allocation19_spill] sm:$0xff] }
0x1e13   :  { %v13426_v33 = vrot.slane %v6120_v43, %v10582_v45  ;;  %v7748_v43 = vmul.f32 %v13294_v19, %v13205_v61  ;;  %v6194_v61 = vsel %vm5442_vm5, %v5902_v9, 0.0 }
0x1e14   :  { %v7765_v40 = vpop.permute.xlu0 %7764  ;;  %6207 = vadd.xlane.f32.xlu1 %v6206_v11  ;;  %6189 = vadd.xlane.f32.xlu0 %v6188_v3  ;;  %v5755_v28 = vpop.permute.xlu1 %5754  ;;  %v6112_v62 = vrot.slane %v6104_v25, %v10582_v45  ;;  %v13423_v0 = vrot.slane %v6105_v47, %v10582_v45 }
0x1e15   :  { %v6072_v29 = vcombine.low %v5737_v60, %v5755_v28  ;;  %v6073_v22 = vcombine.high %v5737_v60, %v5755_v28  ;;  %v7769_v31 = vadd.f32 %v7765_v40, %v7749_v49  ;;  %v13410_v60 = vrot.slane %v6121_v27, %v10582_v45 }
0x1e16   :  { %v7768_v23 = vadd.f32 %v7763_v35, %v7748_v43  ;;  %v13852_v40 = vlaneseq }
0x1e17   :  { %v6080_v55 = vrot.slane %v6072_v29, %v13842_v37  ;;  %v6087_v1 = vrot.slane %v6073_v22, %v13842_v37  ;;  %10236 = vtanh.f32 %v7769_v31 }
0x1e18   :  { %v5764_v24 = vpop.permute.xlu0 %5763  ;;  %6210 = vadd.xlane.f32.xlu1 %v6209_v34  ;;  %6192 = vadd.xlane.f32.xlu0 %v6191_v4  ;;  %10238 = vtanh.f32 %v7768_v23  ;;  %v13456_v28 = vand.u32 127, %v13852_v40 }
0x1e19   :  { %v6088_v48 = vcombine.low %v5746_v54, %v5764_v24  ;;  %v6089_v36 = vcombine.high %v5746_v54, %v5764_v24 }
0x1e1a   :  { %v13460_v29 = vsub.s32 %v13456_v28, %v13853_v38 }
0x1e1b   :  { %v6096_v26 = vrot.slane %v6088_v48, %v13842_v37  ;;  %v6103_v16 = vrot.slane %v6089_v36, %v13842_v37 }
0x1e1d   :  { %v6136_v6 = vcombine.low %v6080_v55, %v6096_v26  ;;  %v6137_v10 = vcombine.high %v6080_v55, %v6096_v26  ;;  %v6152_v39 = vcombine.low %v6087_v1, %v6103_v16  ;;  %v6153_v5 = vcombine.high %v6087_v1, %v6103_v16 }
0x1e1f   :  { %v6144_v56 = vrot.slane %v6136_v6, %v10582_v45  ;;  %v13414_v17 = vrot.slane %v6137_v10, %v10582_v45  ;;  %v13417_v41 = vrot.slane %v6153_v5, %v10582_v45  ;;  %v13420_v37 = vrot.slane %v6152_v39, %v10582_v45 }
0x1e21   :  { %v6168_v12 = vcombine.low %v6112_v62, %v6144_v56  ;;  %v6174_v7 = vcombine.low %v13410_v60, %v13417_v41  ;;  %v6171_v50 = vcombine.high %v13423_v0, %v13414_v17  ;;  %v6172_v14 = vcombine.low %v13426_v33, %v13420_v37  ;;  %v10237_v45 = vpop.eup %10236 }
0x1e22   :  { %v6173_v21 = vcombine.high %v13426_v33, %v13420_v37  ;;  %v6175_v54 = vcombine.high %v13410_v60, %v13417_v41  ;;  %v10239_v11 = vpop.eup %10238  ;;  %v6169_v3 = vcombine.high %v6112_v62, %v6144_v56  ;;  %v6170_v35 = vcombine.low %v13423_v0, %v13414_v17  ;;  %v7796_v33 = vld [vmem:[#allocation3 + $0x18] sm:$0xf] }
0x1e23   :  { %v6224_v27 = vsel %vm5442_vm5, %v6168_v12, 0.0  ;;  %v6236_v8 = vsel %vm5442_vm5, %v6172_v14, 0.0  ;;  %v7819_v60 = vsel %vm6797_vm13, %v7796_v33, 0.0 }
0x1e24   :  { %6225 = vadd.xlane.f32.xlu0 %v6224_v27  ;;  %v6227_v18 = vsel %vm5442_vm5, %v6169_v3, 0.0  ;;  %v6230_v32 = vsel %vm5442_vm5, %v6170_v35, 0.0 }
0x1e29   :  { %7776 = vrot.lane.b32.xlu1 %v10237_v45, %s10346_s24 }
0x1e3a   :  { %7774 = vrot.lane.b32.xlu0 %v10239_v11, %s10346_s24 }
0x1e4d   :  { %6228 = vadd.xlane.f32.xlu1 %v6227_v18 }
0x1e51   :  { %6213 = vadd.xlane.f32.xlu1 %v6212_v2 }
0x1e59   :  { %6195 = vadd.xlane.f32.xlu0 %v6194_v61 }
0x1e5d   :  { %6231 = vadd.xlane.f32.xlu0 %v6230_v32 }
0x1e91   :  { %v6181_v52 = vpop.xlane.xlu0 %6180  ;;  %v6178_v22 = vpop.xlane.xlu1 %6177 }
0x1e92   :  { %v6250_v34 = vmul.f32 0.14285715, %v6181_v52  ;;  %v6249_v4 = vmul.f32 0.14285715, %v6178_v22 }
0x1e94   :  { %v6306_v9 = vrot.slane %v6250_v34, %v13460_v29  ;;  %v6302_v15 = vrot.slane %v6249_v4, %v13460_v29 }
0x1e95   :  { %v6184_v49 = vpop.xlane.xlu0 %6183  ;;  %v6187_v24 = vpop.xlane.xlu1 %6186 }
0x1e96   :  { %v6396_v48 = vsel %vm6395_vm4, %v6306_v9, %v6302_v15  ;;  %v6251_v36 = vmul.f32 0.14285715, %v6184_v49  ;;  %v6252_v25 = vmul.f32 0.14285715, %v6187_v24  ;;  %v6215_v24 = vsel %vm5442_vm5, %v6037_v57, 0.0 }
0x1e98   :  { %v6310_v31 = vrot.slane %v6251_v36, %v13460_v29  ;;  %v6314_v55 = vrot.slane %v6252_v25, %v13460_v29  ;;  %v6239_v36 = vsel %vm5442_vm5, %v6173_v21, 0.0  ;;  %v7795_v21 = vld [vmem:[#allocation3 + $0x10] sm:$0xff] }
0x1e99   :  { %v7818_v41 = vsel %vm6659_vm14, %v7795_v21, 0.0 }
0x1e9a   :  { %v6398_v1 = vsel %vm6397_vm6, %v6310_v31, %v6396_v48  ;;  %v6218_v48 = vsel %vm5442_vm5, %v6038_v63, 0.0  ;;  %v6197_v63 = vsel %vm5442_vm5, %v5903_v53, 0.0 }
0x1e9b   :  { %v6400_v26 = vsel %vm6399_vm7, %v6314_v55, %v6398_v1  ;;  %v7794_v55 = vld [vmem:[#allocation3 + $0x8] sm:$0xf]  ;;  %v7797_v1 = vld [vmem:[#allocation3 + $0x20] sm:$0xff] }
0x1e9d   :  { %v6202_v16 = vpop.xlane.xlu0 %6201  ;;  %v6205_v47 = vpop.xlane.xlu1 %6204 }
0x1e9e   :  { %v6257_v6 = vmul.f32 0.14285715, %v6202_v16  ;;  %v6258_v10 = vmul.f32 0.14285715, %v6205_v47  ;;  %v7793_v16 = vld [vmem:[#allocation3] sm:$0xff]  ;;  %v7799_v47 = vld [vmem:[#allocation3 + $0x30] sm:$0xff] }
0x1ea0   :  { %v6334_v39 = vrot.slane %v6257_v6, %v13460_v29  ;;  %v6338_v5 = vrot.slane %v6258_v10, %v13460_v29  ;;  %v7800_v6 = vld [vmem:[#allocation3 + $0x38] sm:$0xf]  ;;  %v7802_v10 = vld [vmem:[#allocation3 + $0x48] sm:$0xf] }
0x1ea1   :  { %v6190_v62 = vpop.xlane.xlu0 %6189  ;;  %v6208_v56 = vpop.xlane.xlu1 %6207 }
0x1ea2   :  { %v6409_v12 = vsel %vm6395_vm4, %v6338_v5, %v6334_v39  ;;  %v6253_v27 = vmul.f32 0.14285715, %v6190_v62  ;;  %v6259_v45 = vmul.f32 0.14285715, %v6208_v56  ;;  %v7810_v39 = vsel %vm6797_vm13, %v7794_v55, 0.0  ;;  %v7803_v5 = vld [vmem:[#allocation3 + $0x50] sm:$0xff] }
0x1ea3   :  { %v7804_v62 = vld [vmem:[#allocation3 + $0x58] sm:$0xf]  ;;  %v7827_v56 = vsel %vm6659_vm14, %v7797_v1, 0.0 }
0x1ea4   :  { %v6318_v43 = vrot.slane %v6253_v27, %v13460_v29  ;;  %v6342_v23 = vrot.slane %v6259_v45, %v13460_v29  ;;  %v7809_v27 = vsel %vm6659_vm14, %v7793_v16, 0.0  ;;  %v7805_v45 = vld [vmem:[#allocation3 + $0x60] sm:$0xff] }
0x1ea5   :  { %v6193_v11 = vpop.xlane.xlu0 %6192  ;;  %v6211_v3 = vpop.xlane.xlu1 %6210 }
0x1ea6   :  { %v6402_v18 = vsel %vm6401_vm8, %v6318_v43, %v6400_v26  ;;  %v6410_v2 = vsel %vm6397_vm6, %v6342_v23, %v6409_v12  ;;  %v6254_v61 = vmul.f32 0.14285715, %v6193_v11  ;;  %v6260_v35 = vmul.f32 0.14285715, %v6211_v3  ;;  %v7798_v26 = vld [vmem:[#allocation3 + $0x28] sm:$0xf] }
0x1ea7   :  { %v7828_v12 = vsel %vm6797_vm13, %v7798_v26, 0.0  ;;  %v7806_v43 = vld [vmem:[#allocation3 + $0x68] sm:$0xf]  ;;  %v7836_v23 = vsel %vm6659_vm14, %v7799_v47, 0.0  ;;  %v7837_v11 = vsel %vm6797_vm13, %v7800_v6, 0.0  ;;  %v7820_v3 = vadd.f32 %v7819_v60, %v7818_v41 }
0x1ea8   :  { %v6322_v32 = vrot.slane %v6254_v61, %v13460_v29  ;;  %v6346_v40 = vrot.slane %v6260_v35, %v13460_v29  ;;  %v7846_v61 = vsel %vm6797_vm13, %v7802_v10, 0.0  ;;  %v7829_v35 = vadd.f32 %v7828_v12, %v7827_v56 }
0x1ea9   :  { %v7777_v52 = vpop.permute.xlu1 %7776 }
0x1eaa   :  { %v6404_v22 = vsel %vm6403_vm9, %v6322_v32, %v6402_v18  ;;  %v13480_v34 = vsel %vm6399_vm7, %v6346_v40, %v6410_v2  ;;  %v7781_v4 = vmul.f32 %v13301_v44, %v7777_v52  ;;  %v6221_v44 = vsel %vm5442_vm5, %v6039_v20, 0.0 }
0x1eab   :  { %v7854_v32 = vsel %vm6659_vm14, %v7803_v5, 0.0  ;;  %v7855_v40 = vsel %vm6797_vm13, %v7804_v62, 0.0  ;;  %v7811_v52 = vadd.f32 %v7810_v39, %v7809_v27 }
0x1eac   :  { %7786 = vrot.lane.b32.xlu0 %v7781_v4, %s10347_s20  ;;  %v7863_v4 = vsel %vm6659_vm14, %v7805_v45, 0.0 }
0x1eb1   :  { %v6226_v9 = vpop.xlane.xlu0 %6225 }
0x1eb2   :  { %v6265_v42 = vmul.f32 0.14285715, %v6226_v9  ;;  %v7864_v9 = vsel %vm6797_vm13, %v7806_v43, 0.0 }
0x1eb4   :  { %v6366_v13 = vrot.slane %v6265_v42, %v13460_v29 }
0x1eb5   :  { %v7775_v15 = vpop.permute.xlu0 %7774 }
0x1eb6   :  { %v7780_v49 = vmul.f32 %v13294_v19, %v7775_v15  ;;  %v6242_v19 = vsel %vm5442_vm5, %v6174_v7, 0.0  ;;  %v6233_v7 = vsel %vm5442_vm5, %v6171_v50, 0.0  ;;  %v6245_v50 = vsel %vm5442_vm5, %v6175_v54, 0.0  ;;  %v7801_v54 = vld [vmem:[#allocation3 + $0x40] sm:$0xff] }
0x1eb7   :  { %v7845_v2 = vsel %vm6659_vm14, %v7801_v54, 0.0  ;;  %vm6407_vm5 = vcmask 1047559  }
0x1eb8   :  { %7784 = vrot.lane.b32.xlu1 %v7780_v49, %s10347_s20  ;;  %v7847_v15 = vadd.f32 %v7846_v61, %v7845_v2  ;;  %v7821_v49 = vrot.slane %v7820_v3, 4 }
0x1ecb   :  { %6216 = vadd.xlane.f32.xlu0 %v6215_v24  ;;  %v7856_v24 = vadd.f32 %v7855_v40, %v7854_v32 }
0x1ecf   :  { %6219 = vadd.xlane.f32.xlu0 %v6218_v48  ;;  %v7830_v48 = vrot.slane %v7829_v35, 4 }
0x1ed3   :  { %6222 = vadd.xlane.f32.xlu0 %v6221_v44  ;;  %v7865_v44 = vadd.f32 %v7864_v9, %v7863_v4 }
0x1ed7   :  { %6243 = vadd.xlane.f32.xlu0 %v6242_v19  ;;  %v7812_v19 = vrot.slane %v7811_v52, 4 }
0x1eda   :  { %v6229_v30 = vpop.xlane.xlu1 %6228 }
0x1edb   :  { %v6266_v57 = vmul.f32 0.14285715, %v6229_v30  ;;  %v7848_v30 = vrot.slane %v7847_v15, 4 }
0x1edc   :  { %6198 = vadd.xlane.f32.xlu1 %v6197_v63 }
0x1edd   :  { %v6370_v59 = vrot.slane %v6266_v57, %v13460_v29  ;;  %v7822_v57 = vadd.f32 %v7821_v49, %v7820_v3 }
0x1ede   :  { %v13548_v63 = vpop.xlane.xlu1 %6213 }
0x1edf   :  { %v6416_v20 = vsel %vm6395_vm4, %v6370_v59, %v6366_v13  ;;  %v7857_v13 = vrot.slane %v7856_v24, 4  ;;  %v7831_v59 = vadd.f32 %v7830_v48, %v7829_v35 }
0x1ee0   :  { %6234 = vadd.xlane.f32.xlu1 %v6233_v7  ;;  %v7813_v7 = vadd.f32 %v7812_v19, %v7811_v52 }
0x1ee4   :  { %6237 = vadd.xlane.f32.xlu1 %v6236_v8 }
0x1ee6   :  { %v6196_v58 = vpop.xlane.xlu0 %6195 }
0x1ee7   :  { %v6255_v53 = vmul.f32 0.14285715, %v6196_v58  ;;  %v7849_v58 = vadd.f32 %v7848_v30, %v7847_v15 }
0x1ee8   :  { %6240 = vadd.xlane.f32.xlu1 %v6239_v36 }
0x1ee9   :  { %v6326_v25 = vrot.slane %v6255_v53, %v13460_v29  ;;  %v7823_v53 = vrot.slane %v7822_v57, 2  ;;  %v7850_v33 = vrot.slane %v7849_v58, 2 }
0x1eea   :  { %v6232_v17 = vpop.xlane.xlu0 %6231 }
0x1eeb   :  { %v6267_v0 = vmul.f32 0.14285715, %v6232_v17  ;;  %v13527_v14 = vsel %vm6405_vm10, %v6326_v25, %v6404_v22  ;;  %v7838_v22 = vadd.f32 %v7837_v11, %v7836_v23  ;;  %v7858_v25 = vadd.f32 %v7857_v13, %v7856_v24 }
0x1eec   :  { %6246 = vadd.xlane.f32.xlu1 %v6245_v50  ;;  %v7832_v17 = vrot.slane %v7831_v59, 2  ;;  %v7814_v50 = vrot.slane %v7813_v7, 2  ;;  %v7824_v21 = vadd.f32 %v7823_v53, %v7822_v57  ;;  %v7851_v60 = vadd.f32 %v7850_v33, %v7849_v58  ;;  %v7913_v33 = vld [vmem:[%s13855_s1 + $0x18] sm:$0xff] }
0x1eed   :  { %v6374_v31 = vrot.slane %v6267_v0, %v13460_v29  ;;  %v7839_v42 = vrot.slane %v7838_v22, 4  ;;  %v7859_v55 = vrot.slane %v7858_v25, 2 }
0x1eee   :  { %v7833_v1 = vadd.f32 %v7832_v17, %v7831_v59  ;;  %v7815_v16 = vadd.f32 %v7814_v50, %v7813_v7  ;;  %v7825_v41 = vrot.slane %v7824_v21, 1  ;;  %v7852_v43 = vrot.slane %v7851_v60, 1  ;;  %v7910_v17 = vld [vmem:[%s13855_s1] sm:$0xff]  ;;  %v7912_v50 = vld [vmem:[%s13855_s1 + $0x10] sm:$0xff] }
0x1eef   :  { %v13531_v37 = vsel %vm6397_vm6, %v6374_v31, %v6416_v20  ;;  %v7866_v20 = vrot.slane %v7865_v44, 4  ;;  %v7840_v8 = vadd.f32 %v7839_v42, %v7838_v22  ;;  %v7860_v10 = vadd.f32 %v7859_v55, %v7858_v25  ;;  %v8498_v25 = vld [vmem:[%s13854_s28] sm:$0xff] }
0x1ef0   :  { %v7834_v39 = vrot.slane %v7833_v1, 1  ;;  %v7816_v12 = vrot.slane %v7815_v16, 1  ;;  %v7826_v23 = vadd.f32 %v7825_v41, %v7824_v21  ;;  %v7853_v40 = vadd.f32 %v7852_v43, %v7851_v60  ;;  %v7914_v55 = vld [vmem:[%s13855_s1 + $0x20] sm:$0xff] }
0x1ef1   :  { %v7867_v0 = vadd.f32 %v7866_v20, %v7865_v44  ;;  %v7841_v31 = vrot.slane %v7840_v8, 2  ;;  %v7861_v11 = vrot.slane %v7860_v10, 1  ;;  %v9576_v21 = vpack.c.bf16 %v7913_v33, %v7912_v50  ;;  %v8131_v50 = vld [vmem:[%s13857_s14 + $0x20] sm:$0xff] }
0x1ef2   :  { %v7817_v61 = vadd.f32 %v7816_v12, %v7815_v16  ;;  %v7883_v52 = vmul.f32 0.083333336, %v7826_v23  ;;  %v7886_v44 = vmul.f32 0.083333336, %v7853_v40 }
0x1ef3   :  { %v7868_v26 = vrot.slane %v7867_v0, 2  ;;  %v7842_v6 = vadd.f32 %v7841_v31, %v7840_v8  ;;  %v7862_v22 = vadd.f32 %v7861_v11, %v7860_v10 }
0x1ef4   :  { %v7882_v49 = vmul.f32 0.083333336, %v7817_v61 }
0x1ef5   :  { %v7869_v5 = vadd.f32 %v7868_v26, %v7867_v0  ;;  %v7843_v27 = vrot.slane %v7842_v6, 1  ;;  %v7887_v30 = vmul.f32 0.083333336, %v7862_v22  ;;  %v7911_v0 = vld [vmem:[%s13855_s1 + $0x8] sm:$0xff] }
0x1ef6   :  { %v7898_v19 = vsel %vm6395_vm4, %v7883_v52, %v7882_v49  ;;  %v9573_v31 = vpack.c.bf16 %v7911_v0, %v7910_v17  ;;  %v8044_v17 = vld [vmem:[%s13856_s8 + $0x28] sm:$0xff] }
0x1ef7   :  { %v7870_v2 = vrot.slane %v7869_v5, 1  ;;  %v7844_v35 = vadd.f32 %v7843_v27, %v7842_v6  ;;  %v6261_v6 = vmul.f32 0.14285715, %v13548_v63  ;;  %v8128_v0 = vld [vmem:[%s13857_s14 + $0x8] sm:$0xff] }
0x1ef8   :  { %9574 = vmatpush3.bf16.msra.mxu1 %v9573_v31  ;;  %v8127_v31 = vld [vmem:[%s13857_s14] sm:$0xff]  ;;  %v9593_v33 = vpack.c.bf16 %v8131_v50, %v8128_v0  ;;  %v8304_v0 = vld [vmem:[%s10495_s13 + $0x8] sm:$0xff] }
0x1ef9   :  { %v7871_v9 = vadd.f32 %v7870_v2, %v7869_v5  ;;  %v7885_v48 = vmul.f32 0.083333336, %v7844_v35  ;;  %9575 = vmatprep.subr.bf16.mxu1 %v13819_v46  ;;  %v8979_v50 = vld [vmem:[%s13861_s5] ss:$0 sm:$0xff] }
0x1efb   :  { %v7888_v57 = vmul.f32 0.083333336, %v7871_v9 }
0x1efc   :  { %9577 = vmatpush3.bf16.msra.mxu1 %v9576_v21  ;;  %v8130_v21 = vld [vmem:[%s13857_s14 + $0x18] sm:$0xff] }
0x1efd   :  { %9578 = vmatprep.subr.bf16.mxu1 %v13819_v46 }
0x1f1e   :  { %v7787_v18 = vpop.permute.xlu0 %7786 }
0x1f1f   :  { %7792 = vst.msk [vmem:[#allocation3 + $0x78] sm:$0xf] %vm6797_vm13, %v7787_v18  ;;  %v7835_v18 = vadd.f32 %v7834_v39, %v7833_v1  ;;  %v7915_v1 = vld [vmem:[%s13855_s1 + $0x28] sm:$0xff] }
0x1f20   :  { %v9579_v26 = vpack.c.bf16 %v7915_v1, %v7914_v55  ;;  %v9595_v1 = vpack.c.bf16 %v8130_v21, %v8127_v31  ;;  %v8321_v31 = vld [vmem:[%s10495_s13 + $0x90] sm:$0xff] }
0x1f21   :  { %v7884_v15 = vmul.f32 0.083333336, %v7835_v18 }
0x1f22   :  { %9580 = vmatpush3.bf16.msra.mxu1 %v9579_v26  ;;  %v8134_v26 = vld [vmem:[%s13857_s14 + $0x38] sm:$0xff] }
0x1f23   :  { %v7899_v13 = vsel %vm6397_vm6, %v7884_v15, %v7898_v19  ;;  %9376 = vmatprep.subr.mxu1 %v13841_v51  ;;  %v7916_v15 = vld [vmem:[%s13855_s1 + $0x30] sm:$0xff] }
0x1f24   :  { %v7900_v20 = vsel %vm6399_vm7, %v7885_v48, %v7899_v13 }
0x1f25   :  { %v7901_v7 = vsel %vm6401_vm8, %v7886_v44, %v7900_v20  ;;  %v8039_v20 = vld [vmem:[%s13856_s8] sm:$0xff] }
0x1f26   :  { %v7808_v47 = vld [vmem:[#allocation3 + $0x78] sm:$0xf]  ;;  %v7902_v58 = vsel %vm6403_vm9, %v7887_v30, %v7901_v7  ;;  %9377 = vmatpush3.msra.mxu1 %v7916_v15  ;;  %v8040_v7 = vld [vmem:[%s13856_s8 + $0x8] sm:$0xff]  ;;  %v8978_v15 = vld [vmem:[%s13860_s0] ss:$0 sm:$0xff] }
0x1f27   :  { %v7873_v56 = vsel %vm6797_vm13, %v7808_v47, 0.0  ;;  %v7903_v53 = vsel %vm6405_vm10, %v7888_v57, %v7902_v58  ;;  %v9582_v58 = vpack.c.bf16 %v8040_v7, %v8039_v20  ;;  %9594 = vmatprep.subr.bf16.mxu1 %v9593_v33  ;;  %v8138_v20 = vld [vmem:[%s13857_s14 + $0x58] sm:$0xff] }
0x1f28   :  { %v8322_v33 = vld [vmem:[%s10495_s13 + $0x98] sm:$0xff] }
0x1f29   :  { %9583 = vmatpush3.bf16.msra.mxu0 %v9582_v58  ;;  %v8320_v58 = vld [vmem:[%s10495_s13 + $0x88] sm:$0xff] }
0x1f2a   :  { %v7785_v36 = vpop.permute.xlu1 %7784  ;;  %9584 = vmatprep.subr.bf16.mxu0 %v13819_v46 }
0x1f2b   :  { %7791 = vst.msk [vmem:[#allocation3 + $0x70] sm:$0xff] %vm6659_vm14, %v7785_v36 }
0x1f32   :  { %v7807_v54 = vld [vmem:[#allocation3 + $0x70] sm:$0xff] }
0x1f33   :  { %v7872_v62 = vsel %vm6659_vm14, %v7807_v54, 0.0 }
0x1f34   :  { %v7874_v45 = vadd.f32 %v7873_v56, %v7872_v62  ;;  %v6350_v62 = vrot.slane %v6261_v6, %v13460_v29  ;;  %v8046_v6 = vld [vmem:[%s13856_s8 + $0x38] sm:$0xff] }
0x1f36   :  { %v7875_v3 = vrot.slane %v7874_v45, 4  ;;  %v6412_v23 = vsel %vm6401_vm8, %v6350_v62, %v13480_v34 }
0x1f38   :  { %v7876_v32 = vadd.f32 %v7875_v3, %v7874_v45 }
0x1f3a   :  { %v7877_v4 = vrot.slane %v7876_v32, 2 }
0x1f3c   :  { %v7878_v24 = vadd.f32 %v7877_v4, %v7876_v32 }
0x1f3e   :  { %v7879_v42 = vrot.slane %v7878_v24, 1 }
0x1f40   :  { %v7880_v59 = vadd.f32 %v7879_v42, %v7878_v24 }
0x1f42   :  { %v7889_v8 = vmul.f32 0.083333336, %v7880_v59 }
0x1f44   :  { %v7904_v36 = vsel %vm6407_vm5, %v7889_v8, %v7903_v53  ;;  %v8041_v8 = vld [vmem:[%s13856_s8 + $0x10] sm:$0xff]  ;;  %v8042_v53 = vld [vmem:[%s13856_s8 + $0x18] sm:$0xff] }
0x1f45   :  { %7905 = vrot.lane.b32.xlu0 %v7904_v36, %s10355_s3  ;;  %v9585_v36 = vpack.c.bf16 %v8042_v53, %v8041_v8  ;;  %v8319_v8 = vld [vmem:[%s10495_s13 + $0x80] sm:$0xff] }
0x1f46   :  { %v9607_v53 = vpack.c.bf16 %v8320_v58, %v8319_v8  ;;  %v8332_v8 = vld [vmem:[%s10495_s13 + $0xe8] sm:$0xff]  ;;  %v8347_v58 = vld [vmem:[%s10495_s13 + $0x160] sm:$0xff] }
0x1f47   :  { %9586 = vmatpush3.bf16.msra.mxu0 %v9585_v36  ;;  %v8335_v36 = vld [vmem:[%s10495_s13 + $0x100] sm:$0xff] }
0x1f48   :  { %9587 = vmatprep.subr.bf16.mxu0 %v13819_v46 }
0x1f49   :  { %8500 = vperm.xlu0 %9742, %v8498_v25   ;;  %v8043_v25 = vld [vmem:[%s13856_s8 + $0x20] sm:$0xff] }
0x1f4a   :  { %v9588_v55 = vpack.c.bf16 %v8044_v17, %v8043_v25  ;;  %v8336_v25 = vld [vmem:[%s10495_s13 + $0x108] sm:$0xff]  ;;  %v8303_v17 = vld [vmem:[%s10495_s13] sm:$0xff] }
0x1f4c   :  { %9589 = vmatpush3.bf16.msra.mxu0 %v9588_v55  ;;  %v9640_v55 = vpack.c.bf16 %v8336_v25, %v8335_v36  ;;  %v8348_v36 = vld [vmem:[%s10495_s13 + $0x168] sm:$0xff]  ;;  %v8315_v25 = vld [vmem:[%s10495_s13 + $0x60] sm:$0xff] }
0x1f4d   :  { %9590 = vmatprep.subr.bf16.mxu0 %v13819_v46 }
0x1f58   :  { %v6217_v16 = vpop.xlane.xlu0 %6216 }
0x1f59   :  { %v6262_v41 = vmul.f32 0.14285715, %v6217_v16  ;;  %v8137_v16 = vld [vmem:[%s13857_s14 + $0x50] sm:$0xff] }
0x1f5b   :  { %v6354_v56 = vrot.slane %v6262_v41, %v13460_v29 }
0x1f5c   :  { %v6220_v47 = vpop.xlane.xlu0 %6219 }
0x1f5d   :  { %v6263_v54 = vmul.f32 0.14285715, %v6220_v47  ;;  %v6413_v11 = vsel %vm6403_vm9, %v6354_v56, %v6412_v23  ;;  %v8045_v47 = vld [vmem:[%s13856_s8 + $0x30] sm:$0xff] }
0x1f5e   :  { %v9591_v41 = vpack.c.bf16 %v8046_v6, %v8045_v47  ;;  %v9611_v6 = vpack.c.bf16 %v8322_v33, %v8321_v31  ;;  %v8334_v31 = vld [vmem:[%s10495_s13 + $0xf8] sm:$0xff]  ;;  %v8349_v33 = vld [vmem:[%s10495_s13 + $0x170] sm:$0xff] }
0x1f5f   :  { %v6358_v27 = vrot.slane %v6263_v54, %v13460_v29  ;;  %v8975_v54 = vld [vmem:[%s13858_s19] ss:$0 sm:$0xff] }
0x1f60   :  { %v6223_v60 = vpop.xlane.xlu0 %6222  ;;  %9592 = vmatpush3.bf16.msra.mxu0 %v9591_v41  ;;  %v8305_v41 = vld [vmem:[%s10495_s13 + $0x10] sm:$0xff] }
0x1f61   :  { %v6264_v39 = vmul.f32 0.14285715, %v6223_v60  ;;  %v6414_v2 = vsel %vm6405_vm10, %v6358_v27, %v6413_v11  ;;  %v9597_v60 = vpack.c.bf16 %v8137_v16, %v8134_v26  ;;  %9601 = vmatprep.subr.bf16.mxu0 %v13819_v46  ;;  %v8337_v26 = vld [vmem:[%s10495_s13 + $0x110] sm:$0xff] }
0x1f63   :  { %v6362_v43 = vrot.slane %v6264_v39, %v13460_v29 }
0x1f64   :  { %v6244_v32 = vpop.xlane.xlu0 %6243 }
0x1f65   :  { %v6415_v35 = vsel %vm6407_vm5, %v6362_v43, %v6414_v2  ;;  %v6271_v34 = vmul.f32 0.14285715, %v6244_v32 }
0x1f67   :  { %v6390_v19 = vrot.slane %v6271_v34, %v13460_v29 }
0x1f69   :  { %v6199_v10 = vpop.xlane.xlu1 %6198 }
0x1f6a   :  { %v6256_v5 = vmul.f32 0.14285715, %v6199_v10 }
0x1f6c   :  { %v6330_v12 = vrot.slane %v6256_v5, %v13460_v29 }
0x1f6d   :  { %v6235_v45 = vpop.xlane.xlu1 %6234 }
0x1f6e   :  { %v6408_v63 = vsel %vm6407_vm5, %v6330_v12, %v13527_v14  ;;  %v6268_v3 = vmul.f32 0.14285715, %v6235_v45 }
0x1f6f   :  { %6426 = vxpose.xlu1.b32.start [1/3] (short) (narrow) %v6408_v63, 8 }
0x1f70   :  { %v6378_v40 = vrot.slane %v6268_v3, %v13460_v29 }
0x1f71   :  { %v6238_v18 = vpop.xlane.xlu1 %6237 }
0x1f72   :  { %v6269_v61 = vmul.f32 0.14285715, %v6238_v18  ;;  %v6418_v4 = vsel %vm6399_vm7, %v6378_v40, %v13531_v37 }
0x1f73   :  { %6427 = vxpose.xlu1.b32.cont [2/3] (short) (narrow) %v6415_v35, 8 }
0x1f74   :  { %v6382_v14 = vrot.slane %v6269_v61, %v13460_v29 }
0x1f75   :  { %v6241_v52 = vpop.xlane.xlu1 %6240 }
0x1f76   :  { %v6270_v22 = vmul.f32 0.14285715, %v6241_v52  ;;  %v6419_v49 = vsel %vm6401_vm8, %v6382_v14, %v6418_v4  ;;  %v8977_v4 = vld [vmem:[%s13859_s2] ss:$0 sm:$0xff] }
0x1f78   :  { %v6386_v9 = vrot.slane %v6270_v22, %v13460_v29 }
0x1f79   :  { %v6247_v24 = vpop.xlane.xlu1 %6246 }
0x1f7a   :  { %v6420_v48 = vsel %vm6403_vm9, %v6386_v9, %v6419_v49  ;;  %v6272_v44 = vmul.f32 0.14285715, %v6247_v24  ;;  %v8129_v24 = vld [vmem:[%s13857_s14 + $0x10] sm:$0xff] }
0x1f7b   :  { %v6421_v37 = vsel %vm6405_vm10, %v6390_v19, %v6420_v48  ;;  %v8132_v48 = vld [vmem:[%s13857_s14 + $0x28] sm:$0xff] }
0x1f7c   :  { %v6394_v42 = vrot.slane %v6272_v44, %v13460_v29 }
0x1f7e   :  { %v6422_v30 = vsel %vm6407_vm5, %v6394_v42, %v6421_v37  ;;  %v9602_v42 = vpack.c.bf16 %v8132_v48, %v8129_v24  ;;  %v8312_v24 = vld [vmem:[%s10495_s13 + $0x48] sm:$0xff] }
0x1f7f   :  { %6428 = vxpose.xlu1.b32.end [3/3] (short) (narrow) %v6422_v30, 8  ;;  %v8133_v30 = vld [vmem:[%s13857_s14 + $0x30] sm:$0xff] }
0x1fb7   :  { %v7906_v57 = vpop.permute.xlu0 %7905 }
0x1ff7   :  { %v6442_v13 = vpop.trf.xlu1 }
0x1ff8   :  { %v7909_v59 = vsel %vm7908_vm11, %v6442_v13, %v7906_v57  ;;  %v8136_v57 = vld [vmem:[%s13857_s14 + $0x48] sm:$0xff]  ;;  %v8135_v13 = vld [vmem:[%s13857_s14 + $0x40] sm:$0xff] }
0x1ff9   :  { %9379 = vmatmul.mubr.msk.f32.vlgmr.msra.gmra.mrb[24].mxu1 %vm5616_vm15, %v7909_v59  ;;  %v9599_v59 = vpack.c.bf16 %v8136_v57, %v8133_v30  ;;  %v9605_v7 = vpack.c.bf16 %v8138_v20, %v8135_v13  ;;  %v8346_v30 = vld [vmem:[%s10495_s13 + $0x158] sm:$0xff]  ;;  %v8313_v57 = vld [vmem:[%s10495_s13 + $0x50] sm:$0xff]  ;;  %vm8504_vm15 = vcmask 23552  }
0x1ffa   :  { %8223 = vmatprep.mubr.f32.mxu1 %v13841_v51  ;;  %9596 = vmatpush1.bf16.msra.mxu1 %v9595_v1  ;;  %v9609_v1 = vpack.c.bf16 %v8304_v0, %v8303_v17  ;;  %v8314_v13 = vld [vmem:[%s10495_s13 + $0x58] sm:$0xff]  ;;  %v8316_v17 = vld [vmem:[%s10495_s13 + $0x68] sm:$0xff]  ;;  %v9658_v0 = vpack.c.bf16 %v8348_v36, %v8347_v58 }
0x1ffb   :  { %9598 = vmatprep.subr.bf16.mxu1 %v9597_v60  ;;  %v8338_v60 = vld [vmem:[%s10495_s13 + $0x118] sm:$0xff]  ;;  %v9629_v20 = vpack.c.bf16 %v8314_v13, %v8313_v57 }
0x1ffe   :  { %9600 = vmatpush1.bf16.msra.mxu1 %v9599_v59 }
0x1fff   :  { %9608 = vmatprep.subr.bf16.mxu1 %v9607_v53 }
0x20cc   :  { %v7993_v10 = vpop.f32.mrb[24].mxu1 }
0x20cd   :  { %v7994_v39 = vadd.f32 %v8975_v54, %v7993_v10  ;;  %v9380_v5 = vpop.f32.mrb[25].mxu1  ;;  %v8306_v54 = vld [vmem:[%s10495_s13 + $0x18] sm:$0xff]  ;;  %v8323_v10 = vld [vmem:[%s10495_s13 + $0xa0] sm:$0xff] }
0x20ce   :  { %v9643_v5 = vpack.c.bf16 %v8338_v60, %v8337_v26  ;;  %v8317_v26 = vld [vmem:[%s10495_s13 + $0x70] sm:$0xff] }
0x20cf   :  { %v7998_v62 = vsel %vm7997_vm12, %v7994_v39, 0.0 }
0x20d0   :  { %v7999_v56 = vrot.slane %v7998_v62, 4 }
0x20d2   :  { %v8000_v12 = vadd.f32 %v7999_v56, %v7998_v62  ;;  %v9613_v62 = vpack.c.bf16 %v8306_v54, %v8305_v41  ;;  %v8339_v56 = vld [vmem:[%s10495_s13 + $0x120] sm:$0xff]  ;;  %v8151_v41 = vsub.s32 2, %v13853_v38 }
0x20d3   :  { %v8139_v54 = vld [vmem:[%s13862_s17] sm:$0x7] }
0x20d4   :  { %v8001_v27 = vrot.slane %v8000_v12, 2 }
0x20d6   :  { %v8002_v45 = vadd.f32 %v8001_v27, %v8000_v12  ;;  %v8340_v27 = vld [vmem:[%s10495_s13 + $0x128] sm:$0xff] }
0x20d8   :  { %v8003_v43 = vrot.slane %v8002_v45, 1 }
0x20da   :  { %v8004_v63 = vadd.f32 %v8003_v43, %v8002_v45  ;;  %v8307_v45 = vld [vmem:[%s10495_s13 + $0x20] sm:$0xff]  ;;  %v8308_v43 = vld [vmem:[%s10495_s13 + $0x28] sm:$0xff] }
0x20dc   :  { %v8006_v23 = vmul.f32 0.125, %v8004_v63  ;;  %v8325_v63 = vld [vmem:[%s10495_s13 + $0xb0] sm:$0xff] }
0x20de   :  { %v8007_v11 = vsub.f32 %v7994_v39, %v8006_v23  ;;  %v8324_v39 = vld [vmem:[%s10495_s13 + $0xa8] sm:$0xff]  ;;  %v8326_v23 = vld [vmem:[%s10495_s13 + $0xb8] sm:$0xff] }
0x20df   :  { %v9615_v12 = vpack.c.bf16 %v8324_v39, %v8323_v10  ;;  %v8143_v10 = vsub.s32 0, %v13853_v38  ;;  %v8147_v39 = vsub.s32 1, %v13853_v38 }
0x20e0   :  { %v8008_v3 = vmul.f32 %v8007_v11, %v8007_v11 }
0x20e2   :  { %v8009_v18 = vsel %vm7997_vm12, %v8008_v3, 0.0  ;;  %v9617_v3 = vpack.c.bf16 %v8308_v43, %v8307_v45 }
0x20e3   :  { %v8010_v2 = vrot.slane %v8009_v18, 4 }
0x20e5   :  { %v8011_v61 = vadd.f32 %v8010_v2, %v8009_v18  ;;  %v8341_v18 = vld [vmem:[%s10495_s13 + $0x130] sm:$0xff]  ;;  %v9619_v2 = vpack.c.bf16 %v8326_v23, %v8325_v63 }
0x20e7   :  { %v8012_v35 = vrot.slane %v8011_v61, 2 }
0x20e9   :  { %v8013_v32 = vadd.f32 %v8012_v35, %v8011_v61  ;;  %v8342_v61 = vld [vmem:[%s10495_s13 + $0x138] sm:$0xff]  ;;  %v8309_v35 = vld [vmem:[%s10495_s13 + $0x30] sm:$0xff] }
0x20eb   :  { %v8014_v40 = vrot.slane %v8013_v32, 1 }
0x20ed   :  { %v8015_v14 = vadd.f32 %v8014_v40, %v8013_v32  ;;  %v8310_v32 = vld [vmem:[%s10495_s13 + $0x38] sm:$0xff]  ;;  %v8327_v40 = vld [vmem:[%s10495_s13 + $0xc0] sm:$0xff] }
0x20ef   :  { %v8016_v52 = vmul.f32 0.125, %v8015_v14  ;;  %v8328_v14 = vld [vmem:[%s10495_s13 + $0xc8] sm:$0xff] }
0x20f1   :  { %v8017_v22 = vadd.f32 1e-05, %v8016_v52  ;;  %v9649_v52 = vpack.c.bf16 %v8342_v61, %v8341_v18 }
0x20f3   :  { %10240 = vrsqrt.f32 %v8017_v22  ;;  %v9621_v22 = vpack.c.bf16 %v8310_v32, %v8309_v35  ;;  %v8983_v35 = vld [vmem:[%s10500_s6] ss:$0 sm:$0xff] }
0x20fd   :  { %v10241_v34 = vpop.eup %10240 }
0x20fe   :  { %v8019_v9 = vmul.f32 %v10241_v34, %v8007_v11  ;;  %v9646_v11 = vpack.c.bf16 %v8340_v27, %v8339_v56  ;;  %v9623_v34 = vpack.c.bf16 %v8328_v14, %v8327_v40  ;;  %v8148_v56 = vrot.slane %v8139_v54, %v8147_v39  ;;  %v8501_v14 = vpop.permute.xlu0 %8500 }
0x20ff   :  { %vm8502_vm1 = vcmp.eq.s32.totalorder %v8501_v14, %v13456_v28 }
0x2100   :  { %v8027_v49 = vmul.f32 %v8977_v4, %v8019_v9  ;;  %v8343_v4 = vld [vmem:[%s10495_s13 + $0x140] sm:$0xff]  ;;  %v8344_v9 = vld [vmem:[%s10495_s13 + $0x148] sm:$0xff] }
0x2102   :  { %v8035_v44 = vadd.f32 %v8978_v15, %v8027_v49  ;;  %v9652_v15 = vpack.c.bf16 %v8344_v9, %v8343_v4  ;;  %v8311_v49 = vld [vmem:[%s10495_s13 + $0x40] sm:$0xff] }
0x2103   :  { %v9625_v48 = vpack.c.bf16 %v8312_v24, %v8311_v49 }
0x2104   :  { %vm8036_vm13 = vcmp.gt.f32.partialorder %v8035_v44, 0.0  ;;  %v8037_v19 = vmul.f32 0.01, %v8035_v44 }
0x2106   :  { %v8038_v37 = vsel %vm8036_vm13, %v8035_v44, %v8037_v19  ;;  %v8329_v44 = vld [vmem:[%s10495_s13 + $0xd0] sm:$0xff]  ;;  %v8330_v19 = vld [vmem:[%s10495_s13 + $0xd8] sm:$0xff] }
0x2107   :  { %9398 = vmatmul.mubr.msk.f32.vlgmr.msra.gmra.mrb[22].mxu0 %vm7997_vm12, %v8038_v37  ;;  %v9627_v37 = vpack.c.bf16 %v8330_v19, %v8329_v44 }
0x2108   :  { %9603 = vmatpush3.bf16.msra.mxu0 %v9602_v42  ;;  %9408 = vmatprep.mubr.msk.f32.mxu0 %vm10310_vm0, %v13841_v51  ;;  %v8345_v42 = vld [vmem:[%s10495_s13 + $0x150] sm:$0xff] }
0x2109   :  { %9604 = vmatprep.subr.bf16.mxu0 %v13819_v46  ;;  %v9655_v59 = vpack.c.bf16 %v8346_v30, %v8345_v42 }
0x210c   :  { %9606 = vmatpush3.bf16.msra.mxu0 %v9605_v7  ;;  %v8331_v7 = vld [vmem:[%s10495_s13 + $0xe0] sm:$0xff] }
0x210d   :  { %9639 = vmatprep.subr.bf16.mxu0 %v13819_v46  ;;  %v9631_v53 = vpack.c.bf16 %v8332_v8, %v8331_v7 }
0x21da   :  { %v8123_v21 = vpop.f32.mrb[22].mxu0 }
0x21db   :  { %v13641_v16 = vadd.f32 %v8979_v50, %v8123_v21  ;;  %v9399_v47 = vpop.f32.mrb[23].mxu0  ;;  %v8333_v50 = vld [vmem:[%s10495_s13 + $0xf0] sm:$0xff]  ;;  %v8350_v21 = vld [vmem:[%s10495_s13 + $0x178] sm:$0xff] }
0x21dc   :  { %v8318_v47 = vld [vmem:[%s10495_s13 + $0x78] sm:$0xff]  ;;  %s10356_s13 = smov [#allocation4]  }
0x21dd   :  { %8981 = vmatmul.mubr.msk.f32.vlgmr.msra.gmra.mrb[26].mxu1 %vm6659_vm14, %v13641_v16  ;;  %9409 = vmatmul.mubr.msk.f32.vlgmr.msra.gmra.mrb[24].mxu0 %vm6659_vm14, %v13641_v16  ;;  %v9637_v60 = vpack.c.bf16 %v8318_v47, %v8317_v26  ;;  %v8630_v39 = vmul.f32 %v13641_v16, %v13641_v16  ;;  %s8835_s6 = sshll.u32 %s10356_s13, 4  ;;  %s8836_s6 = int_to_ptr.vmem [resolvable:$true] %s8835_s6 }
0x21de   :  { %9641 = vmatpush3.bf16.msra.mxu0 %v9640_v55  ;;  %9610 = vmatpush3.bf16.msra.mxu1 %v9609_v1  ;;  %v9633_v55 = vpack.c.bf16 %v8316_v17, %v8315_v25  ;;  %v9635_v1 = vpack.c.bf16 %v8334_v31, %v8333_v50  ;;  %s10256_s29 = scalar_lea.vmem %s8836_s6, 16  ;;  %s10260_s7 = scalar_lea.vmem %s8836_s6, 32 }
0x21df   :  { %9642 = vmatprep.subr.bf16.mxu0 %v13819_v46  ;;  %9612 = vmatprep.subr.bf16.mxu1 %v9611_v6  ;;  %v9661_v6 = vpack.c.bf16 %v8350_v21, %v8349_v33  ;;  %p10257_p0 = scmp.ne.s32.totalorder %s8836_s6, %s10256_s29  ;;  %p10261_p1 = scmp.lt.s32.totalorder %s8836_s6, %s8836_s6 }
0x21e0   :  { %9443 = vmatprep.mubr.msk.f32.mxu0 %vm10310_vm0, %v13841_v51  ;;  %p10262_p2 = scmp.lt.s32.totalorder %s10260_s7, %s10256_s29 }
0x21e2   :  { %9644 = vmatpush3.bf16.msra.mxu0 %v9643_v5  ;;  %9614 = vmatpush3.bf16.msra.mxu1 %v9613_v62  ;;  %v8152_v5 = vrot.slane %v8139_v54, %v8151_v41  ;;  %v8144_v62 = vrot.slane %v8139_v54, %v8143_v10  ;;  %p10263_p3 = por %p10262_p2, %p10261_p1 }
0x21e3   :  { %9645 = vmatprep.subr.bf16.mxu0 %v13819_v46  ;;  %9616 = vmatprep.subr.bf16.mxu1 %v9615_v12 }
0x21e4   :  { %p10264_p4 = pnand %p10263_p3, %p10257_p0 }
0x21e6   :  { %9647 = vmatpush3.bf16.msra.mxu0 %v9646_v11  ;;  %9618 = vmatpush3.bf16.msra.mxu1 %v9617_v3 }
0x21e7   :  { %9648 = vmatprep.subr.bf16.mxu0 %v13819_v46  ;;  %9620 = vmatprep.subr.bf16.mxu1 %v9619_v2 }
0x21ea   :  { %9650 = vmatpush3.bf16.msra.mxu0 %v9649_v52  ;;  %9622 = vmatpush3.bf16.msra.mxu1 %v9621_v22 }
0x21eb   :  { %9651 = vmatprep.subr.bf16.mxu0 %v13819_v46  ;;  %9624 = vmatprep.subr.bf16.mxu1 %v9623_v34 }
0x21ee   :  { %9653 = vmatpush3.bf16.msra.mxu0 %v9652_v15  ;;  %9626 = vmatpush3.bf16.msra.mxu1 %v9625_v48 }
0x21ef   :  { %9654 = vmatprep.subr.bf16.mxu0 %v13819_v46  ;;  %9628 = vmatprep.subr.bf16.mxu1 %v9627_v37 }
0x21f2   :  { %9656 = vmatpush3.bf16.msra.mxu0 %v9655_v59  ;;  %9630 = vmatpush3.bf16.msra.mxu1 %v9629_v20 }
0x21f3   :  { %9657 = vmatprep.subr.bf16.mxu0 %v13819_v46  ;;  %9632 = vmatprep.subr.bf16.mxu1 %v9631_v53 }
0x21f6   :  { %9659 = vmatpush3.bf16.msra.mxu0 %v9658_v0  ;;  %9634 = vmatpush3.bf16.msra.mxu1 %v9633_v55 }
0x21f7   :  { %9660 = vmatprep.subr.bf16.mxu0 %v13819_v46  ;;  %9636 = vmatprep.subr.bf16.mxu1 %v9635_v1 }
0x21fa   :  { %9662 = vmatpush3.bf16.msra.mxu0 %v9661_v6  ;;  %9638 = vmatpush3.bf16.msra.mxu1 %v9637_v60 }
0x21fb   :  { %9451 = vmatprep.subr.mxu0 %v13841_v51  ;;  %9446 = vmatprep.subr.mxu1 %v13841_v51 }
0x22b0   :  { %v8225_v46 = vpop.f32.mrb[26].mxu1  ;;  %v8296_v12 = vpop.f32.mrb[24].mxu0 }
0x22b1   :  { %v8297_v27 = vadd.f32 %v8296_v12, %v8152_v5  ;;  %v8227_v45 = vpop.f32.mrb[27].mxu1  ;;  %v9410_v43 = vpop.f32.mrb[25].mxu0  ;;  %v8226_v63 = vadd.f32 %v8225_v46, %v8144_v62 }
0x22b2   :  { %v8228_v23 = vadd.f32 %v8227_v45, %v8148_v56 }
0x22b3   :  { %10242 = vtanh.f32 %v8297_v27 }
0x22b4   :  { %10244 = vtanh.f32 %v8228_v23 }
0x22b5   :  { %10246 = vtanh.f32 %v8226_v63 }
0x22bd   :  { %v10243_v11 = vpop.eup %10242 }
0x22be   :  { %v10245_v3 = vpop.eup %10244  ;;  %9444 = vmatmul.mubr.f32.vlgmr.msra.gmra.mrb[26].mxu0 %v10243_v11 }
0x22bf   :  { %v10247_v18 = vpop.eup %10246  ;;  %8422 = vmatprep.mubr.f32.mxu1 %v10245_v3  ;;  %9453 = vmatprep.mubr.msk.f32.mxu0 %vm10310_vm0, %v13841_v51 }
0x22c0   :  { %8423 = vmatmul.mubr.f32.vlgmr.msra.gmra.mrb[28].mxu1 %v10247_v18 }
0x22c1   :  { %9447 = vmatpush3.msra.mxu1 %v13641_v16  ;;  %9448 = vmatprep.mubr.msk.f32.mxu1 %vm10310_vm0, %v13841_v51 }
0x22c2   :  { %9456 = vmatprep.subr.mxu1 %v13841_v51 }
0x2391   :  { %v8494_v38 = vpop.f32.mrb[26].mxu0 }
0x2392   :  { %v9445_v2 = vpop.f32.mrb[27].mxu0 }
0x2393   :  { %v9143_v61 = vpop.f32.mrb[28].mxu1 }
0x2394   :  { %v9144_v32 = vpop.f32.mrb[29].mxu1 }
0x2395   :  { %v9145_v40 = vadd.f32 %v9144_v32, %v9143_v61 }
0x2397   :  { %v8425_v52 = vadd.f32 %v9145_v40, %v8983_v35 }
0x2399   :  { %v8495_v22 = vadd.f32 %v8494_v38, %v8425_v52 }
0x239b   :  { %v8503_v34 = vsel %vm8502_vm1, %v8495_v22, -inf }
0x239c   :  { %v8505_v4 = vsel %vm8504_vm15, %v8503_v34, -inf }
0x239d   :  { %v8506_v9 = vrot.slane %v8505_v4, 4 }
0x239f   :  { %v8507_v15 = vmax.f32 %v8505_v4, %v8506_v9 }
0x23a1   :  { %v8508_v49 = vrot.slane %v8507_v15, 2 }
0x23a3   :  { %v8509_v24 = vmax.f32 %v8507_v15, %v8508_v49 }
0x23a5   :  { %v8510_v48 = vrot.slane %v8509_v24, 1 }
0x23a7   :  { %v8511_v44 = vmax.f32 %v8509_v24, %v8510_v48 }
0x23a9   :  { %v8512_v19 = vsub.f32 %v8503_v34, %v8511_v44 }
0x23ab   :  { %v8513_v42 = vmul.f32 1.442695, %v8512_v19 }
0x23ad   :  { %10248 = vpow2.f32 %v8513_v42 }
0x23b7   :  { %v10249_v37 = vpop.eup %10248 }
0x23b8   :  { %v8515_v30 = vsel %vm8504_vm15, %v10249_v37, 0.0 }
0x23b9   :  { %v8516_v57 = vrot.slane %v8515_v30, 4 }
0x23bb   :  { %v8517_v13 = vadd.f32 %v8516_v57, %v8515_v30 }
0x23bd   :  { %v8518_v59 = vrot.slane %v8517_v13, 2 }
0x23bf   :  { %v8519_v20 = vadd.f32 %v8518_v59, %v8517_v13 }
0x23c1   :  { %v8520_v28 = vrot.slane %v8519_v20, 1 }
0x23c3   :  { %v8521_v7 = vadd.f32 %v8520_v28, %v8519_v20 }
0x23c5   :  { %10250 = vrcp.f32 %v8521_v7 }
0x23cf   :  { %v10251_v8 = vpop.eup %10250 }
0x23d0   :  { %v8523_v58 = vmul.f32 %v10251_v8, %v10249_v37 }
0x23d2   :  { %8524 = vxpose.xlu0.b32.start.end [1/1] (short) (narrow) %v8523_v58, 8 }
0x2452   :  { %v8540_v53 = vpop.trf.xlu0 }
0x2453   :  { %9449 = vmatmul.mubr.msk.f32.vlgmr.msra.gmra.mrb[30].mxu1 %vm8556_vm2, %v8540_v53 }
0x2454   :  { %9458 = vmatprep.mubr.msk.f32.mxu1 %vm10310_vm0, %v13841_v51  ;;  %vm8810_vm0 = vcmask 18432  }
0x2526   :  { %v8626_v36 = vpop.f32.mrb[30].mxu1 }
0x2527   :  { %v9450_v25 = vpop.f32.mrb[31].mxu1  ;;  %9452 = vmatpush3.xpose.msk.msra.mxu0 %vm6659_vm14, %v8626_v36  ;;  %9457 = vmatpush3.xpose.msk.msra.mxu1 %vm6659_vm14, %v8626_v36  ;;  %v8634_v17 = vmul.f32 %v8626_v36, %v8626_v36 }
0x2529   :  { %v8636_v0 = vsel %vm8635_vm3, %v8634_v17, 0.0 }
0x252a   :  { %9454 = vmatmul.mubr.msk.f32.vlgmr.msra.gmra.mrb[28].mxu0 %vm6659_vm14, %v13641_v16  ;;  %9459 = vmatmul.mubr.msk.f32.vlgmr.msra.gmra.mrb[32].mxu1 %vm6659_vm14, %v8626_v36 }
0x252b   :  { %8637 = vadd.xlane.f32.xlu0 %v8636_v0 }
0x25b8   :  { %v8638_v50 = vpop.xlane.xlu0 %8637 }
0x25b9   :  { %v8716_v31 = vrot.slane %v8638_v50, %v13460_v29  ;;  %v8631_v29 = vsel %vm6659_vm14, %v8630_v39, 0.0  ;;  %vm8825_vm14 = vcmask 0  }
0x25bb   :  { %v8803_v21 = vadd.f32 %v8716_v31, %v8638_v50 }
0x25fd   :  { %v8708_v33 = vpop.f32.mrb[28].mxu0  ;;  %v8798_v51 = vpop.f32.mrb[32].mxu1 }
0x25fe   :  { %v8804_v55 = vmul.f32 2.0, %v8798_v51  ;;  %v9455_v1 = vpop.f32.mrb[29].mxu0  ;;  %v9460_v26 = vpop.f32.mrb[33].mxu1  ;;  %v8725_v12 = vmul.f32 2.0, %v8708_v33 }
0x2600   :  { %v8805_v47 = vsub.f32 %v8803_v21, %v8804_v55 }
0x2602   :  { %v8806_v6 = vmax.f32 %v8805_v47, 0.0 }
0x2604   :  { %v8807_v60 = vmul.f32 -0.5, %v8806_v6 }
0x2606   :  { %v8808_v41 = vmul.f32 1.442695, %v8807_v60 }
0x2608   :  { %10252 = vpow2.f32 %v8808_v41 }
0x2612   :  { %v10253_v54 = vpop.eup %10252 }
0x2613   :  { %v8811_v10 = vsel %vm8810_vm0, %v10253_v54, 0.0 }
0x2614   :  { %8812 = vadd.xlane.f32.xlu1 %v8811_v10 }
0x2618   :  { %8632 = vadd.xlane.f32.xlu1 %v8631_v29 }
0x26a1   :  { %v8813_v5 = vpop.xlane.xlu1 %8812 }
0x26a2   :  { %v8814_v62 = vrot.slane %v8813_v5, 4 }
0x26a4   :  { %v8815_v56 = vadd.f32 %v8814_v62, %v8813_v5 }
0x26a5   :  { %v8633_v46 = vpop.xlane.xlu1 %8632 }
0x26a6   :  { %v8816_v27 = vrot.slane %v8815_v56, 2  ;;  %v8724_v45 = vadd.f32 %v8716_v31, %v8633_v46 }
0x26a8   :  { %v8726_v43 = vsub.f32 %v8724_v45, %v8725_v12  ;;  %v8817_v63 = vadd.f32 %v8816_v27, %v8815_v56 }
0x26aa   :  { %v8727_v23 = vmax.f32 %v8726_v43, 0.0  ;;  %v8818_v11 = vrot.slane %v8817_v63, 1 }
0x26ac   :  { %v8728_v3 = vmul.f32 -0.5, %v8727_v23  ;;  %v8819_v18 = vadd.f32 %v8818_v11, %v8817_v63 }
0x26ae   :  { %v8729_v38 = vmul.f32 1.442695, %v8728_v3  ;;  %9663 = vpush %v8819_v18 }
0x26b0   :  { %10254 = vpow2.f32 %v8729_v38 }
0x26ba   :  { %v10255_v16 = vpop.eup %10254 }
0x26bb   :  { %8731 = vst.msk [vmem:[%s10505_s12] sm:$0xff] %vm8504_vm15, %v10255_v16 }
0x26df   :  { %s9664_s21 = spop %9663 }
0x26e0   :  { %s8823_s25 = smul.f32 0.33333334, %s9664_s21 }
0x26e2   :  { %v8824_v2 = vstv %s8823_s25 }
0x26e3   :  { %8826 = vst.msk [vmem:[#allocation4] sm:$0x1] %vm8825_vm14, %v8824_v2 }
0x26e4   :  { %10267 = shalt.err (!%p10264_p4)
}
0x26e5   :  { %s10268_s12 = scalar_lea.hbm %s10510_s30, 16 }
0x26e6   :  { %p10269_p5 = scmp.ne.s32.totalorder %s10510_s30, %s10268_s12  ;;  %p10272_p6 = scmp.lt.u32.totalorder %s10268_s12, %s10510_s30 }
0x26e8   :  { %p10274_p7 = pnand %p10272_p6, %p10269_p5 }
0x26ea   :  { %10277 = shalt.err (!%p10274_p7)
}
0x26eb   :  { %8838 = dma.vmem_to_hbm [thread:$0]  %s8836_s6, 16, %s10510_s30, [#allocation5]  }
0x26ec   :  { %10278 = dma.done.wait [#allocation5], 16  }
0x26ed   :  { %10279 = vsyncadd [#allocation5], 4294967280 }
0x26ee   :  { %8844 = vsyncpa [#allocation5], 1 }

</bundles_post_ra>
